<compile_context>
chip_gen: v6e
topology: v6e:2x2x1
jax: 0.10.0
libtpu: 0.0.40
codegen_flags: <defaults>
</compile_context>

<pallas_src>
import functools

import jax
import jax.numpy as jnp
from jax.experimental import pallas as pl
from jax.experimental.pallas import tpu as pltpu


# ----------------------------------------------------------------------------
# Pallas kernels
# ----------------------------------------------------------------------------
def _conv_bn_relu_pool_kernel(xe_ref, xo_ref, w_ref, shift_ref, o_ref, *,
                              pw, batch, rows_per_step):
    """Fused 3x3 valid conv + eval-BN + ReLU + 2x2 max-pool.

    xe_ref: (H, C, We*batch)  even input columns (lane index = col*batch + b)
    xo_ref: (H, C, Wo*batch)  odd  input columns
    w_ref:  (3, 3, O, C)      conv weights with the BN scale folded in
    shift_ref: (O, 1)         per-channel shift (BN beta/mean + conv bias)
    o_ref:  (rows_per_step, O, pw*batch)   pooled output rows for this step
    """
    n = pw * batch
    shift = shift_ref[...]                                           # (O, 1)
    w_tap = [[w_ref[di, dj] for dj in range(3)] for di in range(3)]  # (O, C)
    base = pl.program_id(0) * rows_per_step

    for r in range(rows_per_step):                 # pooled output rows
        i0 = 2 * (base + r)                        # first conv row of the pair
        # Four input rows feed conv rows i0, i0+1.  Load each row once and
        # slice its two column windows (offset 0 and offset `batch`).
        e0, e1, o0, o1 = [], [], [], []
        for k in range(4):
            re_ = xe_ref[i0 + k]                   # (C, We*batch)
            ro_ = xo_ref[i0 + k]                   # (C, Wo*batch)
            e0.append(re_[:, 0:n])
            e1.append(re_[:, batch:n + batch])
            o0.append(ro_[:, 0:n])
            o1.append(ro_[:, batch:n + batch])

        pooled = None
        for rr in range(2):                        # the two conv rows pooled together
            acc_e = None                           # even conv output columns
            acc_o = None                           # odd  conv output columns
            for di in range(3):
                k = rr + di
                ae = (jnp.dot(w_tap[di][0], e0[k], preferred_element_type=jnp.float32)
                      + jnp.dot(w_tap[di][1], o0[k], preferred_element_type=jnp.float32)
                      + jnp.dot(w_tap[di][2], e1[k], preferred_element_type=jnp.float32))
                ao = (jnp.dot(w_tap[di][0], o0[k], preferred_element_type=jnp.float32)
                      + jnp.dot(w_tap[di][1], e1[k], preferred_element_type=jnp.float32)
                      + jnp.dot(w_tap[di][2], o1[k], preferred_element_type=jnp.float32))
                acc_e = ae if acc_e is None else acc_e + ae
                acc_o = ao if acc_o is None else acc_o + ao
            m = jnp.maximum(acc_e, acc_o)          # max over the column pair
            pooled = m if pooled is None else jnp.maximum(pooled, m)  # row pair

        # Per-channel shift + ReLU commute with the max (shift is constant).
        y = jnp.maximum(pooled + shift, 0.0)
        o_ref[r] = y.astype(o_ref.dtype)


def _fc_kernel(x_ref, w1_ref, b1_ref, w2_ref, b2_ref, o_ref):
    """Fused fc1 + ReLU + fc2 (fc2 zero-padded to a lane-dense width)."""
    h = jnp.dot(x_ref[...], w1_ref[...], preferred_element_type=jnp.float32)
    h = jnp.maximum(h + b1_ref[...], 0.0)
    y = jnp.dot(h, w2_ref[...], preferred_element_type=jnp.float32) + b2_ref[...]
    o_ref[...] = y.astype(o_ref.dtype)


# ----------------------------------------------------------------------------
# Layer wrappers (glue in plain JAX, compute in Pallas)
# ----------------------------------------------------------------------------
def _pick_rows_per_step(ph, max_rows=8):
    """Largest divisor of `ph` <= max_rows that still leaves >= 2 grid steps
    (so the 'parallel' axis can be sharded across v7x's two TensorCores)."""
    best = 1
    for d in range(1, min(ph, max_rows) + 1):
        if ph % d == 0 and (ph // d >= 2 or ph == 1):
            best = d
    return best


def conv_bn_relu_pool(x, w, bias, gamma, beta, mean, var, *, eps=1e-5):
    """x: (H, C, W, B) -> (PH, O, PW, B): 3x3 valid conv + eval-BN + ReLU + 2x2 pool."""
    H, C, W, B = x.shape
    O = w.shape[0]
    OH, OW = H - 2, W - 2
    PH, PW = OH // 2, OW // 2
    We, Wo = (W + 1) // 2, W // 2

    # Column-parity split (XLA glue on the small activation).  The merged last
    # dim is ordered (column, batch) so it matches the kernel's lane layout.
    xe = x[:, :, 0::2, :].reshape(H, C, We * B)
    xo = x[:, :, 1::2, :].reshape(H, C, Wo * B)

    # Fold eval-mode BatchNorm (and the conv bias) into weights / shift.
    scale = gamma / jnp.sqrt(var + eps)                               # (O,)
    wk = jnp.transpose(w * scale[:, None, None, None], (2, 3, 0, 1))  # (3,3,O,C)
    shift = (beta + (bias - mean) * scale)[:, None]                   # (O, 1)

    rows = _pick_rows_per_step(PH)
    grid = (PH // rows,)
    kernel = functools.partial(_conv_bn_relu_pool_kernel,
                               pw=PW, batch=B, rows_per_step=rows)

    out = pl.pallas_call(
        kernel,
        out_shape=jax.ShapeDtypeStruct((PH, O, PW * B), jnp.float32),
        grid=grid,
        in_specs=[
            pl.BlockSpec((H, C, We * B), lambda i: (0, 0, 0)),     # resident in VMEM
            pl.BlockSpec((H, C, Wo * B), lambda i: (0, 0, 0)),     # resident in VMEM
            pl.BlockSpec((3, 3, O, C), lambda i: (0, 0, 0, 0)),    # folded weights
            pl.BlockSpec((O, 1), lambda i: (0, 0)),                # shift
        ],
        out_specs=pl.BlockSpec((rows, O, PW * B), lambda i: (i, 0, 0)),
        compiler_params=pltpu.CompilerParams(
            dimension_semantics=("parallel",)),
    )(xe, xo, wk, shift)
    return out.reshape(PH, O, PW, B)


def fc_head(x, w1, b1, w2, b2, *, tb=256):
    """Fused fc1 + ReLU + fc2.  x: (B, 128), w1: (64, 128), w2: (N, 64)."""
    B, K1 = x.shape
    Hd = w1.shape[0]
    N = w2.shape[0]
    NP = ((N + 127) // 128) * 128                 # lane-dense padded logits width
    w1t = w1.T                                    # (128, 64)
    b1r = b1[None, :]                             # (1, 64)
    w2p = jnp.zeros((Hd, NP), jnp.float32).at[:, :N].set(w2.T)
    b2p = jnp.zeros((1, NP), jnp.float32).at[:, :N].set(b2[None, :])
    tb = min(tb, B)
    grid = (pl.cdiv(B, tb),)
    out = pl.pallas_call(
        _fc_kernel,
        out_shape=jax.ShapeDtypeStruct((B, NP), jnp.float32),
        grid=grid,
        in_specs=[
            pl.BlockSpec((tb, K1), lambda i: (i, 0)),
            pl.BlockSpec((K1, Hd), lambda i: (0, 0)),
            pl.BlockSpec((1, Hd), lambda i: (0, 0)),
            pl.BlockSpec((Hd, NP), lambda i: (0, 0)),
            pl.BlockSpec((1, NP), lambda i: (0, 0)),
        ],
        out_specs=pl.BlockSpec((tb, NP), lambda i: (i, 0)),
        compiler_params=pltpu.CompilerParams(
            dimension_semantics=("parallel",)),
    )(x, w1t, b1r, w2p, b2p)
    return out[:, :N]


# ----------------------------------------------------------------------------
# Model: parameter init + forward
# ----------------------------------------------------------------------------
def init_params(key, num_classes=10):
    ks = jax.random.split(key, 22)
    it = iter(range(22))
    p = {}

    def conv_p(o, c, k):
        fan_in = c * k * k
        bound = 1.0 / jnp.sqrt(fan_in)
        kw_, kb_ = ks[next(it)], ks[next(it)]
        return (
            jax.random.uniform(kw_, (o, c, k, k), jnp.float32, -bound, bound),
            jax.random.uniform(kb_, (o,), jnp.float32, -bound, bound),
        )

    def bn_p(c):
        kg, kb, km, kv = ks[next(it)], ks[next(it)], ks[next(it)], ks[next(it)]
        return (
            jax.random.uniform(kg, (c,), jnp.float32, 0.5, 1.5),    # gamma
            jax.random.uniform(kb, (c,), jnp.float32, -0.1, 0.1),   # beta
            jax.random.uniform(km, (c,), jnp.float32, -0.1, 0.1),   # running_mean
            jax.random.uniform(kv, (c,), jnp.float32, 0.5, 1.5),    # running_var
        )

    p["conv1_w"], p["conv1_b"] = conv_p(8, 3, 3)
    p["bn1"] = bn_p(8)
    p["conv2_w"], p["conv2_b"] = conv_p(16, 8, 3)
    p["bn2"] = bn_p(16)
    p["conv3_w"], p["conv3_b"] = conv_p(32, 16, 3)
    p["bn3"] = bn_p(32)

    bound1 = 1.0 / jnp.sqrt(128.0)
    p["fc1_w"] = jax.random.uniform(ks[next(it)], (64, 128), jnp.float32, -bound1, bound1)
    p["fc1_b"] = jax.random.uniform(ks[next(it)], (64,), jnp.float32, -bound1, bound1)
    bound2 = 1.0 / jnp.sqrt(64.0)
    p["fc2_w"] = jax.random.uniform(ks[next(it)], (num_classes, 64), jnp.float32, -bound2, bound2)
    p["fc2_b"] = jax.random.uniform(ks[next(it)], (num_classes,), jnp.float32, -bound2, bound2)
    return p


def cifar_tiny_forward(params, x):
    """x: (B, 3, 32, 32) float32 NCHW -> logits (B, num_classes)."""
    B = x.shape[0]
    a = jnp.transpose(x, (2, 1, 3, 0))                                              # (H, C, W, B)
    a = conv_bn_relu_pool(a, params["conv1_w"], params["conv1_b"], *params["bn1"])  # (15, 8, 15, B)
    a = conv_bn_relu_pool(a, params["conv2_w"], params["conv2_b"], *params["bn2"])  # (6, 16, 6, B)
    a = conv_bn_relu_pool(a, params["conv3_w"], params["conv3_b"], *params["bn3"])  # (2, 32, 2, B)
    feat = jnp.transpose(a, (3, 1, 0, 2)).reshape(B, -1)                            # (B, 128) NCHW flatten
    return fc_head(feat, params["fc1_w"], params["fc1_b"],
                   params["fc2_w"], params["fc2_b"])                                # (B, num_classes)


# ----------------------------------------------------------------------------
# Pure-JAX reference (eval-mode BN), used only for a correctness check in main.
# ----------------------------------------------------------------------------
def _reference_forward(params, x, eps=1e-5):
    hp = jax.lax.Precision.HIGHEST

    def stage(a, w, b, gamma, beta, mean, var):
        y = jax.lax.conv_general_dilated(
            a, w, window_strides=(1, 1), padding="VALID",
            dimension_numbers=("NCHW", "OIHW", "NCHW"), precision=hp)
        y = y + b[None, :, None, None]
        scale = gamma / jnp.sqrt(var + eps)
        y = (scale[None, :, None, None] * (y - mean[None, :, None, None])
             + beta[None, :, None, None])
        y = jnp.maximum(y, 0.0)
        Bq, Cq, Hq, Wq = y.shape
        y = y[:, :, : (Hq // 2) * 2, : (Wq // 2) * 2]
        return y.reshape(Bq, Cq, Hq // 2, 2, Wq // 2, 2).max(axis=(3, 5))

    a = stage(x, params["conv1_w"], params["conv1_b"], *params["bn1"])
    a = stage(a, params["conv2_w"], params["conv2_b"], *params["bn2"])
    a = stage(a, params["conv3_w"], params["conv3_b"], *params["bn3"])
    f = a.reshape(a.shape[0], -1)
    h = jnp.maximum(jnp.dot(f, params["fc1_w"].T, precision=hp) + params["fc1_b"], 0.0)
    return jnp.dot(h, params["fc2_w"].T, precision=hp) + params["fc2_b"]


if __name__ == "__main__":
    key = jax.random.PRNGKey(0)
    pkey, xkey = jax.random.split(key)
    params = init_params(pkey, num_classes=10)
    # Input must be 32x32 so the conv/pool stack yields 32*2*2 = 128 features for fc1.
    x = jax.random.normal(xkey, (2, 3, 32, 32), dtype=jnp.float32)

    logits = jax.jit(cifar_tiny_forward)(params, x)
    jax.block_until_ready(logits)
    assert logits.shape == (2, 10)
    assert bool(jnp.all(jnp.isfinite(logits)))

    ref = _reference_forward(params, x)
    assert bool(jnp.allclose(logits, ref, rtol=2e-3, atol=2e-3)), \
        float(jnp.max(jnp.abs(logits - ref)))
    print("KERNEL_OK")
</pallas_src>

<mosaic_0001>
module attributes {stable_mosaic.version = 11 : i64} {
  func.func @_conv_bn_relu_pool_kernel(%arg0: i32, %arg1: memref<32x3x32xf32, #tpu.memory_space<vmem>>, %arg2: memref<32x3x32xf32, #tpu.memory_space<vmem>>, %arg3: memref<3x3x8x3xf32, #tpu.memory_space<vmem>>, %arg4: memref<8x1xf32, #tpu.memory_space<vmem>>, %arg5: memref<5x8x30xf32, #tpu.memory_space<vmem>>) attributes {dimension_semantics = [#tpu.dimension_semantics<parallel>], iteration_bounds = array<i64: 3>, scalar_prefetch = 0 : i64, scratch_operands = 0 : i64, tpu.core_type = #tpu.core_type<tc>, window_params = [{pipeline_mode = #tpu.pipeline_mode<synchronous>, transform_indices = @transform_0, window_bounds = array<i64: 32, 3, 32>}, {pipeline_mode = #tpu.pipeline_mode<synchronous>, transform_indices = @transform_1, window_bounds = array<i64: 32, 3, 32>}, {pipeline_mode = #tpu.pipeline_mode<synchronous>, transform_indices = @transform_2, window_bounds = array<i64: 3, 3, 8, 3>}, {pipeline_mode = #tpu.pipeline_mode<synchronous>, transform_indices = @transform_3, window_bounds = array<i64: 8, 1>}, {transform_indices = @transform_4, window_bounds = array<i64: 5, 8, 30>}]} {
    %c0 = arith.constant 0 : index
    %c0_0 = arith.constant 0 : index
    %0 = vector.load %arg4[%c0, %c0_0] : memref<8x1xf32, #tpu.memory_space<vmem>>, vector<8x1xf32>
    %c0_1 = arith.constant 0 : index
    %c0_2 = arith.constant 0 : index
    %c0_3 = arith.constant 0 : index
    %c0_4 = arith.constant 0 : index
    %1 = vector.load %arg3[%c0_1, %c0_2, %c0_3, %c0_4] : memref<3x3x8x3xf32, #tpu.memory_space<vmem>>, vector<1x1x8x3xf32>
    %2 = vector.shape_cast %1 : vector<1x1x8x3xf32> to vector<8x3xf32>
    %c0_5 = arith.constant 0 : index
    %c1 = arith.constant 1 : index
    %c0_6 = arith.constant 0 : index
    %c0_7 = arith.constant 0 : index
    %3 = vector.load %arg3[%c0_5, %c1, %c0_6, %c0_7] : memref<3x3x8x3xf32, #tpu.memory_space<vmem>>, vector<1x1x8x3xf32>
    %4 = vector.shape_cast %3 : vector<1x1x8x3xf32> to vector<8x3xf32>
    %c0_8 = arith.constant 0 : index
    %c2 = arith.constant 2 : index
    %c0_9 = arith.constant 0 : index
    %c0_10 = arith.constant 0 : index
    %5 = vector.load %arg3[%c0_8, %c2, %c0_9, %c0_10] : memref<3x3x8x3xf32, #tpu.memory_space<vmem>>, vector<1x1x8x3xf32>
    %6 = vector.shape_cast %5 : vector<1x1x8x3xf32> to vector<8x3xf32>
    %c1_11 = arith.constant 1 : index
    %c0_12 = arith.constant 0 : index
    %c0_13 = arith.constant 0 : index
    %c0_14 = arith.constant 0 : index
    %7 = vector.load %arg3[%c1_11, %c0_12, %c0_13, %c0_14] : memref<3x3x8x3xf32, #tpu.memory_space<vmem>>, vector<1x1x8x3xf32>
    %8 = vector.shape_cast %7 : vector<1x1x8x3xf32> to vector<8x3xf32>
    %c1_15 = arith.constant 1 : index
    %c1_16 = arith.constant 1 : index
    %c0_17 = arith.constant 0 : index
    %c0_18 = arith.constant 0 : index
    %9 = vector.load %arg3[%c1_15, %c1_16, %c0_17, %c0_18] : memref<3x3x8x3xf32, #tpu.memory_space<vmem>>, vector<1x1x8x3xf32>
    %10 = vector.shape_cast %9 : vector<1x1x8x3xf32> to vector<8x3xf32>
    %c1_19 = arith.constant 1 : index
    %c2_20 = arith.constant 2 : index
    %c0_21 = arith.constant 0 : index
    %c0_22 = arith.constant 0 : index
    %11 = vector.load %arg3[%c1_19, %c2_20, %c0_21, %c0_22] : memref<3x3x8x3xf32, #tpu.memory_space<vmem>>, vector<1x1x8x3xf32>
    %12 = vector.shape_cast %11 : vector<1x1x8x3xf32> to vector<8x3xf32>
    %c2_23 = arith.constant 2 : index
    %c0_24 = arith.constant 0 : index
    %c0_25 = arith.constant 0 : index
    %c0_26 = arith.constant 0 : index
    %13 = vector.load %arg3[%c2_23, %c0_24, %c0_25, %c0_26] : memref<3x3x8x3xf32, #tpu.memory_space<vmem>>, vector<1x1x8x3xf32>
    %14 = vector.shape_cast %13 : vector<1x1x8x3xf32> to vector<8x3xf32>
    %c2_27 = arith.constant 2 : index
    %c1_28 = arith.constant 1 : index
    %c0_29 = arith.constant 0 : index
    %c0_30 = arith.constant 0 : index
    %15 = vector.load %arg3[%c2_27, %c1_28, %c0_29, %c0_30] : memref<3x3x8x3xf32, #tpu.memory_space<vmem>>, vector<1x1x8x3xf32>
    %16 = vector.shape_cast %15 : vector<1x1x8x3xf32> to vector<8x3xf32>
    %c2_31 = arith.constant 2 : index
    %c2_32 = arith.constant 2 : index
    %c0_33 = arith.constant 0 : index
    %c0_34 = arith.constant 0 : index
    %17 = vector.load %arg3[%c2_31, %c2_32, %c0_33, %c0_34] : memref<3x3x8x3xf32, #tpu.memory_space<vmem>>, vector<1x1x8x3xf32>
    %18 = vector.shape_cast %17 : vector<1x1x8x3xf32> to vector<8x3xf32>
    %c5_i32 = arith.constant 5 : i32
    %19 = arith.muli %arg0, %c5_i32 : i32
    %c0_i32 = arith.constant 0 : i32
    %20 = arith.addi %19, %c0_i32 : i32
    %c2_i32 = arith.constant 2 : i32
    %21 = arith.muli %c2_i32, %20 : i32
    %c0_i32_35 = arith.constant 0 : i32
    %22 = arith.addi %21, %c0_i32_35 : i32
    %23 = arith.index_cast %22 : i32 to index
    %c0_36 = arith.constant 0 : index
    %c0_37 = arith.constant 0 : index
    %24 = vector.load %arg1[%23, %c0_36, %c0_37] : memref<32x3x32xf32, #tpu.memory_space<vmem>>, vector<1x3x32xf32>
    %25 = vector.shape_cast %24 : vector<1x3x32xf32> to vector<3x32xf32>
    %c0_i32_38 = arith.constant 0 : i32
    %26 = arith.addi %21, %c0_i32_38 : i32
    %27 = arith.index_cast %26 : i32 to index
    %c0_39 = arith.constant 0 : index
    %c0_40 = arith.constant 0 : index
    %28 = vector.load %arg2[%27, %c0_39, %c0_40] : memref<32x3x32xf32, #tpu.memory_space<vmem>>, vector<1x3x32xf32>
    %29 = vector.shape_cast %28 : vector<1x3x32xf32> to vector<3x32xf32>
    %30 = vector.extract_strided_slice %25 {offsets = [0, 0], sizes = [3, 30], strides = [1, 1]} : vector<3x32xf32> to vector<3x30xf32>
    %31 = vector.extract_strided_slice %25 {offsets = [0, 2], sizes = [3, 30], strides = [1, 1]} : vector<3x32xf32> to vector<3x30xf32>
    %32 = vector.extract_strided_slice %29 {offsets = [0, 0], sizes = [3, 30], strides = [1, 1]} : vector<3x32xf32> to vector<3x30xf32>
    %33 = vector.extract_strided_slice %29 {offsets = [0, 2], sizes = [3, 30], strides = [1, 1]} : vector<3x32xf32> to vector<3x30xf32>
    %c1_i32 = arith.constant 1 : i32
    %34 = arith.addi %21, %c1_i32 : i32
    %35 = arith.index_cast %34 : i32 to index
    %c0_41 = arith.constant 0 : index
    %c0_42 = arith.constant 0 : index
    %36 = vector.load %arg1[%35, %c0_41, %c0_42] : memref<32x3x32xf32, #tpu.memory_space<vmem>>, vector<1x3x32xf32>
    %37 = vector.shape_cast %36 : vector<1x3x32xf32> to vector<3x32xf32>
    %c1_i32_43 = arith.constant 1 : i32
    %38 = arith.addi %21, %c1_i32_43 : i32
    %39 = arith.index_cast %38 : i32 to index
    %c0_44 = arith.constant 0 : index
    %c0_45 = arith.constant 0 : index
    %40 = vector.load %arg2[%39, %c0_44, %c0_45] : memref<32x3x32xf32, #tpu.memory_space<vmem>>, vector<1x3x32xf32>
    %41 = vector.shape_cast %40 : vector<1x3x32xf32> to vector<3x32xf32>
    %42 = vector.extract_strided_slice %37 {offsets = [0, 0], sizes = [3, 30], strides = [1, 1]} : vector<3x32xf32> to vector<3x30xf32>
    %43 = vector.extract_strided_slice %37 {offsets = [0, 2], sizes = [3, 30], strides = [1, 1]} : vector<3x32xf32> to vector<3x30xf32>
    %44 = vector.extract_strided_slice %41 {offsets = [0, 0], sizes = [3, 30], strides = [1, 1]} : vector<3x32xf32> to vector<3x30xf32>
    %45 = vector.extract_strided_slice %41 {offsets = [0, 2], sizes = [3, 30], strides = [1, 1]} : vector<3x32xf32> to vector<3x30xf32>
    %c2_i32_46 = arith.constant 2 : i32
    %46 = arith.addi %21, %c2_i32_46 : i32
    %47 = arith.index_cast %46 : i32 to index
    %c0_47 = arith.constant 0 : index
    %c0_48 = arith.constant 0 : index
    %48 = vector.load %arg1[%47, %c0_47, %c0_48] : memref<32x3x32xf32, #tpu.memory_space<vmem>>, vector<1x3x32xf32>
    %49 = vector.shape_cast %48 : vector<1x3x32xf32> to vector<3x32xf32>
    %c2_i32_49 = arith.constant 2 : i32
    %50 = arith.addi %21, %c2_i32_49 : i32
    %51 = arith.index_cast %50 : i32 to index
    %c0_50 = arith.constant 0 : index
    %c0_51 = arith.constant 0 : index
    %52 = vector.load %arg2[%51, %c0_50, %c0_51] : memref<32x3x32xf32, #tpu.memory_space<vmem>>, vector<1x3x32xf32>
    %53 = vector.shape_cast %52 : vector<1x3x32xf32> to vector<3x32xf32>
    %54 = vector.extract_strided_slice %49 {offsets = [0, 0], sizes = [3, 30], strides = [1, 1]} : vector<3x32xf32> to vector<3x30xf32>
    %55 = vector.extract_strided_slice %49 {offsets = [0, 2], sizes = [3, 30], strides = [1, 1]} : vector<3x32xf32> to vector<3x30xf32>
    %56 = vector.extract_strided_slice %53 {offsets = [0, 0], sizes = [3, 30], strides = [1, 1]} : vector<3x32xf32> to vector<3x30xf32>
    %57 = vector.extract_strided_slice %53 {offsets = [0, 2], sizes = [3, 30], strides = [1, 1]} : vector<3x32xf32> to vector<3x30xf32>
    %c3_i32 = arith.constant 3 : i32
    %58 = arith.addi %21, %c3_i32 : i32
    %59 = arith.index_cast %58 : i32 to index
    %c0_52 = arith.constant 0 : index
    %c0_53 = arith.constant 0 : index
    %60 = vector.load %arg1[%59, %c0_52, %c0_53] : memref<32x3x32xf32, #tpu.memory_space<vmem>>, vector<1x3x32xf32>
    %61 = vector.shape_cast %60 : vector<1x3x32xf32> to vector<3x32xf32>
    %c3_i32_54 = arith.constant 3 : i32
    %62 = arith.addi %21, %c3_i32_54 : i32
    %63 = arith.index_cast %62 : i32 to index
    %c0_55 = arith.constant 0 : index
    %c0_56 = arith.constant 0 : index
    %64 = vector.load %arg2[%63, %c0_55, %c0_56] : memref<32x3x32xf32, #tpu.memory_space<vmem>>, vector<1x3x32xf32>
    %65 = vector.shape_cast %64 : vector<1x3x32xf32> to vector<3x32xf32>
    %66 = vector.extract_strided_slice %61 {offsets = [0, 0], sizes = [3, 30], strides = [1, 1]} : vector<3x32xf32> to vector<3x30xf32>
    %67 = vector.extract_strided_slice %61 {offsets = [0, 2], sizes = [3, 30], strides = [1, 1]} : vector<3x32xf32> to vector<3x30xf32>
    %68 = vector.extract_strided_slice %65 {offsets = [0, 0], sizes = [3, 30], strides = [1, 1]} : vector<3x32xf32> to vector<3x30xf32>
    %69 = vector.extract_strided_slice %65 {offsets = [0, 2], sizes = [3, 30], strides = [1, 1]} : vector<3x32xf32> to vector<3x30xf32>
    %cst = arith.constant dense<0.000000e+00> : vector<8x30xf32>
    %70 = tpu.matmul %2, %30, %cst {dimension_numbers = #tpu.dot_dimension_numbers<[1], [0], [0], [1], [0, 0, 1, 1], [], []>} : vector<8x3xf32>, vector<3x30xf32>, vector<8x30xf32> -> vector<8x30xf32>
    %cst_57 = arith.constant dense<0.000000e+00> : vector<8x30xf32>
    %71 = tpu.matmul %4, %32, %cst_57 {dimension_numbers = #tpu.dot_dimension_numbers<[1], [0], [0], [1], [0, 0, 1, 1], [], []>} : vector<8x3xf32>, vector<3x30xf32>, vector<8x30xf32> -> vector<8x30xf32>
    %72 = arith.addf %70, %71 : vector<8x30xf32>
    %cst_58 = arith.constant dense<0.000000e+00> : vector<8x30xf32>
    %73 = tpu.matmul %6, %31, %cst_58 {dimension_numbers = #tpu.dot_dimension_numbers<[1], [0], [0], [1], [0, 0, 1, 1], [], []>} : vector<8x3xf32>, vector<3x30xf32>, vector<8x30xf32> -> vector<8x30xf32>
    %74 = arith.addf %72, %73 : vector<8x30xf32>
    %cst_59 = arith.constant dense<0.000000e+00> : vector<8x30xf32>
    %75 = tpu.matmul %2, %32, %cst_59 {dimension_numbers = #tpu.dot_dimension_numbers<[1], [0], [0], [1], [0, 0, 1, 1], [], []>} : vector<8x3xf32>, vector<3x30xf32>, vector<8x30xf32> -> vector<8x30xf32>
    %cst_60 = arith.constant dense<0.000000e+00> : vector<8x30xf32>
    %76 = tpu.matmul %4, %31, %cst_60 {dimension_numbers = #tpu.dot_dimension_numbers<[1], [0], [0], [1], [0, 0, 1, 1], [], []>} : vector<8x3xf32>, vector<3x30xf32>, vector<8x30xf32> -> vector<8x30xf32>
    %77 = arith.addf %75, %76 : vector<8x30xf32>
    %cst_61 = arith.constant dense<0.000000e+00> : vector<8x30xf32>
    %78 = tpu.matmul %6, %33, %cst_61 {dimension_numbers = #tpu.dot_dimension_numbers<[1], [0], [0], [1], [0, 0, 1, 1], [], []>} : vector<8x3xf32>, vector<3x30xf32>, vector<8x30xf32> -> vector<8x30xf32>
    %79 = arith.addf %77, %78 : vector<8x30xf32>
    %cst_62 = arith.constant dense<0.000000e+00> : vector<8x30xf32>
    %80 = tpu.matmul %8, %42, %cst_62 {dimension_numbers = #tpu.dot_dimension_numbers<[1], [0], [0], [1], [0, 0, 1, 1], [], []>} : vector<8x3xf32>, vector<3x30xf32>, vector<8x30xf32> -> vector<8x30xf32>
    %cst_63 = arith.constant dense<0.000000e+00> : vector<8x30xf32>
    %81 = tpu.matmul %10, %44, %cst_63 {dimension_numbers = #tpu.dot_dimension_numbers<[1], [0], [0], [1], [0, 0, 1, 1], [], []>} : vector<8x3xf32>, vector<3x30xf32>, vector<8x30xf32> -> vector<8x30xf32>
    %82 = arith.addf %80, %81 : vector<8x30xf32>
    %cst_64 = arith.constant dense<0.000000e+00> : vector<8x30xf32>
    %83 = tpu.matmul %12, %43, %cst_64 {dimension_numbers = #tpu.dot_dimension_numbers<[1], [0], [0], [1], [0, 0, 1, 1], [], []>} : vector<8x3xf32>, vector<3x30xf32>, vector<8x30xf32> -> vector<8x30xf32>
    %84 = arith.addf %82, %83 : vector<8x30xf32>
    %cst_65 = arith.constant dense<0.000000e+00> : vector<8x30xf32>
    %85 = tpu.matmul %8, %44, %cst_65 {dimension_numbers = #tpu.dot_dimension_numbers<[1], [0], [0], [1], [0, 0, 1, 1], [], []>} : vector<8x3xf32>, vector<3x30xf32>, vector<8x30xf32> -> vector<8x30xf32>
    %cst_66 = arith.constant dense<0.000000e+00> : vector<8x30xf32>
    %86 = tpu.matmul %10, %43, %cst_66 {dimension_numbers = #tpu.dot_dimension_numbers<[1], [0], [0], [1], [0, 0, 1, 1], [], []>} : vector<8x3xf32>, vector<3x30xf32>, vector<8x30xf32> -> vector<8x30xf32>
    %87 = arith.addf %85, %86 : vector<8x30xf32>
    %cst_67 = arith.constant dense<0.000000e+00> : vector<8x30xf32>
    %88 = tpu.matmul %12, %45, %cst_67 {dimension_numbers = #tpu.dot_dimension_numbers<[1], [0], [0], [1], [0, 0, 1, 1], [], []>} : vector<8x3xf32>, vector<3x30xf32>, vector<8x30xf32> -> vector<8x30xf32>
    %89 = arith.addf %87, %88 : vector<8x30xf32>
    %90 = arith.addf %74, %84 : vector<8x30xf32>
    %91 = arith.addf %79, %89 : vector<8x30xf32>
    %cst_68 = arith.constant dense<0.000000e+00> : vector<8x30xf32>
    %92 = tpu.matmul %14, %54, %cst_68 {dimension_numbers = #tpu.dot_dimension_numbers<[1], [0], [0], [1], [0, 0, 1, 1], [], []>} : vector<8x3xf32>, vector<3x30xf32>, vector<8x30xf32> -> vector<8x30xf32>
    %cst_69 = arith.constant dense<0.000000e+00> : vector<8x30xf32>
    %93 = tpu.matmul %16, %56, %cst_69 {dimension_numbers = #tpu.dot_dimension_numbers<[1], [0], [0], [1], [0, 0, 1, 1], [], []>} : vector<8x3xf32>, vector<3x30xf32>, vector<8x30xf32> -> vector<8x30xf32>
    %94 = arith.addf %92, %93 : vector<8x30xf32>
    %cst_70 = arith.constant dense<0.000000e+00> : vector<8x30xf32>
    %95 = tpu.matmul %18, %55, %cst_70 {dimension_numbers = #tpu.dot_dimension_numbers<[1], [0], [0], [1], [0, 0, 1, 1], [], []>} : vector<8x3xf32>, vector<3x30xf32>, vector<8x30xf32> -> vector<8x30xf32>
    %96 = arith.addf %94, %95 : vector<8x30xf32>
    %cst_71 = arith.constant dense<0.000000e+00> : vector<8x30xf32>
    %97 = tpu.matmul %14, %56, %cst_71 {dimension_numbers = #tpu.dot_dimension_numbers<[1], [0], [0], [1], [0, 0, 1, 1], [], []>} : vector<8x3xf32>, vector<3x30xf32>, vector<8x30xf32> -> vector<8x30xf32>
    %cst_72 = arith.constant dense<0.000000e+00> : vector<8x30xf32>
    %98 = tpu.matmul %16, %55, %cst_72 {dimension_numbers = #tpu.dot_dimension_numbers<[1], [0], [0], [1], [0, 0, 1, 1], [], []>} : vector<8x3xf32>, vector<3x30xf32>, vector<8x30xf32> -> vector<8x30xf32>
    %99 = arith.addf %97, %98 : vector<8x30xf32>
    %cst_73 = arith.constant dense<0.000000e+00> : vector<8x30xf32>
    %100 = tpu.matmul %18, %57, %cst_73 {dimension_numbers = #tpu.dot_dimension_numbers<[1], [0], [0], [1], [0, 0, 1, 1], [], []>} : vector<8x3xf32>, vector<3x30xf32>, vector<8x30xf32> -> vector<8x30xf32>
    %101 = arith.addf %99, %100 : vector<8x30xf32>
    %102 = arith.addf %90, %96 : vector<8x30xf32>
    %103 = arith.addf %91, %101 : vector<8x30xf32>
    %104 = arith.maximumf %102, %103 : vector<8x30xf32>
    %cst_74 = arith.constant dense<0.000000e+00> : vector<8x30xf32>
    %105 = tpu.matmul %2, %42, %cst_74 {dimension_numbers = #tpu.dot_dimension_numbers<[1], [0], [0], [1], [0, 0, 1, 1], [], []>} : vector<8x3xf32>, vector<3x30xf32>, vector<8x30xf32> -> vector<8x30xf32>
    %cst_75 = arith.constant dense<0.000000e+00> : vector<8x30xf32>
    %106 = tpu.matmul %4, %44, %cst_75 {dimension_numbers = #tpu.dot_dimension_numbers<[1], [0], [0], [1], [0, 0, 1, 1], [], []>} : vector<8x3xf32>, vector<3x30xf32>, vector<8x30xf32> -> vector<8x30xf32>
    %107 = arith.addf %105, %106 : vector<8x30xf32>
    %cst_76 = arith.constant dense<0.000000e+00> : vector<8x30xf32>
    %108 = tpu.matmul %6, %43, %cst_76 {dimension_numbers = #tpu.dot_dimension_numbers<[1], [0], [0], [1], [0, 0, 1, 1], [], []>} : vector<8x3xf32>, vector<3x30xf32>, vector<8x30xf32> -> vector<8x30xf32>
    %109 = arith.addf %107, %108 : vector<8x30xf32>
    %cst_77 = arith.constant dense<0.000000e+00> : vector<8x30xf32>
    %110 = tpu.matmul %2, %44, %cst_77 {dimension_numbers = #tpu.dot_dimension_numbers<[1], [0], [0], [1], [0, 0, 1, 1], [], []>} : vector<8x3xf32>, vector<3x30xf32>, vector<8x30xf32> -> vector<8x30xf32>
    %cst_78 = arith.constant dense<0.000000e+00> : vector<8x30xf32>
    %111 = tpu.matmul %4, %43, %cst_78 {dimension_numbers = #tpu.dot_dimension_numbers<[1], [0], [0], [1], [0, 0, 1, 1], [], []>} : vector<8x3xf32>, vector<3x30xf32>, vector<8x30xf32> -> vector<8x30xf32>
    %112 = arith.addf %110, %111 : vector<8x30xf32>
    %cst_79 = arith.constant dense<0.000000e+00> : vector<8x30xf32>
    %113 = tpu.matmul %6, %45, %cst_79 {dimension_numbers = #tpu.dot_dimension_numbers<[1], [0], [0], [1], [0, 0, 1, 1], [], []>} : vector<8x3xf32>, vector<3x30xf32>, vector<8x30xf32> -> vector<8x30xf32>
    %114 = arith.addf %112, %113 : vector<8x30xf32>
    %cst_80 = arith.constant dense<0.000000e+00> : vector<8x30xf32>
    %115 = tpu.matmul %8, %54, %cst_80 {dimension_numbers = #tpu.dot_dimension_numbers<[1], [0], [0], [1], [0, 0, 1, 1], [], []>} : vector<8x3xf32>, vector<3x30xf32>, vector<8x30xf32> -> vector<8x30xf32>
    %cst_81 = arith.constant dense<0.000000e+00> : vector<8x30xf32>
    %116 = tpu.matmul %10, %56, %cst_81 {dimension_numbers = #tpu.dot_dimension_numbers<[1], [0], [0], [1], [0, 0, 1, 1], [], []>} : vector<8x3xf32>, vector<3x30xf32>, vector<8x30xf32> -> vector<8x30xf32>
    %117 = arith.addf %115, %116 : vector<8x30xf32>
    %cst_82 = arith.constant dense<0.000000e+00> : vector<8x30xf32>
    %118 = tpu.matmul %12, %55, %cst_82 {dimension_numbers = #tpu.dot_dimension_numbers<[1], [0], [0], [1], [0, 0, 1, 1], [], []>} : vector<8x3xf32>, vector<3x30xf32>, vector<8x30xf32> -> vector<8x30xf32>
    %119 = arith.addf %117, %118 : vector<8x30xf32>
    %cst_83 = arith.constant dense<0.000000e+00> : vector<8x30xf32>
    %120 = tpu.matmul %8, %56, %cst_83 {dimension_numbers = #tpu.dot_dimension_numbers<[1], [0], [0], [1], [0, 0, 1, 1], [], []>} : vector<8x3xf32>, vector<3x30xf32>, vector<8x30xf32> -> vector<8x30xf32>
    %cst_84 = arith.constant dense<0.000000e+00> : vector<8x30xf32>
    %121 = tpu.matmul %10, %55, %cst_84 {dimension_numbers = #tpu.dot_dimension_numbers<[1], [0], [0], [1], [0, 0, 1, 1], [], []>} : vector<8x3xf32>, vector<3x30xf32>, vector<8x30xf32> -> vector<8x30xf32>
    %122 = arith.addf %120, %121 : vector<8x30xf32>
    %cst_85 = arith.constant dense<0.000000e+00> : vector<8x30xf32>
    %123 = tpu.matmul %12, %57, %cst_85 {dimension_numbers = #tpu.dot_dimension_numbers<[1], [0], [0], [1], [0, 0, 1, 1], [], []>} : vector<8x3xf32>, vector<3x30xf32>, vector<8x30xf32> -> vector<8x30xf32>
    %124 = arith.addf %122, %123 : vector<8x30xf32>
    %125 = arith.addf %109, %119 : vector<8x30xf32>
    %126 = arith.addf %114, %124 : vector<8x30xf32>
    %cst_86 = arith.constant dense<0.000000e+00> : vector<8x30xf32>
    %127 = tpu.matmul %14, %66, %cst_86 {dimension_numbers = #tpu.dot_dimension_numbers<[1], [0], [0], [1], [0, 0, 1, 1], [], []>} : vector<8x3xf32>, vector<3x30xf32>, vector<8x30xf32> -> vector<8x30xf32>
    %cst_87 = arith.constant dense<0.000000e+00> : vector<8x30xf32>
    %128 = tpu.matmul %16, %68, %cst_87 {dimension_numbers = #tpu.dot_dimension_numbers<[1], [0], [0], [1], [0, 0, 1, 1], [], []>} : vector<8x3xf32>, vector<3x30xf32>, vector<8x30xf32> -> vector<8x30xf32>
    %129 = arith.addf %127, %128 : vector<8x30xf32>
    %cst_88 = arith.constant dense<0.000000e+00> : vector<8x30xf32>
    %130 = tpu.matmul %18, %67, %cst_88 {dimension_numbers = #tpu.dot_dimension_numbers<[1], [0], [0], [1], [0, 0, 1, 1], [], []>} : vector<8x3xf32>, vector<3x30xf32>, vector<8x30xf32> -> vector<8x30xf32>
    %131 = arith.addf %129, %130 : vector<8x30xf32>
    %cst_89 = arith.constant dense<0.000000e+00> : vector<8x30xf32>
    %132 = tpu.matmul %14, %68, %cst_89 {dimension_numbers = #tpu.dot_dimension_numbers<[1], [0], [0], [1], [0, 0, 1, 1], [], []>} : vector<8x3xf32>, vector<3x30xf32>, vector<8x30xf32> -> vector<8x30xf32>
    %cst_90 = arith.constant dense<0.000000e+00> : vector<8x30xf32>
    %133 = tpu.matmul %16, %67, %cst_90 {dimension_numbers = #tpu.dot_dimension_numbers<[1], [0], [0], [1], [0, 0, 1, 1], [], []>} : vector<8x3xf32>, vector<3x30xf32>, vector<8x30xf32> -> vector<8x30xf32>
    %134 = arith.addf %132, %133 : vector<8x30xf32>
    %cst_91 = arith.constant dense<0.000000e+00> : vector<8x30xf32>
    %135 = tpu.matmul %18, %69, %cst_91 {dimension_numbers = #tpu.dot_dimension_numbers<[1], [0], [0], [1], [0, 0, 1, 1], [], []>} : vector<8x3xf32>, vector<3x30xf32>, vector<8x30xf32> -> vector<8x30xf32>
    %136 = arith.addf %134, %135 : vector<8x30xf32>
    %137 = arith.addf %125, %131 : vector<8x30xf32>
    %138 = arith.addf %126, %136 : vector<8x30xf32>
    %139 = arith.maximumf %137, %138 : vector<8x30xf32>
    %140 = arith.maximumf %104, %139 : vector<8x30xf32>
    %141 = vector.broadcast %0 : vector<8x1xf32> to vector<8x30xf32>
    %142 = arith.addf %140, %141 : vector<8x30xf32>
    %cst_92 = arith.constant 0.000000e+00 : f32
    %143 = vector.broadcast %cst_92 : f32 to vector<8x30xf32>
    %144 = arith.maximumf %142, %143 : vector<8x30xf32>
    %c0_93 = arith.constant 0 : index
    %c0_94 = arith.constant 0 : index
    %c0_95 = arith.constant 0 : index
    %145 = vector.load %arg5[%c0_93, %c0_94, %c0_95] : memref<5x8x30xf32, #tpu.memory_space<vmem>>, vector<1x8x30xf32>
    %146 = vector.shape_cast %145 : vector<1x8x30xf32> to vector<8x30xf32>
    %147 = vector.shape_cast %144 : vector<8x30xf32> to vector<1x8x30xf32>
    tpu.vector_store %arg5[%c0_93, %c0_94, %c0_95], %147 {strides = array<i32>} : memref<5x8x30xf32, #tpu.memory_space<vmem>>, vector<1x8x30xf32>,
    %c1_i32_96 = arith.constant 1 : i32
    %148 = arith.addi %19, %c1_i32_96 : i32
    %c2_i32_97 = arith.constant 2 : i32
    %149 = arith.muli %c2_i32_97, %148 : i32
    %c0_i32_98 = arith.constant 0 : i32
    %150 = arith.addi %149, %c0_i32_98 : i32
    %151 = arith.index_cast %150 : i32 to index
    %c0_99 = arith.constant 0 : index
    %c0_100 = arith.constant 0 : index
    %152 = vector.load %arg1[%151, %c0_99, %c0_100] : memref<32x3x32xf32, #tpu.memory_space<vmem>>, vector<1x3x32xf32>
    %153 = vector.shape_cast %152 : vector<1x3x32xf32> to vector<3x32xf32>
    %c0_i32_101 = arith.constant 0 : i32
    %154 = arith.addi %149, %c0_i32_101 : i32
    %155 = arith.index_cast %154 : i32 to index
    %c0_102 = arith.constant 0 : index
    %c0_103 = arith.constant 0 : index
    %156 = vector.load %arg2[%155, %c0_102, %c0_103] : memref<32x3x32xf32, #tpu.memory_space<vmem>>, vector<1x3x32xf32>
    %157 = vector.shape_cast %156 : vector<1x3x32xf32> to vector<3x32xf32>
    %158 = vector.extract_strided_slice %153 {offsets = [0, 0], sizes = [3, 30], strides = [1, 1]} : vector<3x32xf32> to vector<3x30xf32>
    %159 = vector.extract_strided_slice %153 {offsets = [0, 2], sizes = [3, 30], strides = [1, 1]} : vector<3x32xf32> to vector<3x30xf32>
    %160 = vector.extract_strided_slice %157 {offsets = [0, 0], sizes = [3, 30], strides = [1, 1]} : vector<3x32xf32> to vector<3x30xf32>
    %161 = vector.extract_strided_slice %157 {offsets = [0, 2], sizes = [3, 30], strides = [1, 1]} : vector<3x32xf32> to vector<3x30xf32>
    %c1_i32_104 = arith.constant 1 : i32
    %162 = arith.addi %149, %c1_i32_104 : i32
    %163 = arith.index_cast %162 : i32 to index
    %c0_105 = arith.constant 0 : index
    %c0_106 = arith.constant 0 : index
    %164 = vector.load %arg1[%163, %c0_105, %c0_106] : memref<32x3x32xf32, #tpu.memory_space<vmem>>, vector<1x3x32xf32>
    %165 = vector.shape_cast %164 : vector<1x3x32xf32> to vector<3x32xf32>
    %c1_i32_107 = arith.constant 1 : i32
    %166 = arith.addi %149, %c1_i32_107 : i32
    %167 = arith.index_cast %166 : i32 to index
    %c0_108 = arith.constant 0 : index
    %c0_109 = arith.constant 0 : index
    %168 = vector.load %arg2[%167, %c0_108, %c0_109] : memref<32x3x32xf32, #tpu.memory_space<vmem>>, vector<1x3x32xf32>
    %169 = vector.shape_cast %168 : vector<1x3x32xf32> to vector<3x32xf32>
    %170 = vector.extract_strided_slice %165 {offsets = [0, 0], sizes = [3, 30], strides = [1, 1]} : vector<3x32xf32> to vector<3x30xf32>
    %171 = vector.extract_strided_slice %165 {offsets = [0, 2], sizes = [3, 30], strides = [1, 1]} : vector<3x32xf32> to vector<3x30xf32>
    %172 = vector.extract_strided_slice %169 {offsets = [0, 0], sizes = [3, 30], strides = [1, 1]} : vector<3x32xf32> to vector<3x30xf32>
    %173 = vector.extract_strided_slice %169 {offsets = [0, 2], sizes = [3, 30], strides = [1, 1]} : vector<3x32xf32> to vector<3x30xf32>
    %c2_i32_110 = arith.constant 2 : i32
    %174 = arith.addi %149, %c2_i32_110 : i32
    %175 = arith.index_cast %174 : i32 to index
    %c0_111 = arith.constant 0 : index
    %c0_112 = arith.constant 0 : index
    %176 = vector.load %arg1[%175, %c0_111, %c0_112] : memref<32x3x32xf32, #tpu.memory_space<vmem>>, vector<1x3x32xf32>
    %177 = vector.shape_cast %176 : vector<1x3x32xf32> to vector<3x32xf32>
    %c2_i32_113 = arith.constant 2 : i32
    %178 = arith.addi %149, %c2_i32_113 : i32
    %179 = arith.index_cast %178 : i32 to index
    %c0_114 = arith.constant 0 : index
    %c0_115 = arith.constant 0 : index
    %180 = vector.load %arg2[%179, %c0_114, %c0_115] : memref<32x3x32xf32, #tpu.memory_space<vmem>>, vector<1x3x32xf32>
    %181 = vector.shape_cast %180 : vector<1x3x32xf32> to vector<3x32xf32>
    %182 = vector.extract_strided_slice %177 {offsets = [0, 0], sizes = [3, 30], strides = [1, 1]} : vector<3x32xf32> to vector<3x30xf32>
    %183 = vector.extract_strided_slice %177 {offsets = [0, 2], sizes = [3, 30], strides = [1, 1]} : vector<3x32xf32> to vector<3x30xf32>
    %184 = vector.extract_strided_slice %181 {offsets = [0, 0], sizes = [3, 30], strides = [1, 1]} : vector<3x32xf32> to vector<3x30xf32>
    %185 = vector.extract_strided_slice %181 {offsets = [0, 2], sizes = [3, 30], strides = [1, 1]} : vector<3x32xf32> to vector<3x30xf32>
    %c3_i32_116 = arith.constant 3 : i32
    %186 = arith.addi %149, %c3_i32_116 : i32
    %187 = arith.index_cast %186 : i32 to index
    %c0_117 = arith.constant 0 : index
    %c0_118 = arith.constant 0 : index
    %188 = vector.load %arg1[%187, %c0_117, %c0_118] : memref<32x3x32xf32, #tpu.memory_space<vmem>>, vector<1x3x32xf32>
    %189 = vector.shape_cast %188 : vector<1x3x32xf32> to vector<3x32xf32>
    %c3_i32_119 = arith.constant 3 : i32
    %190 = arith.addi %149, %c3_i32_119 : i32
    %191 = arith.index_cast %190 : i32 to index
    %c0_120 = arith.constant 0 : index
    %c0_121 = arith.constant 0 : index
    %192 = vector.load %arg2[%191, %c0_120, %c0_121] : memref<32x3x32xf32, #tpu.memory_space<vmem>>, vector<1x3x32xf32>
    %193 = vector.shape_cast %192 : vector<1x3x32xf32> to vector<3x32xf32>
    %194 = vector.extract_strided_slice %189 {offsets = [0, 0], sizes = [3, 30], strides = [1, 1]} : vector<3x32xf32> to vector<3x30xf32>
    %195 = vector.extract_strided_slice %189 {offsets = [0, 2], sizes = [3, 30], strides = [1, 1]} : vector<3x32xf32> to vector<3x30xf32>
    %196 = vector.extract_strided_slice %193 {offsets = [0, 0], sizes = [3, 30], strides = [1, 1]} : vector<3x32xf32> to vector<3x30xf32>
    %197 = vector.extract_strided_slice %193 {offsets = [0, 2], sizes = [3, 30], strides = [1, 1]} : vector<3x32xf32> to vector<3x30xf32>
    %cst_122 = arith.constant dense<0.000000e+00> : vector<8x30xf32>
    %198 = tpu.matmul %2, %158, %cst_122 {dimension_numbers = #tpu.dot_dimension_numbers<[1], [0], [0], [1], [0, 0, 1, 1], [], []>} : vector<8x3xf32>, vector<3x30xf32>, vector<8x30xf32> -> vector<8x30xf32>
    %cst_123 = arith.constant dense<0.000000e+00> : vector<8x30xf32>
    %199 = tpu.matmul %4, %160, %cst_123 {dimension_numbers = #tpu.dot_dimension_numbers<[1], [0], [0], [1], [0, 0, 1, 1], [], []>} : vector<8x3xf32>, vector<3x30xf32>, vector<8x30xf32> -> vector<8x30xf32>
    %200 = arith.addf %198, %199 : vector<8x30xf32>
    %cst_124 = arith.constant dense<0.000000e+00> : vector<8x30xf32>
    %201 = tpu.matmul %6, %159, %cst_124 {dimension_numbers = #tpu.dot_dimension_numbers<[1], [0], [0], [1], [0, 0, 1, 1], [], []>} : vector<8x3xf32>, vector<3x30xf32>, vector<8x30xf32> -> vector<8x30xf32>
    %202 = arith.addf %200, %201 : vector<8x30xf32>
    %cst_125 = arith.constant dense<0.000000e+00> : vector<8x30xf32>
    %203 = tpu.matmul %2, %160, %cst_125 {dimension_numbers = #tpu.dot_dimension_numbers<[1], [0], [0], [1], [0, 0, 1, 1], [], []>} : vector<8x3xf32>, vector<3x30xf32>, vector<8x30xf32> -> vector<8x30xf32>
    %cst_126 = arith.constant dense<0.000000e+00> : vector<8x30xf32>
    %204 = tpu.matmul %4, %159, %cst_126 {dimension_numbers = #tpu.dot_dimension_numbers<[1], [0], [0], [1], [0, 0, 1, 1], [], []>} : vector<8x3xf32>, vector<3x30xf32>, vector<8x30xf32> -> vector<8x30xf32>
    %205 = arith.addf %203, %204 : vector<8x30xf32>
    %cst_127 = arith.constant dense<0.000000e+00> : vector<8x30xf32>
    %206 = tpu.matmul %6, %161, %cst_127 {dimension_numbers = #tpu.dot_dimension_numbers<[1], [0], [0], [1], [0, 0, 1, 1], [], []>} : vector<8x3xf32>, vector<3x30xf32>, vector<8x30xf32> -> vector<8x30xf32>
    %207 = arith.addf %205, %206 : vector<8x30xf32>
    %cst_128 = arith.constant dense<0.000000e+00> : vector<8x30xf32>
    %208 = tpu.matmul %8, %170, %cst_128 {dimension_numbers = #tpu.dot_dimension_numbers<[1], [0], [0], [1], [0, 0, 1, 1], [], []>} : vector<8x3xf32>, vector<3x30xf32>, vector<8x30xf32> -> vector<8x30xf32>
    %cst_129 = arith.constant dense<0.000000e+00> : vector<8x30xf32>
    %209 = tpu.matmul %10, %172, %cst_129 {dimension_numbers = #tpu.dot_dimension_numbers<[1], [0], [0], [1], [0, 0, 1, 1], [], []>} : vector<8x3xf32>, vector<3x30xf32>, vector<8x30xf32> -> vector<8x30xf32>
    %210 = arith.addf %208, %209 : vector<8x30xf32>
    %cst_130 = arith.constant dense<0.000000e+00> : vector<8x30xf32>
    %211 = tpu.matmul %12, %171, %cst_130 {dimension_numbers = #tpu.dot_dimension_numbers<[1], [0], [0], [1], [0, 0, 1, 1], [], []>} : vector<8x3xf32>, vector<3x30xf32>, vector<8x30xf32> -> vector<8x30xf32>
    %212 = arith.addf %210, %211 : vector<8x30xf32>
    %cst_131 = arith.constant dense<0.000000e+00> : vector<8x30xf32>
    %213 = tpu.matmul %8, %172, %cst_131 {dimension_numbers = #tpu.dot_dimension_numbers<[1], [0], [0], [1], [0, 0, 1, 1], [], []>} : vector<8x3xf32>, vector<3x30xf32>, vector<8x30xf32> -> vector<8x30xf32>
    %cst_132 = arith.constant dense<0.000000e+00> : vector<8x30xf32>
    %214 = tpu.matmul %10, %171, %cst_132 {dimension_numbers = #tpu.dot_dimension_numbers<[1], [0], [0], [1], [0, 0, 1, 1], [], []>} : vector<8x3xf32>, vector<3x30xf32>, vector<8x30xf32> -> vector<8x30xf32>
    %215 = arith.addf %213, %214 : vector<8x30xf32>
    %cst_133 = arith.constant dense<0.000000e+00> : vector<8x30xf32>
    %216 = tpu.matmul %12, %173, %cst_133 {dimension_numbers = #tpu.dot_dimension_numbers<[1], [0], [0], [1], [0, 0, 1, 1], [], []>} : vector<8x3xf32>, vector<3x30xf32>, vector<8x30xf32> -> vector<8x30xf32>
    %217 = arith.addf %215, %216 : vector<8x30xf32>
    %218 = arith.addf %202, %212 : vector<8x30xf32>
    %219 = arith.addf %207, %217 : vector<8x30xf32>
    %cst_134 = arith.constant dense<0.000000e+00> : vector<8x30xf32>
    %220 = tpu.matmul %14, %182, %cst_134 {dimension_numbers = #tpu.dot_dimension_numbers<[1], [0], [0], [1], [0, 0, 1, 1], [], []>} : vector<8x3xf32>, vector<3x30xf32>, vector<8x30xf32> -> vector<8x30xf32>
    %cst_135 = arith.constant dense<0.000000e+00> : vector<8x30xf32>
    %221 = tpu.matmul %16, %184, %cst_135 {dimension_numbers = #tpu.dot_dimension_numbers<[1], [0], [0], [1], [0, 0, 1, 1], [], []>} : vector<8x3xf32>, vector<3x30xf32>, vector<8x30xf32> -> vector<8x30xf32>
    %222 = arith.addf %220, %221 : vector<8x30xf32>
    %cst_136 = arith.constant dense<0.000000e+00> : vector<8x30xf32>
    %223 = tpu.matmul %18, %183, %cst_136 {dimension_numbers = #tpu.dot_dimension_numbers<[1], [0], [0], [1], [0, 0, 1, 1], [], []>} : vector<8x3xf32>, vector<3x30xf32>, vector<8x30xf32> -> vector<8x30xf32>
    %224 = arith.addf %222, %223 : vector<8x30xf32>
    %cst_137 = arith.constant dense<0.000000e+00> : vector<8x30xf32>
    %225 = tpu.matmul %14, %184, %cst_137 {dimension_numbers = #tpu.dot_dimension_numbers<[1], [0], [0], [1], [0, 0, 1, 1], [], []>} : vector<8x3xf32>, vector<3x30xf32>, vector<8x30xf32> -> vector<8x30xf32>
    %cst_138 = arith.constant dense<0.000000e+00> : vector<8x30xf32>
    %226 = tpu.matmul %16, %183, %cst_138 {dimension_numbers = #tpu.dot_dimension_numbers<[1], [0], [0], [1], [0, 0, 1, 1], [], []>} : vector<8x3xf32>, vector<3x30xf32>, vector<8x30xf32> -> vector<8x30xf32>
    %227 = arith.addf %225, %226 : vector<8x30xf32>
    %cst_139 = arith.constant dense<0.000000e+00> : vector<8x30xf32>
    %228 = tpu.matmul %18, %185, %cst_139 {dimension_numbers = #tpu.dot_dimension_numbers<[1], [0], [0], [1], [0, 0, 1, 1], [], []>} : vector<8x3xf32>, vector<3x30xf32>, vector<8x30xf32> -> vector<8x30xf32>
    %229 = arith.addf %227, %228 : vector<8x30xf32>
    %230 = arith.addf %218, %224 : vector<8x30xf32>
    %231 = arith.addf %219, %229 : vector<8x30xf32>
    %232 = arith.maximumf %230, %231 : vector<8x30xf32>
    %cst_140 = arith.constant dense<0.000000e+00> : vector<8x30xf32>
    %233 = tpu.matmul %2, %170, %cst_140 {dimension_numbers = #tpu.dot_dimension_numbers<[1], [0], [0], [1], [0, 0, 1, 1], [], []>} : vector<8x3xf32>, vector<3x30xf32>, vector<8x30xf32> -> vector<8x30xf32>
    %cst_141 = arith.constant dense<0.000000e+00> : vector<8x30xf32>
    %234 = tpu.matmul %4, %172, %cst_141 {dimension_numbers = #tpu.dot_dimension_numbers<[1], [0], [0], [1], [0, 0, 1, 1], [], []>} : vector<8x3xf32>, vector<3x30xf32>, vector<8x30xf32> -> vector<8x30xf32>
    %235 = arith.addf %233, %234 : vector<8x30xf32>
    %cst_142 = arith.constant dense<0.000000e+00> : vector<8x30xf32>
    %236 = tpu.matmul %6, %171, %cst_142 {dimension_numbers = #tpu.dot_dimension_numbers<[1], [0], [0], [1], [0, 0, 1, 1], [], []>} : vector<8x3xf32>, vector<3x30xf32>, vector<8x30xf32> -> vector<8x30xf32>
    %237 = arith.addf %235, %236 : vector<8x30xf32>
    %cst_143 = arith.constant dense<0.000000e+00> : vector<8x30xf32>
    %238 = tpu.matmul %2, %172, %cst_143 {dimension_numbers = #tpu.dot_dimension_numbers<[1], [0], [0], [1], [0, 0, 1, 1], [], []>} : vector<8x3xf32>, vector<3x30xf32>, vector<8x30xf32> -> vector<8x30xf32>
    %cst_144 = arith.constant dense<0.000000e+00> : vector<8x30xf32>
    %239 = tpu.matmul %4, %171, %cst_144 {dimension_numbers = #tpu.dot_dimension_numbers<[1], [0], [0], [1], [0, 0, 1, 1], [], []>} : vector<8x3xf32>, vector<3x30xf32>, vector<8x30xf32> -> vector<8x30xf32>
    %240 = arith.addf %238, %239 : vector<8x30xf32>
    %cst_145 = arith.constant dense<0.000000e+00> : vector<8x30xf32>
    %241 = tpu.matmul %6, %173, %cst_145 {dimension_numbers = #tpu.dot_dimension_numbers<[1], [0], [0], [1], [0, 0, 1, 1], [], []>} : vector<8x3xf32>, vector<3x30xf32>, vector<8x30xf32> -> vector<8x30xf32>
    %242 = arith.addf %240, %241 : vector<8x30xf32>
    %cst_146 = arith.constant dense<0.000000e+00> : vector<8x30xf32>
    %243 = tpu.matmul %8, %182, %cst_146 {dimension_numbers = #tpu.dot_dimension_numbers<[1], [0], [0], [1], [0, 0, 1, 1], [], []>} : vector<8x3xf32>, vector<3x30xf32>, vector<8x30xf32> -> vector<8x30xf32>
    %cst_147 = arith.constant dense<0.000000e+00> : vector<8x30xf32>
    %244 = tpu.matmul %10, %184, %cst_147 {dimension_numbers = #tpu.dot_dimension_numbers<[1], [0], [0], [1], [0, 0, 1, 1], [], []>} : vector<8x3xf32>, vector<3x30xf32>, vector<8x30xf32> -> vector<8x30xf32>
    %245 = arith.addf %243, %244 : vector<8x30xf32>
    %cst_148 = arith.constant dense<0.000000e+00> : vector<8x30xf32>
    %246 = tpu.matmul %12, %183, %cst_148 {dimension_numbers = #tpu.dot_dimension_numbers<[1], [0], [0], [1], [0, 0, 1, 1], [], []>} : vector<8x3xf32>, vector<3x30xf32>, vector<8x30xf32> -> vector<8x30xf32>
    %247 = arith.addf %245, %246 : vector<8x30xf32>
    %cst_149 = arith.constant dense<0.000000e+00> : vector<8x30xf32>
    %248 = tpu.matmul %8, %184, %cst_149 {dimension_numbers = #tpu.dot_dimension_numbers<[1], [0], [0], [1], [0, 0, 1, 1], [], []>} : vector<8x3xf32>, vector<3x30xf32>, vector<8x30xf32> -> vector<8x30xf32>
    %cst_150 = arith.constant dense<0.000000e+00> : vector<8x30xf32>
    %249 = tpu.matmul %10, %183, %cst_150 {dimension_numbers = #tpu.dot_dimension_numbers<[1], [0], [0], [1], [0, 0, 1, 1], [], []>} : vector<8x3xf32>, vector<3x30xf32>, vector<8x30xf32> -> vector<8x30xf32>
    %250 = arith.addf %248, %249 : vector<8x30xf32>
    %cst_151 = arith.constant dense<0.000000e+00> : vector<8x30xf32>
    %251 = tpu.matmul %12, %185, %cst_151 {dimension_numbers = #tpu.dot_dimension_numbers<[1], [0], [0], [1], [0, 0, 1, 1], [], []>} : vector<8x3xf32>, vector<3x30xf32>, vector<8x30xf32> -> vector<8x30xf32>
    %252 = arith.addf %250, %251 : vector<8x30xf32>
    %253 = arith.addf %237, %247 : vector<8x30xf32>
    %254 = arith.addf %242, %252 : vector<8x30xf32>
    %cst_152 = arith.constant dense<0.000000e+00> : vector<8x30xf32>
    %255 = tpu.matmul %14, %194, %cst_152 {dimension_numbers = #tpu.dot_dimension_numbers<[1], [0], [0], [1], [0, 0, 1, 1], [], []>} : vector<8x3xf32>, vector<3x30xf32>, vector<8x30xf32> -> vector<8x30xf32>
    %cst_153 = arith.constant dense<0.000000e+00> : vector<8x30xf32>
    %256 = tpu.matmul %16, %196, %cst_153 {dimension_numbers = #tpu.dot_dimension_numbers<[1], [0], [0], [1], [0, 0, 1, 1], [], []>} : vector<8x3xf32>, vector<3x30xf32>, vector<8x30xf32> -> vector<8x30xf32>
    %257 = arith.addf %255, %256 : vector<8x30xf32>
    %cst_154 = arith.constant dense<0.000000e+00> : vector<8x30xf32>
    %258 = tpu.matmul %18, %195, %cst_154 {dimension_numbers = #tpu.dot_dimension_numbers<[1], [0], [0], [1], [0, 0, 1, 1], [], []>} : vector<8x3xf32>, vector<3x30xf32>, vector<8x30xf32> -> vector<8x30xf32>
    %259 = arith.addf %257, %258 : vector<8x30xf32>
    %cst_155 = arith.constant dense<0.000000e+00> : vector<8x30xf32>
    %260 = tpu.matmul %14, %196, %cst_155 {dimension_numbers = #tpu.dot_dimension_numbers<[1], [0], [0], [1], [0, 0, 1, 1], [], []>} : vector<8x3xf32>, vector<3x30xf32>, vector<8x30xf32> -> vector<8x30xf32>
    %cst_156 = arith.constant dense<0.000000e+00> : vector<8x30xf32>
    %261 = tpu.matmul %16, %195, %cst_156 {dimension_numbers = #tpu.dot_dimension_numbers<[1], [0], [0], [1], [0, 0, 1, 1], [], []>} : vector<8x3xf32>, vector<3x30xf32>, vector<8x30xf32> -> vector<8x30xf32>
    %262 = arith.addf %260, %261 : vector<8x30xf32>
    %cst_157 = arith.constant dense<0.000000e+00> : vector<8x30xf32>
    %263 = tpu.matmul %18, %197, %cst_157 {dimension_numbers = #tpu.dot_dimension_numbers<[1], [0], [0], [1], [0, 0, 1, 1], [], []>} : vector<8x3xf32>, vector<3x30xf32>, vector<8x30xf32> -> vector<8x30xf32>
    %264 = arith.addf %262, %263 : vector<8x30xf32>
    %265 = arith.addf %253, %259 : vector<8x30xf32>
    %266 = arith.addf %254, %264 : vector<8x30xf32>
    %267 = arith.maximumf %265, %266 : vector<8x30xf32>
    %268 = arith.maximumf %232, %267 : vector<8x30xf32>
    %269 = vector.broadcast %0 : vector<8x1xf32> to vector<8x30xf32>
    %270 = arith.addf %268, %269 : vector<8x30xf32>
    %cst_158 = arith.constant 0.000000e+00 : f32
    %271 = vector.broadcast %cst_158 : f32 to vector<8x30xf32>
    %272 = arith.maximumf %270, %271 : vector<8x30xf32>
    %c1_159 = arith.constant 1 : index
    %c0_160 = arith.constant 0 : index
    %c0_161 = arith.constant 0 : index
    %273 = vector.load %arg5[%c1_159, %c0_160, %c0_161] : memref<5x8x30xf32, #tpu.memory_space<vmem>>, vector<1x8x30xf32>
    %274 = vector.shape_cast %273 : vector<1x8x30xf32> to vector<8x30xf32>
    %275 = vector.shape_cast %272 : vector<8x30xf32> to vector<1x8x30xf32>
    tpu.vector_store %arg5[%c1_159, %c0_160, %c0_161], %275 {strides = array<i32>} : memref<5x8x30xf32, #tpu.memory_space<vmem>>, vector<1x8x30xf32>,
    %c2_i32_162 = arith.constant 2 : i32
    %276 = arith.addi %19, %c2_i32_162 : i32
    %c2_i32_163 = arith.constant 2 : i32
    %277 = arith.muli %c2_i32_163, %276 : i32
    %c0_i32_164 = arith.constant 0 : i32
    %278 = arith.addi %277, %c0_i32_164 : i32
    %279 = arith.index_cast %278 : i32 to index
    %c0_165 = arith.constant 0 : index
    %c0_166 = arith.constant 0 : index
    %280 = vector.load %arg1[%279, %c0_165, %c0_166] : memref<32x3x32xf32, #tpu.memory_space<vmem>>, vector<1x3x32xf32>
    %281 = vector.shape_cast %280 : vector<1x3x32xf32> to vector<3x32xf32>
    %c0_i32_167 = arith.constant 0 : i32
    %282 = arith.addi %277, %c0_i32_167 : i32
    %283 = arith.index_cast %282 : i32 to index
    %c0_168 = arith.constant 0 : index
    %c0_169 = arith.constant 0 : index
    %284 = vector.load %arg2[%283, %c0_168, %c0_169] : memref<32x3x32xf32, #tpu.memory_space<vmem>>, vector<1x3x32xf32>
    %285 = vector.shape_cast %284 : vector<1x3x32xf32> to vector<3x32xf32>
    %286 = vector.extract_strided_slice %281 {offsets = [0, 0], sizes = [3, 30], strides = [1, 1]} : vector<3x32xf32> to vector<3x30xf32>
    %287 = vector.extract_strided_slice %281 {offsets = [0, 2], sizes = [3, 30], strides = [1, 1]} : vector<3x32xf32> to vector<3x30xf32>
    %288 = vector.extract_strided_slice %285 {offsets = [0, 0], sizes = [3, 30], strides = [1, 1]} : vector<3x32xf32> to vector<3x30xf32>
    %289 = vector.extract_strided_slice %285 {offsets = [0, 2], sizes = [3, 30], strides = [1, 1]} : vector<3x32xf32> to vector<3x30xf32>
    %c1_i32_170 = arith.constant 1 : i32
    %290 = arith.addi %277, %c1_i32_170 : i32
    %291 = arith.index_cast %290 : i32 to index
    %c0_171 = arith.constant 0 : index
    %c0_172 = arith.constant 0 : index
    %292 = vector.load %arg1[%291, %c0_171, %c0_172] : memref<32x3x32xf32, #tpu.memory_space<vmem>>, vector<1x3x32xf32>
    %293 = vector.shape_cast %292 : vector<1x3x32xf32> to vector<3x32xf32>
    %c1_i32_173 = arith.constant 1 : i32
    %294 = arith.addi %277, %c1_i32_173 : i32
    %295 = arith.index_cast %294 : i32 to index
    %c0_174 = arith.constant 0 : index
    %c0_175 = arith.constant 0 : index
    %296 = vector.load %arg2[%295, %c0_174, %c0_175] : memref<32x3x32xf32, #tpu.memory_space<vmem>>, vector<1x3x32xf32>
    %297 = vector.shape_cast %296 : vector<1x3x32xf32> to vector<3x32xf32>
    %298 = vector.extract_strided_slice %293 {offsets = [0, 0], sizes = [3, 30], strides = [1, 1]} : vector<3x32xf32> to vector<3x30xf32>
    %299 = vector.extract_strided_slice %293 {offsets = [0, 2], sizes = [3, 30], strides = [1, 1]} : vector<3x32xf32> to vector<3x30xf32>
    %300 = vector.extract_strided_slice %297 {offsets = [0, 0], sizes = [3, 30], strides = [1, 1]} : vector<3x32xf32> to vector<3x30xf32>
    %301 = vector.extract_strided_slice %297 {offsets = [0, 2], sizes = [3, 30], strides = [1, 1]} : vector<3x32xf32> to vector<3x30xf32>
    %c2_i32_176 = arith.constant 2 : i32
    %302 = arith.addi %277, %c2_i32_176 : i32
    %303 = arith.index_cast %302 : i32 to index
    %c0_177 = arith.constant 0 : index
    %c0_178 = arith.constant 0 : index
    %304 = vector.load %arg1[%303, %c0_177, %c0_178] : memref<32x3x32xf32, #tpu.memory_space<vmem>>, vector<1x3x32xf32>
    %305 = vector.shape_cast %304 : vector<1x3x32xf32> to vector<3x32xf32>
    %c2_i32_179 = arith.constant 2 : i32
    %306 = arith.addi %277, %c2_i32_179 : i32
    %307 = arith.index_cast %306 : i32 to index
    %c0_180 = arith.constant 0 : index
    %c0_181 = arith.constant 0 : index
    %308 = vector.load %arg2[%307, %c0_180, %c0_181] : memref<32x3x32xf32, #tpu.memory_space<vmem>>, vector<1x3x32xf32>
    %309 = vector.shape_cast %308 : vector<1x3x32xf32> to vector<3x32xf32>
    %310 = vector.extract_strided_slice %305 {offsets = [0, 0], sizes = [3, 30], strides = [1, 1]} : vector<3x32xf32> to vector<3x30xf32>
    %311 = vector.extract_strided_slice %305 {offsets = [0, 2], sizes = [3, 30], strides = [1, 1]} : vector<3x32xf32> to vector<3x30xf32>
    %312 = vector.extract_strided_slice %309 {offsets = [0, 0], sizes = [3, 30], strides = [1, 1]} : vector<3x32xf32> to vector<3x30xf32>
    %313 = vector.extract_strided_slice %309 {offsets = [0, 2], sizes = [3, 30], strides = [1, 1]} : vector<3x32xf32> to vector<3x30xf32>
    %c3_i32_182 = arith.constant 3 : i32
    %314 = arith.addi %277, %c3_i32_182 : i32
    %315 = arith.index_cast %314 : i32 to index
    %c0_183 = arith.constant 0 : index
    %c0_184 = arith.constant 0 : index
    %316 = vector.load %arg1[%315, %c0_183, %c0_184] : memref<32x3x32xf32, #tpu.memory_space<vmem>>, vector<1x3x32xf32>
    %317 = vector.shape_cast %316 : vector<1x3x32xf32> to vector<3x32xf32>
    %c3_i32_185 = arith.constant 3 : i32
    %318 = arith.addi %277, %c3_i32_185 : i32
    %319 = arith.index_cast %318 : i32 to index
    %c0_186 = arith.constant 0 : index
    %c0_187 = arith.constant 0 : index
    %320 = vector.load %arg2[%319, %c0_186, %c0_187] : memref<32x3x32xf32, #tpu.memory_space<vmem>>, vector<1x3x32xf32>
    %321 = vector.shape_cast %320 : vector<1x3x32xf32> to vector<3x32xf32>
    %322 = vector.extract_strided_slice %317 {offsets = [0, 0], sizes = [3, 30], strides = [1, 1]} : vector<3x32xf32> to vector<3x30xf32>
    %323 = vector.extract_strided_slice %317 {offsets = [0, 2], sizes = [3, 30], strides = [1, 1]} : vector<3x32xf32> to vector<3x30xf32>
    %324 = vector.extract_strided_slice %321 {offsets = [0, 0], sizes = [3, 30], strides = [1, 1]} : vector<3x32xf32> to vector<3x30xf32>
    %325 = vector.extract_strided_slice %321 {offsets = [0, 2], sizes = [3, 30], strides = [1, 1]} : vector<3x32xf32> to vector<3x30xf32>
    %cst_188 = arith.constant dense<0.000000e+00> : vector<8x30xf32>
    %326 = tpu.matmul %2, %286, %cst_188 {dimension_numbers = #tpu.dot_dimension_numbers<[1], [0], [0], [1], [0, 0, 1, 1], [], []>} : vector<8x3xf32>, vector<3x30xf32>, vector<8x30xf32> -> vector<8x30xf32>
    %cst_189 = arith.constant dense<0.000000e+00> : vector<8x30xf32>
    %327 = tpu.matmul %4, %288, %cst_189 {dimension_numbers = #tpu.dot_dimension_numbers<[1], [0], [0], [1], [0, 0, 1, 1], [], []>} : vector<8x3xf32>, vector<3x30xf32>, vector<8x30xf32> -> vector<8x30xf32>
    %328 = arith.addf %326, %327 : vector<8x30xf32>
    %cst_190 = arith.constant dense<0.000000e+00> : vector<8x30xf32>
    %329 = tpu.matmul %6, %287, %cst_190 {dimension_numbers = #tpu.dot_dimension_numbers<[1], [0], [0], [1], [0, 0, 1, 1], [], []>} : vector<8x3xf32>, vector<3x30xf32>, vector<8x30xf32> -> vector<8x30xf32>
    %330 = arith.addf %328, %329 : vector<8x30xf32>
    %cst_191 = arith.constant dense<0.000000e+00> : vector<8x30xf32>
    %331 = tpu.matmul %2, %288, %cst_191 {dimension_numbers = #tpu.dot_dimension_numbers<[1], [0], [0], [1], [0, 0, 1, 1], [], []>} : vector<8x3xf32>, vector<3x30xf32>, vector<8x30xf32> -> vector<8x30xf32>
    %cst_192 = arith.constant dense<0.000000e+00> : vector<8x30xf32>
    %332 = tpu.matmul %4, %287, %cst_192 {dimension_numbers = #tpu.dot_dimension_numbers<[1], [0], [0], [1], [0, 0, 1, 1], [], []>} : vector<8x3xf32>, vector<3x30xf32>, vector<8x30xf32> -> vector<8x30xf32>
    %333 = arith.addf %331, %332 : vector<8x30xf32>
    %cst_193 = arith.constant dense<0.000000e+00> : vector<8x30xf32>
    %334 = tpu.matmul %6, %289, %cst_193 {dimension_numbers = #tpu.dot_dimension_numbers<[1], [0], [0], [1], [0, 0, 1, 1], [], []>} : vector<8x3xf32>, vector<3x30xf32>, vector<8x30xf32> -> vector<8x30xf32>
    %335 = arith.addf %333, %334 : vector<8x30xf32>
    %cst_194 = arith.constant dense<0.000000e+00> : vector<8x30xf32>
    %336 = tpu.matmul %8, %298, %cst_194 {dimension_numbers = #tpu.dot_dimension_numbers<[1], [0], [0], [1], [0, 0, 1, 1], [], []>} : vector<8x3xf32>, vector<3x30xf32>, vector<8x30xf32> -> vector<8x30xf32>
    %cst_195 = arith.constant dense<0.000000e+00> : vector<8x30xf32>
    %337 = tpu.matmul %10, %300, %cst_195 {dimension_numbers = #tpu.dot_dimension_numbers<[1], [0], [0], [1], [0, 0, 1, 1], [], []>} : vector<8x3xf32>, vector<3x30xf32>, vector<8x30xf32> -> vector<8x30xf32>
    %338 = arith.addf %336, %337 : vector<8x30xf32>
    %cst_196 = arith.constant dense<0.000000e+00> : vector<8x30xf32>
    %339 = tpu.matmul %12, %299, %cst_196 {dimension_numbers = #tpu.dot_dimension_numbers<[1], [0], [0], [1], [0, 0, 1, 1], [], []>} : vector<8x3xf32>, vector<3x30xf32>, vector<8x30xf32> -> vector<8x30xf32>
    %340 = arith.addf %338, %339 : vector<8x30xf32>
    %cst_197 = arith.constant dense<0.000000e+00> : vector<8x30xf32>
    %341 = tpu.matmul %8, %300, %cst_197 {dimension_numbers = #tpu.dot_dimension_numbers<[1], [0], [0], [1], [0, 0, 1, 1], [], []>} : vector<8x3xf32>, vector<3x30xf32>, vector<8x30xf32> -> vector<8x30xf32>
    %cst_198 = arith.constant dense<0.000000e+00> : vector<8x30xf32>
    %342 = tpu.matmul %10, %299, %cst_198 {dimension_numbers = #tpu.dot_dimension_numbers<[1], [0], [0], [1], [0, 0, 1, 1], [], []>} : vector<8x3xf32>, vector<3x30xf32>, vector<8x30xf32> -> vector<8x30xf32>
    %343 = arith.addf %341, %342 : vector<8x30xf32>
    %cst_199 = arith.constant dense<0.000000e+00> : vector<8x30xf32>
    %344 = tpu.matmul %12, %301, %cst_199 {dimension_numbers = #tpu.dot_dimension_numbers<[1], [0], [0], [1], [0, 0, 1, 1], [], []>} : vector<8x3xf32>, vector<3x30xf32>, vector<8x30xf32> -> vector<8x30xf32>
    %345 = arith.addf %343, %344 : vector<8x30xf32>
    %346 = arith.addf %330, %340 : vector<8x30xf32>
    %347 = arith.addf %335, %345 : vector<8x30xf32>
    %cst_200 = arith.constant dense<0.000000e+00> : vector<8x30xf32>
    %348 = tpu.matmul %14, %310, %cst_200 {dimension_numbers = #tpu.dot_dimension_numbers<[1], [0], [0], [1], [0, 0, 1, 1], [], []>} : vector<8x3xf32>, vector<3x30xf32>, vector<8x30xf32> -> vector<8x30xf32>
    %cst_201 = arith.constant dense<0.000000e+00> : vector<8x30xf32>
    %349 = tpu.matmul %16, %312, %cst_201 {dimension_numbers = #tpu.dot_dimension_numbers<[1], [0], [0], [1], [0, 0, 1, 1], [], []>} : vector<8x3xf32>, vector<3x30xf32>, vector<8x30xf32> -> vector<8x30xf32>
    %350 = arith.addf %348, %349 : vector<8x30xf32>
    %cst_202 = arith.constant dense<0.000000e+00> : vector<8x30xf32>
    %351 = tpu.matmul %18, %311, %cst_202 {dimension_numbers = #tpu.dot_dimension_numbers<[1], [0], [0], [1], [0, 0, 1, 1], [], []>} : vector<8x3xf32>, vector<3x30xf32>, vector<8x30xf32> -> vector<8x30xf32>
    %352 = arith.addf %350, %351 : vector<8x30xf32>
    %cst_203 = arith.constant dense<0.000000e+00> : vector<8x30xf32>
    %353 = tpu.matmul %14, %312, %cst_203 {dimension_numbers = #tpu.dot_dimension_numbers<[1], [0], [0], [1], [0, 0, 1, 1], [], []>} : vector<8x3xf32>, vector<3x30xf32>, vector<8x30xf32> -> vector<8x30xf32>
    %cst_204 = arith.constant dense<0.000000e+00> : vector<8x30xf32>
    %354 = tpu.matmul %16, %311, %cst_204 {dimension_numbers = #tpu.dot_dimension_numbers<[1], [0], [0], [1], [0, 0, 1, 1], [], []>} : vector<8x3xf32>, vector<3x30xf32>, vector<8x30xf32> -> vector<8x30xf32>
    %355 = arith.addf %353, %354 : vector<8x30xf32>
    %cst_205 = arith.constant dense<0.000000e+00> : vector<8x30xf32>
    %356 = tpu.matmul %18, %313, %cst_205 {dimension_numbers = #tpu.dot_dimension_numbers<[1], [0], [0], [1], [0, 0, 1, 1], [], []>} : vector<8x3xf32>, vector<3x30xf32>, vector<8x30xf32> -> vector<8x30xf32>
    %357 = arith.addf %355, %356 : vector<8x30xf32>
    %358 = arith.addf %346, %352 : vector<8x30xf32>
    %359 = arith.addf %347, %357 : vector<8x30xf32>
    %360 = arith.maximumf %358, %359 : vector<8x30xf32>
    %cst_206 = arith.constant dense<0.000000e+00> : vector<8x30xf32>
    %361 = tpu.matmul %2, %298, %cst_206 {dimension_numbers = #tpu.dot_dimension_numbers<[1], [0], [0], [1], [0, 0, 1, 1], [], []>} : vector<8x3xf32>, vector<3x30xf32>, vector<8x30xf32> -> vector<8x30xf32>
    %cst_207 = arith.constant dense<0.000000e+00> : vector<8x30xf32>
    %362 = tpu.matmul %4, %300, %cst_207 {dimension_numbers = #tpu.dot_dimension_numbers<[1], [0], [0], [1], [0, 0, 1, 1], [], []>} : vector<8x3xf32>, vector<3x30xf32>, vector<8x30xf32> -> vector<8x30xf32>
    %363 = arith.addf %361, %362 : vector<8x30xf32>
    %cst_208 = arith.constant dense<0.000000e+00> : vector<8x30xf32>
    %364 = tpu.matmul %6, %299, %cst_208 {dimension_numbers = #tpu.dot_dimension_numbers<[1], [0], [0], [1], [0, 0, 1, 1], [], []>} : vector<8x3xf32>, vector<3x30xf32>, vector<8x30xf32> -> vector<8x30xf32>
    %365 = arith.addf %363, %364 : vector<8x30xf32>
    %cst_209 = arith.constant dense<0.000000e+00> : vector<8x30xf32>
    %366 = tpu.matmul %2, %300, %cst_209 {dimension_numbers = #tpu.dot_dimension_numbers<[1], [0], [0], [1], [0, 0, 1, 1], [], []>} : vector<8x3xf32>, vector<3x30xf32>, vector<8x30xf32> -> vector<8x30xf32>
    %cst_210 = arith.constant dense<0.000000e+00> : vector<8x30xf32>
    %367 = tpu.matmul %4, %299, %cst_210 {dimension_numbers = #tpu.dot_dimension_numbers<[1], [0], [0], [1], [0, 0, 1, 1], [], []>} : vector<8x3xf32>, vector<3x30xf32>, vector<8x30xf32> -> vector<8x30xf32>
    %368 = arith.addf %366, %367 : vector<8x30xf32>
    %cst_211 = arith.constant dense<0.000000e+00> : vector<8x30xf32>
    %369 = tpu.matmul %6, %301, %cst_211 {dimension_numbers = #tpu.dot_dimension_numbers<[1], [0], [0], [1], [0, 0, 1, 1], [], []>} : vector<8x3xf32>, vector<3x30xf32>, vector<8x30xf32> -> vector<8x30xf32>
    %370 = arith.addf %368, %369 : vector<8x30xf32>
    %cst_212 = arith.constant dense<0.000000e+00> : vector<8x30xf32>
    %371 = tpu.matmul %8, %310, %cst_212 {dimension_numbers = #tpu.dot_dimension_numbers<[1], [0], [0], [1], [0, 0, 1, 1], [], []>} : vector<8x3xf32>, vector<3x30xf32>, vector<8x30xf32> -> vector<8x30xf32>
    %cst_213 = arith.constant dense<0.000000e+00> : vector<8x30xf32>
    %372 = tpu.matmul %10, %312, %cst_213 {dimension_numbers = #tpu.dot_dimension_numbers<[1], [0], [0], [1], [0, 0, 1, 1], [], []>} : vector<8x3xf32>, vector<3x30xf32>, vector<8x30xf32> -> vector<8x30xf32>
    %373 = arith.addf %371, %372 : vector<8x30xf32>
    %cst_214 = arith.constant dense<0.000000e+00> : vector<8x30xf32>
    %374 = tpu.matmul %12, %311, %cst_214 {dimension_numbers = #tpu.dot_dimension_numbers<[1], [0], [0], [1], [0, 0, 1, 1], [], []>} : vector<8x3xf32>, vector<3x30xf32>, vector<8x30xf32> -> vector<8x30xf32>
    %375 = arith.addf %373, %374 : vector<8x30xf32>
    %cst_215 = arith.constant dense<0.000000e+00> : vector<8x30xf32>
    %376 = tpu.matmul %8, %312, %cst_215 {dimension_numbers = #tpu.dot_dimension_numbers<[1], [0], [0], [1], [0, 0, 1, 1], [], []>} : vector<8x3xf32>, vector<3x30xf32>, vector<8x30xf32> -> vector<8x30xf32>
    %cst_216 = arith.constant dense<0.000000e+00> : vector<8x30xf32>
    %377 = tpu.matmul %10, %311, %cst_216 {dimension_numbers = #tpu.dot_dimension_numbers<[1], [0], [0], [1], [0, 0, 1, 1], [], []>} : vector<8x3xf32>, vector<3x30xf32>, vector<8x30xf32> -> vector<8x30xf32>
    %378 = arith.addf %376, %377 : vector<8x30xf32>
    %cst_217 = arith.constant dense<0.000000e+00> : vector<8x30xf32>
    %379 = tpu.matmul %12, %313, %cst_217 {dimension_numbers = #tpu.dot_dimension_numbers<[1], [0], [0], [1], [0, 0, 1, 1], [], []>} : vector<8x3xf32>, vector<3x30xf32>, vector<8x30xf32> -> vector<8x30xf32>
    %380 = arith.addf %378, %379 : vector<8x30xf32>
    %381 = arith.addf %365, %375 : vector<8x30xf32>
    %382 = arith.addf %370, %380 : vector<8x30xf32>
    %cst_218 = arith.constant dense<0.000000e+00> : vector<8x30xf32>
    %383 = tpu.matmul %14, %322, %cst_218 {dimension_numbers = #tpu.dot_dimension_numbers<[1], [0], [0], [1], [0, 0, 1, 1], [], []>} : vector<8x3xf32>, vector<3x30xf32>, vector<8x30xf32> -> vector<8x30xf32>
    %cst_219 = arith.constant dense<0.000000e+00> : vector<8x30xf32>
    %384 = tpu.matmul %16, %324, %cst_219 {dimension_numbers = #tpu.dot_dimension_numbers<[1], [0], [0], [1], [0, 0, 1, 1], [], []>} : vector<8x3xf32>, vector<3x30xf32>, vector<8x30xf32> -> vector<8x30xf32>
    %385 = arith.addf %383, %384 : vector<8x30xf32>
    %cst_220 = arith.constant dense<0.000000e+00> : vector<8x30xf32>
    %386 = tpu.matmul %18, %323, %cst_220 {dimension_numbers = #tpu.dot_dimension_numbers<[1], [0], [0], [1], [0, 0, 1, 1], [], []>} : vector<8x3xf32>, vector<3x30xf32>, vector<8x30xf32> -> vector<8x30xf32>
    %387 = arith.addf %385, %386 : vector<8x30xf32>
    %cst_221 = arith.constant dense<0.000000e+00> : vector<8x30xf32>
    %388 = tpu.matmul %14, %324, %cst_221 {dimension_numbers = #tpu.dot_dimension_numbers<[1], [0], [0], [1], [0, 0, 1, 1], [], []>} : vector<8x3xf32>, vector<3x30xf32>, vector<8x30xf32> -> vector<8x30xf32>
    %cst_222 = arith.constant dense<0.000000e+00> : vector<8x30xf32>
    %389 = tpu.matmul %16, %323, %cst_222 {dimension_numbers = #tpu.dot_dimension_numbers<[1], [0], [0], [1], [0, 0, 1, 1], [], []>} : vector<8x3xf32>, vector<3x30xf32>, vector<8x30xf32> -> vector<8x30xf32>
    %390 = arith.addf %388, %389 : vector<8x30xf32>
    %cst_223 = arith.constant dense<0.000000e+00> : vector<8x30xf32>
    %391 = tpu.matmul %18, %325, %cst_223 {dimension_numbers = #tpu.dot_dimension_numbers<[1], [0], [0], [1], [0, 0, 1, 1], [], []>} : vector<8x3xf32>, vector<3x30xf32>, vector<8x30xf32> -> vector<8x30xf32>
    %392 = arith.addf %390, %391 : vector<8x30xf32>
    %393 = arith.addf %381, %387 : vector<8x30xf32>
    %394 = arith.addf %382, %392 : vector<8x30xf32>
    %395 = arith.maximumf %393, %394 : vector<8x30xf32>
    %396 = arith.maximumf %360, %395 : vector<8x30xf32>
    %397 = vector.broadcast %0 : vector<8x1xf32> to vector<8x30xf32>
    %398 = arith.addf %396, %397 : vector<8x30xf32>
    %cst_224 = arith.constant 0.000000e+00 : f32
    %399 = vector.broadcast %cst_224 : f32 to vector<8x30xf32>
    %400 = arith.maximumf %398, %399 : vector<8x30xf32>
    %c2_225 = arith.constant 2 : index
    %c0_226 = arith.constant 0 : index
    %c0_227 = arith.constant 0 : index
    %401 = vector.load %arg5[%c2_225, %c0_226, %c0_227] : memref<5x8x30xf32, #tpu.memory_space<vmem>>, vector<1x8x30xf32>
    %402 = vector.shape_cast %401 : vector<1x8x30xf32> to vector<8x30xf32>
    %403 = vector.shape_cast %400 : vector<8x30xf32> to vector<1x8x30xf32>
    tpu.vector_store %arg5[%c2_225, %c0_226, %c0_227], %403 {strides = array<i32>} : memref<5x8x30xf32, #tpu.memory_space<vmem>>, vector<1x8x30xf32>,
    %c3_i32_228 = arith.constant 3 : i32
    %404 = arith.addi %19, %c3_i32_228 : i32
    %c2_i32_229 = arith.constant 2 : i32
    %405 = arith.muli %c2_i32_229, %404 : i32
    %c0_i32_230 = arith.constant 0 : i32
    %406 = arith.addi %405, %c0_i32_230 : i32
    %407 = arith.index_cast %406 : i32 to index
    %c0_231 = arith.constant 0 : index
    %c0_232 = arith.constant 0 : index
    %408 = vector.load %arg1[%407, %c0_231, %c0_232] : memref<32x3x32xf32, #tpu.memory_space<vmem>>, vector<1x3x32xf32>
    %409 = vector.shape_cast %408 : vector<1x3x32xf32> to vector<3x32xf32>
    %c0_i32_233 = arith.constant 0 : i32
    %410 = arith.addi %405, %c0_i32_233 : i32
    %411 = arith.index_cast %410 : i32 to index
    %c0_234 = arith.constant 0 : index
    %c0_235 = arith.constant 0 : index
    %412 = vector.load %arg2[%411, %c0_234, %c0_235] : memref<32x3x32xf32, #tpu.memory_space<vmem>>, vector<1x3x32xf32>
    %413 = vector.shape_cast %412 : vector<1x3x32xf32> to vector<3x32xf32>
    %414 = vector.extract_strided_slice %409 {offsets = [0, 0], sizes = [3, 30], strides = [1, 1]} : vector<3x32xf32> to vector<3x30xf32>
    %415 = vector.extract_strided_slice %409 {offsets = [0, 2], sizes = [3, 30], strides = [1, 1]} : vector<3x32xf32> to vector<3x30xf32>
    %416 = vector.extract_strided_slice %413 {offsets = [0, 0], sizes = [3, 30], strides = [1, 1]} : vector<3x32xf32> to vector<3x30xf32>
    %417 = vector.extract_strided_slice %413 {offsets = [0, 2], sizes = [3, 30], strides = [1, 1]} : vector<3x32xf32> to vector<3x30xf32>
    %c1_i32_236 = arith.constant 1 : i32
    %418 = arith.addi %405, %c1_i32_236 : i32
    %419 = arith.index_cast %418 : i32 to index
    %c0_237 = arith.constant 0 : index
    %c0_238 = arith.constant 0 : index
    %420 = vector.load %arg1[%419, %c0_237, %c0_238] : memref<32x3x32xf32, #tpu.memory_space<vmem>>, vector<1x3x32xf32>
    %421 = vector.shape_cast %420 : vector<1x3x32xf32> to vector<3x32xf32>
    %c1_i32_239 = arith.constant 1 : i32
    %422 = arith.addi %405, %c1_i32_239 : i32
    %423 = arith.index_cast %422 : i32 to index
    %c0_240 = arith.constant 0 : index
    %c0_241 = arith.constant 0 : index
    %424 = vector.load %arg2[%423, %c0_240, %c0_241] : memref<32x3x32xf32, #tpu.memory_space<vmem>>, vector<1x3x32xf32>
    %425 = vector.shape_cast %424 : vector<1x3x32xf32> to vector<3x32xf32>
    %426 = vector.extract_strided_slice %421 {offsets = [0, 0], sizes = [3, 30], strides = [1, 1]} : vector<3x32xf32> to vector<3x30xf32>
    %427 = vector.extract_strided_slice %421 {offsets = [0, 2], sizes = [3, 30], strides = [1, 1]} : vector<3x32xf32> to vector<3x30xf32>
    %428 = vector.extract_strided_slice %425 {offsets = [0, 0], sizes = [3, 30], strides = [1, 1]} : vector<3x32xf32> to vector<3x30xf32>
    %429 = vector.extract_strided_slice %425 {offsets = [0, 2], sizes = [3, 30], strides = [1, 1]} : vector<3x32xf32> to vector<3x30xf32>
    %c2_i32_242 = arith.constant 2 : i32
    %430 = arith.addi %405, %c2_i32_242 : i32
    %431 = arith.index_cast %430 : i32 to index
    %c0_243 = arith.constant 0 : index
    %c0_244 = arith.constant 0 : index
    %432 = vector.load %arg1[%431, %c0_243, %c0_244] : memref<32x3x32xf32, #tpu.memory_space<vmem>>, vector<1x3x32xf32>
    %433 = vector.shape_cast %432 : vector<1x3x32xf32> to vector<3x32xf32>
    %c2_i32_245 = arith.constant 2 : i32
    %434 = arith.addi %405, %c2_i32_245 : i32
    %435 = arith.index_cast %434 : i32 to index
    %c0_246 = arith.constant 0 : index
    %c0_247 = arith.constant 0 : index
    %436 = vector.load %arg2[%435, %c0_246, %c0_247] : memref<32x3x32xf32, #tpu.memory_space<vmem>>, vector<1x3x32xf32>
    %437 = vector.shape_cast %436 : vector<1x3x32xf32> to vector<3x32xf32>
    %438 = vector.extract_strided_slice %433 {offsets = [0, 0], sizes = [3, 30], strides = [1, 1]} : vector<3x32xf32> to vector<3x30xf32>
    %439 = vector.extract_strided_slice %433 {offsets = [0, 2], sizes = [3, 30], strides = [1, 1]} : vector<3x32xf32> to vector<3x30xf32>
    %440 = vector.extract_strided_slice %437 {offsets = [0, 0], sizes = [3, 30], strides = [1, 1]} : vector<3x32xf32> to vector<3x30xf32>
    %441 = vector.extract_strided_slice %437 {offsets = [0, 2], sizes = [3, 30], strides = [1, 1]} : vector<3x32xf32> to vector<3x30xf32>
    %c3_i32_248 = arith.constant 3 : i32
    %442 = arith.addi %405, %c3_i32_248 : i32
    %443 = arith.index_cast %442 : i32 to index
    %c0_249 = arith.constant 0 : index
    %c0_250 = arith.constant 0 : index
    %444 = vector.load %arg1[%443, %c0_249, %c0_250] : memref<32x3x32xf32, #tpu.memory_space<vmem>>, vector<1x3x32xf32>
    %445 = vector.shape_cast %444 : vector<1x3x32xf32> to vector<3x32xf32>
    %c3_i32_251 = arith.constant 3 : i32
    %446 = arith.addi %405, %c3_i32_251 : i32
    %447 = arith.index_cast %446 : i32 to index
    %c0_252 = arith.constant 0 : index
    %c0_253 = arith.constant 0 : index
    %448 = vector.load %arg2[%447, %c0_252, %c0_253] : memref<32x3x32xf32, #tpu.memory_space<vmem>>, vector<1x3x32xf32>
    %449 = vector.shape_cast %448 : vector<1x3x32xf32> to vector<3x32xf32>
    %450 = vector.extract_strided_slice %445 {offsets = [0, 0], sizes = [3, 30], strides = [1, 1]} : vector<3x32xf32> to vector<3x30xf32>
    %451 = vector.extract_strided_slice %445 {offsets = [0, 2], sizes = [3, 30], strides = [1, 1]} : vector<3x32xf32> to vector<3x30xf32>
    %452 = vector.extract_strided_slice %449 {offsets = [0, 0], sizes = [3, 30], strides = [1, 1]} : vector<3x32xf32> to vector<3x30xf32>
    %453 = vector.extract_strided_slice %449 {offsets = [0, 2], sizes = [3, 30], strides = [1, 1]} : vector<3x32xf32> to vector<3x30xf32>
    %cst_254 = arith.constant dense<0.000000e+00> : vector<8x30xf32>
    %454 = tpu.matmul %2, %414, %cst_254 {dimension_numbers = #tpu.dot_dimension_numbers<[1], [0], [0], [1], [0, 0, 1, 1], [], []>} : vector<8x3xf32>, vector<3x30xf32>, vector<8x30xf32> -> vector<8x30xf32>
    %cst_255 = arith.constant dense<0.000000e+00> : vector<8x30xf32>
    %455 = tpu.matmul %4, %416, %cst_255 {dimension_numbers = #tpu.dot_dimension_numbers<[1], [0], [0], [1], [0, 0, 1, 1], [], []>} : vector<8x3xf32>, vector<3x30xf32>, vector<8x30xf32> -> vector<8x30xf32>
    %456 = arith.addf %454, %455 : vector<8x30xf32>
    %cst_256 = arith.constant dense<0.000000e+00> : vector<8x30xf32>
    %457 = tpu.matmul %6, %415, %cst_256 {dimension_numbers = #tpu.dot_dimension_numbers<[1], [0], [0], [1], [0, 0, 1, 1], [], []>} : vector<8x3xf32>, vector<3x30xf32>, vector<8x30xf32> -> vector<8x30xf32>
    %458 = arith.addf %456, %457 : vector<8x30xf32>
    %cst_257 = arith.constant dense<0.000000e+00> : vector<8x30xf32>
    %459 = tpu.matmul %2, %416, %cst_257 {dimension_numbers = #tpu.dot_dimension_numbers<[1], [0], [0], [1], [0, 0, 1, 1], [], []>} : vector<8x3xf32>, vector<3x30xf32>, vector<8x30xf32> -> vector<8x30xf32>
    %cst_258 = arith.constant dense<0.000000e+00> : vector<8x30xf32>
    %460 = tpu.matmul %4, %415, %cst_258 {dimension_numbers = #tpu.dot_dimension_numbers<[1], [0], [0], [1], [0, 0, 1, 1], [], []>} : vector<8x3xf32>, vector<3x30xf32>, vector<8x30xf32> -> vector<8x30xf32>
    %461 = arith.addf %459, %460 : vector<8x30xf32>
    %cst_259 = arith.constant dense<0.000000e+00> : vector<8x30xf32>
    %462 = tpu.matmul %6, %417, %cst_259 {dimension_numbers = #tpu.dot_dimension_numbers<[1], [0], [0], [1], [0, 0, 1, 1], [], []>} : vector<8x3xf32>, vector<3x30xf32>, vector<8x30xf32> -> vector<8x30xf32>
    %463 = arith.addf %461, %462 : vector<8x30xf32>
    %cst_260 = arith.constant dense<0.000000e+00> : vector<8x30xf32>
    %464 = tpu.matmul %8, %426, %cst_260 {dimension_numbers = #tpu.dot_dimension_numbers<[1], [0], [0], [1], [0, 0, 1, 1], [], []>} : vector<8x3xf32>, vector<3x30xf32>, vector<8x30xf32> -> vector<8x30xf32>
    %cst_261 = arith.constant dense<0.000000e+00> : vector<8x30xf32>
    %465 = tpu.matmul %10, %428, %cst_261 {dimension_numbers = #tpu.dot_dimension_numbers<[1], [0], [0], [1], [0, 0, 1, 1], [], []>} : vector<8x3xf32>, vector<3x30xf32>, vector<8x30xf32> -> vector<8x30xf32>
    %466 = arith.addf %464, %465 : vector<8x30xf32>
    %cst_262 = arith.constant dense<0.000000e+00> : vector<8x30xf32>
    %467 = tpu.matmul %12, %427, %cst_262 {dimension_numbers = #tpu.dot_dimension_numbers<[1], [0], [0], [1], [0, 0, 1, 1], [], []>} : vector<8x3xf32>, vector<3x30xf32>, vector<8x30xf32> -> vector<8x30xf32>
    %468 = arith.addf %466, %467 : vector<8x30xf32>
    %cst_263 = arith.constant dense<0.000000e+00> : vector<8x30xf32>
    %469 = tpu.matmul %8, %428, %cst_263 {dimension_numbers = #tpu.dot_dimension_numbers<[1], [0], [0], [1], [0, 0, 1, 1], [], []>} : vector<8x3xf32>, vector<3x30xf32>, vector<8x30xf32> -> vector<8x30xf32>
    %cst_264 = arith.constant dense<0.000000e+00> : vector<8x30xf32>
    %470 = tpu.matmul %10, %427, %cst_264 {dimension_numbers = #tpu.dot_dimension_numbers<[1], [0], [0], [1], [0, 0, 1, 1], [], []>} : vector<8x3xf32>, vector<3x30xf32>, vector<8x30xf32> -> vector<8x30xf32>
    %471 = arith.addf %469, %470 : vector<8x30xf32>
    %cst_265 = arith.constant dense<0.000000e+00> : vector<8x30xf32>
    %472 = tpu.matmul %12, %429, %cst_265 {dimension_numbers = #tpu.dot_dimension_numbers<[1], [0], [0], [1], [0, 0, 1, 1], [], []>} : vector<8x3xf32>, vector<3x30xf32>, vector<8x30xf32> -> vector<8x30xf32>
    %473 = arith.addf %471, %472 : vector<8x30xf32>
    %474 = arith.addf %458, %468 : vector<8x30xf32>
    %475 = arith.addf %463, %473 : vector<8x30xf32>
    %cst_266 = arith.constant dense<0.000000e+00> : vector<8x30xf32>
    %476 = tpu.matmul %14, %438, %cst_266 {dimension_numbers = #tpu.dot_dimension_numbers<[1], [0], [0], [1], [0, 0, 1, 1], [], []>} : vector<8x3xf32>, vector<3x30xf32>, vector<8x30xf32> -> vector<8x30xf32>
    %cst_267 = arith.constant dense<0.000000e+00> : vector<8x30xf32>
    %477 = tpu.matmul %16, %440, %cst_267 {dimension_numbers = #tpu.dot_dimension_numbers<[1], [0], [0], [1], [0, 0, 1, 1], [], []>} : vector<8x3xf32>, vector<3x30xf32>, vector<8x30xf32> -> vector<8x30xf32>
    %478 = arith.addf %476, %477 : vector<8x30xf32>
    %cst_268 = arith.constant dense<0.000000e+00> : vector<8x30xf32>
    %479 = tpu.matmul %18, %439, %cst_268 {dimension_numbers = #tpu.dot_dimension_numbers<[1], [0], [0], [1], [0, 0, 1, 1], [], []>} : vector<8x3xf32>, vector<3x30xf32>, vector<8x30xf32> -> vector<8x30xf32>
    %480 = arith.addf %478, %479 : vector<8x30xf32>
    %cst_269 = arith.constant dense<0.000000e+00> : vector<8x30xf32>
    %481 = tpu.matmul %14, %440, %cst_269 {dimension_numbers = #tpu.dot_dimension_numbers<[1], [0], [0], [1], [0, 0, 1, 1], [], []>} : vector<8x3xf32>, vector<3x30xf32>, vector<8x30xf32> -> vector<8x30xf32>
    %cst_270 = arith.constant dense<0.000000e+00> : vector<8x30xf32>
    %482 = tpu.matmul %16, %439, %cst_270 {dimension_numbers = #tpu.dot_dimension_numbers<[1], [0], [0], [1], [0, 0, 1, 1], [], []>} : vector<8x3xf32>, vector<3x30xf32>, vector<8x30xf32> -> vector<8x30xf32>
    %483 = arith.addf %481, %482 : vector<8x30xf32>
    %cst_271 = arith.constant dense<0.000000e+00> : vector<8x30xf32>
    %484 = tpu.matmul %18, %441, %cst_271 {dimension_numbers = #tpu.dot_dimension_numbers<[1], [0], [0], [1], [0, 0, 1, 1], [], []>} : vector<8x3xf32>, vector<3x30xf32>, vector<8x30xf32> -> vector<8x30xf32>
    %485 = arith.addf %483, %484 : vector<8x30xf32>
    %486 = arith.addf %474, %480 : vector<8x30xf32>
    %487 = arith.addf %475, %485 : vector<8x30xf32>
    %488 = arith.maximumf %486, %487 : vector<8x30xf32>
    %cst_272 = arith.constant dense<0.000000e+00> : vector<8x30xf32>
    %489 = tpu.matmul %2, %426, %cst_272 {dimension_numbers = #tpu.dot_dimension_numbers<[1], [0], [0], [1], [0, 0, 1, 1], [], []>} : vector<8x3xf32>, vector<3x30xf32>, vector<8x30xf32> -> vector<8x30xf32>
    %cst_273 = arith.constant dense<0.000000e+00> : vector<8x30xf32>
    %490 = tpu.matmul %4, %428, %cst_273 {dimension_numbers = #tpu.dot_dimension_numbers<[1], [0], [0], [1], [0, 0, 1, 1], [], []>} : vector<8x3xf32>, vector<3x30xf32>, vector<8x30xf32> -> vector<8x30xf32>
    %491 = arith.addf %489, %490 : vector<8x30xf32>
    %cst_274 = arith.constant dense<0.000000e+00> : vector<8x30xf32>
    %492 = tpu.matmul %6, %427, %cst_274 {dimension_numbers = #tpu.dot_dimension_numbers<[1], [0], [0], [1], [0, 0, 1, 1], [], []>} : vector<8x3xf32>, vector<3x30xf32>, vector<8x30xf32> -> vector<8x30xf32>
    %493 = arith.addf %491, %492 : vector<8x30xf32>
    %cst_275 = arith.constant dense<0.000000e+00> : vector<8x30xf32>
    %494 = tpu.matmul %2, %428, %cst_275 {dimension_numbers = #tpu.dot_dimension_numbers<[1], [0], [0], [1], [0, 0, 1, 1], [], []>} : vector<8x3xf32>, vector<3x30xf32>, vector<8x30xf32> -> vector<8x30xf32>
    %cst_276 = arith.constant dense<0.000000e+00> : vector<8x30xf32>
    %495 = tpu.matmul %4, %427, %cst_276 {dimension_numbers = #tpu.dot_dimension_numbers<[1], [0], [0], [1], [0, 0, 1, 1], [], []>} : vector<8x3xf32>, vector<3x30xf32>, vector<8x30xf32> -> vector<8x30xf32>
    %496 = arith.addf %494, %495 : vector<8x30xf32>
    %cst_277 = arith.constant dense<0.000000e+00> : vector<8x30xf32>
    %497 = tpu.matmul %6, %429, %cst_277 {dimension_numbers = #tpu.dot_dimension_numbers<[1], [0], [0], [1], [0, 0, 1, 1], [], []>} : vector<8x3xf32>, vector<3x30xf32>, vector<8x30xf32> -> vector<8x30xf32>
    %498 = arith.addf %496, %497 : vector<8x30xf32>
    %cst_278 = arith.constant dense<0.000000e+00> : vector<8x30xf32>
    %499 = tpu.matmul %8, %438, %cst_278 {dimension_numbers = #tpu.dot_dimension_numbers<[1], [0], [0], [1], [0, 0, 1, 1], [], []>} : vector<8x3xf32>, vector<3x30xf32>, vector<8x30xf32> -> vector<8x30xf32>
    %cst_279 = arith.constant dense<0.000000e+00> : vector<8x30xf32>
    %500 = tpu.matmul %10, %440, %cst_279 {dimension_numbers = #tpu.dot_dimension_numbers<[1], [0], [0], [1], [0, 0, 1, 1], [], []>} : vector<8x3xf32>, vector<3x30xf32>, vector<8x30xf32> -> vector<8x30xf32>
    %501 = arith.addf %499, %500 : vector<8x30xf32>
    %cst_280 = arith.constant dense<0.000000e+00> : vector<8x30xf32>
    %502 = tpu.matmul %12, %439, %cst_280 {dimension_numbers = #tpu.dot_dimension_numbers<[1], [0], [0], [1], [0, 0, 1, 1], [], []>} : vector<8x3xf32>, vector<3x30xf32>, vector<8x30xf32> -> vector<8x30xf32>
    %503 = arith.addf %501, %502 : vector<8x30xf32>
    %cst_281 = arith.constant dense<0.000000e+00> : vector<8x30xf32>
    %504 = tpu.matmul %8, %440, %cst_281 {dimension_numbers = #tpu.dot_dimension_numbers<[1], [0], [0], [1], [0, 0, 1, 1], [], []>} : vector<8x3xf32>, vector<3x30xf32>, vector<8x30xf32> -> vector<8x30xf32>
    %cst_282 = arith.constant dense<0.000000e+00> : vector<8x30xf32>
    %505 = tpu.matmul %10, %439, %cst_282 {dimension_numbers = #tpu.dot_dimension_numbers<[1], [0], [0], [1], [0, 0, 1, 1], [], []>} : vector<8x3xf32>, vector<3x30xf32>, vector<8x30xf32> -> vector<8x30xf32>
    %506 = arith.addf %504, %505 : vector<8x30xf32>
    %cst_283 = arith.constant dense<0.000000e+00> : vector<8x30xf32>
    %507 = tpu.matmul %12, %441, %cst_283 {dimension_numbers = #tpu.dot_dimension_numbers<[1], [0], [0], [1], [0, 0, 1, 1], [], []>} : vector<8x3xf32>, vector<3x30xf32>, vector<8x30xf32> -> vector<8x30xf32>
    %508 = arith.addf %506, %507 : vector<8x30xf32>
    %509 = arith.addf %493, %503 : vector<8x30xf32>
    %510 = arith.addf %498, %508 : vector<8x30xf32>
    %cst_284 = arith.constant dense<0.000000e+00> : vector<8x30xf32>
    %511 = tpu.matmul %14, %450, %cst_284 {dimension_numbers = #tpu.dot_dimension_numbers<[1], [0], [0], [1], [0, 0, 1, 1], [], []>} : vector<8x3xf32>, vector<3x30xf32>, vector<8x30xf32> -> vector<8x30xf32>
    %cst_285 = arith.constant dense<0.000000e+00> : vector<8x30xf32>
    %512 = tpu.matmul %16, %452, %cst_285 {dimension_numbers = #tpu.dot_dimension_numbers<[1], [0], [0], [1], [0, 0, 1, 1], [], []>} : vector<8x3xf32>, vector<3x30xf32>, vector<8x30xf32> -> vector<8x30xf32>
    %513 = arith.addf %511, %512 : vector<8x30xf32>
    %cst_286 = arith.constant dense<0.000000e+00> : vector<8x30xf32>
    %514 = tpu.matmul %18, %451, %cst_286 {dimension_numbers = #tpu.dot_dimension_numbers<[1], [0], [0], [1], [0, 0, 1, 1], [], []>} : vector<8x3xf32>, vector<3x30xf32>, vector<8x30xf32> -> vector<8x30xf32>
    %515 = arith.addf %513, %514 : vector<8x30xf32>
    %cst_287 = arith.constant dense<0.000000e+00> : vector<8x30xf32>
    %516 = tpu.matmul %14, %452, %cst_287 {dimension_numbers = #tpu.dot_dimension_numbers<[1], [0], [0], [1], [0, 0, 1, 1], [], []>} : vector<8x3xf32>, vector<3x30xf32>, vector<8x30xf32> -> vector<8x30xf32>
    %cst_288 = arith.constant dense<0.000000e+00> : vector<8x30xf32>
    %517 = tpu.matmul %16, %451, %cst_288 {dimension_numbers = #tpu.dot_dimension_numbers<[1], [0], [0], [1], [0, 0, 1, 1], [], []>} : vector<8x3xf32>, vector<3x30xf32>, vector<8x30xf32> -> vector<8x30xf32>
    %518 = arith.addf %516, %517 : vector<8x30xf32>
    %cst_289 = arith.constant dense<0.000000e+00> : vector<8x30xf32>
    %519 = tpu.matmul %18, %453, %cst_289 {dimension_numbers = #tpu.dot_dimension_numbers<[1], [0], [0], [1], [0, 0, 1, 1], [], []>} : vector<8x3xf32>, vector<3x30xf32>, vector<8x30xf32> -> vector<8x30xf32>
    %520 = arith.addf %518, %519 : vector<8x30xf32>
    %521 = arith.addf %509, %515 : vector<8x30xf32>
    %522 = arith.addf %510, %520 : vector<8x30xf32>
    %523 = arith.maximumf %521, %522 : vector<8x30xf32>
    %524 = arith.maximumf %488, %523 : vector<8x30xf32>
    %525 = vector.broadcast %0 : vector<8x1xf32> to vector<8x30xf32>
    %526 = arith.addf %524, %525 : vector<8x30xf32>
    %cst_290 = arith.constant 0.000000e+00 : f32
    %527 = vector.broadcast %cst_290 : f32 to vector<8x30xf32>
    %528 = arith.maximumf %526, %527 : vector<8x30xf32>
    %c3 = arith.constant 3 : index
    %c0_291 = arith.constant 0 : index
    %c0_292 = arith.constant 0 : index
    %529 = vector.load %arg5[%c3, %c0_291, %c0_292] : memref<5x8x30xf32, #tpu.memory_space<vmem>>, vector<1x8x30xf32>
    %530 = vector.shape_cast %529 : vector<1x8x30xf32> to vector<8x30xf32>
    %531 = vector.shape_cast %528 : vector<8x30xf32> to vector<1x8x30xf32>
    tpu.vector_store %arg5[%c3, %c0_291, %c0_292], %531 {strides = array<i32>} : memref<5x8x30xf32, #tpu.memory_space<vmem>>, vector<1x8x30xf32>,
    %c4_i32 = arith.constant 4 : i32
    %532 = arith.addi %19, %c4_i32 : i32
    %c2_i32_293 = arith.constant 2 : i32
    %533 = arith.muli %c2_i32_293, %532 : i32
    %c0_i32_294 = arith.constant 0 : i32
    %534 = arith.addi %533, %c0_i32_294 : i32
    %535 = arith.index_cast %534 : i32 to index
    %c0_295 = arith.constant 0 : index
    %c0_296 = arith.constant 0 : index
    %536 = vector.load %arg1[%535, %c0_295, %c0_296] : memref<32x3x32xf32, #tpu.memory_space<vmem>>, vector<1x3x32xf32>
    %537 = vector.shape_cast %536 : vector<1x3x32xf32> to vector<3x32xf32>
    %c0_i32_297 = arith.constant 0 : i32
    %538 = arith.addi %533, %c0_i32_297 : i32
    %539 = arith.index_cast %538 : i32 to index
    %c0_298 = arith.constant 0 : index
    %c0_299 = arith.constant 0 : index
    %540 = vector.load %arg2[%539, %c0_298, %c0_299] : memref<32x3x32xf32, #tpu.memory_space<vmem>>, vector<1x3x32xf32>
    %541 = vector.shape_cast %540 : vector<1x3x32xf32> to vector<3x32xf32>
    %542 = vector.extract_strided_slice %537 {offsets = [0, 0], sizes = [3, 30], strides = [1, 1]} : vector<3x32xf32> to vector<3x30xf32>
    %543 = vector.extract_strided_slice %537 {offsets = [0, 2], sizes = [3, 30], strides = [1, 1]} : vector<3x32xf32> to vector<3x30xf32>
    %544 = vector.extract_strided_slice %541 {offsets = [0, 0], sizes = [3, 30], strides = [1, 1]} : vector<3x32xf32> to vector<3x30xf32>
    %545 = vector.extract_strided_slice %541 {offsets = [0, 2], sizes = [3, 30], strides = [1, 1]} : vector<3x32xf32> to vector<3x30xf32>
    %c1_i32_300 = arith.constant 1 : i32
    %546 = arith.addi %533, %c1_i32_300 : i32
    %547 = arith.index_cast %546 : i32 to index
    %c0_301 = arith.constant 0 : index
    %c0_302 = arith.constant 0 : index
    %548 = vector.load %arg1[%547, %c0_301, %c0_302] : memref<32x3x32xf32, #tpu.memory_space<vmem>>, vector<1x3x32xf32>
    %549 = vector.shape_cast %548 : vector<1x3x32xf32> to vector<3x32xf32>
    %c1_i32_303 = arith.constant 1 : i32
    %550 = arith.addi %533, %c1_i32_303 : i32
    %551 = arith.index_cast %550 : i32 to index
    %c0_304 = arith.constant 0 : index
    %c0_305 = arith.constant 0 : index
    %552 = vector.load %arg2[%551, %c0_304, %c0_305] : memref<32x3x32xf32, #tpu.memory_space<vmem>>, vector<1x3x32xf32>
    %553 = vector.shape_cast %552 : vector<1x3x32xf32> to vector<3x32xf32>
    %554 = vector.extract_strided_slice %549 {offsets = [0, 0], sizes = [3, 30], strides = [1, 1]} : vector<3x32xf32> to vector<3x30xf32>
    %555 = vector.extract_strided_slice %549 {offsets = [0, 2], sizes = [3, 30], strides = [1, 1]} : vector<3x32xf32> to vector<3x30xf32>
    %556 = vector.extract_strided_slice %553 {offsets = [0, 0], sizes = [3, 30], strides = [1, 1]} : vector<3x32xf32> to vector<3x30xf32>
    %557 = vector.extract_strided_slice %553 {offsets = [0, 2], sizes = [3, 30], strides = [1, 1]} : vector<3x32xf32> to vector<3x30xf32>
    %c2_i32_306 = arith.constant 2 : i32
    %558 = arith.addi %533, %c2_i32_306 : i32
    %559 = arith.index_cast %558 : i32 to index
    %c0_307 = arith.constant 0 : index
    %c0_308 = arith.constant 0 : index
    %560 = vector.load %arg1[%559, %c0_307, %c0_308] : memref<32x3x32xf32, #tpu.memory_space<vmem>>, vector<1x3x32xf32>
    %561 = vector.shape_cast %560 : vector<1x3x32xf32> to vector<3x32xf32>
    %c2_i32_309 = arith.constant 2 : i32
    %562 = arith.addi %533, %c2_i32_309 : i32
    %563 = arith.index_cast %562 : i32 to index
    %c0_310 = arith.constant 0 : index
    %c0_311 = arith.constant 0 : index
    %564 = vector.load %arg2[%563, %c0_310, %c0_311] : memref<32x3x32xf32, #tpu.memory_space<vmem>>, vector<1x3x32xf32>
    %565 = vector.shape_cast %564 : vector<1x3x32xf32> to vector<3x32xf32>
    %566 = vector.extract_strided_slice %561 {offsets = [0, 0], sizes = [3, 30], strides = [1, 1]} : vector<3x32xf32> to vector<3x30xf32>
    %567 = vector.extract_strided_slice %561 {offsets = [0, 2], sizes = [3, 30], strides = [1, 1]} : vector<3x32xf32> to vector<3x30xf32>
    %568 = vector.extract_strided_slice %565 {offsets = [0, 0], sizes = [3, 30], strides = [1, 1]} : vector<3x32xf32> to vector<3x30xf32>
    %569 = vector.extract_strided_slice %565 {offsets = [0, 2], sizes = [3, 30], strides = [1, 1]} : vector<3x32xf32> to vector<3x30xf32>
    %c3_i32_312 = arith.constant 3 : i32
    %570 = arith.addi %533, %c3_i32_312 : i32
    %571 = arith.index_cast %570 : i32 to index
    %c0_313 = arith.constant 0 : index
    %c0_314 = arith.constant 0 : index
    %572 = vector.load %arg1[%571, %c0_313, %c0_314] : memref<32x3x32xf32, #tpu.memory_space<vmem>>, vector<1x3x32xf32>
    %573 = vector.shape_cast %572 : vector<1x3x32xf32> to vector<3x32xf32>
    %c3_i32_315 = arith.constant 3 : i32
    %574 = arith.addi %533, %c3_i32_315 : i32
    %575 = arith.index_cast %574 : i32 to index
    %c0_316 = arith.constant 0 : index
    %c0_317 = arith.constant 0 : index
    %576 = vector.load %arg2[%575, %c0_316, %c0_317] : memref<32x3x32xf32, #tpu.memory_space<vmem>>, vector<1x3x32xf32>
    %577 = vector.shape_cast %576 : vector<1x3x32xf32> to vector<3x32xf32>
    %578 = vector.extract_strided_slice %573 {offsets = [0, 0], sizes = [3, 30], strides = [1, 1]} : vector<3x32xf32> to vector<3x30xf32>
    %579 = vector.extract_strided_slice %573 {offsets = [0, 2], sizes = [3, 30], strides = [1, 1]} : vector<3x32xf32> to vector<3x30xf32>
    %580 = vector.extract_strided_slice %577 {offsets = [0, 0], sizes = [3, 30], strides = [1, 1]} : vector<3x32xf32> to vector<3x30xf32>
    %581 = vector.extract_strided_slice %577 {offsets = [0, 2], sizes = [3, 30], strides = [1, 1]} : vector<3x32xf32> to vector<3x30xf32>
    %cst_318 = arith.constant dense<0.000000e+00> : vector<8x30xf32>
    %582 = tpu.matmul %2, %542, %cst_318 {dimension_numbers = #tpu.dot_dimension_numbers<[1], [0], [0], [1], [0, 0, 1, 1], [], []>} : vector<8x3xf32>, vector<3x30xf32>, vector<8x30xf32> -> vector<8x30xf32>
    %cst_319 = arith.constant dense<0.000000e+00> : vector<8x30xf32>
    %583 = tpu.matmul %4, %544, %cst_319 {dimension_numbers = #tpu.dot_dimension_numbers<[1], [0], [0], [1], [0, 0, 1, 1], [], []>} : vector<8x3xf32>, vector<3x30xf32>, vector<8x30xf32> -> vector<8x30xf32>
    %584 = arith.addf %582, %583 : vector<8x30xf32>
    %cst_320 = arith.constant dense<0.000000e+00> : vector<8x30xf32>
    %585 = tpu.matmul %6, %543, %cst_320 {dimension_numbers = #tpu.dot_dimension_numbers<[1], [0], [0], [1], [0, 0, 1, 1], [], []>} : vector<8x3xf32>, vector<3x30xf32>, vector<8x30xf32> -> vector<8x30xf32>
    %586 = arith.addf %584, %585 : vector<8x30xf32>
    %cst_321 = arith.constant dense<0.000000e+00> : vector<8x30xf32>
    %587 = tpu.matmul %2, %544, %cst_321 {dimension_numbers = #tpu.dot_dimension_numbers<[1], [0], [0], [1], [0, 0, 1, 1], [], []>} : vector<8x3xf32>, vector<3x30xf32>, vector<8x30xf32> -> vector<8x30xf32>
    %cst_322 = arith.constant dense<0.000000e+00> : vector<8x30xf32>
    %588 = tpu.matmul %4, %543, %cst_322 {dimension_numbers = #tpu.dot_dimension_numbers<[1], [0], [0], [1], [0, 0, 1, 1], [], []>} : vector<8x3xf32>, vector<3x30xf32>, vector<8x30xf32> -> vector<8x30xf32>
    %589 = arith.addf %587, %588 : vector<8x30xf32>
    %cst_323 = arith.constant dense<0.000000e+00> : vector<8x30xf32>
    %590 = tpu.matmul %6, %545, %cst_323 {dimension_numbers = #tpu.dot_dimension_numbers<[1], [0], [0], [1], [0, 0, 1, 1], [], []>} : vector<8x3xf32>, vector<3x30xf32>, vector<8x30xf32> -> vector<8x30xf32>
    %591 = arith.addf %589, %590 : vector<8x30xf32>
    %cst_324 = arith.constant dense<0.000000e+00> : vector<8x30xf32>
    %592 = tpu.matmul %8, %554, %cst_324 {dimension_numbers = #tpu.dot_dimension_numbers<[1], [0], [0], [1], [0, 0, 1, 1], [], []>} : vector<8x3xf32>, vector<3x30xf32>, vector<8x30xf32> -> vector<8x30xf32>
    %cst_325 = arith.constant dense<0.000000e+00> : vector<8x30xf32>
    %593 = tpu.matmul %10, %556, %cst_325 {dimension_numbers = #tpu.dot_dimension_numbers<[1], [0], [0], [1], [0, 0, 1, 1], [], []>} : vector<8x3xf32>, vector<3x30xf32>, vector<8x30xf32> -> vector<8x30xf32>
    %594 = arith.addf %592, %593 : vector<8x30xf32>
    %cst_326 = arith.constant dense<0.000000e+00> : vector<8x30xf32>
    %595 = tpu.matmul %12, %555, %cst_326 {dimension_numbers = #tpu.dot_dimension_numbers<[1], [0], [0], [1], [0, 0, 1, 1], [], []>} : vector<8x3xf32>, vector<3x30xf32>, vector<8x30xf32> -> vector<8x30xf32>
    %596 = arith.addf %594, %595 : vector<8x30xf32>
    %cst_327 = arith.constant dense<0.000000e+00> : vector<8x30xf32>
    %597 = tpu.matmul %8, %556, %cst_327 {dimension_numbers = #tpu.dot_dimension_numbers<[1], [0], [0], [1], [0, 0, 1, 1], [], []>} : vector<8x3xf32>, vector<3x30xf32>, vector<8x30xf32> -> vector<8x30xf32>
    %cst_328 = arith.constant dense<0.000000e+00> : vector<8x30xf32>
    %598 = tpu.matmul %10, %555, %cst_328 {dimension_numbers = #tpu.dot_dimension_numbers<[1], [0], [0], [1], [0, 0, 1, 1], [], []>} : vector<8x3xf32>, vector<3x30xf32>, vector<8x30xf32> -> vector<8x30xf32>
    %599 = arith.addf %597, %598 : vector<8x30xf32>
    %cst_329 = arith.constant dense<0.000000e+00> : vector<8x30xf32>
    %600 = tpu.matmul %12, %557, %cst_329 {dimension_numbers = #tpu.dot_dimension_numbers<[1], [0], [0], [1], [0, 0, 1, 1], [], []>} : vector<8x3xf32>, vector<3x30xf32>, vector<8x30xf32> -> vector<8x30xf32>
    %601 = arith.addf %599, %600 : vector<8x30xf32>
    %602 = arith.addf %586, %596 : vector<8x30xf32>
    %603 = arith.addf %591, %601 : vector<8x30xf32>
    %cst_330 = arith.constant dense<0.000000e+00> : vector<8x30xf32>
    %604 = tpu.matmul %14, %566, %cst_330 {dimension_numbers = #tpu.dot_dimension_numbers<[1], [0], [0], [1], [0, 0, 1, 1], [], []>} : vector<8x3xf32>, vector<3x30xf32>, vector<8x30xf32> -> vector<8x30xf32>
    %cst_331 = arith.constant dense<0.000000e+00> : vector<8x30xf32>
    %605 = tpu.matmul %16, %568, %cst_331 {dimension_numbers = #tpu.dot_dimension_numbers<[1], [0], [0], [1], [0, 0, 1, 1], [], []>} : vector<8x3xf32>, vector<3x30xf32>, vector<8x30xf32> -> vector<8x30xf32>
    %606 = arith.addf %604, %605 : vector<8x30xf32>
    %cst_332 = arith.constant dense<0.000000e+00> : vector<8x30xf32>
    %607 = tpu.matmul %18, %567, %cst_332 {dimension_numbers = #tpu.dot_dimension_numbers<[1], [0], [0], [1], [0, 0, 1, 1], [], []>} : vector<8x3xf32>, vector<3x30xf32>, vector<8x30xf32> -> vector<8x30xf32>
    %608 = arith.addf %606, %607 : vector<8x30xf32>
    %cst_333 = arith.constant dense<0.000000e+00> : vector<8x30xf32>
    %609 = tpu.matmul %14, %568, %cst_333 {dimension_numbers = #tpu.dot_dimension_numbers<[1], [0], [0], [1], [0, 0, 1, 1], [], []>} : vector<8x3xf32>, vector<3x30xf32>, vector<8x30xf32> -> vector<8x30xf32>
    %cst_334 = arith.constant dense<0.000000e+00> : vector<8x30xf32>
    %610 = tpu.matmul %16, %567, %cst_334 {dimension_numbers = #tpu.dot_dimension_numbers<[1], [0], [0], [1], [0, 0, 1, 1], [], []>} : vector<8x3xf32>, vector<3x30xf32>, vector<8x30xf32> -> vector<8x30xf32>
    %611 = arith.addf %609, %610 : vector<8x30xf32>
    %cst_335 = arith.constant dense<0.000000e+00> : vector<8x30xf32>
    %612 = tpu.matmul %18, %569, %cst_335 {dimension_numbers = #tpu.dot_dimension_numbers<[1], [0], [0], [1], [0, 0, 1, 1], [], []>} : vector<8x3xf32>, vector<3x30xf32>, vector<8x30xf32> -> vector<8x30xf32>
    %613 = arith.addf %611, %612 : vector<8x30xf32>
    %614 = arith.addf %602, %608 : vector<8x30xf32>
    %615 = arith.addf %603, %613 : vector<8x30xf32>
    %616 = arith.maximumf %614, %615 : vector<8x30xf32>
    %cst_336 = arith.constant dense<0.000000e+00> : vector<8x30xf32>
    %617 = tpu.matmul %2, %554, %cst_336 {dimension_numbers = #tpu.dot_dimension_numbers<[1], [0], [0], [1], [0, 0, 1, 1], [], []>} : vector<8x3xf32>, vector<3x30xf32>, vector<8x30xf32> -> vector<8x30xf32>
    %cst_337 = arith.constant dense<0.000000e+00> : vector<8x30xf32>
    %618 = tpu.matmul %4, %556, %cst_337 {dimension_numbers = #tpu.dot_dimension_numbers<[1], [0], [0], [1], [0, 0, 1, 1], [], []>} : vector<8x3xf32>, vector<3x30xf32>, vector<8x30xf32> -> vector<8x30xf32>
    %619 = arith.addf %617, %618 : vector<8x30xf32>
    %cst_338 = arith.constant dense<0.000000e+00> : vector<8x30xf32>
    %620 = tpu.matmul %6, %555, %cst_338 {dimension_numbers = #tpu.dot_dimension_numbers<[1], [0], [0], [1], [0, 0, 1, 1], [], []>} : vector<8x3xf32>, vector<3x30xf32>, vector<8x30xf32> -> vector<8x30xf32>
    %621 = arith.addf %619, %620 : vector<8x30xf32>
    %cst_339 = arith.constant dense<0.000000e+00> : vector<8x30xf32>
    %622 = tpu.matmul %2, %556, %cst_339 {dimension_numbers = #tpu.dot_dimension_numbers<[1], [0], [0], [1], [0, 0, 1, 1], [], []>} : vector<8x3xf32>, vector<3x30xf32>, vector<8x30xf32> -> vector<8x30xf32>
    %cst_340 = arith.constant dense<0.000000e+00> : vector<8x30xf32>
    %623 = tpu.matmul %4, %555, %cst_340 {dimension_numbers = #tpu.dot_dimension_numbers<[1], [0], [0], [1], [0, 0, 1, 1], [], []>} : vector<8x3xf32>, vector<3x30xf32>, vector<8x30xf32> -> vector<8x30xf32>
    %624 = arith.addf %622, %623 : vector<8x30xf32>
    %cst_341 = arith.constant dense<0.000000e+00> : vector<8x30xf32>
    %625 = tpu.matmul %6, %557, %cst_341 {dimension_numbers = #tpu.dot_dimension_numbers<[1], [0], [0], [1], [0, 0, 1, 1], [], []>} : vector<8x3xf32>, vector<3x30xf32>, vector<8x30xf32> -> vector<8x30xf32>
    %626 = arith.addf %624, %625 : vector<8x30xf32>
    %cst_342 = arith.constant dense<0.000000e+00> : vector<8x30xf32>
    %627 = tpu.matmul %8, %566, %cst_342 {dimension_numbers = #tpu.dot_dimension_numbers<[1], [0], [0], [1], [0, 0, 1, 1], [], []>} : vector<8x3xf32>, vector<3x30xf32>, vector<8x30xf32> -> vector<8x30xf32>
    %cst_343 = arith.constant dense<0.000000e+00> : vector<8x30xf32>
    %628 = tpu.matmul %10, %568, %cst_343 {dimension_numbers = #tpu.dot_dimension_numbers<[1], [0], [0], [1], [0, 0, 1, 1], [], []>} : vector<8x3xf32>, vector<3x30xf32>, vector<8x30xf32> -> vector<8x30xf32>
    %629 = arith.addf %627, %628 : vector<8x30xf32>
    %cst_344 = arith.constant dense<0.000000e+00> : vector<8x30xf32>
    %630 = tpu.matmul %12, %567, %cst_344 {dimension_numbers = #tpu.dot_dimension_numbers<[1], [0], [0], [1], [0, 0, 1, 1], [], []>} : vector<8x3xf32>, vector<3x30xf32>, vector<8x30xf32> -> vector<8x30xf32>
    %631 = arith.addf %629, %630 : vector<8x30xf32>
    %cst_345 = arith.constant dense<0.000000e+00> : vector<8x30xf32>
    %632 = tpu.matmul %8, %568, %cst_345 {dimension_numbers = #tpu.dot_dimension_numbers<[1], [0], [0], [1], [0, 0, 1, 1], [], []>} : vector<8x3xf32>, vector<3x30xf32>, vector<8x30xf32> -> vector<8x30xf32>
    %cst_346 = arith.constant dense<0.000000e+00> : vector<8x30xf32>
    %633 = tpu.matmul %10, %567, %cst_346 {dimension_numbers = #tpu.dot_dimension_numbers<[1], [0], [0], [1], [0, 0, 1, 1], [], []>} : vector<8x3xf32>, vector<3x30xf32>, vector<8x30xf32> -> vector<8x30xf32>
    %634 = arith.addf %632, %633 : vector<8x30xf32>
    %cst_347 = arith.constant dense<0.000000e+00> : vector<8x30xf32>
    %635 = tpu.matmul %12, %569, %cst_347 {dimension_numbers = #tpu.dot_dimension_numbers<[1], [0], [0], [1], [0, 0, 1, 1], [], []>} : vector<8x3xf32>, vector<3x30xf32>, vector<8x30xf32> -> vector<8x30xf32>
    %636 = arith.addf %634, %635 : vector<8x30xf32>
    %637 = arith.addf %621, %631 : vector<8x30xf32>
    %638 = arith.addf %626, %636 : vector<8x30xf32>
    %cst_348 = arith.constant dense<0.000000e+00> : vector<8x30xf32>
    %639 = tpu.matmul %14, %578, %cst_348 {dimension_numbers = #tpu.dot_dimension_numbers<[1], [0], [0], [1], [0, 0, 1, 1], [], []>} : vector<8x3xf32>, vector<3x30xf32>, vector<8x30xf32> -> vector<8x30xf32>
    %cst_349 = arith.constant dense<0.000000e+00> : vector<8x30xf32>
    %640 = tpu.matmul %16, %580, %cst_349 {dimension_numbers = #tpu.dot_dimension_numbers<[1], [0], [0], [1], [0, 0, 1, 1], [], []>} : vector<8x3xf32>, vector<3x30xf32>, vector<8x30xf32> -> vector<8x30xf32>
    %641 = arith.addf %639, %640 : vector<8x30xf32>
    %cst_350 = arith.constant dense<0.000000e+00> : vector<8x30xf32>
    %642 = tpu.matmul %18, %579, %cst_350 {dimension_numbers = #tpu.dot_dimension_numbers<[1], [0], [0], [1], [0, 0, 1, 1], [], []>} : vector<8x3xf32>, vector<3x30xf32>, vector<8x30xf32> -> vector<8x30xf32>
    %643 = arith.addf %641, %642 : vector<8x30xf32>
    %cst_351 = arith.constant dense<0.000000e+00> : vector<8x30xf32>
    %644 = tpu.matmul %14, %580, %cst_351 {dimension_numbers = #tpu.dot_dimension_numbers<[1], [0], [0], [1], [0, 0, 1, 1], [], []>} : vector<8x3xf32>, vector<3x30xf32>, vector<8x30xf32> -> vector<8x30xf32>
    %cst_352 = arith.constant dense<0.000000e+00> : vector<8x30xf32>
    %645 = tpu.matmul %16, %579, %cst_352 {dimension_numbers = #tpu.dot_dimension_numbers<[1], [0], [0], [1], [0, 0, 1, 1], [], []>} : vector<8x3xf32>, vector<3x30xf32>, vector<8x30xf32> -> vector<8x30xf32>
    %646 = arith.addf %644, %645 : vector<8x30xf32>
    %cst_353 = arith.constant dense<0.000000e+00> : vector<8x30xf32>
    %647 = tpu.matmul %18, %581, %cst_353 {dimension_numbers = #tpu.dot_dimension_numbers<[1], [0], [0], [1], [0, 0, 1, 1], [], []>} : vector<8x3xf32>, vector<3x30xf32>, vector<8x30xf32> -> vector<8x30xf32>
    %648 = arith.addf %646, %647 : vector<8x30xf32>
    %649 = arith.addf %637, %643 : vector<8x30xf32>
    %650 = arith.addf %638, %648 : vector<8x30xf32>
    %651 = arith.maximumf %649, %650 : vector<8x30xf32>
    %652 = arith.maximumf %616, %651 : vector<8x30xf32>
    %653 = vector.broadcast %0 : vector<8x1xf32> to vector<8x30xf32>
    %654 = arith.addf %652, %653 : vector<8x30xf32>
    %cst_354 = arith.constant 0.000000e+00 : f32
    %655 = vector.broadcast %cst_354 : f32 to vector<8x30xf32>
    %656 = arith.maximumf %654, %655 : vector<8x30xf32>
    %c4 = arith.constant 4 : index
    %c0_355 = arith.constant 0 : index
    %c0_356 = arith.constant 0 : index
    %657 = vector.load %arg5[%c4, %c0_355, %c0_356] : memref<5x8x30xf32, #tpu.memory_space<vmem>>, vector<1x8x30xf32>
    %658 = vector.shape_cast %657 : vector<1x8x30xf32> to vector<8x30xf32>
    %659 = vector.shape_cast %656 : vector<8x30xf32> to vector<1x8x30xf32>
    tpu.vector_store %arg5[%c4, %c0_355, %c0_356], %659 {strides = array<i32>} : memref<5x8x30xf32, #tpu.memory_space<vmem>>, vector<1x8x30xf32>,
    return
  }
  func.func @transform_0(%arg0: i32) -> (i32, i32, i32) {
    %c0_i32 = arith.constant 0 : i32
    %c0_i32_0 = arith.constant 0 : i32
    %c0_i32_1 = arith.constant 0 : i32
    %c0_i32_2 = arith.constant 0 : i32
    return %c0_i32, %c0_i32_0, %c0_i32_1 : i32, i32, i32
  }
  func.func @transform_1(%arg0: i32) -> (i32, i32, i32) {
    %c0_i32 = arith.constant 0 : i32
    %c0_i32_0 = arith.constant 0 : i32
    %c0_i32_1 = arith.constant 0 : i32
    %c0_i32_2 = arith.constant 0 : i32
    return %c0_i32, %c0_i32_0, %c0_i32_1 : i32, i32, i32
  }
  func.func @transform_2(%arg0: i32) -> (i32, i32, i32, i32) {
    %c0_i32 = arith.constant 0 : i32
    %c0_i32_0 = arith.constant 0 : i32
    %c0_i32_1 = arith.constant 0 : i32
    %c0_i32_2 = arith.constant 0 : i32
    %c0_i32_3 = arith.constant 0 : i32
    return %c0_i32, %c0_i32_0, %c0_i32_1, %c0_i32_2 : i32, i32, i32, i32
  }
  func.func @transform_3(%arg0: i32) -> (i32, i32) {
    %c0_i32 = arith.constant 0 : i32
    %c0_i32_0 = arith.constant 0 : i32
    %c0_i32_1 = arith.constant 0 : i32
    return %c0_i32, %c0_i32_0 : i32, i32
  }
  func.func @transform_4(%arg0: i32) -> (i32, i32, i32) {
    %c0_i32 = arith.constant 0 : i32
    %c0_i32_0 = arith.constant 0 : i32
    %c0_i32_1 = arith.constant 0 : i32
    return %arg0, %c0_i32, %c0_i32_0 : i32, i32, i32
  }
}

module attributes {stable_mosaic.version = 11 : i64} {
  func.func @_conv_bn_relu_pool_kernel(%arg0: i32, %arg1: memref<15x8x16xf32, #tpu.memory_space<vmem>>, %arg2: memref<15x8x14xf32, #tpu.memory_space<vmem>>, %arg3: memref<3x3x16x8xf32, #tpu.memory_space<vmem>>, %arg4: memref<16x1xf32, #tpu.memory_space<vmem>>, %arg5: memref<3x16x12xf32, #tpu.memory_space<vmem>>) attributes {dimension_semantics = [#tpu.dimension_semantics<parallel>], iteration_bounds = array<i64: 2>, scalar_prefetch = 0 : i64, scratch_operands = 0 : i64, tpu.core_type = #tpu.core_type<tc>, window_params = [{pipeline_mode = #tpu.pipeline_mode<synchronous>, transform_indices = @transform_0, window_bounds = array<i64: 15, 8, 16>}, {pipeline_mode = #tpu.pipeline_mode<synchronous>, transform_indices = @transform_1, window_bounds = array<i64: 15, 8, 14>}, {pipeline_mode = #tpu.pipeline_mode<synchronous>, transform_indices = @transform_2, window_bounds = array<i64: 3, 3, 16, 8>}, {pipeline_mode = #tpu.pipeline_mode<synchronous>, transform_indices = @transform_3, window_bounds = array<i64: 16, 1>}, {transform_indices = @transform_4, window_bounds = array<i64: 3, 16, 12>}]} {
    %c0 = arith.constant 0 : index
    %c0_0 = arith.constant 0 : index
    %0 = vector.load %arg4[%c0, %c0_0] : memref<16x1xf32, #tpu.memory_space<vmem>>, vector<16x1xf32>
    %c0_1 = arith.constant 0 : index
    %c0_2 = arith.constant 0 : index
    %c0_3 = arith.constant 0 : index
    %c0_4 = arith.constant 0 : index
    %1 = vector.load %arg3[%c0_1, %c0_2, %c0_3, %c0_4] : memref<3x3x16x8xf32, #tpu.memory_space<vmem>>, vector<1x1x16x8xf32>
    %2 = vector.shape_cast %1 : vector<1x1x16x8xf32> to vector<16x8xf32>
    %c0_5 = arith.constant 0 : index
    %c1 = arith.constant 1 : index
    %c0_6 = arith.constant 0 : index
    %c0_7 = arith.constant 0 : index
    %3 = vector.load %arg3[%c0_5, %c1, %c0_6, %c0_7] : memref<3x3x16x8xf32, #tpu.memory_space<vmem>>, vector<1x1x16x8xf32>
    %4 = vector.shape_cast %3 : vector<1x1x16x8xf32> to vector<16x8xf32>
    %c0_8 = arith.constant 0 : index
    %c2 = arith.constant 2 : index
    %c0_9 = arith.constant 0 : index
    %c0_10 = arith.constant 0 : index
    %5 = vector.load %arg3[%c0_8, %c2, %c0_9, %c0_10] : memref<3x3x16x8xf32, #tpu.memory_space<vmem>>, vector<1x1x16x8xf32>
    %6 = vector.shape_cast %5 : vector<1x1x16x8xf32> to vector<16x8xf32>
    %c1_11 = arith.constant 1 : index
    %c0_12 = arith.constant 0 : index
    %c0_13 = arith.constant 0 : index
    %c0_14 = arith.constant 0 : index
    %7 = vector.load %arg3[%c1_11, %c0_12, %c0_13, %c0_14] : memref<3x3x16x8xf32, #tpu.memory_space<vmem>>, vector<1x1x16x8xf32>
    %8 = vector.shape_cast %7 : vector<1x1x16x8xf32> to vector<16x8xf32>
    %c1_15 = arith.constant 1 : index
    %c1_16 = arith.constant 1 : index
    %c0_17 = arith.constant 0 : index
    %c0_18 = arith.constant 0 : index
    %9 = vector.load %arg3[%c1_15, %c1_16, %c0_17, %c0_18] : memref<3x3x16x8xf32, #tpu.memory_space<vmem>>, vector<1x1x16x8xf32>
    %10 = vector.shape_cast %9 : vector<1x1x16x8xf32> to vector<16x8xf32>
    %c1_19 = arith.constant 1 : index
    %c2_20 = arith.constant 2 : index
    %c0_21 = arith.constant 0 : index
    %c0_22 = arith.constant 0 : index
    %11 = vector.load %arg3[%c1_19, %c2_20, %c0_21, %c0_22] : memref<3x3x16x8xf32, #tpu.memory_space<vmem>>, vector<1x1x16x8xf32>
    %12 = vector.shape_cast %11 : vector<1x1x16x8xf32> to vector<16x8xf32>
    %c2_23 = arith.constant 2 : index
    %c0_24 = arith.constant 0 : index
    %c0_25 = arith.constant 0 : index
    %c0_26 = arith.constant 0 : index
    %13 = vector.load %arg3[%c2_23, %c0_24, %c0_25, %c0_26] : memref<3x3x16x8xf32, #tpu.memory_space<vmem>>, vector<1x1x16x8xf32>
    %14 = vector.shape_cast %13 : vector<1x1x16x8xf32> to vector<16x8xf32>
    %c2_27 = arith.constant 2 : index
    %c1_28 = arith.constant 1 : index
    %c0_29 = arith.constant 0 : index
    %c0_30 = arith.constant 0 : index
    %15 = vector.load %arg3[%c2_27, %c1_28, %c0_29, %c0_30] : memref<3x3x16x8xf32, #tpu.memory_space<vmem>>, vector<1x1x16x8xf32>
    %16 = vector.shape_cast %15 : vector<1x1x16x8xf32> to vector<16x8xf32>
    %c2_31 = arith.constant 2 : index
    %c2_32 = arith.constant 2 : index
    %c0_33 = arith.constant 0 : index
    %c0_34 = arith.constant 0 : index
    %17 = vector.load %arg3[%c2_31, %c2_32, %c0_33, %c0_34] : memref<3x3x16x8xf32, #tpu.memory_space<vmem>>, vector<1x1x16x8xf32>
    %18 = vector.shape_cast %17 : vector<1x1x16x8xf32> to vector<16x8xf32>
    %c3_i32 = arith.constant 3 : i32
    %19 = arith.muli %arg0, %c3_i32 : i32
    %c0_i32 = arith.constant 0 : i32
    %20 = arith.addi %19, %c0_i32 : i32
    %c2_i32 = arith.constant 2 : i32
    %21 = arith.muli %c2_i32, %20 : i32
    %c0_i32_35 = arith.constant 0 : i32
    %22 = arith.addi %21, %c0_i32_35 : i32
    %23 = arith.index_cast %22 : i32 to index
    %c0_36 = arith.constant 0 : index
    %c0_37 = arith.constant 0 : index
    %24 = vector.load %arg1[%23, %c0_36, %c0_37] : memref<15x8x16xf32, #tpu.memory_space<vmem>>, vector<1x8x16xf32>
    %25 = vector.shape_cast %24 : vector<1x8x16xf32> to vector<8x16xf32>
    %c0_i32_38 = arith.constant 0 : i32
    %26 = arith.addi %21, %c0_i32_38 : i32
    %27 = arith.index_cast %26 : i32 to index
    %c0_39 = arith.constant 0 : index
    %c0_40 = arith.constant 0 : index
    %28 = vector.load %arg2[%27, %c0_39, %c0_40] : memref<15x8x14xf32, #tpu.memory_space<vmem>>, vector<1x8x14xf32>
    %29 = vector.shape_cast %28 : vector<1x8x14xf32> to vector<8x14xf32>
    %30 = vector.extract_strided_slice %25 {offsets = [0, 0], sizes = [8, 12], strides = [1, 1]} : vector<8x16xf32> to vector<8x12xf32>
    %31 = vector.extract_strided_slice %25 {offsets = [0, 2], sizes = [8, 12], strides = [1, 1]} : vector<8x16xf32> to vector<8x12xf32>
    %32 = vector.extract_strided_slice %29 {offsets = [0, 0], sizes = [8, 12], strides = [1, 1]} : vector<8x14xf32> to vector<8x12xf32>
    %33 = vector.extract_strided_slice %29 {offsets = [0, 2], sizes = [8, 12], strides = [1, 1]} : vector<8x14xf32> to vector<8x12xf32>
    %c1_i32 = arith.constant 1 : i32
    %34 = arith.addi %21, %c1_i32 : i32
    %35 = arith.index_cast %34 : i32 to index
    %c0_41 = arith.constant 0 : index
    %c0_42 = arith.constant 0 : index
    %36 = vector.load %arg1[%35, %c0_41, %c0_42] : memref<15x8x16xf32, #tpu.memory_space<vmem>>, vector<1x8x16xf32>
    %37 = vector.shape_cast %36 : vector<1x8x16xf32> to vector<8x16xf32>
    %c1_i32_43 = arith.constant 1 : i32
    %38 = arith.addi %21, %c1_i32_43 : i32
    %39 = arith.index_cast %38 : i32 to index
    %c0_44 = arith.constant 0 : index
    %c0_45 = arith.constant 0 : index
    %40 = vector.load %arg2[%39, %c0_44, %c0_45] : memref<15x8x14xf32, #tpu.memory_space<vmem>>, vector<1x8x14xf32>
    %41 = vector.shape_cast %40 : vector<1x8x14xf32> to vector<8x14xf32>
    %42 = vector.extract_strided_slice %37 {offsets = [0, 0], sizes = [8, 12], strides = [1, 1]} : vector<8x16xf32> to vector<8x12xf32>
    %43 = vector.extract_strided_slice %37 {offsets = [0, 2], sizes = [8, 12], strides = [1, 1]} : vector<8x16xf32> to vector<8x12xf32>
    %44 = vector.extract_strided_slice %41 {offsets = [0, 0], sizes = [8, 12], strides = [1, 1]} : vector<8x14xf32> to vector<8x12xf32>
    %45 = vector.extract_strided_slice %41 {offsets = [0, 2], sizes = [8, 12], strides = [1, 1]} : vector<8x14xf32> to vector<8x12xf32>
    %c2_i32_46 = arith.constant 2 : i32
    %46 = arith.addi %21, %c2_i32_46 : i32
    %47 = arith.index_cast %46 : i32 to index
    %c0_47 = arith.constant 0 : index
    %c0_48 = arith.constant 0 : index
    %48 = vector.load %arg1[%47, %c0_47, %c0_48] : memref<15x8x16xf32, #tpu.memory_space<vmem>>, vector<1x8x16xf32>
    %49 = vector.shape_cast %48 : vector<1x8x16xf32> to vector<8x16xf32>
    %c2_i32_49 = arith.constant 2 : i32
    %50 = arith.addi %21, %c2_i32_49 : i32
    %51 = arith.index_cast %50 : i32 to index
    %c0_50 = arith.constant 0 : index
    %c0_51 = arith.constant 0 : index
    %52 = vector.load %arg2[%51, %c0_50, %c0_51] : memref<15x8x14xf32, #tpu.memory_space<vmem>>, vector<1x8x14xf32>
    %53 = vector.shape_cast %52 : vector<1x8x14xf32> to vector<8x14xf32>
    %54 = vector.extract_strided_slice %49 {offsets = [0, 0], sizes = [8, 12], strides = [1, 1]} : vector<8x16xf32> to vector<8x12xf32>
    %55 = vector.extract_strided_slice %49 {offsets = [0, 2], sizes = [8, 12], strides = [1, 1]} : vector<8x16xf32> to vector<8x12xf32>
    %56 = vector.extract_strided_slice %53 {offsets = [0, 0], sizes = [8, 12], strides = [1, 1]} : vector<8x14xf32> to vector<8x12xf32>
    %57 = vector.extract_strided_slice %53 {offsets = [0, 2], sizes = [8, 12], strides = [1, 1]} : vector<8x14xf32> to vector<8x12xf32>
    %c3_i32_52 = arith.constant 3 : i32
    %58 = arith.addi %21, %c3_i32_52 : i32
    %59 = arith.index_cast %58 : i32 to index
    %c0_53 = arith.constant 0 : index
    %c0_54 = arith.constant 0 : index
    %60 = vector.load %arg1[%59, %c0_53, %c0_54] : memref<15x8x16xf32, #tpu.memory_space<vmem>>, vector<1x8x16xf32>
    %61 = vector.shape_cast %60 : vector<1x8x16xf32> to vector<8x16xf32>
    %c3_i32_55 = arith.constant 3 : i32
    %62 = arith.addi %21, %c3_i32_55 : i32
    %63 = arith.index_cast %62 : i32 to index
    %c0_56 = arith.constant 0 : index
    %c0_57 = arith.constant 0 : index
    %64 = vector.load %arg2[%63, %c0_56, %c0_57] : memref<15x8x14xf32, #tpu.memory_space<vmem>>, vector<1x8x14xf32>
    %65 = vector.shape_cast %64 : vector<1x8x14xf32> to vector<8x14xf32>
    %66 = vector.extract_strided_slice %61 {offsets = [0, 0], sizes = [8, 12], strides = [1, 1]} : vector<8x16xf32> to vector<8x12xf32>
    %67 = vector.extract_strided_slice %61 {offsets = [0, 2], sizes = [8, 12], strides = [1, 1]} : vector<8x16xf32> to vector<8x12xf32>
    %68 = vector.extract_strided_slice %65 {offsets = [0, 0], sizes = [8, 12], strides = [1, 1]} : vector<8x14xf32> to vector<8x12xf32>
    %69 = vector.extract_strided_slice %65 {offsets = [0, 2], sizes = [8, 12], strides = [1, 1]} : vector<8x14xf32> to vector<8x12xf32>
    %cst = arith.constant dense<0.000000e+00> : vector<16x12xf32>
    %70 = tpu.matmul %2, %30, %cst {dimension_numbers = #tpu.dot_dimension_numbers<[1], [0], [0], [1], [0, 0, 1, 1], [], []>} : vector<16x8xf32>, vector<8x12xf32>, vector<16x12xf32> -> vector<16x12xf32>
    %cst_58 = arith.constant dense<0.000000e+00> : vector<16x12xf32>
    %71 = tpu.matmul %4, %32, %cst_58 {dimension_numbers = #tpu.dot_dimension_numbers<[1], [0], [0], [1], [0, 0, 1, 1], [], []>} : vector<16x8xf32>, vector<8x12xf32>, vector<16x12xf32> -> vector<16x12xf32>
    %72 = arith.addf %70, %71 : vector<16x12xf32>
    %cst_59 = arith.constant dense<0.000000e+00> : vector<16x12xf32>
    %73 = tpu.matmul %6, %31, %cst_59 {dimension_numbers = #tpu.dot_dimension_numbers<[1], [0], [0], [1], [0, 0, 1, 1], [], []>} : vector<16x8xf32>, vector<8x12xf32>, vector<16x12xf32> -> vector<16x12xf32>
    %74 = arith.addf %72, %73 : vector<16x12xf32>
    %cst_60 = arith.constant dense<0.000000e+00> : vector<16x12xf32>
    %75 = tpu.matmul %2, %32, %cst_60 {dimension_numbers = #tpu.dot_dimension_numbers<[1], [0], [0], [1], [0, 0, 1, 1], [], []>} : vector<16x8xf32>, vector<8x12xf32>, vector<16x12xf32> -> vector<16x12xf32>
    %cst_61 = arith.constant dense<0.000000e+00> : vector<16x12xf32>
    %76 = tpu.matmul %4, %31, %cst_61 {dimension_numbers = #tpu.dot_dimension_numbers<[1], [0], [0], [1], [0, 0, 1, 1], [], []>} : vector<16x8xf32>, vector<8x12xf32>, vector<16x12xf32> -> vector<16x12xf32>
    %77 = arith.addf %75, %76 : vector<16x12xf32>
    %cst_62 = arith.constant dense<0.000000e+00> : vector<16x12xf32>
    %78 = tpu.matmul %6, %33, %cst_62 {dimension_numbers = #tpu.dot_dimension_numbers<[1], [0], [0], [1], [0, 0, 1, 1], [], []>} : vector<16x8xf32>, vector<8x12xf32>, vector<16x12xf32> -> vector<16x12xf32>
    %79 = arith.addf %77, %78 : vector<16x12xf32>
    %cst_63 = arith.constant dense<0.000000e+00> : vector<16x12xf32>
    %80 = tpu.matmul %8, %42, %cst_63 {dimension_numbers = #tpu.dot_dimension_numbers<[1], [0], [0], [1], [0, 0, 1, 1], [], []>} : vector<16x8xf32>, vector<8x12xf32>, vector<16x12xf32> -> vector<16x12xf32>
    %cst_64 = arith.constant dense<0.000000e+00> : vector<16x12xf32>
    %81 = tpu.matmul %10, %44, %cst_64 {dimension_numbers = #tpu.dot_dimension_numbers<[1], [0], [0], [1], [0, 0, 1, 1], [], []>} : vector<16x8xf32>, vector<8x12xf32>, vector<16x12xf32> -> vector<16x12xf32>
    %82 = arith.addf %80, %81 : vector<16x12xf32>
    %cst_65 = arith.constant dense<0.000000e+00> : vector<16x12xf32>
    %83 = tpu.matmul %12, %43, %cst_65 {dimension_numbers = #tpu.dot_dimension_numbers<[1], [0], [0], [1], [0, 0, 1, 1], [], []>} : vector<16x8xf32>, vector<8x12xf32>, vector<16x12xf32> -> vector<16x12xf32>
    %84 = arith.addf %82, %83 : vector<16x12xf32>
    %cst_66 = arith.constant dense<0.000000e+00> : vector<16x12xf32>
    %85 = tpu.matmul %8, %44, %cst_66 {dimension_numbers = #tpu.dot_dimension_numbers<[1], [0], [0], [1], [0, 0, 1, 1], [], []>} : vector<16x8xf32>, vector<8x12xf32>, vector<16x12xf32> -> vector<16x12xf32>
    %cst_67 = arith.constant dense<0.000000e+00> : vector<16x12xf32>
    %86 = tpu.matmul %10, %43, %cst_67 {dimension_numbers = #tpu.dot_dimension_numbers<[1], [0], [0], [1], [0, 0, 1, 1], [], []>} : vector<16x8xf32>, vector<8x12xf32>, vector<16x12xf32> -> vector<16x12xf32>
    %87 = arith.addf %85, %86 : vector<16x12xf32>
    %cst_68 = arith.constant dense<0.000000e+00> : vector<16x12xf32>
    %88 = tpu.matmul %12, %45, %cst_68 {dimension_numbers = #tpu.dot_dimension_numbers<[1], [0], [0], [1], [0, 0, 1, 1], [], []>} : vector<16x8xf32>, vector<8x12xf32>, vector<16x12xf32> -> vector<16x12xf32>
    %89 = arith.addf %87, %88 : vector<16x12xf32>
    %90 = arith.addf %74, %84 : vector<16x12xf32>
    %91 = arith.addf %79, %89 : vector<16x12xf32>
    %cst_69 = arith.constant dense<0.000000e+00> : vector<16x12xf32>
    %92 = tpu.matmul %14, %54, %cst_69 {dimension_numbers = #tpu.dot_dimension_numbers<[1], [0], [0], [1], [0, 0, 1, 1], [], []>} : vector<16x8xf32>, vector<8x12xf32>, vector<16x12xf32> -> vector<16x12xf32>
    %cst_70 = arith.constant dense<0.000000e+00> : vector<16x12xf32>
    %93 = tpu.matmul %16, %56, %cst_70 {dimension_numbers = #tpu.dot_dimension_numbers<[1], [0], [0], [1], [0, 0, 1, 1], [], []>} : vector<16x8xf32>, vector<8x12xf32>, vector<16x12xf32> -> vector<16x12xf32>
    %94 = arith.addf %92, %93 : vector<16x12xf32>
    %cst_71 = arith.constant dense<0.000000e+00> : vector<16x12xf32>
    %95 = tpu.matmul %18, %55, %cst_71 {dimension_numbers = #tpu.dot_dimension_numbers<[1], [0], [0], [1], [0, 0, 1, 1], [], []>} : vector<16x8xf32>, vector<8x12xf32>, vector<16x12xf32> -> vector<16x12xf32>
    %96 = arith.addf %94, %95 : vector<16x12xf32>
    %cst_72 = arith.constant dense<0.000000e+00> : vector<16x12xf32>
    %97 = tpu.matmul %14, %56, %cst_72 {dimension_numbers = #tpu.dot_dimension_numbers<[1], [0], [0], [1], [0, 0, 1, 1], [], []>} : vector<16x8xf32>, vector<8x12xf32>, vector<16x12xf32> -> vector<16x12xf32>
    %cst_73 = arith.constant dense<0.000000e+00> : vector<16x12xf32>
    %98 = tpu.matmul %16, %55, %cst_73 {dimension_numbers = #tpu.dot_dimension_numbers<[1], [0], [0], [1], [0, 0, 1, 1], [], []>} : vector<16x8xf32>, vector<8x12xf32>, vector<16x12xf32> -> vector<16x12xf32>
    %99 = arith.addf %97, %98 : vector<16x12xf32>
    %cst_74 = arith.constant dense<0.000000e+00> : vector<16x12xf32>
    %100 = tpu.matmul %18, %57, %cst_74 {dimension_numbers = #tpu.dot_dimension_numbers<[1], [0], [0], [1], [0, 0, 1, 1], [], []>} : vector<16x8xf32>, vector<8x12xf32>, vector<16x12xf32> -> vector<16x12xf32>
    %101 = arith.addf %99, %100 : vector<16x12xf32>
    %102 = arith.addf %90, %96 : vector<16x12xf32>
    %103 = arith.addf %91, %101 : vector<16x12xf32>
    %104 = arith.maximumf %102, %103 : vector<16x12xf32>
    %cst_75 = arith.constant dense<0.000000e+00> : vector<16x12xf32>
    %105 = tpu.matmul %2, %42, %cst_75 {dimension_numbers = #tpu.dot_dimension_numbers<[1], [0], [0], [1], [0, 0, 1, 1], [], []>} : vector<16x8xf32>, vector<8x12xf32>, vector<16x12xf32> -> vector<16x12xf32>
    %cst_76 = arith.constant dense<0.000000e+00> : vector<16x12xf32>
    %106 = tpu.matmul %4, %44, %cst_76 {dimension_numbers = #tpu.dot_dimension_numbers<[1], [0], [0], [1], [0, 0, 1, 1], [], []>} : vector<16x8xf32>, vector<8x12xf32>, vector<16x12xf32> -> vector<16x12xf32>
    %107 = arith.addf %105, %106 : vector<16x12xf32>
    %cst_77 = arith.constant dense<0.000000e+00> : vector<16x12xf32>
    %108 = tpu.matmul %6, %43, %cst_77 {dimension_numbers = #tpu.dot_dimension_numbers<[1], [0], [0], [1], [0, 0, 1, 1], [], []>} : vector<16x8xf32>, vector<8x12xf32>, vector<16x12xf32> -> vector<16x12xf32>
    %109 = arith.addf %107, %108 : vector<16x12xf32>
    %cst_78 = arith.constant dense<0.000000e+00> : vector<16x12xf32>
    %110 = tpu.matmul %2, %44, %cst_78 {dimension_numbers = #tpu.dot_dimension_numbers<[1], [0], [0], [1], [0, 0, 1, 1], [], []>} : vector<16x8xf32>, vector<8x12xf32>, vector<16x12xf32> -> vector<16x12xf32>
    %cst_79 = arith.constant dense<0.000000e+00> : vector<16x12xf32>
    %111 = tpu.matmul %4, %43, %cst_79 {dimension_numbers = #tpu.dot_dimension_numbers<[1], [0], [0], [1], [0, 0, 1, 1], [], []>} : vector<16x8xf32>, vector<8x12xf32>, vector<16x12xf32> -> vector<16x12xf32>
    %112 = arith.addf %110, %111 : vector<16x12xf32>
    %cst_80 = arith.constant dense<0.000000e+00> : vector<16x12xf32>
    %113 = tpu.matmul %6, %45, %cst_80 {dimension_numbers = #tpu.dot_dimension_numbers<[1], [0], [0], [1], [0, 0, 1, 1], [], []>} : vector<16x8xf32>, vector<8x12xf32>, vector<16x12xf32> -> vector<16x12xf32>
    %114 = arith.addf %112, %113 : vector<16x12xf32>
    %cst_81 = arith.constant dense<0.000000e+00> : vector<16x12xf32>
    %115 = tpu.matmul %8, %54, %cst_81 {dimension_numbers = #tpu.dot_dimension_numbers<[1], [0], [0], [1], [0, 0, 1, 1], [], []>} : vector<16x8xf32>, vector<8x12xf32>, vector<16x12xf32> -> vector<16x12xf32>
    %cst_82 = arith.constant dense<0.000000e+00> : vector<16x12xf32>
    %116 = tpu.matmul %10, %56, %cst_82 {dimension_numbers = #tpu.dot_dimension_numbers<[1], [0], [0], [1], [0, 0, 1, 1], [], []>} : vector<16x8xf32>, vector<8x12xf32>, vector<16x12xf32> -> vector<16x12xf32>
    %117 = arith.addf %115, %116 : vector<16x12xf32>
    %cst_83 = arith.constant dense<0.000000e+00> : vector<16x12xf32>
    %118 = tpu.matmul %12, %55, %cst_83 {dimension_numbers = #tpu.dot_dimension_numbers<[1], [0], [0], [1], [0, 0, 1, 1], [], []>} : vector<16x8xf32>, vector<8x12xf32>, vector<16x12xf32> -> vector<16x12xf32>
    %119 = arith.addf %117, %118 : vector<16x12xf32>
    %cst_84 = arith.constant dense<0.000000e+00> : vector<16x12xf32>
    %120 = tpu.matmul %8, %56, %cst_84 {dimension_numbers = #tpu.dot_dimension_numbers<[1], [0], [0], [1], [0, 0, 1, 1], [], []>} : vector<16x8xf32>, vector<8x12xf32>, vector<16x12xf32> -> vector<16x12xf32>
    %cst_85 = arith.constant dense<0.000000e+00> : vector<16x12xf32>
    %121 = tpu.matmul %10, %55, %cst_85 {dimension_numbers = #tpu.dot_dimension_numbers<[1], [0], [0], [1], [0, 0, 1, 1], [], []>} : vector<16x8xf32>, vector<8x12xf32>, vector<16x12xf32> -> vector<16x12xf32>
    %122 = arith.addf %120, %121 : vector<16x12xf32>
    %cst_86 = arith.constant dense<0.000000e+00> : vector<16x12xf32>
    %123 = tpu.matmul %12, %57, %cst_86 {dimension_numbers = #tpu.dot_dimension_numbers<[1], [0], [0], [1], [0, 0, 1, 1], [], []>} : vector<16x8xf32>, vector<8x12xf32>, vector<16x12xf32> -> vector<16x12xf32>
    %124 = arith.addf %122, %123 : vector<16x12xf32>
    %125 = arith.addf %109, %119 : vector<16x12xf32>
    %126 = arith.addf %114, %124 : vector<16x12xf32>
    %cst_87 = arith.constant dense<0.000000e+00> : vector<16x12xf32>
    %127 = tpu.matmul %14, %66, %cst_87 {dimension_numbers = #tpu.dot_dimension_numbers<[1], [0], [0], [1], [0, 0, 1, 1], [], []>} : vector<16x8xf32>, vector<8x12xf32>, vector<16x12xf32> -> vector<16x12xf32>
    %cst_88 = arith.constant dense<0.000000e+00> : vector<16x12xf32>
    %128 = tpu.matmul %16, %68, %cst_88 {dimension_numbers = #tpu.dot_dimension_numbers<[1], [0], [0], [1], [0, 0, 1, 1], [], []>} : vector<16x8xf32>, vector<8x12xf32>, vector<16x12xf32> -> vector<16x12xf32>
    %129 = arith.addf %127, %128 : vector<16x12xf32>
    %cst_89 = arith.constant dense<0.000000e+00> : vector<16x12xf32>
    %130 = tpu.matmul %18, %67, %cst_89 {dimension_numbers = #tpu.dot_dimension_numbers<[1], [0], [0], [1], [0, 0, 1, 1], [], []>} : vector<16x8xf32>, vector<8x12xf32>, vector<16x12xf32> -> vector<16x12xf32>
    %131 = arith.addf %129, %130 : vector<16x12xf32>
    %cst_90 = arith.constant dense<0.000000e+00> : vector<16x12xf32>
    %132 = tpu.matmul %14, %68, %cst_90 {dimension_numbers = #tpu.dot_dimension_numbers<[1], [0], [0], [1], [0, 0, 1, 1], [], []>} : vector<16x8xf32>, vector<8x12xf32>, vector<16x12xf32> -> vector<16x12xf32>
    %cst_91 = arith.constant dense<0.000000e+00> : vector<16x12xf32>
    %133 = tpu.matmul %16, %67, %cst_91 {dimension_numbers = #tpu.dot_dimension_numbers<[1], [0], [0], [1], [0, 0, 1, 1], [], []>} : vector<16x8xf32>, vector<8x12xf32>, vector<16x12xf32> -> vector<16x12xf32>
    %134 = arith.addf %132, %133 : vector<16x12xf32>
    %cst_92 = arith.constant dense<0.000000e+00> : vector<16x12xf32>
    %135 = tpu.matmul %18, %69, %cst_92 {dimension_numbers = #tpu.dot_dimension_numbers<[1], [0], [0], [1], [0, 0, 1, 1], [], []>} : vector<16x8xf32>, vector<8x12xf32>, vector<16x12xf32> -> vector<16x12xf32>
    %136 = arith.addf %134, %135 : vector<16x12xf32>
    %137 = arith.addf %125, %131 : vector<16x12xf32>
    %138 = arith.addf %126, %136 : vector<16x12xf32>
    %139 = arith.maximumf %137, %138 : vector<16x12xf32>
    %140 = arith.maximumf %104, %139 : vector<16x12xf32>
    %141 = vector.broadcast %0 : vector<16x1xf32> to vector<16x12xf32>
    %142 = arith.addf %140, %141 : vector<16x12xf32>
    %cst_93 = arith.constant 0.000000e+00 : f32
    %143 = vector.broadcast %cst_93 : f32 to vector<16x12xf32>
    %144 = arith.maximumf %142, %143 : vector<16x12xf32>
    %c0_94 = arith.constant 0 : index
    %c0_95 = arith.constant 0 : index
    %c0_96 = arith.constant 0 : index
    %145 = vector.load %arg5[%c0_94, %c0_95, %c0_96] : memref<3x16x12xf32, #tpu.memory_space<vmem>>, vector<1x16x12xf32>
    %146 = vector.shape_cast %145 : vector<1x16x12xf32> to vector<16x12xf32>
    %147 = vector.shape_cast %144 : vector<16x12xf32> to vector<1x16x12xf32>
    tpu.vector_store %arg5[%c0_94, %c0_95, %c0_96], %147 {strides = array<i32>} : memref<3x16x12xf32, #tpu.memory_space<vmem>>, vector<1x16x12xf32>,
    %c1_i32_97 = arith.constant 1 : i32
    %148 = arith.addi %19, %c1_i32_97 : i32
    %c2_i32_98 = arith.constant 2 : i32
    %149 = arith.muli %c2_i32_98, %148 : i32
    %c0_i32_99 = arith.constant 0 : i32
    %150 = arith.addi %149, %c0_i32_99 : i32
    %151 = arith.index_cast %150 : i32 to index
    %c0_100 = arith.constant 0 : index
    %c0_101 = arith.constant 0 : index
    %152 = vector.load %arg1[%151, %c0_100, %c0_101] : memref<15x8x16xf32, #tpu.memory_space<vmem>>, vector<1x8x16xf32>
    %153 = vector.shape_cast %152 : vector<1x8x16xf32> to vector<8x16xf32>
    %c0_i32_102 = arith.constant 0 : i32
    %154 = arith.addi %149, %c0_i32_102 : i32
    %155 = arith.index_cast %154 : i32 to index
    %c0_103 = arith.constant 0 : index
    %c0_104 = arith.constant 0 : index
    %156 = vector.load %arg2[%155, %c0_103, %c0_104] : memref<15x8x14xf32, #tpu.memory_space<vmem>>, vector<1x8x14xf32>
    %157 = vector.shape_cast %156 : vector<1x8x14xf32> to vector<8x14xf32>
    %158 = vector.extract_strided_slice %153 {offsets = [0, 0], sizes = [8, 12], strides = [1, 1]} : vector<8x16xf32> to vector<8x12xf32>
    %159 = vector.extract_strided_slice %153 {offsets = [0, 2], sizes = [8, 12], strides = [1, 1]} : vector<8x16xf32> to vector<8x12xf32>
    %160 = vector.extract_strided_slice %157 {offsets = [0, 0], sizes = [8, 12], strides = [1, 1]} : vector<8x14xf32> to vector<8x12xf32>
    %161 = vector.extract_strided_slice %157 {offsets = [0, 2], sizes = [8, 12], strides = [1, 1]} : vector<8x14xf32> to vector<8x12xf32>
    %c1_i32_105 = arith.constant 1 : i32
    %162 = arith.addi %149, %c1_i32_105 : i32
    %163 = arith.index_cast %162 : i32 to index
    %c0_106 = arith.constant 0 : index
    %c0_107 = arith.constant 0 : index
    %164 = vector.load %arg1[%163, %c0_106, %c0_107] : memref<15x8x16xf32, #tpu.memory_space<vmem>>, vector<1x8x16xf32>
    %165 = vector.shape_cast %164 : vector<1x8x16xf32> to vector<8x16xf32>
    %c1_i32_108 = arith.constant 1 : i32
    %166 = arith.addi %149, %c1_i32_108 : i32
    %167 = arith.index_cast %166 : i32 to index
    %c0_109 = arith.constant 0 : index
    %c0_110 = arith.constant 0 : index
    %168 = vector.load %arg2[%167, %c0_109, %c0_110] : memref<15x8x14xf32, #tpu.memory_space<vmem>>, vector<1x8x14xf32>
    %169 = vector.shape_cast %168 : vector<1x8x14xf32> to vector<8x14xf32>
    %170 = vector.extract_strided_slice %165 {offsets = [0, 0], sizes = [8, 12], strides = [1, 1]} : vector<8x16xf32> to vector<8x12xf32>
    %171 = vector.extract_strided_slice %165 {offsets = [0, 2], sizes = [8, 12], strides = [1, 1]} : vector<8x16xf32> to vector<8x12xf32>
    %172 = vector.extract_strided_slice %169 {offsets = [0, 0], sizes = [8, 12], strides = [1, 1]} : vector<8x14xf32> to vector<8x12xf32>
    %173 = vector.extract_strided_slice %169 {offsets = [0, 2], sizes = [8, 12], strides = [1, 1]} : vector<8x14xf32> to vector<8x12xf32>
    %c2_i32_111 = arith.constant 2 : i32
    %174 = arith.addi %149, %c2_i32_111 : i32
    %175 = arith.index_cast %174 : i32 to index
    %c0_112 = arith.constant 0 : index
    %c0_113 = arith.constant 0 : index
    %176 = vector.load %arg1[%175, %c0_112, %c0_113] : memref<15x8x16xf32, #tpu.memory_space<vmem>>, vector<1x8x16xf32>
    %177 = vector.shape_cast %176 : vector<1x8x16xf32> to vector<8x16xf32>
    %c2_i32_114 = arith.constant 2 : i32
    %178 = arith.addi %149, %c2_i32_114 : i32
    %179 = arith.index_cast %178 : i32 to index
    %c0_115 = arith.constant 0 : index
    %c0_116 = arith.constant 0 : index
    %180 = vector.load %arg2[%179, %c0_115, %c0_116] : memref<15x8x14xf32, #tpu.memory_space<vmem>>, vector<1x8x14xf32>
    %181 = vector.shape_cast %180 : vector<1x8x14xf32> to vector<8x14xf32>
    %182 = vector.extract_strided_slice %177 {offsets = [0, 0], sizes = [8, 12], strides = [1, 1]} : vector<8x16xf32> to vector<8x12xf32>
    %183 = vector.extract_strided_slice %177 {offsets = [0, 2], sizes = [8, 12], strides = [1, 1]} : vector<8x16xf32> to vector<8x12xf32>
    %184 = vector.extract_strided_slice %181 {offsets = [0, 0], sizes = [8, 12], strides = [1, 1]} : vector<8x14xf32> to vector<8x12xf32>
    %185 = vector.extract_strided_slice %181 {offsets = [0, 2], sizes = [8, 12], strides = [1, 1]} : vector<8x14xf32> to vector<8x12xf32>
    %c3_i32_117 = arith.constant 3 : i32
    %186 = arith.addi %149, %c3_i32_117 : i32
    %187 = arith.index_cast %186 : i32 to index
    %c0_118 = arith.constant 0 : index
    %c0_119 = arith.constant 0 : index
    %188 = vector.load %arg1[%187, %c0_118, %c0_119] : memref<15x8x16xf32, #tpu.memory_space<vmem>>, vector<1x8x16xf32>
    %189 = vector.shape_cast %188 : vector<1x8x16xf32> to vector<8x16xf32>
    %c3_i32_120 = arith.constant 3 : i32
    %190 = arith.addi %149, %c3_i32_120 : i32
    %191 = arith.index_cast %190 : i32 to index
    %c0_121 = arith.constant 0 : index
    %c0_122 = arith.constant 0 : index
    %192 = vector.load %arg2[%191, %c0_121, %c0_122] : memref<15x8x14xf32, #tpu.memory_space<vmem>>, vector<1x8x14xf32>
    %193 = vector.shape_cast %192 : vector<1x8x14xf32> to vector<8x14xf32>
    %194 = vector.extract_strided_slice %189 {offsets = [0, 0], sizes = [8, 12], strides = [1, 1]} : vector<8x16xf32> to vector<8x12xf32>
    %195 = vector.extract_strided_slice %189 {offsets = [0, 2], sizes = [8, 12], strides = [1, 1]} : vector<8x16xf32> to vector<8x12xf32>
    %196 = vector.extract_strided_slice %193 {offsets = [0, 0], sizes = [8, 12], strides = [1, 1]} : vector<8x14xf32> to vector<8x12xf32>
    %197 = vector.extract_strided_slice %193 {offsets = [0, 2], sizes = [8, 12], strides = [1, 1]} : vector<8x14xf32> to vector<8x12xf32>
    %cst_123 = arith.constant dense<0.000000e+00> : vector<16x12xf32>
    %198 = tpu.matmul %2, %158, %cst_123 {dimension_numbers = #tpu.dot_dimension_numbers<[1], [0], [0], [1], [0, 0, 1, 1], [], []>} : vector<16x8xf32>, vector<8x12xf32>, vector<16x12xf32> -> vector<16x12xf32>
    %cst_124 = arith.constant dense<0.000000e+00> : vector<16x12xf32>
    %199 = tpu.matmul %4, %160, %cst_124 {dimension_numbers = #tpu.dot_dimension_numbers<[1], [0], [0], [1], [0, 0, 1, 1], [], []>} : vector<16x8xf32>, vector<8x12xf32>, vector<16x12xf32> -> vector<16x12xf32>
    %200 = arith.addf %198, %199 : vector<16x12xf32>
    %cst_125 = arith.constant dense<0.000000e+00> : vector<16x12xf32>
    %201 = tpu.matmul %6, %159, %cst_125 {dimension_numbers = #tpu.dot_dimension_numbers<[1], [0], [0], [1], [0, 0, 1, 1], [], []>} : vector<16x8xf32>, vector<8x12xf32>, vector<16x12xf32> -> vector<16x12xf32>
    %202 = arith.addf %200, %201 : vector<16x12xf32>
    %cst_126 = arith.constant dense<0.000000e+00> : vector<16x12xf32>
    %203 = tpu.matmul %2, %160, %cst_126 {dimension_numbers = #tpu.dot_dimension_numbers<[1], [0], [0], [1], [0, 0, 1, 1], [], []>} : vector<16x8xf32>, vector<8x12xf32>, vector<16x12xf32> -> vector<16x12xf32>
    %cst_127 = arith.constant dense<0.000000e+00> : vector<16x12xf32>
    %204 = tpu.matmul %4, %159, %cst_127 {dimension_numbers = #tpu.dot_dimension_numbers<[1], [0], [0], [1], [0, 0, 1, 1], [], []>} : vector<16x8xf32>, vector<8x12xf32>, vector<16x12xf32> -> vector<16x12xf32>
    %205 = arith.addf %203, %204 : vector<16x12xf32>
    %cst_128 = arith.constant dense<0.000000e+00> : vector<16x12xf32>
    %206 = tpu.matmul %6, %161, %cst_128 {dimension_numbers = #tpu.dot_dimension_numbers<[1], [0], [0], [1], [0, 0, 1, 1], [], []>} : vector<16x8xf32>, vector<8x12xf32>, vector<16x12xf32> -> vector<16x12xf32>
    %207 = arith.addf %205, %206 : vector<16x12xf32>
    %cst_129 = arith.constant dense<0.000000e+00> : vector<16x12xf32>
    %208 = tpu.matmul %8, %170, %cst_129 {dimension_numbers = #tpu.dot_dimension_numbers<[1], [0], [0], [1], [0, 0, 1, 1], [], []>} : vector<16x8xf32>, vector<8x12xf32>, vector<16x12xf32> -> vector<16x12xf32>
    %cst_130 = arith.constant dense<0.000000e+00> : vector<16x12xf32>
    %209 = tpu.matmul %10, %172, %cst_130 {dimension_numbers = #tpu.dot_dimension_numbers<[1], [0], [0], [1], [0, 0, 1, 1], [], []>} : vector<16x8xf32>, vector<8x12xf32>, vector<16x12xf32> -> vector<16x12xf32>
    %210 = arith.addf %208, %209 : vector<16x12xf32>
    %cst_131 = arith.constant dense<0.000000e+00> : vector<16x12xf32>
    %211 = tpu.matmul %12, %171, %cst_131 {dimension_numbers = #tpu.dot_dimension_numbers<[1], [0], [0], [1], [0, 0, 1, 1], [], []>} : vector<16x8xf32>, vector<8x12xf32>, vector<16x12xf32> -> vector<16x12xf32>
    %212 = arith.addf %210, %211 : vector<16x12xf32>
    %cst_132 = arith.constant dense<0.000000e+00> : vector<16x12xf32>
    %213 = tpu.matmul %8, %172, %cst_132 {dimension_numbers = #tpu.dot_dimension_numbers<[1], [0], [0], [1], [0, 0, 1, 1], [], []>} : vector<16x8xf32>, vector<8x12xf32>, vector<16x12xf32> -> vector<16x12xf32>
    %cst_133 = arith.constant dense<0.000000e+00> : vector<16x12xf32>
    %214 = tpu.matmul %10, %171, %cst_133 {dimension_numbers = #tpu.dot_dimension_numbers<[1], [0], [0], [1], [0, 0, 1, 1], [], []>} : vector<16x8xf32>, vector<8x12xf32>, vector<16x12xf32> -> vector<16x12xf32>
    %215 = arith.addf %213, %214 : vector<16x12xf32>
    %cst_134 = arith.constant dense<0.000000e+00> : vector<16x12xf32>
    %216 = tpu.matmul %12, %173, %cst_134 {dimension_numbers = #tpu.dot_dimension_numbers<[1], [0], [0], [1], [0, 0, 1, 1], [], []>} : vector<16x8xf32>, vector<8x12xf32>, vector<16x12xf32> -> vector<16x12xf32>
    %217 = arith.addf %215, %216 : vector<16x12xf32>
    %218 = arith.addf %202, %212 : vector<16x12xf32>
    %219 = arith.addf %207, %217 : vector<16x12xf32>
    %cst_135 = arith.constant dense<0.000000e+00> : vector<16x12xf32>
    %220 = tpu.matmul %14, %182, %cst_135 {dimension_numbers = #tpu.dot_dimension_numbers<[1], [0], [0], [1], [0, 0, 1, 1], [], []>} : vector<16x8xf32>, vector<8x12xf32>, vector<16x12xf32> -> vector<16x12xf32>
    %cst_136 = arith.constant dense<0.000000e+00> : vector<16x12xf32>
    %221 = tpu.matmul %16, %184, %cst_136 {dimension_numbers = #tpu.dot_dimension_numbers<[1], [0], [0], [1], [0, 0, 1, 1], [], []>} : vector<16x8xf32>, vector<8x12xf32>, vector<16x12xf32> -> vector<16x12xf32>
    %222 = arith.addf %220, %221 : vector<16x12xf32>
    %cst_137 = arith.constant dense<0.000000e+00> : vector<16x12xf32>
    %223 = tpu.matmul %18, %183, %cst_137 {dimension_numbers = #tpu.dot_dimension_numbers<[1], [0], [0], [1], [0, 0, 1, 1], [], []>} : vector<16x8xf32>, vector<8x12xf32>, vector<16x12xf32> -> vector<16x12xf32>
    %224 = arith.addf %222, %223 : vector<16x12xf32>
    %cst_138 = arith.constant dense<0.000000e+00> : vector<16x12xf32>
    %225 = tpu.matmul %14, %184, %cst_138 {dimension_numbers = #tpu.dot_dimension_numbers<[1], [0], [0], [1], [0, 0, 1, 1], [], []>} : vector<16x8xf32>, vector<8x12xf32>, vector<16x12xf32> -> vector<16x12xf32>
    %cst_139 = arith.constant dense<0.000000e+00> : vector<16x12xf32>
    %226 = tpu.matmul %16, %183, %cst_139 {dimension_numbers = #tpu.dot_dimension_numbers<[1], [0], [0], [1], [0, 0, 1, 1], [], []>} : vector<16x8xf32>, vector<8x12xf32>, vector<16x12xf32> -> vector<16x12xf32>
    %227 = arith.addf %225, %226 : vector<16x12xf32>
    %cst_140 = arith.constant dense<0.000000e+00> : vector<16x12xf32>
    %228 = tpu.matmul %18, %185, %cst_140 {dimension_numbers = #tpu.dot_dimension_numbers<[1], [0], [0], [1], [0, 0, 1, 1], [], []>} : vector<16x8xf32>, vector<8x12xf32>, vector<16x12xf32> -> vector<16x12xf32>
    %229 = arith.addf %227, %228 : vector<16x12xf32>
    %230 = arith.addf %218, %224 : vector<16x12xf32>
    %231 = arith.addf %219, %229 : vector<16x12xf32>
    %232 = arith.maximumf %230, %231 : vector<16x12xf32>
    %cst_141 = arith.constant dense<0.000000e+00> : vector<16x12xf32>
    %233 = tpu.matmul %2, %170, %cst_141 {dimension_numbers = #tpu.dot_dimension_numbers<[1], [0], [0], [1], [0, 0, 1, 1], [], []>} : vector<16x8xf32>, vector<8x12xf32>, vector<16x12xf32> -> vector<16x12xf32>
    %cst_142 = arith.constant dense<0.000000e+00> : vector<16x12xf32>
    %234 = tpu.matmul %4, %172, %cst_142 {dimension_numbers = #tpu.dot_dimension_numbers<[1], [0], [0], [1], [0, 0, 1, 1], [], []>} : vector<16x8xf32>, vector<8x12xf32>, vector<16x12xf32> -> vector<16x12xf32>
    %235 = arith.addf %233, %234 : vector<16x12xf32>
    %cst_143 = arith.constant dense<0.000000e+00> : vector<16x12xf32>
    %236 = tpu.matmul %6, %171, %cst_143 {dimension_numbers = #tpu.dot_dimension_numbers<[1], [0], [0], [1], [0, 0, 1, 1], [], []>} : vector<16x8xf32>, vector<8x12xf32>, vector<16x12xf32> -> vector<16x12xf32>
    %237 = arith.addf %235, %236 : vector<16x12xf32>
    %cst_144 = arith.constant dense<0.000000e+00> : vector<16x12xf32>
    %238 = tpu.matmul %2, %172, %cst_144 {dimension_numbers = #tpu.dot_dimension_numbers<[1], [0], [0], [1], [0, 0, 1, 1], [], []>} : vector<16x8xf32>, vector<8x12xf32>, vector<16x12xf32> -> vector<16x12xf32>
    %cst_145 = arith.constant dense<0.000000e+00> : vector<16x12xf32>
    %239 = tpu.matmul %4, %171, %cst_145 {dimension_numbers = #tpu.dot_dimension_numbers<[1], [0], [0], [1], [0, 0, 1, 1], [], []>} : vector<16x8xf32>, vector<8x12xf32>, vector<16x12xf32> -> vector<16x12xf32>
    %240 = arith.addf %238, %239 : vector<16x12xf32>
    %cst_146 = arith.constant dense<0.000000e+00> : vector<16x12xf32>
    %241 = tpu.matmul %6, %173, %cst_146 {dimension_numbers = #tpu.dot_dimension_numbers<[1], [0], [0], [1], [0, 0, 1, 1], [], []>} : vector<16x8xf32>, vector<8x12xf32>, vector<16x12xf32> -> vector<16x12xf32>
    %242 = arith.addf %240, %241 : vector<16x12xf32>
    %cst_147 = arith.constant dense<0.000000e+00> : vector<16x12xf32>
    %243 = tpu.matmul %8, %182, %cst_147 {dimension_numbers = #tpu.dot_dimension_numbers<[1], [0], [0], [1], [0, 0, 1, 1], [], []>} : vector<16x8xf32>, vector<8x12xf32>, vector<16x12xf32> -> vector<16x12xf32>
    %cst_148 = arith.constant dense<0.000000e+00> : vector<16x12xf32>
    %244 = tpu.matmul %10, %184, %cst_148 {dimension_numbers = #tpu.dot_dimension_numbers<[1], [0], [0], [1], [0, 0, 1, 1], [], []>} : vector<16x8xf32>, vector<8x12xf32>, vector<16x12xf32> -> vector<16x12xf32>
    %245 = arith.addf %243, %244 : vector<16x12xf32>
    %cst_149 = arith.constant dense<0.000000e+00> : vector<16x12xf32>
    %246 = tpu.matmul %12, %183, %cst_149 {dimension_numbers = #tpu.dot_dimension_numbers<[1], [0], [0], [1], [0, 0, 1, 1], [], []>} : vector<16x8xf32>, vector<8x12xf32>, vector<16x12xf32> -> vector<16x12xf32>
    %247 = arith.addf %245, %246 : vector<16x12xf32>
    %cst_150 = arith.constant dense<0.000000e+00> : vector<16x12xf32>
    %248 = tpu.matmul %8, %184, %cst_150 {dimension_numbers = #tpu.dot_dimension_numbers<[1], [0], [0], [1], [0, 0, 1, 1], [], []>} : vector<16x8xf32>, vector<8x12xf32>, vector<16x12xf32> -> vector<16x12xf32>
    %cst_151 = arith.constant dense<0.000000e+00> : vector<16x12xf32>
    %249 = tpu.matmul %10, %183, %cst_151 {dimension_numbers = #tpu.dot_dimension_numbers<[1], [0], [0], [1], [0, 0, 1, 1], [], []>} : vector<16x8xf32>, vector<8x12xf32>, vector<16x12xf32> -> vector<16x12xf32>
    %250 = arith.addf %248, %249 : vector<16x12xf32>
    %cst_152 = arith.constant dense<0.000000e+00> : vector<16x12xf32>
    %251 = tpu.matmul %12, %185, %cst_152 {dimension_numbers = #tpu.dot_dimension_numbers<[1], [0], [0], [1], [0, 0, 1, 1], [], []>} : vector<16x8xf32>, vector<8x12xf32>, vector<16x12xf32> -> vector<16x12xf32>
    %252 = arith.addf %250, %251 : vector<16x12xf32>
    %253 = arith.addf %237, %247 : vector<16x12xf32>
    %254 = arith.addf %242, %252 : vector<16x12xf32>
    %cst_153 = arith.constant dense<0.000000e+00> : vector<16x12xf32>
    %255 = tpu.matmul %14, %194, %cst_153 {dimension_numbers = #tpu.dot_dimension_numbers<[1], [0], [0], [1], [0, 0, 1, 1], [], []>} : vector<16x8xf32>, vector<8x12xf32>, vector<16x12xf32> -> vector<16x12xf32>
    %cst_154 = arith.constant dense<0.000000e+00> : vector<16x12xf32>
    %256 = tpu.matmul %16, %196, %cst_154 {dimension_numbers = #tpu.dot_dimension_numbers<[1], [0], [0], [1], [0, 0, 1, 1], [], []>} : vector<16x8xf32>, vector<8x12xf32>, vector<16x12xf32> -> vector<16x12xf32>
    %257 = arith.addf %255, %256 : vector<16x12xf32>
    %cst_155 = arith.constant dense<0.000000e+00> : vector<16x12xf32>
    %258 = tpu.matmul %18, %195, %cst_155 {dimension_numbers = #tpu.dot_dimension_numbers<[1], [0], [0], [1], [0, 0, 1, 1], [], []>} : vector<16x8xf32>, vector<8x12xf32>, vector<16x12xf32> -> vector<16x12xf32>
    %259 = arith.addf %257, %258 : vector<16x12xf32>
    %cst_156 = arith.constant dense<0.000000e+00> : vector<16x12xf32>
    %260 = tpu.matmul %14, %196, %cst_156 {dimension_numbers = #tpu.dot_dimension_numbers<[1], [0], [0], [1], [0, 0, 1, 1], [], []>} : vector<16x8xf32>, vector<8x12xf32>, vector<16x12xf32> -> vector<16x12xf32>
    %cst_157 = arith.constant dense<0.000000e+00> : vector<16x12xf32>
    %261 = tpu.matmul %16, %195, %cst_157 {dimension_numbers = #tpu.dot_dimension_numbers<[1], [0], [0], [1], [0, 0, 1, 1], [], []>} : vector<16x8xf32>, vector<8x12xf32>, vector<16x12xf32> -> vector<16x12xf32>
    %262 = arith.addf %260, %261 : vector<16x12xf32>
    %cst_158 = arith.constant dense<0.000000e+00> : vector<16x12xf32>
    %263 = tpu.matmul %18, %197, %cst_158 {dimension_numbers = #tpu.dot_dimension_numbers<[1], [0], [0], [1], [0, 0, 1, 1], [], []>} : vector<16x8xf32>, vector<8x12xf32>, vector<16x12xf32> -> vector<16x12xf32>
    %264 = arith.addf %262, %263 : vector<16x12xf32>
    %265 = arith.addf %253, %259 : vector<16x12xf32>
    %266 = arith.addf %254, %264 : vector<16x12xf32>
    %267 = arith.maximumf %265, %266 : vector<16x12xf32>
    %268 = arith.maximumf %232, %267 : vector<16x12xf32>
    %269 = vector.broadcast %0 : vector<16x1xf32> to vector<16x12xf32>
    %270 = arith.addf %268, %269 : vector<16x12xf32>
    %cst_159 = arith.constant 0.000000e+00 : f32
    %271 = vector.broadcast %cst_159 : f32 to vector<16x12xf32>
    %272 = arith.maximumf %270, %271 : vector<16x12xf32>
    %c1_160 = arith.constant 1 : index
    %c0_161 = arith.constant 0 : index
    %c0_162 = arith.constant 0 : index
    %273 = vector.load %arg5[%c1_160, %c0_161, %c0_162] : memref<3x16x12xf32, #tpu.memory_space<vmem>>, vector<1x16x12xf32>
    %274 = vector.shape_cast %273 : vector<1x16x12xf32> to vector<16x12xf32>
    %275 = vector.shape_cast %272 : vector<16x12xf32> to vector<1x16x12xf32>
    tpu.vector_store %arg5[%c1_160, %c0_161, %c0_162], %275 {strides = array<i32>} : memref<3x16x12xf32, #tpu.memory_space<vmem>>, vector<1x16x12xf32>,
    %c2_i32_163 = arith.constant 2 : i32
    %276 = arith.addi %19, %c2_i32_163 : i32
    %c2_i32_164 = arith.constant 2 : i32
    %277 = arith.muli %c2_i32_164, %276 : i32
    %c0_i32_165 = arith.constant 0 : i32
    %278 = arith.addi %277, %c0_i32_165 : i32
    %279 = arith.index_cast %278 : i32 to index
    %c0_166 = arith.constant 0 : index
    %c0_167 = arith.constant 0 : index
    %280 = vector.load %arg1[%279, %c0_166, %c0_167] : memref<15x8x16xf32, #tpu.memory_space<vmem>>, vector<1x8x16xf32>
    %281 = vector.shape_cast %280 : vector<1x8x16xf32> to vector<8x16xf32>
    %c0_i32_168 = arith.constant 0 : i32
    %282 = arith.addi %277, %c0_i32_168 : i32
    %283 = arith.index_cast %282 : i32 to index
    %c0_169 = arith.constant 0 : index
    %c0_170 = arith.constant 0 : index
    %284 = vector.load %arg2[%283, %c0_169, %c0_170] : memref<15x8x14xf32, #tpu.memory_space<vmem>>, vector<1x8x14xf32>
    %285 = vector.shape_cast %284 : vector<1x8x14xf32> to vector<8x14xf32>
    %286 = vector.extract_strided_slice %281 {offsets = [0, 0], sizes = [8, 12], strides = [1, 1]} : vector<8x16xf32> to vector<8x12xf32>
    %287 = vector.extract_strided_slice %281 {offsets = [0, 2], sizes = [8, 12], strides = [1, 1]} : vector<8x16xf32> to vector<8x12xf32>
    %288 = vector.extract_strided_slice %285 {offsets = [0, 0], sizes = [8, 12], strides = [1, 1]} : vector<8x14xf32> to vector<8x12xf32>
    %289 = vector.extract_strided_slice %285 {offsets = [0, 2], sizes = [8, 12], strides = [1, 1]} : vector<8x14xf32> to vector<8x12xf32>
    %c1_i32_171 = arith.constant 1 : i32
    %290 = arith.addi %277, %c1_i32_171 : i32
    %291 = arith.index_cast %290 : i32 to index
    %c0_172 = arith.constant 0 : index
    %c0_173 = arith.constant 0 : index
    %292 = vector.load %arg1[%291, %c0_172, %c0_173] : memref<15x8x16xf32, #tpu.memory_space<vmem>>, vector<1x8x16xf32>
    %293 = vector.shape_cast %292 : vector<1x8x16xf32> to vector<8x16xf32>
    %c1_i32_174 = arith.constant 1 : i32
    %294 = arith.addi %277, %c1_i32_174 : i32
    %295 = arith.index_cast %294 : i32 to index
    %c0_175 = arith.constant 0 : index
    %c0_176 = arith.constant 0 : index
    %296 = vector.load %arg2[%295, %c0_175, %c0_176] : memref<15x8x14xf32, #tpu.memory_space<vmem>>, vector<1x8x14xf32>
    %297 = vector.shape_cast %296 : vector<1x8x14xf32> to vector<8x14xf32>
    %298 = vector.extract_strided_slice %293 {offsets = [0, 0], sizes = [8, 12], strides = [1, 1]} : vector<8x16xf32> to vector<8x12xf32>
    %299 = vector.extract_strided_slice %293 {offsets = [0, 2], sizes = [8, 12], strides = [1, 1]} : vector<8x16xf32> to vector<8x12xf32>
    %300 = vector.extract_strided_slice %297 {offsets = [0, 0], sizes = [8, 12], strides = [1, 1]} : vector<8x14xf32> to vector<8x12xf32>
    %301 = vector.extract_strided_slice %297 {offsets = [0, 2], sizes = [8, 12], strides = [1, 1]} : vector<8x14xf32> to vector<8x12xf32>
    %c2_i32_177 = arith.constant 2 : i32
    %302 = arith.addi %277, %c2_i32_177 : i32
    %303 = arith.index_cast %302 : i32 to index
    %c0_178 = arith.constant 0 : index
    %c0_179 = arith.constant 0 : index
    %304 = vector.load %arg1[%303, %c0_178, %c0_179] : memref<15x8x16xf32, #tpu.memory_space<vmem>>, vector<1x8x16xf32>
    %305 = vector.shape_cast %304 : vector<1x8x16xf32> to vector<8x16xf32>
    %c2_i32_180 = arith.constant 2 : i32
    %306 = arith.addi %277, %c2_i32_180 : i32
    %307 = arith.index_cast %306 : i32 to index
    %c0_181 = arith.constant 0 : index
    %c0_182 = arith.constant 0 : index
    %308 = vector.load %arg2[%307, %c0_181, %c0_182] : memref<15x8x14xf32, #tpu.memory_space<vmem>>, vector<1x8x14xf32>
    %309 = vector.shape_cast %308 : vector<1x8x14xf32> to vector<8x14xf32>
    %310 = vector.extract_strided_slice %305 {offsets = [0, 0], sizes = [8, 12], strides = [1, 1]} : vector<8x16xf32> to vector<8x12xf32>
    %311 = vector.extract_strided_slice %305 {offsets = [0, 2], sizes = [8, 12], strides = [1, 1]} : vector<8x16xf32> to vector<8x12xf32>
    %312 = vector.extract_strided_slice %309 {offsets = [0, 0], sizes = [8, 12], strides = [1, 1]} : vector<8x14xf32> to vector<8x12xf32>
    %313 = vector.extract_strided_slice %309 {offsets = [0, 2], sizes = [8, 12], strides = [1, 1]} : vector<8x14xf32> to vector<8x12xf32>
    %c3_i32_183 = arith.constant 3 : i32
    %314 = arith.addi %277, %c3_i32_183 : i32
    %315 = arith.index_cast %314 : i32 to index
    %c0_184 = arith.constant 0 : index
    %c0_185 = arith.constant 0 : index
    %316 = vector.load %arg1[%315, %c0_184, %c0_185] : memref<15x8x16xf32, #tpu.memory_space<vmem>>, vector<1x8x16xf32>
    %317 = vector.shape_cast %316 : vector<1x8x16xf32> to vector<8x16xf32>
    %c3_i32_186 = arith.constant 3 : i32
    %318 = arith.addi %277, %c3_i32_186 : i32
    %319 = arith.index_cast %318 : i32 to index
    %c0_187 = arith.constant 0 : index
    %c0_188 = arith.constant 0 : index
    %320 = vector.load %arg2[%319, %c0_187, %c0_188] : memref<15x8x14xf32, #tpu.memory_space<vmem>>, vector<1x8x14xf32>
    %321 = vector.shape_cast %320 : vector<1x8x14xf32> to vector<8x14xf32>
    %322 = vector.extract_strided_slice %317 {offsets = [0, 0], sizes = [8, 12], strides = [1, 1]} : vector<8x16xf32> to vector<8x12xf32>
    %323 = vector.extract_strided_slice %317 {offsets = [0, 2], sizes = [8, 12], strides = [1, 1]} : vector<8x16xf32> to vector<8x12xf32>
    %324 = vector.extract_strided_slice %321 {offsets = [0, 0], sizes = [8, 12], strides = [1, 1]} : vector<8x14xf32> to vector<8x12xf32>
    %325 = vector.extract_strided_slice %321 {offsets = [0, 2], sizes = [8, 12], strides = [1, 1]} : vector<8x14xf32> to vector<8x12xf32>
    %cst_189 = arith.constant dense<0.000000e+00> : vector<16x12xf32>
    %326 = tpu.matmul %2, %286, %cst_189 {dimension_numbers = #tpu.dot_dimension_numbers<[1], [0], [0], [1], [0, 0, 1, 1], [], []>} : vector<16x8xf32>, vector<8x12xf32>, vector<16x12xf32> -> vector<16x12xf32>
    %cst_190 = arith.constant dense<0.000000e+00> : vector<16x12xf32>
    %327 = tpu.matmul %4, %288, %cst_190 {dimension_numbers = #tpu.dot_dimension_numbers<[1], [0], [0], [1], [0, 0, 1, 1], [], []>} : vector<16x8xf32>, vector<8x12xf32>, vector<16x12xf32> -> vector<16x12xf32>
    %328 = arith.addf %326, %327 : vector<16x12xf32>
    %cst_191 = arith.constant dense<0.000000e+00> : vector<16x12xf32>
    %329 = tpu.matmul %6, %287, %cst_191 {dimension_numbers = #tpu.dot_dimension_numbers<[1], [0], [0], [1], [0, 0, 1, 1], [], []>} : vector<16x8xf32>, vector<8x12xf32>, vector<16x12xf32> -> vector<16x12xf32>
    %330 = arith.addf %328, %329 : vector<16x12xf32>
    %cst_192 = arith.constant dense<0.000000e+00> : vector<16x12xf32>
    %331 = tpu.matmul %2, %288, %cst_192 {dimension_numbers = #tpu.dot_dimension_numbers<[1], [0], [0], [1], [0, 0, 1, 1], [], []>} : vector<16x8xf32>, vector<8x12xf32>, vector<16x12xf32> -> vector<16x12xf32>
    %cst_193 = arith.constant dense<0.000000e+00> : vector<16x12xf32>
    %332 = tpu.matmul %4, %287, %cst_193 {dimension_numbers = #tpu.dot_dimension_numbers<[1], [0], [0], [1], [0, 0, 1, 1], [], []>} : vector<16x8xf32>, vector<8x12xf32>, vector<16x12xf32> -> vector<16x12xf32>
    %333 = arith.addf %331, %332 : vector<16x12xf32>
    %cst_194 = arith.constant dense<0.000000e+00> : vector<16x12xf32>
    %334 = tpu.matmul %6, %289, %cst_194 {dimension_numbers = #tpu.dot_dimension_numbers<[1], [0], [0], [1], [0, 0, 1, 1], [], []>} : vector<16x8xf32>, vector<8x12xf32>, vector<16x12xf32> -> vector<16x12xf32>
    %335 = arith.addf %333, %334 : vector<16x12xf32>
    %cst_195 = arith.constant dense<0.000000e+00> : vector<16x12xf32>
    %336 = tpu.matmul %8, %298, %cst_195 {dimension_numbers = #tpu.dot_dimension_numbers<[1], [0], [0], [1], [0, 0, 1, 1], [], []>} : vector<16x8xf32>, vector<8x12xf32>, vector<16x12xf32> -> vector<16x12xf32>
    %cst_196 = arith.constant dense<0.000000e+00> : vector<16x12xf32>
    %337 = tpu.matmul %10, %300, %cst_196 {dimension_numbers = #tpu.dot_dimension_numbers<[1], [0], [0], [1], [0, 0, 1, 1], [], []>} : vector<16x8xf32>, vector<8x12xf32>, vector<16x12xf32> -> vector<16x12xf32>
    %338 = arith.addf %336, %337 : vector<16x12xf32>
    %cst_197 = arith.constant dense<0.000000e+00> : vector<16x12xf32>
    %339 = tpu.matmul %12, %299, %cst_197 {dimension_numbers = #tpu.dot_dimension_numbers<[1], [0], [0], [1], [0, 0, 1, 1], [], []>} : vector<16x8xf32>, vector<8x12xf32>, vector<16x12xf32> -> vector<16x12xf32>
    %340 = arith.addf %338, %339 : vector<16x12xf32>
    %cst_198 = arith.constant dense<0.000000e+00> : vector<16x12xf32>
    %341 = tpu.matmul %8, %300, %cst_198 {dimension_numbers = #tpu.dot_dimension_numbers<[1], [0], [0], [1], [0, 0, 1, 1], [], []>} : vector<16x8xf32>, vector<8x12xf32>, vector<16x12xf32> -> vector<16x12xf32>
    %cst_199 = arith.constant dense<0.000000e+00> : vector<16x12xf32>
    %342 = tpu.matmul %10, %299, %cst_199 {dimension_numbers = #tpu.dot_dimension_numbers<[1], [0], [0], [1], [0, 0, 1, 1], [], []>} : vector<16x8xf32>, vector<8x12xf32>, vector<16x12xf32> -> vector<16x12xf32>
    %343 = arith.addf %341, %342 : vector<16x12xf32>
    %cst_200 = arith.constant dense<0.000000e+00> : vector<16x12xf32>
    %344 = tpu.matmul %12, %301, %cst_200 {dimension_numbers = #tpu.dot_dimension_numbers<[1], [0], [0], [1], [0, 0, 1, 1], [], []>} : vector<16x8xf32>, vector<8x12xf32>, vector<16x12xf32> -> vector<16x12xf32>
    %345 = arith.addf %343, %344 : vector<16x12xf32>
    %346 = arith.addf %330, %340 : vector<16x12xf32>
    %347 = arith.addf %335, %345 : vector<16x12xf32>
    %cst_201 = arith.constant dense<0.000000e+00> : vector<16x12xf32>
    %348 = tpu.matmul %14, %310, %cst_201 {dimension_numbers = #tpu.dot_dimension_numbers<[1], [0], [0], [1], [0, 0, 1, 1], [], []>} : vector<16x8xf32>, vector<8x12xf32>, vector<16x12xf32> -> vector<16x12xf32>
    %cst_202 = arith.constant dense<0.000000e+00> : vector<16x12xf32>
    %349 = tpu.matmul %16, %312, %cst_202 {dimension_numbers = #tpu.dot_dimension_numbers<[1], [0], [0], [1], [0, 0, 1, 1], [], []>} : vector<16x8xf32>, vector<8x12xf32>, vector<16x12xf32> -> vector<16x12xf32>
    %350 = arith.addf %348, %349 : vector<16x12xf32>
    %cst_203 = arith.constant dense<0.000000e+00> : vector<16x12xf32>
    %351 = tpu.matmul %18, %311, %cst_203 {dimension_numbers = #tpu.dot_dimension_numbers<[1], [0], [0], [1], [0, 0, 1, 1], [], []>} : vector<16x8xf32>, vector<8x12xf32>, vector<16x12xf32> -> vector<16x12xf32>
    %352 = arith.addf %350, %351 : vector<16x12xf32>
    %cst_204 = arith.constant dense<0.000000e+00> : vector<16x12xf32>
    %353 = tpu.matmul %14, %312, %cst_204 {dimension_numbers = #tpu.dot_dimension_numbers<[1], [0], [0], [1], [0, 0, 1, 1], [], []>} : vector<16x8xf32>, vector<8x12xf32>, vector<16x12xf32> -> vector<16x12xf32>
    %cst_205 = arith.constant dense<0.000000e+00> : vector<16x12xf32>
    %354 = tpu.matmul %16, %311, %cst_205 {dimension_numbers = #tpu.dot_dimension_numbers<[1], [0], [0], [1], [0, 0, 1, 1], [], []>} : vector<16x8xf32>, vector<8x12xf32>, vector<16x12xf32> -> vector<16x12xf32>
    %355 = arith.addf %353, %354 : vector<16x12xf32>
    %cst_206 = arith.constant dense<0.000000e+00> : vector<16x12xf32>
    %356 = tpu.matmul %18, %313, %cst_206 {dimension_numbers = #tpu.dot_dimension_numbers<[1], [0], [0], [1], [0, 0, 1, 1], [], []>} : vector<16x8xf32>, vector<8x12xf32>, vector<16x12xf32> -> vector<16x12xf32>
    %357 = arith.addf %355, %356 : vector<16x12xf32>
    %358 = arith.addf %346, %352 : vector<16x12xf32>
    %359 = arith.addf %347, %357 : vector<16x12xf32>
    %360 = arith.maximumf %358, %359 : vector<16x12xf32>
    %cst_207 = arith.constant dense<0.000000e+00> : vector<16x12xf32>
    %361 = tpu.matmul %2, %298, %cst_207 {dimension_numbers = #tpu.dot_dimension_numbers<[1], [0], [0], [1], [0, 0, 1, 1], [], []>} : vector<16x8xf32>, vector<8x12xf32>, vector<16x12xf32> -> vector<16x12xf32>
    %cst_208 = arith.constant dense<0.000000e+00> : vector<16x12xf32>
    %362 = tpu.matmul %4, %300, %cst_208 {dimension_numbers = #tpu.dot_dimension_numbers<[1], [0], [0], [1], [0, 0, 1, 1], [], []>} : vector<16x8xf32>, vector<8x12xf32>, vector<16x12xf32> -> vector<16x12xf32>
    %363 = arith.addf %361, %362 : vector<16x12xf32>
    %cst_209 = arith.constant dense<0.000000e+00> : vector<16x12xf32>
    %364 = tpu.matmul %6, %299, %cst_209 {dimension_numbers = #tpu.dot_dimension_numbers<[1], [0], [0], [1], [0, 0, 1, 1], [], []>} : vector<16x8xf32>, vector<8x12xf32>, vector<16x12xf32> -> vector<16x12xf32>
    %365 = arith.addf %363, %364 : vector<16x12xf32>
    %cst_210 = arith.constant dense<0.000000e+00> : vector<16x12xf32>
    %366 = tpu.matmul %2, %300, %cst_210 {dimension_numbers = #tpu.dot_dimension_numbers<[1], [0], [0], [1], [0, 0, 1, 1], [], []>} : vector<16x8xf32>, vector<8x12xf32>, vector<16x12xf32> -> vector<16x12xf32>
    %cst_211 = arith.constant dense<0.000000e+00> : vector<16x12xf32>
    %367 = tpu.matmul %4, %299, %cst_211 {dimension_numbers = #tpu.dot_dimension_numbers<[1], [0], [0], [1], [0, 0, 1, 1], [], []>} : vector<16x8xf32>, vector<8x12xf32>, vector<16x12xf32> -> vector<16x12xf32>
    %368 = arith.addf %366, %367 : vector<16x12xf32>
    %cst_212 = arith.constant dense<0.000000e+00> : vector<16x12xf32>
    %369 = tpu.matmul %6, %301, %cst_212 {dimension_numbers = #tpu.dot_dimension_numbers<[1], [0], [0], [1], [0, 0, 1, 1], [], []>} : vector<16x8xf32>, vector<8x12xf32>, vector<16x12xf32> -> vector<16x12xf32>
    %370 = arith.addf %368, %369 : vector<16x12xf32>
    %cst_213 = arith.constant dense<0.000000e+00> : vector<16x12xf32>
    %371 = tpu.matmul %8, %310, %cst_213 {dimension_numbers = #tpu.dot_dimension_numbers<[1], [0], [0], [1], [0, 0, 1, 1], [], []>} : vector<16x8xf32>, vector<8x12xf32>, vector<16x12xf32> -> vector<16x12xf32>
    %cst_214 = arith.constant dense<0.000000e+00> : vector<16x12xf32>
    %372 = tpu.matmul %10, %312, %cst_214 {dimension_numbers = #tpu.dot_dimension_numbers<[1], [0], [0], [1], [0, 0, 1, 1], [], []>} : vector<16x8xf32>, vector<8x12xf32>, vector<16x12xf32> -> vector<16x12xf32>
    %373 = arith.addf %371, %372 : vector<16x12xf32>
    %cst_215 = arith.constant dense<0.000000e+00> : vector<16x12xf32>
    %374 = tpu.matmul %12, %311, %cst_215 {dimension_numbers = #tpu.dot_dimension_numbers<[1], [0], [0], [1], [0, 0, 1, 1], [], []>} : vector<16x8xf32>, vector<8x12xf32>, vector<16x12xf32> -> vector<16x12xf32>
    %375 = arith.addf %373, %374 : vector<16x12xf32>
    %cst_216 = arith.constant dense<0.000000e+00> : vector<16x12xf32>
    %376 = tpu.matmul %8, %312, %cst_216 {dimension_numbers = #tpu.dot_dimension_numbers<[1], [0], [0], [1], [0, 0, 1, 1], [], []>} : vector<16x8xf32>, vector<8x12xf32>, vector<16x12xf32> -> vector<16x12xf32>
    %cst_217 = arith.constant dense<0.000000e+00> : vector<16x12xf32>
    %377 = tpu.matmul %10, %311, %cst_217 {dimension_numbers = #tpu.dot_dimension_numbers<[1], [0], [0], [1], [0, 0, 1, 1], [], []>} : vector<16x8xf32>, vector<8x12xf32>, vector<16x12xf32> -> vector<16x12xf32>
    %378 = arith.addf %376, %377 : vector<16x12xf32>
    %cst_218 = arith.constant dense<0.000000e+00> : vector<16x12xf32>
    %379 = tpu.matmul %12, %313, %cst_218 {dimension_numbers = #tpu.dot_dimension_numbers<[1], [0], [0], [1], [0, 0, 1, 1], [], []>} : vector<16x8xf32>, vector<8x12xf32>, vector<16x12xf32> -> vector<16x12xf32>
    %380 = arith.addf %378, %379 : vector<16x12xf32>
    %381 = arith.addf %365, %375 : vector<16x12xf32>
    %382 = arith.addf %370, %380 : vector<16x12xf32>
    %cst_219 = arith.constant dense<0.000000e+00> : vector<16x12xf32>
    %383 = tpu.matmul %14, %322, %cst_219 {dimension_numbers = #tpu.dot_dimension_numbers<[1], [0], [0], [1], [0, 0, 1, 1], [], []>} : vector<16x8xf32>, vector<8x12xf32>, vector<16x12xf32> -> vector<16x12xf32>
    %cst_220 = arith.constant dense<0.000000e+00> : vector<16x12xf32>
    %384 = tpu.matmul %16, %324, %cst_220 {dimension_numbers = #tpu.dot_dimension_numbers<[1], [0], [0], [1], [0, 0, 1, 1], [], []>} : vector<16x8xf32>, vector<8x12xf32>, vector<16x12xf32> -> vector<16x12xf32>
    %385 = arith.addf %383, %384 : vector<16x12xf32>
    %cst_221 = arith.constant dense<0.000000e+00> : vector<16x12xf32>
    %386 = tpu.matmul %18, %323, %cst_221 {dimension_numbers = #tpu.dot_dimension_numbers<[1], [0], [0], [1], [0, 0, 1, 1], [], []>} : vector<16x8xf32>, vector<8x12xf32>, vector<16x12xf32> -> vector<16x12xf32>
    %387 = arith.addf %385, %386 : vector<16x12xf32>
    %cst_222 = arith.constant dense<0.000000e+00> : vector<16x12xf32>
    %388 = tpu.matmul %14, %324, %cst_222 {dimension_numbers = #tpu.dot_dimension_numbers<[1], [0], [0], [1], [0, 0, 1, 1], [], []>} : vector<16x8xf32>, vector<8x12xf32>, vector<16x12xf32> -> vector<16x12xf32>
    %cst_223 = arith.constant dense<0.000000e+00> : vector<16x12xf32>
    %389 = tpu.matmul %16, %323, %cst_223 {dimension_numbers = #tpu.dot_dimension_numbers<[1], [0], [0], [1], [0, 0, 1, 1], [], []>} : vector<16x8xf32>, vector<8x12xf32>, vector<16x12xf32> -> vector<16x12xf32>
    %390 = arith.addf %388, %389 : vector<16x12xf32>
    %cst_224 = arith.constant dense<0.000000e+00> : vector<16x12xf32>
    %391 = tpu.matmul %18, %325, %cst_224 {dimension_numbers = #tpu.dot_dimension_numbers<[1], [0], [0], [1], [0, 0, 1, 1], [], []>} : vector<16x8xf32>, vector<8x12xf32>, vector<16x12xf32> -> vector<16x12xf32>
    %392 = arith.addf %390, %391 : vector<16x12xf32>
    %393 = arith.addf %381, %387 : vector<16x12xf32>
    %394 = arith.addf %382, %392 : vector<16x12xf32>
    %395 = arith.maximumf %393, %394 : vector<16x12xf32>
    %396 = arith.maximumf %360, %395 : vector<16x12xf32>
    %397 = vector.broadcast %0 : vector<16x1xf32> to vector<16x12xf32>
    %398 = arith.addf %396, %397 : vector<16x12xf32>
    %cst_225 = arith.constant 0.000000e+00 : f32
    %399 = vector.broadcast %cst_225 : f32 to vector<16x12xf32>
    %400 = arith.maximumf %398, %399 : vector<16x12xf32>
    %c2_226 = arith.constant 2 : index
    %c0_227 = arith.constant 0 : index
    %c0_228 = arith.constant 0 : index
    %401 = vector.load %arg5[%c2_226, %c0_227, %c0_228] : memref<3x16x12xf32, #tpu.memory_space<vmem>>, vector<1x16x12xf32>
    %402 = vector.shape_cast %401 : vector<1x16x12xf32> to vector<16x12xf32>
    %403 = vector.shape_cast %400 : vector<16x12xf32> to vector<1x16x12xf32>
    tpu.vector_store %arg5[%c2_226, %c0_227, %c0_228], %403 {strides = array<i32>} : memref<3x16x12xf32, #tpu.memory_space<vmem>>, vector<1x16x12xf32>,
    return
  }
  func.func @transform_0(%arg0: i32) -> (i32, i32, i32) {
    %c0_i32 = arith.constant 0 : i32
    %c0_i32_0 = arith.constant 0 : i32
    %c0_i32_1 = arith.constant 0 : i32
    %c0_i32_2 = arith.constant 0 : i32
    return %c0_i32, %c0_i32_0, %c0_i32_1 : i32, i32, i32
  }
  func.func @transform_1(%arg0: i32) -> (i32, i32, i32) {
    %c0_i32 = arith.constant 0 : i32
    %c0_i32_0 = arith.constant 0 : i32
    %c0_i32_1 = arith.constant 0 : i32
    %c0_i32_2 = arith.constant 0 : i32
    return %c0_i32, %c0_i32_0, %c0_i32_1 : i32, i32, i32
  }
  func.func @transform_2(%arg0: i32) -> (i32, i32, i32, i32) {
    %c0_i32 = arith.constant 0 : i32
    %c0_i32_0 = arith.constant 0 : i32
    %c0_i32_1 = arith.constant 0 : i32
    %c0_i32_2 = arith.constant 0 : i32
    %c0_i32_3 = arith.constant 0 : i32
    return %c0_i32, %c0_i32_0, %c0_i32_1, %c0_i32_2 : i32, i32, i32, i32
  }
  func.func @transform_3(%arg0: i32) -> (i32, i32) {
    %c0_i32 = arith.constant 0 : i32
    %c0_i32_0 = arith.constant 0 : i32
    %c0_i32_1 = arith.constant 0 : i32
    return %c0_i32, %c0_i32_0 : i32, i32
  }
  func.func @transform_4(%arg0: i32) -> (i32, i32, i32) {
    %c0_i32 = arith.constant 0 : i32
    %c0_i32_0 = arith.constant 0 : i32
    %c0_i32_1 = arith.constant 0 : i32
    return %arg0, %c0_i32, %c0_i32_0 : i32, i32, i32
  }
}

module attributes {stable_mosaic.version = 11 : i64} {
  func.func @_conv_bn_relu_pool_kernel(%arg0: i32, %arg1: memref<6x16x6xf32, #tpu.memory_space<vmem>>, %arg2: memref<6x16x6xf32, #tpu.memory_space<vmem>>, %arg3: memref<3x3x32x16xf32, #tpu.memory_space<vmem>>, %arg4: memref<32x1xf32, #tpu.memory_space<vmem>>, %arg5: memref<1x32x4xf32, #tpu.memory_space<vmem>>) attributes {dimension_semantics = [#tpu.dimension_semantics<parallel>], iteration_bounds = array<i64: 2>, scalar_prefetch = 0 : i64, scratch_operands = 0 : i64, tpu.core_type = #tpu.core_type<tc>, window_params = [{pipeline_mode = #tpu.pipeline_mode<synchronous>, transform_indices = @transform_0, window_bounds = array<i64: 6, 16, 6>}, {pipeline_mode = #tpu.pipeline_mode<synchronous>, transform_indices = @transform_1, window_bounds = array<i64: 6, 16, 6>}, {pipeline_mode = #tpu.pipeline_mode<synchronous>, transform_indices = @transform_2, window_bounds = array<i64: 3, 3, 32, 16>}, {pipeline_mode = #tpu.pipeline_mode<synchronous>, transform_indices = @transform_3, window_bounds = array<i64: 32, 1>}, {transform_indices = @transform_4, window_bounds = array<i64: 1, 32, 4>}]} {
    %c0 = arith.constant 0 : index
    %c0_0 = arith.constant 0 : index
    %0 = vector.load %arg4[%c0, %c0_0] : memref<32x1xf32, #tpu.memory_space<vmem>>, vector<32x1xf32>
    %c0_1 = arith.constant 0 : index
    %c0_2 = arith.constant 0 : index
    %c0_3 = arith.constant 0 : index
    %c0_4 = arith.constant 0 : index
    %1 = vector.load %arg3[%c0_1, %c0_2, %c0_3, %c0_4] : memref<3x3x32x16xf32, #tpu.memory_space<vmem>>, vector<1x1x32x16xf32>
    %2 = vector.shape_cast %1 : vector<1x1x32x16xf32> to vector<32x16xf32>
    %c0_5 = arith.constant 0 : index
    %c1 = arith.constant 1 : index
    %c0_6 = arith.constant 0 : index
    %c0_7 = arith.constant 0 : index
    %3 = vector.load %arg3[%c0_5, %c1, %c0_6, %c0_7] : memref<3x3x32x16xf32, #tpu.memory_space<vmem>>, vector<1x1x32x16xf32>
    %4 = vector.shape_cast %3 : vector<1x1x32x16xf32> to vector<32x16xf32>
    %c0_8 = arith.constant 0 : index
    %c2 = arith.constant 2 : index
    %c0_9 = arith.constant 0 : index
    %c0_10 = arith.constant 0 : index
    %5 = vector.load %arg3[%c0_8, %c2, %c0_9, %c0_10] : memref<3x3x32x16xf32, #tpu.memory_space<vmem>>, vector<1x1x32x16xf32>
    %6 = vector.shape_cast %5 : vector<1x1x32x16xf32> to vector<32x16xf32>
    %c1_11 = arith.constant 1 : index
    %c0_12 = arith.constant 0 : index
    %c0_13 = arith.constant 0 : index
    %c0_14 = arith.constant 0 : index
    %7 = vector.load %arg3[%c1_11, %c0_12, %c0_13, %c0_14] : memref<3x3x32x16xf32, #tpu.memory_space<vmem>>, vector<1x1x32x16xf32>
    %8 = vector.shape_cast %7 : vector<1x1x32x16xf32> to vector<32x16xf32>
    %c1_15 = arith.constant 1 : index
    %c1_16 = arith.constant 1 : index
    %c0_17 = arith.constant 0 : index
    %c0_18 = arith.constant 0 : index
    %9 = vector.load %arg3[%c1_15, %c1_16, %c0_17, %c0_18] : memref<3x3x32x16xf32, #tpu.memory_space<vmem>>, vector<1x1x32x16xf32>
    %10 = vector.shape_cast %9 : vector<1x1x32x16xf32> to vector<32x16xf32>
    %c1_19 = arith.constant 1 : index
    %c2_20 = arith.constant 2 : index
    %c0_21 = arith.constant 0 : index
    %c0_22 = arith.constant 0 : index
    %11 = vector.load %arg3[%c1_19, %c2_20, %c0_21, %c0_22] : memref<3x3x32x16xf32, #tpu.memory_space<vmem>>, vector<1x1x32x16xf32>
    %12 = vector.shape_cast %11 : vector<1x1x32x16xf32> to vector<32x16xf32>
    %c2_23 = arith.constant 2 : index
    %c0_24 = arith.constant 0 : index
    %c0_25 = arith.constant 0 : index
    %c0_26 = arith.constant 0 : index
    %13 = vector.load %arg3[%c2_23, %c0_24, %c0_25, %c0_26] : memref<3x3x32x16xf32, #tpu.memory_space<vmem>>, vector<1x1x32x16xf32>
    %14 = vector.shape_cast %13 : vector<1x1x32x16xf32> to vector<32x16xf32>
    %c2_27 = arith.constant 2 : index
    %c1_28 = arith.constant 1 : index
    %c0_29 = arith.constant 0 : index
    %c0_30 = arith.constant 0 : index
    %15 = vector.load %arg3[%c2_27, %c1_28, %c0_29, %c0_30] : memref<3x3x32x16xf32, #tpu.memory_space<vmem>>, vector<1x1x32x16xf32>
    %16 = vector.shape_cast %15 : vector<1x1x32x16xf32> to vector<32x16xf32>
    %c2_31 = arith.constant 2 : index
    %c2_32 = arith.constant 2 : index
    %c0_33 = arith.constant 0 : index
    %c0_34 = arith.constant 0 : index
    %17 = vector.load %arg3[%c2_31, %c2_32, %c0_33, %c0_34] : memref<3x3x32x16xf32, #tpu.memory_space<vmem>>, vector<1x1x32x16xf32>
    %18 = vector.shape_cast %17 : vector<1x1x32x16xf32> to vector<32x16xf32>
    %c1_i32 = arith.constant 1 : i32
    %19 = arith.muli %arg0, %c1_i32 : i32
    %c0_i32 = arith.constant 0 : i32
    %20 = arith.addi %19, %c0_i32 : i32
    %c2_i32 = arith.constant 2 : i32
    %21 = arith.muli %c2_i32, %20 : i32
    %c0_i32_35 = arith.constant 0 : i32
    %22 = arith.addi %21, %c0_i32_35 : i32
    %23 = arith.index_cast %22 : i32 to index
    %c0_36 = arith.constant 0 : index
    %c0_37 = arith.constant 0 : index
    %24 = vector.load %arg1[%23, %c0_36, %c0_37] : memref<6x16x6xf32, #tpu.memory_space<vmem>>, vector<1x16x6xf32>
    %25 = vector.shape_cast %24 : vector<1x16x6xf32> to vector<16x6xf32>
    %c0_i32_38 = arith.constant 0 : i32
    %26 = arith.addi %21, %c0_i32_38 : i32
    %27 = arith.index_cast %26 : i32 to index
    %c0_39 = arith.constant 0 : index
    %c0_40 = arith.constant 0 : index
    %28 = vector.load %arg2[%27, %c0_39, %c0_40] : memref<6x16x6xf32, #tpu.memory_space<vmem>>, vector<1x16x6xf32>
    %29 = vector.shape_cast %28 : vector<1x16x6xf32> to vector<16x6xf32>
    %30 = vector.extract_strided_slice %25 {offsets = [0, 0], sizes = [16, 4], strides = [1, 1]} : vector<16x6xf32> to vector<16x4xf32>
    %31 = vector.extract_strided_slice %25 {offsets = [0, 2], sizes = [16, 4], strides = [1, 1]} : vector<16x6xf32> to vector<16x4xf32>
    %32 = vector.extract_strided_slice %29 {offsets = [0, 0], sizes = [16, 4], strides = [1, 1]} : vector<16x6xf32> to vector<16x4xf32>
    %33 = vector.extract_strided_slice %29 {offsets = [0, 2], sizes = [16, 4], strides = [1, 1]} : vector<16x6xf32> to vector<16x4xf32>
    %c1_i32_41 = arith.constant 1 : i32
    %34 = arith.addi %21, %c1_i32_41 : i32
    %35 = arith.index_cast %34 : i32 to index
    %c0_42 = arith.constant 0 : index
    %c0_43 = arith.constant 0 : index
    %36 = vector.load %arg1[%35, %c0_42, %c0_43] : memref<6x16x6xf32, #tpu.memory_space<vmem>>, vector<1x16x6xf32>
    %37 = vector.shape_cast %36 : vector<1x16x6xf32> to vector<16x6xf32>
    %c1_i32_44 = arith.constant 1 : i32
    %38 = arith.addi %21, %c1_i32_44 : i32
    %39 = arith.index_cast %38 : i32 to index
    %c0_45 = arith.constant 0 : index
    %c0_46 = arith.constant 0 : index
    %40 = vector.load %arg2[%39, %c0_45, %c0_46] : memref<6x16x6xf32, #tpu.memory_space<vmem>>, vector<1x16x6xf32>
    %41 = vector.shape_cast %40 : vector<1x16x6xf32> to vector<16x6xf32>
    %42 = vector.extract_strided_slice %37 {offsets = [0, 0], sizes = [16, 4], strides = [1, 1]} : vector<16x6xf32> to vector<16x4xf32>
    %43 = vector.extract_strided_slice %37 {offsets = [0, 2], sizes = [16, 4], strides = [1, 1]} : vector<16x6xf32> to vector<16x4xf32>
    %44 = vector.extract_strided_slice %41 {offsets = [0, 0], sizes = [16, 4], strides = [1, 1]} : vector<16x6xf32> to vector<16x4xf32>
    %45 = vector.extract_strided_slice %41 {offsets = [0, 2], sizes = [16, 4], strides = [1, 1]} : vector<16x6xf32> to vector<16x4xf32>
    %c2_i32_47 = arith.constant 2 : i32
    %46 = arith.addi %21, %c2_i32_47 : i32
    %47 = arith.index_cast %46 : i32 to index
    %c0_48 = arith.constant 0 : index
    %c0_49 = arith.constant 0 : index
    %48 = vector.load %arg1[%47, %c0_48, %c0_49] : memref<6x16x6xf32, #tpu.memory_space<vmem>>, vector<1x16x6xf32>
    %49 = vector.shape_cast %48 : vector<1x16x6xf32> to vector<16x6xf32>
    %c2_i32_50 = arith.constant 2 : i32
    %50 = arith.addi %21, %c2_i32_50 : i32
    %51 = arith.index_cast %50 : i32 to index
    %c0_51 = arith.constant 0 : index
    %c0_52 = arith.constant 0 : index
    %52 = vector.load %arg2[%51, %c0_51, %c0_52] : memref<6x16x6xf32, #tpu.memory_space<vmem>>, vector<1x16x6xf32>
    %53 = vector.shape_cast %52 : vector<1x16x6xf32> to vector<16x6xf32>
    %54 = vector.extract_strided_slice %49 {offsets = [0, 0], sizes = [16, 4], strides = [1, 1]} : vector<16x6xf32> to vector<16x4xf32>
    %55 = vector.extract_strided_slice %49 {offsets = [0, 2], sizes = [16, 4], strides = [1, 1]} : vector<16x6xf32> to vector<16x4xf32>
    %56 = vector.extract_strided_slice %53 {offsets = [0, 0], sizes = [16, 4], strides = [1, 1]} : vector<16x6xf32> to vector<16x4xf32>
    %57 = vector.extract_strided_slice %53 {offsets = [0, 2], sizes = [16, 4], strides = [1, 1]} : vector<16x6xf32> to vector<16x4xf32>
    %c3_i32 = arith.constant 3 : i32
    %58 = arith.addi %21, %c3_i32 : i32
    %59 = arith.index_cast %58 : i32 to index
    %c0_53 = arith.constant 0 : index
    %c0_54 = arith.constant 0 : index
    %60 = vector.load %arg1[%59, %c0_53, %c0_54] : memref<6x16x6xf32, #tpu.memory_space<vmem>>, vector<1x16x6xf32>
    %61 = vector.shape_cast %60 : vector<1x16x6xf32> to vector<16x6xf32>
    %c3_i32_55 = arith.constant 3 : i32
    %62 = arith.addi %21, %c3_i32_55 : i32
    %63 = arith.index_cast %62 : i32 to index
    %c0_56 = arith.constant 0 : index
    %c0_57 = arith.constant 0 : index
    %64 = vector.load %arg2[%63, %c0_56, %c0_57] : memref<6x16x6xf32, #tpu.memory_space<vmem>>, vector<1x16x6xf32>
    %65 = vector.shape_cast %64 : vector<1x16x6xf32> to vector<16x6xf32>
    %66 = vector.extract_strided_slice %61 {offsets = [0, 0], sizes = [16, 4], strides = [1, 1]} : vector<16x6xf32> to vector<16x4xf32>
    %67 = vector.extract_strided_slice %61 {offsets = [0, 2], sizes = [16, 4], strides = [1, 1]} : vector<16x6xf32> to vector<16x4xf32>
    %68 = vector.extract_strided_slice %65 {offsets = [0, 0], sizes = [16, 4], strides = [1, 1]} : vector<16x6xf32> to vector<16x4xf32>
    %69 = vector.extract_strided_slice %65 {offsets = [0, 2], sizes = [16, 4], strides = [1, 1]} : vector<16x6xf32> to vector<16x4xf32>
    %cst = arith.constant dense<0.000000e+00> : vector<32x4xf32>
    %70 = tpu.matmul %2, %30, %cst {dimension_numbers = #tpu.dot_dimension_numbers<[1], [0], [0], [1], [0, 0, 1, 1], [], []>} : vector<32x16xf32>, vector<16x4xf32>, vector<32x4xf32> -> vector<32x4xf32>
    %cst_58 = arith.constant dense<0.000000e+00> : vector<32x4xf32>
    %71 = tpu.matmul %4, %32, %cst_58 {dimension_numbers = #tpu.dot_dimension_numbers<[1], [0], [0], [1], [0, 0, 1, 1], [], []>} : vector<32x16xf32>, vector<16x4xf32>, vector<32x4xf32> -> vector<32x4xf32>
    %72 = arith.addf %70, %71 : vector<32x4xf32>
    %cst_59 = arith.constant dense<0.000000e+00> : vector<32x4xf32>
    %73 = tpu.matmul %6, %31, %cst_59 {dimension_numbers = #tpu.dot_dimension_numbers<[1], [0], [0], [1], [0, 0, 1, 1], [], []>} : vector<32x16xf32>, vector<16x4xf32>, vector<32x4xf32> -> vector<32x4xf32>
    %74 = arith.addf %72, %73 : vector<32x4xf32>
    %cst_60 = arith.constant dense<0.000000e+00> : vector<32x4xf32>
    %75 = tpu.matmul %2, %32, %cst_60 {dimension_numbers = #tpu.dot_dimension_numbers<[1], [0], [0], [1], [0, 0, 1, 1], [], []>} : vector<32x16xf32>, vector<16x4xf32>, vector<32x4xf32> -> vector<32x4xf32>
    %cst_61 = arith.constant dense<0.000000e+00> : vector<32x4xf32>
    %76 = tpu.matmul %4, %31, %cst_61 {dimension_numbers = #tpu.dot_dimension_numbers<[1], [0], [0], [1], [0, 0, 1, 1], [], []>} : vector<32x16xf32>, vector<16x4xf32>, vector<32x4xf32> -> vector<32x4xf32>
    %77 = arith.addf %75, %76 : vector<32x4xf32>
    %cst_62 = arith.constant dense<0.000000e+00> : vector<32x4xf32>
    %78 = tpu.matmul %6, %33, %cst_62 {dimension_numbers = #tpu.dot_dimension_numbers<[1], [0], [0], [1], [0, 0, 1, 1], [], []>} : vector<32x16xf32>, vector<16x4xf32>, vector<32x4xf32> -> vector<32x4xf32>
    %79 = arith.addf %77, %78 : vector<32x4xf32>
    %cst_63 = arith.constant dense<0.000000e+00> : vector<32x4xf32>
    %80 = tpu.matmul %8, %42, %cst_63 {dimension_numbers = #tpu.dot_dimension_numbers<[1], [0], [0], [1], [0, 0, 1, 1], [], []>} : vector<32x16xf32>, vector<16x4xf32>, vector<32x4xf32> -> vector<32x4xf32>
    %cst_64 = arith.constant dense<0.000000e+00> : vector<32x4xf32>
    %81 = tpu.matmul %10, %44, %cst_64 {dimension_numbers = #tpu.dot_dimension_numbers<[1], [0], [0], [1], [0, 0, 1, 1], [], []>} : vector<32x16xf32>, vector<16x4xf32>, vector<32x4xf32> -> vector<32x4xf32>
    %82 = arith.addf %80, %81 : vector<32x4xf32>
    %cst_65 = arith.constant dense<0.000000e+00> : vector<32x4xf32>
    %83 = tpu.matmul %12, %43, %cst_65 {dimension_numbers = #tpu.dot_dimension_numbers<[1], [0], [0], [1], [0, 0, 1, 1], [], []>} : vector<32x16xf32>, vector<16x4xf32>, vector<32x4xf32> -> vector<32x4xf32>
    %84 = arith.addf %82, %83 : vector<32x4xf32>
    %cst_66 = arith.constant dense<0.000000e+00> : vector<32x4xf32>
    %85 = tpu.matmul %8, %44, %cst_66 {dimension_numbers = #tpu.dot_dimension_numbers<[1], [0], [0], [1], [0, 0, 1, 1], [], []>} : vector<32x16xf32>, vector<16x4xf32>, vector<32x4xf32> -> vector<32x4xf32>
    %cst_67 = arith.constant dense<0.000000e+00> : vector<32x4xf32>
    %86 = tpu.matmul %10, %43, %cst_67 {dimension_numbers = #tpu.dot_dimension_numbers<[1], [0], [0], [1], [0, 0, 1, 1], [], []>} : vector<32x16xf32>, vector<16x4xf32>, vector<32x4xf32> -> vector<32x4xf32>
    %87 = arith.addf %85, %86 : vector<32x4xf32>
    %cst_68 = arith.constant dense<0.000000e+00> : vector<32x4xf32>
    %88 = tpu.matmul %12, %45, %cst_68 {dimension_numbers = #tpu.dot_dimension_numbers<[1], [0], [0], [1], [0, 0, 1, 1], [], []>} : vector<32x16xf32>, vector<16x4xf32>, vector<32x4xf32> -> vector<32x4xf32>
    %89 = arith.addf %87, %88 : vector<32x4xf32>
    %90 = arith.addf %74, %84 : vector<32x4xf32>
    %91 = arith.addf %79, %89 : vector<32x4xf32>
    %cst_69 = arith.constant dense<0.000000e+00> : vector<32x4xf32>
    %92 = tpu.matmul %14, %54, %cst_69 {dimension_numbers = #tpu.dot_dimension_numbers<[1], [0], [0], [1], [0, 0, 1, 1], [], []>} : vector<32x16xf32>, vector<16x4xf32>, vector<32x4xf32> -> vector<32x4xf32>
    %cst_70 = arith.constant dense<0.000000e+00> : vector<32x4xf32>
    %93 = tpu.matmul %16, %56, %cst_70 {dimension_numbers = #tpu.dot_dimension_numbers<[1], [0], [0], [1], [0, 0, 1, 1], [], []>} : vector<32x16xf32>, vector<16x4xf32>, vector<32x4xf32> -> vector<32x4xf32>
    %94 = arith.addf %92, %93 : vector<32x4xf32>
    %cst_71 = arith.constant dense<0.000000e+00> : vector<32x4xf32>
    %95 = tpu.matmul %18, %55, %cst_71 {dimension_numbers = #tpu.dot_dimension_numbers<[1], [0], [0], [1], [0, 0, 1, 1], [], []>} : vector<32x16xf32>, vector<16x4xf32>, vector<32x4xf32> -> vector<32x4xf32>
    %96 = arith.addf %94, %95 : vector<32x4xf32>
    %cst_72 = arith.constant dense<0.000000e+00> : vector<32x4xf32>
    %97 = tpu.matmul %14, %56, %cst_72 {dimension_numbers = #tpu.dot_dimension_numbers<[1], [0], [0], [1], [0, 0, 1, 1], [], []>} : vector<32x16xf32>, vector<16x4xf32>, vector<32x4xf32> -> vector<32x4xf32>
    %cst_73 = arith.constant dense<0.000000e+00> : vector<32x4xf32>
    %98 = tpu.matmul %16, %55, %cst_73 {dimension_numbers = #tpu.dot_dimension_numbers<[1], [0], [0], [1], [0, 0, 1, 1], [], []>} : vector<32x16xf32>, vector<16x4xf32>, vector<32x4xf32> -> vector<32x4xf32>
    %99 = arith.addf %97, %98 : vector<32x4xf32>
    %cst_74 = arith.constant dense<0.000000e+00> : vector<32x4xf32>
    %100 = tpu.matmul %18, %57, %cst_74 {dimension_numbers = #tpu.dot_dimension_numbers<[1], [0], [0], [1], [0, 0, 1, 1], [], []>} : vector<32x16xf32>, vector<16x4xf32>, vector<32x4xf32> -> vector<32x4xf32>
    %101 = arith.addf %99, %100 : vector<32x4xf32>
    %102 = arith.addf %90, %96 : vector<32x4xf32>
    %103 = arith.addf %91, %101 : vector<32x4xf32>
    %104 = arith.maximumf %102, %103 : vector<32x4xf32>
    %cst_75 = arith.constant dense<0.000000e+00> : vector<32x4xf32>
    %105 = tpu.matmul %2, %42, %cst_75 {dimension_numbers = #tpu.dot_dimension_numbers<[1], [0], [0], [1], [0, 0, 1, 1], [], []>} : vector<32x16xf32>, vector<16x4xf32>, vector<32x4xf32> -> vector<32x4xf32>
    %cst_76 = arith.constant dense<0.000000e+00> : vector<32x4xf32>
    %106 = tpu.matmul %4, %44, %cst_76 {dimension_numbers = #tpu.dot_dimension_numbers<[1], [0], [0], [1], [0, 0, 1, 1], [], []>} : vector<32x16xf32>, vector<16x4xf32>, vector<32x4xf32> -> vector<32x4xf32>
    %107 = arith.addf %105, %106 : vector<32x4xf32>
    %cst_77 = arith.constant dense<0.000000e+00> : vector<32x4xf32>
    %108 = tpu.matmul %6, %43, %cst_77 {dimension_numbers = #tpu.dot_dimension_numbers<[1], [0], [0], [1], [0, 0, 1, 1], [], []>} : vector<32x16xf32>, vector<16x4xf32>, vector<32x4xf32> -> vector<32x4xf32>
    %109 = arith.addf %107, %108 : vector<32x4xf32>
    %cst_78 = arith.constant dense<0.000000e+00> : vector<32x4xf32>
    %110 = tpu.matmul %2, %44, %cst_78 {dimension_numbers = #tpu.dot_dimension_numbers<[1], [0], [0], [1], [0, 0, 1, 1], [], []>} : vector<32x16xf32>, vector<16x4xf32>, vector<32x4xf32> -> vector<32x4xf32>
    %cst_79 = arith.constant dense<0.000000e+00> : vector<32x4xf32>
    %111 = tpu.matmul %4, %43, %cst_79 {dimension_numbers = #tpu.dot_dimension_numbers<[1], [0], [0], [1], [0, 0, 1, 1], [], []>} : vector<32x16xf32>, vector<16x4xf32>, vector<32x4xf32> -> vector<32x4xf32>
    %112 = arith.addf %110, %111 : vector<32x4xf32>
    %cst_80 = arith.constant dense<0.000000e+00> : vector<32x4xf32>
    %113 = tpu.matmul %6, %45, %cst_80 {dimension_numbers = #tpu.dot_dimension_numbers<[1], [0], [0], [1], [0, 0, 1, 1], [], []>} : vector<32x16xf32>, vector<16x4xf32>, vector<32x4xf32> -> vector<32x4xf32>
    %114 = arith.addf %112, %113 : vector<32x4xf32>
    %cst_81 = arith.constant dense<0.000000e+00> : vector<32x4xf32>
    %115 = tpu.matmul %8, %54, %cst_81 {dimension_numbers = #tpu.dot_dimension_numbers<[1], [0], [0], [1], [0, 0, 1, 1], [], []>} : vector<32x16xf32>, vector<16x4xf32>, vector<32x4xf32> -> vector<32x4xf32>
    %cst_82 = arith.constant dense<0.000000e+00> : vector<32x4xf32>
    %116 = tpu.matmul %10, %56, %cst_82 {dimension_numbers = #tpu.dot_dimension_numbers<[1], [0], [0], [1], [0, 0, 1, 1], [], []>} : vector<32x16xf32>, vector<16x4xf32>, vector<32x4xf32> -> vector<32x4xf32>
    %117 = arith.addf %115, %116 : vector<32x4xf32>
    %cst_83 = arith.constant dense<0.000000e+00> : vector<32x4xf32>
    %118 = tpu.matmul %12, %55, %cst_83 {dimension_numbers = #tpu.dot_dimension_numbers<[1], [0], [0], [1], [0, 0, 1, 1], [], []>} : vector<32x16xf32>, vector<16x4xf32>, vector<32x4xf32> -> vector<32x4xf32>
    %119 = arith.addf %117, %118 : vector<32x4xf32>
    %cst_84 = arith.constant dense<0.000000e+00> : vector<32x4xf32>
    %120 = tpu.matmul %8, %56, %cst_84 {dimension_numbers = #tpu.dot_dimension_numbers<[1], [0], [0], [1], [0, 0, 1, 1], [], []>} : vector<32x16xf32>, vector<16x4xf32>, vector<32x4xf32> -> vector<32x4xf32>
    %cst_85 = arith.constant dense<0.000000e+00> : vector<32x4xf32>
    %121 = tpu.matmul %10, %55, %cst_85 {dimension_numbers = #tpu.dot_dimension_numbers<[1], [0], [0], [1], [0, 0, 1, 1], [], []>} : vector<32x16xf32>, vector<16x4xf32>, vector<32x4xf32> -> vector<32x4xf32>
    %122 = arith.addf %120, %121 : vector<32x4xf32>
    %cst_86 = arith.constant dense<0.000000e+00> : vector<32x4xf32>
    %123 = tpu.matmul %12, %57, %cst_86 {dimension_numbers = #tpu.dot_dimension_numbers<[1], [0], [0], [1], [0, 0, 1, 1], [], []>} : vector<32x16xf32>, vector<16x4xf32>, vector<32x4xf32> -> vector<32x4xf32>
    %124 = arith.addf %122, %123 : vector<32x4xf32>
    %125 = arith.addf %109, %119 : vector<32x4xf32>
    %126 = arith.addf %114, %124 : vector<32x4xf32>
    %cst_87 = arith.constant dense<0.000000e+00> : vector<32x4xf32>
    %127 = tpu.matmul %14, %66, %cst_87 {dimension_numbers = #tpu.dot_dimension_numbers<[1], [0], [0], [1], [0, 0, 1, 1], [], []>} : vector<32x16xf32>, vector<16x4xf32>, vector<32x4xf32> -> vector<32x4xf32>
    %cst_88 = arith.constant dense<0.000000e+00> : vector<32x4xf32>
    %128 = tpu.matmul %16, %68, %cst_88 {dimension_numbers = #tpu.dot_dimension_numbers<[1], [0], [0], [1], [0, 0, 1, 1], [], []>} : vector<32x16xf32>, vector<16x4xf32>, vector<32x4xf32> -> vector<32x4xf32>
    %129 = arith.addf %127, %128 : vector<32x4xf32>
    %cst_89 = arith.constant dense<0.000000e+00> : vector<32x4xf32>
    %130 = tpu.matmul %18, %67, %cst_89 {dimension_numbers = #tpu.dot_dimension_numbers<[1], [0], [0], [1], [0, 0, 1, 1], [], []>} : vector<32x16xf32>, vector<16x4xf32>, vector<32x4xf32> -> vector<32x4xf32>
    %131 = arith.addf %129, %130 : vector<32x4xf32>
    %cst_90 = arith.constant dense<0.000000e+00> : vector<32x4xf32>
    %132 = tpu.matmul %14, %68, %cst_90 {dimension_numbers = #tpu.dot_dimension_numbers<[1], [0], [0], [1], [0, 0, 1, 1], [], []>} : vector<32x16xf32>, vector<16x4xf32>, vector<32x4xf32> -> vector<32x4xf32>
    %cst_91 = arith.constant dense<0.000000e+00> : vector<32x4xf32>
    %133 = tpu.matmul %16, %67, %cst_91 {dimension_numbers = #tpu.dot_dimension_numbers<[1], [0], [0], [1], [0, 0, 1, 1], [], []>} : vector<32x16xf32>, vector<16x4xf32>, vector<32x4xf32> -> vector<32x4xf32>
    %134 = arith.addf %132, %133 : vector<32x4xf32>
    %cst_92 = arith.constant dense<0.000000e+00> : vector<32x4xf32>
    %135 = tpu.matmul %18, %69, %cst_92 {dimension_numbers = #tpu.dot_dimension_numbers<[1], [0], [0], [1], [0, 0, 1, 1], [], []>} : vector<32x16xf32>, vector<16x4xf32>, vector<32x4xf32> -> vector<32x4xf32>
    %136 = arith.addf %134, %135 : vector<32x4xf32>
    %137 = arith.addf %125, %131 : vector<32x4xf32>
    %138 = arith.addf %126, %136 : vector<32x4xf32>
    %139 = arith.maximumf %137, %138 : vector<32x4xf32>
    %140 = arith.maximumf %104, %139 : vector<32x4xf32>
    %141 = vector.broadcast %0 : vector<32x1xf32> to vector<32x4xf32>
    %142 = arith.addf %140, %141 : vector<32x4xf32>
    %cst_93 = arith.constant 0.000000e+00 : f32
    %143 = vector.broadcast %cst_93 : f32 to vector<32x4xf32>
    %144 = arith.maximumf %142, %143 : vector<32x4xf32>
    %c0_94 = arith.constant 0 : index
    %c0_95 = arith.constant 0 : index
    %c0_96 = arith.constant 0 : index
    %145 = vector.load %arg5[%c0_94, %c0_95, %c0_96] : memref<1x32x4xf32, #tpu.memory_space<vmem>>, vector<1x32x4xf32>
    %146 = vector.shape_cast %145 : vector<1x32x4xf32> to vector<32x4xf32>
    %147 = vector.shape_cast %144 : vector<32x4xf32> to vector<1x32x4xf32>
    tpu.vector_store %arg5[%c0_94, %c0_95, %c0_96], %147 {strides = array<i32>} : memref<1x32x4xf32, #tpu.memory_space<vmem>>, vector<1x32x4xf32>,
    return
  }
  func.func @transform_0(%arg0: i32) -> (i32, i32, i32) {
    %c0_i32 = arith.constant 0 : i32
    %c0_i32_0 = arith.constant 0 : i32
    %c0_i32_1 = arith.constant 0 : i32
    %c0_i32_2 = arith.constant 0 : i32
    return %c0_i32, %c0_i32_0, %c0_i32_1 : i32, i32, i32
  }
  func.func @transform_1(%arg0: i32) -> (i32, i32, i32) {
    %c0_i32 = arith.constant 0 : i32
    %c0_i32_0 = arith.constant 0 : i32
    %c0_i32_1 = arith.constant 0 : i32
    %c0_i32_2 = arith.constant 0 : i32
    return %c0_i32, %c0_i32_0, %c0_i32_1 : i32, i32, i32
  }
  func.func @transform_2(%arg0: i32) -> (i32, i32, i32, i32) {
    %c0_i32 = arith.constant 0 : i32
    %c0_i32_0 = arith.constant 0 : i32
    %c0_i32_1 = arith.constant 0 : i32
    %c0_i32_2 = arith.constant 0 : i32
    %c0_i32_3 = arith.constant 0 : i32
    return %c0_i32, %c0_i32_0, %c0_i32_1, %c0_i32_2 : i32, i32, i32, i32
  }
  func.func @transform_3(%arg0: i32) -> (i32, i32) {
    %c0_i32 = arith.constant 0 : i32
    %c0_i32_0 = arith.constant 0 : i32
    %c0_i32_1 = arith.constant 0 : i32
    return %c0_i32, %c0_i32_0 : i32, i32
  }
  func.func @transform_4(%arg0: i32) -> (i32, i32, i32) {
    %c0_i32 = arith.constant 0 : i32
    %c0_i32_0 = arith.constant 0 : i32
    %c0_i32_1 = arith.constant 0 : i32
    return %arg0, %c0_i32, %c0_i32_0 : i32, i32, i32
  }
}

module attributes {stable_mosaic.version = 11 : i64} {
  func.func @_fc_kernel(%arg0: i32, %arg1: memref<2x128xf32, #tpu.memory_space<vmem>>, %arg2: memref<128x64xf32, #tpu.memory_space<vmem>>, %arg3: memref<1x64xf32, #tpu.memory_space<vmem>>, %arg4: memref<64x128xf32, #tpu.memory_space<vmem>>, %arg5: memref<1x128xf32, #tpu.memory_space<vmem>>, %arg6: memref<2x128xf32, #tpu.memory_space<vmem>>) attributes {dimension_semantics = [#tpu.dimension_semantics<parallel>], iteration_bounds = array<i64: 1>, scalar_prefetch = 0 : i64, scratch_operands = 0 : i64, tpu.core_type = #tpu.core_type<tc>, window_params = [{transform_indices = @transform_0, window_bounds = array<i64: 2, 128>}, {pipeline_mode = #tpu.pipeline_mode<synchronous>, transform_indices = @transform_1, window_bounds = array<i64: 128, 64>}, {pipeline_mode = #tpu.pipeline_mode<synchronous>, transform_indices = @transform_2, window_bounds = array<i64: 1, 64>}, {pipeline_mode = #tpu.pipeline_mode<synchronous>, transform_indices = @transform_3, window_bounds = array<i64: 64, 128>}, {pipeline_mode = #tpu.pipeline_mode<synchronous>, transform_indices = @transform_4, window_bounds = array<i64: 1, 128>}, {transform_indices = @transform_5, window_bounds = array<i64: 2, 128>}]} {
    %c0 = arith.constant 0 : index
    %c0_0 = arith.constant 0 : index
    %0 = vector.load %arg1[%c0, %c0_0] : memref<2x128xf32, #tpu.memory_space<vmem>>, vector<2x128xf32>
    %c0_1 = arith.constant 0 : index
    %c0_2 = arith.constant 0 : index
    %1 = vector.load %arg2[%c0_1, %c0_2] : memref<128x64xf32, #tpu.memory_space<vmem>>, vector<128x64xf32>
    %cst = arith.constant dense<0.000000e+00> : vector<2x64xf32>
    %2 = tpu.matmul %0, %1, %cst {dimension_numbers = #tpu.dot_dimension_numbers<[1], [0], [0], [1], [0, 0, 1, 1], [], []>} : vector<2x128xf32>, vector<128x64xf32>, vector<2x64xf32> -> vector<2x64xf32>
    %c0_3 = arith.constant 0 : index
    %c0_4 = arith.constant 0 : index
    %3 = vector.load %arg3[%c0_3, %c0_4] : memref<1x64xf32, #tpu.memory_space<vmem>>, vector<1x64xf32>
    %4 = vector.broadcast %3 : vector<1x64xf32> to vector<2x64xf32>
    %5 = arith.addf %2, %4 : vector<2x64xf32>
    %cst_5 = arith.constant 0.000000e+00 : f32
    %6 = vector.broadcast %cst_5 : f32 to vector<2x64xf32>
    %7 = arith.maximumf %5, %6 : vector<2x64xf32>
    %c0_6 = arith.constant 0 : index
    %c0_7 = arith.constant 0 : index
    %8 = vector.load %arg4[%c0_6, %c0_7] : memref<64x128xf32, #tpu.memory_space<vmem>>, vector<64x128xf32>
    %cst_8 = arith.constant dense<0.000000e+00> : vector<2x128xf32>
    %9 = tpu.matmul %7, %8, %cst_8 {dimension_numbers = #tpu.dot_dimension_numbers<[1], [0], [0], [1], [0, 0, 1, 1], [], []>} : vector<2x64xf32>, vector<64x128xf32>, vector<2x128xf32> -> vector<2x128xf32>
    %c0_9 = arith.constant 0 : index
    %c0_10 = arith.constant 0 : index
    %10 = vector.load %arg5[%c0_9, %c0_10] : memref<1x128xf32, #tpu.memory_space<vmem>>, vector<1x128xf32>
    %11 = vector.broadcast %10 : vector<1x128xf32> to vector<2x128xf32>
    %12 = arith.addf %9, %11 : vector<2x128xf32>
    %c0_11 = arith.constant 0 : index
    %c0_12 = arith.constant 0 : index
    %13 = vector.load %arg6[%c0_11, %c0_12] : memref<2x128xf32, #tpu.memory_space<vmem>>, vector<2x128xf32>
    tpu.vector_store %arg6[%c0_11, %c0_12], %12 {strides = array<i32>} : memref<2x128xf32, #tpu.memory_space<vmem>>, vector<2x128xf32>,
    return
  }
  func.func @transform_0(%arg0: i32) -> (i32, i32) {
    %c0_i32 = arith.constant 0 : i32
    %c0_i32_0 = arith.constant 0 : i32
    return %arg0, %c0_i32 : i32, i32
  }
  func.func @transform_1(%arg0: i32) -> (i32, i32) {
    %c0_i32 = arith.constant 0 : i32
    %c0_i32_0 = arith.constant 0 : i32
    %c0_i32_1 = arith.constant 0 : i32
    return %c0_i32, %c0_i32_0 : i32, i32
  }
  func.func @transform_2(%arg0: i32) -> (i32, i32) {
    %c0_i32 = arith.constant 0 : i32
    %c0_i32_0 = arith.constant 0 : i32
    %c0_i32_1 = arith.constant 0 : i32
    return %c0_i32, %c0_i32_0 : i32, i32
  }
  func.func @transform_3(%arg0: i32) -> (i32, i32) {
    %c0_i32 = arith.constant 0 : i32
    %c0_i32_0 = arith.constant 0 : i32
    %c0_i32_1 = arith.constant 0 : i32
    return %c0_i32, %c0_i32_0 : i32, i32
  }
  func.func @transform_4(%arg0: i32) -> (i32, i32) {
    %c0_i32 = arith.constant 0 : i32
    %c0_i32_0 = arith.constant 0 : i32
    %c0_i32_1 = arith.constant 0 : i32
    return %c0_i32, %c0_i32_0 : i32, i32
  }
  func.func @transform_5(%arg0: i32) -> (i32, i32) {
    %c0_i32 = arith.constant 0 : i32
    %c0_i32_0 = arith.constant 0 : i32
    return %arg0, %c0_i32 : i32, i32
  }
}

</mosaic_0001>

<bundles_post_ra>
// kernel: cifar_tiny_forward.7
= control target key start
LH: loop header
LB: loop body
LE: loop exit
PB: predicated region body
PF: predicated region fallthrough
CT: control target
= control target key end

     0   :  { %v328_v1 = vmov 0.0   ;;  %vm329_vm0 = vmmov 0   ;;  %s471_s0 = inlined_call_operand.vmem [shape: f32[2,128], index: 0, kind: input, shape index: {}]   ;;  %s472_s1 = inlined_call_operand.vmem [shape: f32[128,64], index: 1, kind: input, shape index: {}]   ;;  %s473_s2 = inlined_call_operand.vmem [shape: f32[1,64], index: 2, kind: input, shape index: {}]   ;;  %s474_s3 = inlined_call_operand.vmem [shape: f32[64,128], index: 3, kind: input, shape index: {}]   ;;  %s475_s4 = inlined_call_operand.vmem [shape: f32[1,128], index: 4, kind: input, shape index: {}]   ;;  %s476_s5 = inlined_call_operand.hbm [shape: f32[2,128], index: 5, kind: output, shape index: {}]  }
   0x1   :  { %v37_v0 = vld [vmem:[%s472_s1 + $0x78] sm:$0xff]  ;;  %249 = vmatprep.subr.mxu0 %v328_v1  ;;  %v36_v2 = vld [vmem:[%s472_s1 + $0x70] sm:$0xff]  ;;  %281 = vmatprep.mubr.msk.f32.mxu0 %vm329_vm0, %v328_v1  ;;  %v35_v3 = vld [vmem:[%s472_s1 + $0x68] sm:$0xff] }
   0x2   :  { %250 = vmatpush3.msra.mxu0 %v37_v0  ;;  %284 = vmatprep.subr.mxu1 %v328_v1  ;;  %v34_v4 = vld [vmem:[%s472_s1 + $0x60] sm:$0xff]  ;;  %v123_v5 = vld [vmem:[%s474_s3 + $0x38] sm:$0xff]  ;;  %v122_v6 = vld [vmem:[%s474_s3 + $0x30] sm:$0xff] }
   0x3   :  { %251 = vmatprep.subr.mxu0 %v328_v1  ;;  %300 = vmatprep.mubr.msk.f32.mxu1 %vm329_vm0, %v328_v1  ;;  %v33_v7 = vld [vmem:[%s472_s1 + $0x58] sm:$0xff]  ;;  %v121_v8 = vld [vmem:[%s474_s3 + $0x28] sm:$0xff] }
   0x4   :  { %252 = vmatpush3.msra.mxu0 %v36_v2  ;;  %285 = vmatpush3.msra.mxu1 %v123_v5 }
   0x5   :  { %253 = vmatprep.subr.mxu0 %v328_v1  ;;  %286 = vmatprep.subr.mxu1 %v328_v1 }
   0x6   :  { %254 = vmatpush3.msra.mxu0 %v35_v3 }
   0x7   :  { %255 = vmatprep.subr.mxu0 %v328_v1 }
   0x8   :  { %10 = vsyncpa [#allocation3], 0  ;;  %256 = vmatpush3.msra.mxu0 %v34_v4  ;;  %287 = vmatpush3.msra.mxu1 %v122_v6  ;;  %v32_v9 = vld [vmem:[%s472_s1 + $0x50] sm:$0xff]  ;;  %v120_v10 = vld [vmem:[%s474_s3 + $0x20] sm:$0xff]  ;;  %vm131_vm1 = vcmask 523264   ;;  %s330_s20 = smov [#allocation2]  }
   0x9   :  { %257 = vmatprep.subr.mxu0 %v328_v1  ;;  %288 = vmatprep.subr.mxu1 %v328_v1  ;;  %v31_v11 = vld [vmem:[%s472_s1 + $0x48] sm:$0xff]  ;;  %v119_v12 = vld [vmem:[%s474_s3 + $0x18] sm:$0xff]  ;;  %v30_v13 = vld [vmem:[%s472_s1 + $0x40] sm:$0xff]  ;;  %s212_s21 = sshll.u32 %s330_s20, 4  ;;  %s213_s21 = int_to_ptr.vmem [resolvable:$true] %s212_s21 }
   0xa   :  { %258 = vmatpush3.msra.mxu0 %v33_v7  ;;  %289 = vmatpush3.msra.mxu1 %v121_v8  ;;  %v29_v14 = vld [vmem:[%s472_s1 + $0x38] sm:$0xff]  ;;  %v28_v15 = vld [vmem:[%s472_s1 + $0x30] sm:$0xff]  ;;  %v27_v16 = vld [vmem:[%s472_s1 + $0x28] sm:$0xff]  ;;  %p311_p1 = scmp.lt.s32.totalorder %s213_s21, %s213_s21 }
   0xb   :  { %259 = vmatprep.subr.mxu0 %v328_v1  ;;  %290 = vmatprep.subr.mxu1 %v328_v1  ;;  %v26_v17 = vld [vmem:[%s472_s1 + $0x20] sm:$0xff]  ;;  %v25_v18 = vld [vmem:[%s472_s1 + $0x18] sm:$0xff]  ;;  %v24_v19 = vld [vmem:[%s472_s1 + $0x10] sm:$0xff] }
   0xc   :  { %260 = vmatpush3.msra.mxu0 %v32_v9  ;;  %291 = vmatpush3.msra.mxu1 %v120_v10  ;;  %v23_v20 = vld [vmem:[%s472_s1 + $0x8] sm:$0xff]  ;;  %v22_v21 = vld [vmem:[%s472_s1] sm:$0xff]  ;;  %v118_v23 = vld [vmem:[%s474_s3 + $0x10] sm:$0xff] }
   0xd   :  { %261 = vmatprep.subr.mxu0 %v328_v1  ;;  %292 = vmatprep.subr.mxu1 %v328_v1  ;;  %v21_v22 = vld [vmem:[%s471_s0] sm:$0x3]  ;;  %v117_v24 = vld [vmem:[%s474_s3 + $0x8] sm:$0xff] }
   0xe   :  { %262 = vmatpush3.msra.mxu0 %v31_v11  ;;  %293 = vmatpush3.msra.mxu1 %v119_v12  ;;  %v116_v25 = vld [vmem:[%s474_s3] sm:$0xff]  ;;  %s306_s3 = scalar_lea.vmem %s213_s21, 32 }
   0xf   :  { %263 = vmatprep.subr.mxu0 %v328_v1  ;;  %294 = vmatprep.subr.mxu1 %v328_v1  ;;  %v220_v26 = vld [vmem:[%s473_s2] ss:$0 sm:$0xff]  ;;  %p307_p0 = scmp.ne.s32.totalorder %s213_s21, %s306_s3  ;;  %p312_p2 = scmp.lt.s32.totalorder %s306_s3, %s306_s3 }
  0x10   :  { %264 = vmatpush3.msra.mxu0 %v30_v13  ;;  %295 = vmatpush3.msra.mxu1 %v118_v23  ;;  %v221_v31 = vld [vmem:[%s475_s4] ss:$0 sm:$0xff] }
  0x11   :  { %265 = vmatprep.subr.mxu0 %v328_v1  ;;  %296 = vmatprep.subr.mxu1 %v328_v1  ;;  %p313_p3 = por %p312_p2, %p311_p1 }
  0x12   :  { %266 = vmatpush3.msra.mxu0 %v29_v14  ;;  %297 = vmatpush3.msra.mxu1 %v117_v24 }
  0x13   :  { %267 = vmatprep.subr.mxu0 %v328_v1  ;;  %298 = vmatprep.subr.mxu1 %v328_v1  ;;  %p314_p4 = pnand %p313_p3, %p307_p0 }
  0x14   :  { %268 = vmatpush3.msra.mxu0 %v28_v15  ;;  %299 = vmatpush3.msra.mxu1 %v116_v25 }
  0x15   :  { %269 = vmatprep.subr.mxu0 %v328_v1 }
  0x16   :  { %270 = vmatpush3.msra.mxu0 %v27_v16 }
  0x17   :  { %271 = vmatprep.subr.mxu0 %v328_v1 }
  0x18   :  { %272 = vmatpush3.msra.mxu0 %v26_v17 }
  0x19   :  { %273 = vmatprep.subr.mxu0 %v328_v1 }
  0x1a   :  { %274 = vmatpush3.msra.mxu0 %v25_v18 }
  0x1b   :  { %275 = vmatprep.subr.mxu0 %v328_v1 }
  0x1c   :  { %276 = vmatpush3.msra.mxu0 %v24_v19 }
  0x1d   :  { %277 = vmatprep.subr.mxu0 %v328_v1 }
  0x1e   :  { %278 = vmatpush3.msra.mxu0 %v23_v20 }
  0x1f   :  { %279 = vmatprep.subr.mxu0 %v328_v1 }
  0x20   :  { %280 = vmatpush3.msra.mxu0 %v22_v21 }
  0x21   :  { %282 = vmatmul.mubr.f32.vlgmr.msra.gmra.mxu0 %v21_v22 }
  0xe1   :  { %v111_v27 = vpop.f32.mrf.mxu0 }
  0xe2   :  { %v112_v28 = vadd.f32 %v220_v26, %v111_v27 }
  0xe3   :  { %v283_v29 = vpop.f32.mrf.mxu0 }
  0xe4   :  { %v115_v30 = vmax.f32 %v112_v28, 0.0 }
  0xe6   :  { %301 = vmatmul.mubr.msk.f32.vlgmr.msra.gmra.mxu1 %vm131_vm1, %v115_v30 }
 0x1a6   :  { %v201_v32 = vpop.f32.mrf.mxu1 }
 0x1a7   :  { %v202_v33 = vadd.f32 %v221_v31, %v201_v32 }
 0x1a8   :  { %v302_v34 = vpop.f32.mrf.mxu1 }
 0x1a9   :  { %205 = vst [vmem:[#allocation2] sm:$0x3] %v202_v33 }
 0x1aa   :  { %317 = shalt.err (!%p314_p4)
}
 0x1ab   :  { %215 = dma.vmem_to_hbm [thread:$0]  %s213_s21, 32, %s476_s5, [#allocation3]  }
 0x1ac   :  { %326 = dma.done.wait [#allocation3], 32  }
 0x1ad   :  { %327 = vsyncadd [#allocation3], 4294967264 }
 0x1ae   :  { %219 = vsyncpa [#allocation3], 1 }

// kernel: cifar_tiny_forward.6
= control target key start
LH: loop header
LB: loop body
LE: loop exit
PB: predicated region body
PF: predicated region fallthrough
CT: control target
= control target key end

     0   :  { %s4528_s15 = smov 0   ;;  %s5321_s0 = inlined_call_operand.vmem [shape: f32[6,16,6], index: 0, kind: input, shape index: {}]   ;;  %s5322_s1 = inlined_call_operand.vmem [shape: f32[6,16,6], index: 1, kind: input, shape index: {}]   ;;  %s5323_s2 = inlined_call_operand.vmem [shape: f32[3,3,32,16], index: 2, kind: input, shape index: {}]   ;;  %s5324_s3 = inlined_call_operand.vmem [shape: f32[32,1], index: 3, kind: input, shape index: {}]   ;;  %s5325_s4 = inlined_call_operand.vmem [shape: f32[2,32,4], index: 4, kind: output, shape index: {}]  }
   0x1 LB: > { %s4534_s16 = sadd.s32 4294967295, %s4499_s15   ;;  %p3690_p0 = scmp.ge.s32.totalorder %s4499_s15, 1  ;;  %s4499_s15 = sphi %s4528_s15, %s14_s15  }
   0x2   : > { %p152_p1 = scmp.lt.s32.totalorder %s4499_s15, 3 }
   0x4   : > { %p153_p2 = pnand %p3690_p0, %p152_p1 }
   0x6   : > { %156 = sbr.rel (%p153_p2) target bundleno = 485 (0x1e5), region = 36 }
   0xb   : > { %s3898_s17 = sshll.u32 %s4534_s16, 5  ;;  %v4542_v0 = vld [vmem:[%s5323_s2 + $0x20] sm:$0xff]  ;;  %vm258_vm0 = vcmask 130048   ;;  %s4501_s28 = smov 126   ;;  %v4580_v6 = vld [vmem:[%s5323_s2 + $0x28] sm:$0xff]  ;;  %v4593_v8 = vld [vmem:[%s5323_s2 + $0x30] sm:$0xff] }
   0xc   : > { %v4547_v1 = vld [vmem:[%s5323_s2] sm:$0xff]  ;;  %s4552_s24 = scalar_lea.vmem %s5321_s0, %s3898_s17  ;;  %s4557_s27 = scalar_lea.vmem %s5322_s1, %s3898_s17  ;;  %4125 = vmatprep.mubr.msk.f32.mxu0 %vm258_vm0, %v4542_v0  ;;  %v4585_v7 = vld [vmem:[%s5323_s2 + $0x8] sm:$0xff]  ;;  %v4598_v9 = vld [vmem:[%s5323_s2 + $0x10] sm:$0xff]  ;;  %vm3611_vm1 = vcmask 31744  }
   0xd   : > { %4135 = vmatprep.mubr.msk.f32.mxu1 %vm258_vm0, %v4547_v1  ;;  %v230_v2 = vld [vmem:[%s4552_s24 + $0x8] sm:$0xff]  ;;  %v229_v4 = vld [vmem:[%s4552_s24] sm:$0xff]  ;;  %v4601_v10 = vld [vmem:[%s4552_s24 + $0x18] sm:$0xff]  ;;  %p173_p3 = scmp.lt.s32.totalorder %s4534_s16, 1 }
   0xe   : > { %v4565_v3 = vld [vmem:[%s4557_s27 + $0x8] sm:$0xff]  ;;  %457 = vrot.lane.b32.xlu0 %v230_v2, %s4501_s28  ;;  %v4572_v5 = vld [vmem:[%s4557_s27] sm:$0xff]  ;;  %4131 = vmatprep.subr.mxu1 %v230_v2  ;;  %v4604_v11 = vld [vmem:[%s4552_s24 + $0x10] sm:$0xff] }
   0xf   : > { %736 = vrot.lane.b32.xlu1 %v4565_v3, %s4501_s28  ;;  %4121 = vmatprep.subr.mxu0 %v4565_v3  ;;  %v4618_v12 = vld [vmem:[%s5323_s2 + $0x38] sm:$0xff]  ;;  %v4632_v14 = vld [vmem:[%s5323_s2 + $0x40] sm:$0xff]  ;;  %v4638_v16 = vld [vmem:[%s4557_s27 + $0x10] sm:$0xff]  ;;  %s5369_s16 = smov (!%p173_p3, %s4534_s16), 1 }
  0x10   : > { %4122 = vmatpush3.msra.mxu0 %v4565_v3  ;;  %4132 = vmatpush3.msra.mxu1 %v230_v2  ;;  %v4623_v13 = vld [vmem:[%s5323_s2 + $0x18] sm:$0xff]  ;;  %v4653_v17 = vld [vmem:[%s4552_s24 + $0x28] sm:$0xff]  ;;  %v4656_v18 = vld [vmem:[%s4552_s24 + $0x20] sm:$0xff]  ;;  %s3897_s7 = sshll.u32 %s5369_s16, 5 }
  0x11   : > { %4123 = vmatprep.subr.mxu0 %v4572_v5  ;;  %4133 = vmatprep.subr.mxu1 %v229_v4  ;;  %v4635_v15 = vld [vmem:[%s4557_s27 + $0x18] sm:$0xff]  ;;  %v4663_v19 = vld [vmem:[%s4557_s27 + $0x28] sm:$0xff]  ;;  %v4666_v20 = vld [vmem:[%s4557_s27 + $0x20] sm:$0xff]  ;;  %s177_s10 = scalar_lea.vmem %s5325_s4, %s3897_s7 }
  0x12   : > { %455 = vrot.lane.b32.xlu0 %v229_v4, %s4501_s28  ;;  %4124 = vmatpush3.msra.mxu0 %v4572_v5  ;;  %v4673_v21 = vld [vmem:[%s4552_s24 + $0x38] sm:$0xff]  ;;  %v4676_v22 = vld [vmem:[%s4552_s24 + $0x30] sm:$0xff]  ;;  %v4695_v27 = vld [vmem:[%s5323_s2 + $0x48] sm:$0xff] }
  0x13   : > { %734 = vrot.lane.b32.xlu1 %v4572_v5, %s4501_s28  ;;  %4134 = vmatpush3.msra.mxu1 %v229_v4  ;;  %v4683_v23 = vld [vmem:[%s4557_s27 + $0x38] sm:$0xff]  ;;  %v4686_v24 = vld [vmem:[%s4557_s27 + $0x30] sm:$0xff]  ;;  %v4742_v32 = vld [vmem:[%s5323_s2 + $0x80] sm:$0xff] }
  0x14   : > { %4126 = vmatmul.mubr.msk.f32.vlgmr.msra.gmra.mxu0 %vm258_vm0, %v4580_v6  ;;  %4136 = vmatmul.mubr.msk.f32.vlgmr.msra.gmra.mxu1 %vm258_vm0, %v4585_v7  ;;  %v4700_v29 = vld [vmem:[%s5323_s2 + $0x50] sm:$0xff]  ;;  %v4712_v30 = vld [vmem:[%s5323_s2 + $0x58] sm:$0xff]  ;;  %v4751_v33 = vld [vmem:[%s5323_s2 + $0x60] sm:$0xff] }
  0x15   : > { %4128 = vmatprep.mubr.msk.f32.mxu0 %vm258_vm0, %v4593_v8  ;;  %4138 = vmatprep.mubr.msk.f32.mxu1 %vm258_vm0, %v4598_v9  ;;  %v4758_v34 = vld [vmem:[%s5323_s2 + $0x88] sm:$0xff]  ;;  %v4780_v37 = vld [vmem:[%s5323_s2 + $0x90] sm:$0xff]  ;;  %v4792_v39 = vld [vmem:[%s5323_s2 + $0x98] sm:$0xff] }
  0x16   : > { %1027 = vrot.lane.b32.xlu0 %v4601_v10, %s4501_s28  ;;  %v4763_v35 = vld [vmem:[%s5323_s2 + $0x68] sm:$0xff]  ;;  %v4785_v38 = vld [vmem:[%s5323_s2 + $0x70] sm:$0xff]  ;;  %v4797_v40 = vld [vmem:[%s5323_s2 + $0x78] sm:$0xff] }
  0x17   : > { %1025 = vrot.lane.b32.xlu1 %v4604_v11, %s4501_s28  ;;  %v4814_v42 = vld [vmem:[%s5323_s2 + $0xa0] sm:$0xff]  ;;  %v4821_v43 = vld [vmem:[%s5323_s2 + $0xa8] sm:$0xff]  ;;  %v4828_v44 = vld [vmem:[%s5323_s2 + $0xb0] sm:$0xff] }
  0x18   : > { %4129 = vmatmul.mubr.msk.f32.gmra.mxu0 %vm258_vm0, %v4618_v12  ;;  %4139 = vmatmul.mubr.msk.f32.gmra.mxu1 %vm258_vm0, %v4623_v13  ;;  %v4846_v46 = vld [vmem:[%s5323_s2 + $0xb8] sm:$0xff]  ;;  %v4882_v48 = vld [vmem:[%s5323_s2 + $0xe0] sm:$0xff]  ;;  %v4898_v50 = vld [vmem:[%s5323_s2 + $0xe8] sm:$0xff] }
  0x19   : > { %4145 = vmatprep.mubr.msk.f32.mxu0 %vm258_vm0, %v4632_v14  ;;  %4155 = vmatprep.mubr.msk.f32.mxu1 %vm258_vm0, %v4542_v0  ;;  %v4891_v49 = vld [vmem:[%s5323_s2 + $0xc0] sm:$0xff]  ;;  %v4903_v51 = vld [vmem:[%s5323_s2 + $0xc8] sm:$0xff]  ;;  %v4920_v53 = vld [vmem:[%s5323_s2 + $0xf0] sm:$0xff] }
  0x1a   : > { %1306 = vrot.lane.b32.xlu0 %v4635_v15, %s4501_s28  ;;  %v4925_v54 = vld [vmem:[%s5323_s2 + $0xd0] sm:$0xff]  ;;  %v4932_v55 = vld [vmem:[%s5323_s2 + $0xf8] sm:$0xff]  ;;  %v4954_v58 = vld [vmem:[%s5323_s2 + $0x100] sm:$0xff] }
  0x1b   : > { %1304 = vrot.lane.b32.xlu1 %v4638_v16, %s4501_s28  ;;  %v4937_v56 = vld [vmem:[%s5323_s2 + $0xd8] sm:$0xff]  ;;  %v4961_v59 = vld [vmem:[%s5323_s2 + $0x108] sm:$0xff]  ;;  %v4968_v60 = vld [vmem:[%s5323_s2 + $0x110] sm:$0xff] }
  0x1c   : > { %v4986_v62 = vld [vmem:[%s5323_s2 + $0x118] sm:$0xff] }
  0x1e   : > { %1605 = vrot.lane.b32.xlu0 %v4653_v17, %s4501_s28 }
  0x1f   : > { %1603 = vrot.lane.b32.xlu1 %v4656_v18, %s4501_s28 }
  0x22   : > { %1884 = vrot.lane.b32.xlu0 %v4663_v19, %s4501_s28 }
  0x23   : > { %1882 = vrot.lane.b32.xlu1 %v4666_v20, %s4501_s28 }
  0x26   : > { %3207 = vrot.lane.b32.xlu0 %v4673_v21, %s4501_s28 }
  0x27   : > { %3205 = vrot.lane.b32.xlu1 %v4676_v22, %s4501_s28 }
  0x2a   : > { %3474 = vrot.lane.b32.xlu0 %v4683_v23, %s4501_s28 }
  0x2b   : > { %3472 = vrot.lane.b32.xlu1 %v4686_v24, %s4501_s28 }
  0x80   : > { %v458_v25 = vpop.permute.xlu0 %457 }
  0x81   : > { %4141 = vmatprep.subr.mxu0 %v458_v25  ;;  %4151 = vmatprep.subr.mxu1 %v458_v25  ;;  %v737_v28 = vpop.permute.xlu1 %736 }
  0x82   : > { %4142 = vmatpush3.msra.mxu0 %v458_v25  ;;  %4152 = vmatpush3.msra.mxu1 %v458_v25 }
  0x84   : > { %v456_v26 = vpop.permute.xlu0 %455 }
  0x85   : > { %4143 = vmatprep.subr.mxu0 %v456_v26  ;;  %4153 = vmatprep.subr.mxu1 %v456_v26  ;;  %v735_v31 = vpop.permute.xlu1 %734 }
  0x86   : > { %4144 = vmatpush3.msra.mxu0 %v456_v26  ;;  %4154 = vmatpush3.msra.mxu1 %v456_v26 }
  0x87   : > { %4146 = vmatmul.mubr.msk.f32.vlgmr.msra.gmra.mxu0 %vm258_vm0, %v4695_v27  ;;  %4156 = vmatmul.mubr.msk.f32.vlgmr.msra.gmra.mxu1 %vm258_vm0, %v4580_v6 }
  0x88   : > { %4161 = vmatprep.subr.mxu0 %v4565_v3  ;;  %4148 = vmatprep.mubr.msk.f32.mxu0 %vm258_vm0, %v4700_v29  ;;  %v4768_v36 = vpop.permute.xlu0 %1027 }
  0x89   : > { %4158 = vmatprep.mubr.msk.f32.mxu1 %vm258_vm0, %v4593_v8  ;;  %4162 = vmatpush3.msra.mxu0 %v4565_v3  ;;  %v4801_v41 = vpop.permute.xlu1 %1025 }
  0x8a   : > { %4171 = vmatprep.subr.mxu1 %v737_v28  ;;  %4163 = vmatprep.subr.mxu0 %v4572_v5 }
  0x8b   : > { %4149 = vmatmul.mubr.msk.f32.gmra.mxu0 %vm258_vm0, %v4712_v30  ;;  %4159 = vmatmul.mubr.msk.f32.gmra.mxu1 %vm258_vm0, %v4618_v12 }
  0x8c   : > { %4172 = vmatpush3.msra.mxu1 %v737_v28  ;;  %4164 = vmatpush3.msra.mxu0 %v4572_v5  ;;  %v4838_v45 = vpop.permute.xlu0 %1306 }
  0x8d   : > { %4173 = vmatprep.subr.mxu1 %v735_v31  ;;  %4165 = vmatprep.mubr.msk.f32.mxu0 %vm258_vm0, %v4547_v1  ;;  %v4852_v47 = vpop.permute.xlu1 %1304 }
  0x8e   : > { %4174 = vmatpush3.msra.mxu1 %v735_v31  ;;  %4175 = vmatprep.mubr.msk.f32.mxu1 %vm258_vm0, %v4632_v14 }
  0x8f   : > { %4166 = vmatmul.mubr.msk.f32.vlgmr.msra.gmra.mxu0 %vm258_vm0, %v4585_v7  ;;  %4176 = vmatmul.mubr.msk.f32.vlgmr.msra.gmra.mxu1 %vm258_vm0, %v4695_v27 }
  0x90   : > { %4181 = vmatprep.subr.mxu0 %v4635_v15  ;;  %4168 = vmatprep.mubr.msk.f32.mxu0 %vm258_vm0, %v4598_v9  ;;  %v4908_v52 = vpop.permute.xlu0 %1605 }
  0x91   : > { %4178 = vmatprep.mubr.msk.f32.mxu1 %vm258_vm0, %v4700_v29  ;;  %4182 = vmatpush3.msra.mxu0 %v4635_v15  ;;  %v4941_v57 = vpop.permute.xlu1 %1603 }
  0x92   : > { %4191 = vmatprep.subr.mxu1 %v4601_v10  ;;  %4183 = vmatprep.subr.mxu0 %v4638_v16 }
  0x93   : > { %4169 = vmatmul.mubr.msk.f32.gmra.mxu0 %vm258_vm0, %v4623_v13  ;;  %4179 = vmatmul.mubr.msk.f32.gmra.mxu1 %vm258_vm0, %v4712_v30 }
  0x94   : > { %4192 = vmatpush3.msra.mxu1 %v4601_v10  ;;  %4184 = vmatpush3.msra.mxu0 %v4638_v16  ;;  %v4978_v61 = vpop.permute.xlu0 %1884 }
  0x95   : > { %4193 = vmatprep.subr.mxu1 %v4604_v11  ;;  %4185 = vmatprep.mubr.msk.f32.mxu0 %vm258_vm0, %v4742_v32  ;;  %v4992_v63 = vpop.permute.xlu1 %1882 }
  0x96   : > { %4194 = vmatpush3.msra.mxu1 %v4604_v11  ;;  %4195 = vmatprep.mubr.msk.f32.mxu1 %vm258_vm0, %v4751_v33 }
  0x97   : > { %4186 = vmatmul.mubr.msk.f32.vlgmr.msra.gmra.mxu0 %vm258_vm0, %v4758_v34  ;;  %4196 = vmatmul.mubr.msk.f32.vlgmr.msra.gmra.mxu1 %vm258_vm0, %v4763_v35 }
  0x98   : > { %4201 = vmatprep.subr.mxu0 %v4768_v36  ;;  %4211 = vmatprep.subr.mxu1 %v4768_v36 }
  0x99   : > { %4202 = vmatpush3.msra.mxu0 %v4768_v36  ;;  %4212 = vmatpush3.msra.mxu1 %v4768_v36 }
  0x9a   : > { %4188 = vmatprep.mubr.msk.f32.mxu0 %vm258_vm0, %v4780_v37  ;;  %4198 = vmatprep.mubr.msk.f32.mxu1 %vm258_vm0, %v4785_v38 }
  0x9b   : > { %4189 = vmatmul.mubr.msk.f32.gmra.mxu0 %vm258_vm0, %v4792_v39  ;;  %4199 = vmatmul.mubr.msk.f32.gmra.mxu1 %vm258_vm0, %v4797_v40 }
  0x9c   : > { %4203 = vmatprep.subr.mxu0 %v4801_v41  ;;  %4213 = vmatprep.subr.mxu1 %v4801_v41 }
  0x9d   : > { %4204 = vmatpush3.msra.mxu0 %v4801_v41  ;;  %4214 = vmatpush3.msra.mxu1 %v4801_v41 }
  0x9e   : > { %4205 = vmatprep.mubr.msk.f32.mxu0 %vm258_vm0, %v4814_v42  ;;  %4215 = vmatprep.mubr.msk.f32.mxu1 %vm258_vm0, %v4742_v32 }
  0x9f   : > { %4206 = vmatmul.mubr.msk.f32.vlgmr.msra.gmra.mxu0 %vm258_vm0, %v4821_v43  ;;  %4216 = vmatmul.mubr.msk.f32.vlgmr.msra.gmra.mxu1 %vm258_vm0, %v4758_v34 }
  0xa0   : > { %4221 = vmatprep.subr.mxu0 %v4635_v15  ;;  %4208 = vmatprep.mubr.msk.f32.mxu0 %vm258_vm0, %v4828_v44 }
  0xa1   : > { %4218 = vmatprep.mubr.msk.f32.mxu1 %vm258_vm0, %v4780_v37  ;;  %4222 = vmatpush3.msra.mxu0 %v4635_v15 }
  0xa2   : > { %4231 = vmatprep.subr.mxu1 %v4838_v45  ;;  %4223 = vmatprep.subr.mxu0 %v4638_v16 }
  0xa3   : > { %4209 = vmatmul.mubr.msk.f32.gmra.mxu0 %vm258_vm0, %v4846_v46  ;;  %4219 = vmatmul.mubr.msk.f32.gmra.mxu1 %vm258_vm0, %v4792_v39 }
  0xa4   : > { %4232 = vmatpush3.msra.mxu1 %v4838_v45  ;;  %4224 = vmatpush3.msra.mxu0 %v4638_v16 }
  0xa5   : > { %4233 = vmatprep.subr.mxu1 %v4852_v47  ;;  %4225 = vmatprep.mubr.msk.f32.mxu0 %vm258_vm0, %v4751_v33 }
  0xa6   : > { %4234 = vmatpush3.msra.mxu1 %v4852_v47  ;;  %4235 = vmatprep.mubr.msk.f32.mxu1 %vm258_vm0, %v4814_v42 }
  0xa7   : > { %4226 = vmatmul.mubr.msk.f32.vlgmr.msra.gmra.mxu0 %vm258_vm0, %v4763_v35  ;;  %4236 = vmatmul.mubr.msk.f32.vlgmr.msra.gmra.mxu1 %vm258_vm0, %v4821_v43 }
  0xa8   : > { %4241 = vmatprep.subr.mxu0 %v4663_v19  ;;  %4228 = vmatprep.mubr.msk.f32.mxu0 %vm258_vm0, %v4785_v38 }
  0xa9   : > { %4238 = vmatprep.mubr.msk.f32.mxu1 %vm258_vm0, %v4828_v44  ;;  %4242 = vmatpush3.msra.mxu0 %v4663_v19 }
  0xaa   : > { %4251 = vmatprep.subr.mxu1 %v4653_v17  ;;  %4243 = vmatprep.subr.mxu0 %v4666_v20 }
  0xab   : > { %4229 = vmatmul.mubr.msk.f32.gmra.mxu0 %vm258_vm0, %v4797_v40  ;;  %4239 = vmatmul.mubr.msk.f32.gmra.mxu1 %vm258_vm0, %v4846_v46 }
  0xac   : > { %4252 = vmatpush3.msra.mxu1 %v4653_v17  ;;  %4244 = vmatpush3.msra.mxu0 %v4666_v20 }
  0xad   : > { %4253 = vmatprep.subr.mxu1 %v4656_v18  ;;  %4245 = vmatprep.mubr.msk.f32.mxu0 %vm258_vm0, %v4882_v48 }
  0xae   : > { %4254 = vmatpush3.msra.mxu1 %v4656_v18  ;;  %4255 = vmatprep.mubr.msk.f32.mxu1 %vm258_vm0, %v4891_v49 }
  0xaf   : > { %4246 = vmatmul.mubr.msk.f32.vlgmr.msra.gmra.mxu0 %vm258_vm0, %v4898_v50  ;;  %4256 = vmatmul.mubr.msk.f32.vlgmr.msra.gmra.mxu1 %vm258_vm0, %v4903_v51 }
  0xb0   : > { %4261 = vmatprep.subr.mxu0 %v4908_v52  ;;  %4271 = vmatprep.subr.mxu1 %v4908_v52 }
  0xb1   : > { %4262 = vmatpush3.msra.mxu0 %v4908_v52  ;;  %4272 = vmatpush3.msra.mxu1 %v4908_v52 }
  0xb2   : > { %4248 = vmatprep.mubr.msk.f32.mxu0 %vm258_vm0, %v4920_v53  ;;  %4258 = vmatprep.mubr.msk.f32.mxu1 %vm258_vm0, %v4925_v54 }
  0xb3   : > { %4249 = vmatmul.mubr.msk.f32.gmra.mxu0 %vm258_vm0, %v4932_v55  ;;  %4259 = vmatmul.mubr.msk.f32.gmra.mxu1 %vm258_vm0, %v4937_v56 }
  0xb4   : > { %4263 = vmatprep.subr.mxu0 %v4941_v57  ;;  %4273 = vmatprep.subr.mxu1 %v4941_v57 }
  0xb5   : > { %4264 = vmatpush3.msra.mxu0 %v4941_v57  ;;  %4274 = vmatpush3.msra.mxu1 %v4941_v57 }
  0xb6   : > { %4265 = vmatprep.mubr.msk.f32.mxu0 %vm258_vm0, %v4954_v58  ;;  %4275 = vmatprep.mubr.msk.f32.mxu1 %vm258_vm0, %v4882_v48 }
  0xb7   : > { %4266 = vmatmul.mubr.msk.f32.vlgmr.msra.gmra.mxu0 %vm258_vm0, %v4961_v59  ;;  %4276 = vmatmul.mubr.msk.f32.vlgmr.msra.gmra.mxu1 %vm258_vm0, %v4898_v50 }
  0xb8   : > { %4281 = vmatprep.subr.mxu0 %v4663_v19  ;;  %4268 = vmatprep.mubr.msk.f32.mxu0 %vm258_vm0, %v4968_v60 }
  0xb9   : > { %4278 = vmatprep.mubr.msk.f32.mxu1 %vm258_vm0, %v4920_v53  ;;  %4282 = vmatpush3.msra.mxu0 %v4663_v19 }
  0xba   : > { %4291 = vmatprep.subr.mxu1 %v4978_v61  ;;  %4283 = vmatprep.subr.mxu0 %v4666_v20 }
  0xbb   : > { %4269 = vmatmul.mubr.msk.f32.gmra.mxu0 %vm258_vm0, %v4986_v62  ;;  %4279 = vmatmul.mubr.msk.f32.gmra.mxu1 %vm258_vm0, %v4932_v55 }
  0xbc   : > { %4292 = vmatpush3.msra.mxu1 %v4978_v61  ;;  %4284 = vmatpush3.msra.mxu0 %v4666_v20 }
  0xbd   : > { %4293 = vmatprep.subr.mxu1 %v4992_v63  ;;  %4285 = vmatprep.mubr.msk.f32.mxu0 %vm258_vm0, %v4891_v49 }
  0xbe   : > { %4294 = vmatpush3.msra.mxu1 %v4992_v63  ;;  %4295 = vmatprep.mubr.msk.f32.mxu1 %vm258_vm0, %v4954_v58 }
  0xbf   : > { %4301 = vmatprep.subr.mxu0 %v4635_v15  ;;  %4311 = vmatprep.subr.mxu1 %v4601_v10 }
  0xc0   : > { %4286 = vmatmul.mubr.msk.f32.vlgmr.msra.gmra.mxu0 %vm258_vm0, %v4903_v51  ;;  %4296 = vmatmul.mubr.msk.f32.vlgmr.msra.gmra.mxu1 %vm258_vm0, %v4961_v59 }
  0xc1   : > { %4302 = vmatpush3.msra.mxu0 %v4635_v15  ;;  %4312 = vmatpush3.msra.mxu1 %v4601_v10 }
  0xc2   : > { %4303 = vmatprep.subr.mxu0 %v4638_v16  ;;  %4313 = vmatprep.subr.mxu1 %v4604_v11 }
  0xc3   : > { %4304 = vmatpush3.msra.mxu0 %v4638_v16  ;;  %4314 = vmatpush3.msra.mxu1 %v4604_v11 }
  0xc4   : > { %4288 = vmatprep.mubr.msk.f32.mxu0 %vm258_vm0, %v4925_v54  ;;  %4298 = vmatprep.mubr.msk.f32.mxu1 %vm258_vm0, %v4968_v60 }
  0xc5   : > { %4321 = vmatprep.subr.mxu0 %v4768_v36  ;;  %4331 = vmatprep.subr.mxu1 %v4768_v36 }
  0xc6   : > { %4289 = vmatmul.mubr.msk.f32.gmra.mxu0 %vm258_vm0, %v4937_v56  ;;  %4299 = vmatmul.mubr.msk.f32.gmra.mxu1 %vm258_vm0, %v4986_v62 }
  0xc7   : > { %4305 = vmatprep.mubr.msk.f32.mxu0 %vm258_vm0, %v4542_v0  ;;  %4315 = vmatprep.mubr.msk.f32.mxu1 %vm258_vm0, %v4547_v1 }
  0xca   : > { %4306 = vmatmul.mubr.msk.f32.vlgmr.msra.gmra.mxu0 %vm258_vm0, %v4580_v6  ;;  %4316 = vmatmul.mubr.msk.f32.vlgmr.msra.gmra.mxu1 %vm258_vm0, %v4585_v7 }
  0xcb   : > { %4322 = vmatpush3.msra.mxu0 %v4768_v36  ;;  %4332 = vmatpush3.msra.mxu1 %v4768_v36 }
  0xcc   : > { %4323 = vmatprep.subr.mxu0 %v4801_v41  ;;  %4333 = vmatprep.subr.mxu1 %v4801_v41 }
  0xcd   : > { %4324 = vmatpush3.msra.mxu0 %v4801_v41  ;;  %4334 = vmatpush3.msra.mxu1 %v4801_v41 }
  0xce   : > { %4308 = vmatprep.mubr.msk.f32.mxu0 %vm258_vm0, %v4593_v8  ;;  %4318 = vmatprep.mubr.msk.f32.mxu1 %vm258_vm0, %v4598_v9 }
  0xcf   : > { %4351 = vmatprep.subr.mxu1 %v4838_v45  ;;  %4309 = vmatmul.mubr.msk.f32.gmra.mxu0 %vm258_vm0, %v4618_v12 }
  0xd0   : > { %4319 = vmatmul.mubr.msk.f32.gmra.mxu1 %vm258_vm0, %v4623_v13  ;;  %4325 = vmatprep.mubr.msk.f32.mxu0 %vm258_vm0, %v4632_v14 }
  0xd1   : > { %4335 = vmatprep.mubr.msk.f32.mxu1 %vm258_vm0, %v4542_v0  ;;  %4341 = vmatprep.subr.mxu0 %v4635_v15 }
  0xd3   : > { %4326 = vmatmul.mubr.msk.f32.vlgmr.msra.gmra.mxu0 %vm258_vm0, %v4695_v27 }
  0xd4   : > { %4336 = vmatmul.mubr.msk.f32.vlgmr.msra.gmra.mxu1 %vm258_vm0, %v4580_v6  ;;  %4328 = vmatprep.mubr.msk.f32.mxu0 %vm258_vm0, %v4700_v29  ;;  %v4127_v2 = vpop.f32.mrf.mxu0  ;;  %v4137_v3 = vpop.f32.mrf.mxu1 }
  0xd5   : > { %4352 = vmatpush3.msra.mxu1 %v4838_v45  ;;  %4338 = vmatprep.mubr.msk.f32.mxu1 %vm258_vm0, %v4593_v8  ;;  %v5066_v4 = vadd.f32 %v4137_v3, %v4127_v2 }
  0xd6   : > { %4353 = vmatprep.subr.mxu1 %v4852_v47  ;;  %4342 = vmatpush3.msra.mxu0 %v4635_v15  ;;  %v337_v0 = vpop.f32.mrf.mxu0  ;;  %v434_v5 = vpop.f32.mrf.mxu1 }
  0xd7   : > { %4354 = vmatpush3.msra.mxu1 %v4852_v47  ;;  %4329 = vmatmul.mubr.msk.f32.gmra.mxu0 %vm258_vm0, %v4712_v30  ;;  %v5073_v6 = vadd.f32 %v434_v5, %v337_v0  ;;  %v3206_v15 = vpop.permute.xlu1 %3205 }
  0xd8   : > { %4339 = vmatmul.mubr.msk.f32.gmra.mxu1 %vm258_vm0, %v4618_v12  ;;  %4343 = vmatprep.subr.mxu0 %v4638_v16  ;;  %v4130_v8 = vpop.f32.mrf.mxu0  ;;  %v4140_v10 = vpop.f32.mrf.mxu1  ;;  %v181_v12 = vld [vmem:[%s5324_s3 + $0x18] sm:$0xff] }
  0xd9   : > { %4344 = vmatpush3.msra.mxu0 %v4638_v16  ;;  %4345 = vmatprep.mubr.msk.f32.mxu0 %vm258_vm0, %v4547_v1  ;;  %v5081_v11 = vadd.f32 %v4140_v10, %v4130_v8  ;;  %v179_v1 = vld [vmem:[%s5324_s3 + $0x8] sm:$0xff] }
  0xda   : > { %4355 = vmatprep.mubr.msk.f32.mxu1 %vm258_vm0, %v4632_v14  ;;  %4361 = vmatprep.subr.mxu0 %v4663_v19  ;;  %v3208_v14 = vpop.permute.xlu0 %3207 }
  0xdb   : > { %4371 = vmatprep.subr.mxu1 %v4653_v17  ;;  %4346 = vmatmul.mubr.msk.f32.vlgmr.msra.gmra.mxu0 %vm258_vm0, %v4585_v7  ;;  %v178_v7 = vld [vmem:[%s5324_s3] sm:$0xff] }
  0xdc   : > { %4356 = vmatmul.mubr.msk.f32.vlgmr.msra.gmra.mxu1 %vm258_vm0, %v4695_v27  ;;  %4362 = vmatpush3.msra.mxu0 %v4663_v19 }
  0xdd   : > { %4372 = vmatpush3.msra.mxu1 %v4653_v17  ;;  %4363 = vmatprep.subr.mxu0 %v4666_v20  ;;  %v3473_v17 = vpop.permute.xlu1 %3472 }
  0xde   : > { %4373 = vmatprep.subr.mxu1 %v4656_v18  ;;  %4364 = vmatpush3.msra.mxu0 %v4666_v20  ;;  %v3475_v16 = vpop.permute.xlu0 %3474 }
  0xdf   : > { %4374 = vmatpush3.msra.mxu1 %v4656_v18  ;;  %4348 = vmatprep.mubr.msk.f32.mxu0 %vm258_vm0, %v4598_v9  ;;  %v4502_v9 = vmov 0   ;;  %v347_v18 = vpop.f32.mrf.mxu0 }
  0xe0   : > { %4358 = vmatprep.mubr.msk.f32.mxu1 %vm258_vm0, %v4700_v29  ;;  %4381 = vmatprep.subr.mxu0 %v4908_v52 }
  0xe1   : > { %4391 = vmatprep.subr.mxu1 %v4908_v52  ;;  %4349 = vmatmul.mubr.msk.f32.gmra.mxu0 %vm258_vm0, %v4623_v13  ;;  %v180_v13 = vld [vmem:[%s5324_s3 + $0x10] sm:$0xff] }
  0xe2   : > { %4359 = vmatmul.mubr.msk.f32.gmra.mxu1 %vm258_vm0, %v4712_v30  ;;  %4365 = vmatprep.mubr.msk.f32.mxu0 %vm258_vm0, %v4742_v32 }
  0xe3   : > { %4375 = vmatprep.mubr.msk.f32.mxu1 %vm258_vm0, %v4751_v33  ;;  %4492 = vset.pattern.permute.xlu1 %v4502_v9 }
  0xe4   : > { %4491 = vset.pattern.permute.xlu0 %v4502_v9  ;;  %3590 = vperm.xlu1 %4492, %v179_v1  }
  0xe5   : > { %4366 = vmatmul.mubr.msk.f32.vlgmr.msra.gmra.mxu0 %vm258_vm0, %v4758_v34  ;;  %3585 = vperm.xlu0 %4491, %v178_v7  }
  0xe6   : > { %4376 = vmatmul.mubr.msk.f32.vlgmr.msra.gmra.mxu1 %vm258_vm0, %v4763_v35  ;;  %4382 = vmatpush3.msra.mxu0 %v4908_v52 }
  0xe7   : > { %4392 = vmatpush3.msra.mxu1 %v4908_v52  ;;  %4383 = vmatprep.subr.mxu0 %v4941_v57 }
  0xe8   : > { %4393 = vmatprep.subr.mxu1 %v4941_v57  ;;  %4384 = vmatpush3.msra.mxu0 %v4941_v57 }
  0xe9   : > { %4394 = vmatpush3.msra.mxu1 %v4941_v57  ;;  %4368 = vmatprep.mubr.msk.f32.mxu0 %vm258_vm0, %v4780_v37 }
  0xea   : > { %4378 = vmatprep.mubr.msk.f32.mxu1 %vm258_vm0, %v4785_v38  ;;  %4411 = vmatprep.subr.mxu1 %v4978_v61 }
  0xeb   : > { %4369 = vmatmul.mubr.msk.f32.gmra.mxu0 %vm258_vm0, %v4792_v39  ;;  %4379 = vmatmul.mubr.msk.f32.gmra.mxu1 %vm258_vm0, %v4797_v40 }
  0xec   : > { %4385 = vmatprep.mubr.msk.f32.mxu0 %vm258_vm0, %v4814_v42  ;;  %4395 = vmatprep.mubr.msk.f32.mxu1 %vm258_vm0, %v4742_v32 }
  0xed   : > { %4401 = vmatprep.subr.mxu0 %v4663_v19  ;;  %3600 = vperm.xlu0 %4491, %v181_v12  }
  0xee   : > { %3595 = vperm.xlu1 %4492, %v180_v13  }
  0xef   : > { %4386 = vmatmul.mubr.msk.f32.vlgmr.msra.gmra.mxu0 %vm258_vm0, %v4821_v43  ;;  %4396 = vmatmul.mubr.msk.f32.vlgmr.msra.gmra.mxu1 %vm258_vm0, %v4758_v34 }
  0xf0   : > { %4412 = vmatpush3.msra.mxu1 %v4978_v61  ;;  %4388 = vmatprep.mubr.msk.f32.mxu0 %vm258_vm0, %v4828_v44 }
  0xf1   : > { %4413 = vmatprep.subr.mxu1 %v4992_v63  ;;  %4402 = vmatpush3.msra.mxu0 %v4663_v19  ;;  %v444_v19 = vpop.f32.mrf.mxu1 }
  0xf2   : > { %4414 = vmatpush3.msra.mxu1 %v4992_v63  ;;  %4398 = vmatprep.mubr.msk.f32.mxu1 %vm258_vm0, %v4780_v37  ;;  %v445_v5 = vadd.f32 %v444_v19, %v347_v18 }
  0xf3   : > { %4389 = vmatmul.mubr.msk.f32.gmra.mxu0 %vm258_vm0, %v4846_v46  ;;  %4399 = vmatmul.mubr.msk.f32.gmra.mxu1 %vm258_vm0, %v4792_v39 }
  0xf4   : > { %4403 = vmatprep.subr.mxu0 %v4666_v20  ;;  %4405 = vmatprep.mubr.msk.f32.mxu0 %vm258_vm0, %v4751_v33 }
  0xf5   : > { %4404 = vmatpush3.msra.mxu0 %v4666_v20  ;;  %4415 = vmatprep.mubr.msk.f32.mxu1 %vm258_vm0, %v4814_v42 }
  0xf6   : > { %4421 = vmatprep.subr.mxu0 %v4683_v23  ;;  %4431 = vmatprep.subr.mxu1 %v4673_v21 }
  0xf7   : > { %4406 = vmatmul.mubr.msk.f32.vlgmr.msra.gmra.mxu0 %vm258_vm0, %v4763_v35  ;;  %4416 = vmatmul.mubr.msk.f32.vlgmr.msra.gmra.mxu1 %vm258_vm0, %v4821_v43 }
  0xf8   : > { %4408 = vmatprep.mubr.msk.f32.mxu0 %vm258_vm0, %v4785_v38  ;;  %4422 = vmatpush3.msra.mxu0 %v4683_v23 }
  0xf9   : > { %4418 = vmatprep.mubr.msk.f32.mxu1 %vm258_vm0, %v4828_v44  ;;  %4432 = vmatpush3.msra.mxu1 %v4673_v21 }
  0xfa   : > { %4423 = vmatprep.subr.mxu0 %v4686_v24  ;;  %4433 = vmatprep.subr.mxu1 %v4676_v22 }
  0xfb   : > { %4409 = vmatmul.mubr.msk.f32.gmra.mxu0 %vm258_vm0, %v4797_v40  ;;  %4419 = vmatmul.mubr.msk.f32.gmra.mxu1 %vm258_vm0, %v4846_v46 }
  0xfc   : > { %4424 = vmatpush3.msra.mxu0 %v4686_v24  ;;  %4425 = vmatprep.mubr.msk.f32.mxu0 %vm258_vm0, %v4882_v48 }
  0xfd   : > { %4434 = vmatpush3.msra.mxu1 %v4676_v22  ;;  %4435 = vmatprep.mubr.msk.f32.mxu1 %vm258_vm0, %v4891_v49 }
  0xfe   : > { %4441 = vmatprep.subr.mxu0 %v3208_v14  ;;  %4451 = vmatprep.subr.mxu1 %v3208_v14 }
  0xff   : > { %4426 = vmatmul.mubr.msk.f32.vlgmr.msra.gmra.mxu0 %vm258_vm0, %v4898_v50  ;;  %4436 = vmatmul.mubr.msk.f32.vlgmr.msra.gmra.mxu1 %vm258_vm0, %v4903_v51 }
 0x100   : > { %4442 = vmatpush3.msra.mxu0 %v3208_v14  ;;  %4452 = vmatpush3.msra.mxu1 %v3208_v14 }
 0x101   : > { %4428 = vmatprep.mubr.msk.f32.mxu0 %vm258_vm0, %v4920_v53  ;;  %4438 = vmatprep.mubr.msk.f32.mxu1 %vm258_vm0, %v4925_v54 }
 0x102   : > { %4443 = vmatprep.subr.mxu0 %v3206_v15  ;;  %4453 = vmatprep.subr.mxu1 %v3206_v15 }
 0x103   : > { %4429 = vmatmul.mubr.msk.f32.gmra.mxu0 %vm258_vm0, %v4932_v55  ;;  %4439 = vmatmul.mubr.msk.f32.gmra.mxu1 %vm258_vm0, %v4937_v56 }
 0x104   : > { %4444 = vmatpush3.msra.mxu0 %v3206_v15  ;;  %4454 = vmatpush3.msra.mxu1 %v3206_v15 }
 0x105   : > { %4445 = vmatprep.mubr.msk.f32.mxu0 %vm258_vm0, %v4954_v58  ;;  %4455 = vmatprep.mubr.msk.f32.mxu1 %vm258_vm0, %v4882_v48 }
 0x106   : > { %4461 = vmatprep.subr.mxu0 %v4683_v23  ;;  %4471 = vmatprep.subr.mxu1 %v3475_v16 }
 0x107   : > { %4446 = vmatmul.mubr.msk.f32.vlgmr.msra.gmra.mxu0 %vm258_vm0, %v4961_v59  ;;  %4456 = vmatmul.mubr.msk.f32.vlgmr.msra.gmra.mxu1 %vm258_vm0, %v4898_v50 }
 0x108   : > { %4448 = vmatprep.mubr.msk.f32.mxu0 %vm258_vm0, %v4968_v60  ;;  %4462 = vmatpush3.msra.mxu0 %v4683_v23 }
 0x109   : > { %4472 = vmatpush3.msra.mxu1 %v3475_v16  ;;  %4458 = vmatprep.mubr.msk.f32.mxu1 %vm258_vm0, %v4920_v53 }
 0x10a   : > { %4463 = vmatprep.subr.mxu0 %v4686_v24  ;;  %4473 = vmatprep.subr.mxu1 %v3473_v17 }
 0x10b   : > { %4449 = vmatmul.mubr.msk.f32.gmra.mxu0 %vm258_vm0, %v4986_v62  ;;  %4459 = vmatmul.mubr.msk.f32.gmra.mxu1 %vm258_vm0, %v4932_v55 }
 0x10c   : > { %4464 = vmatpush3.msra.mxu0 %v4686_v24  ;;  %4465 = vmatprep.mubr.msk.f32.mxu0 %vm258_vm0, %v4891_v49 }
 0x10d   : > { %4474 = vmatpush3.msra.mxu1 %v3473_v17  ;;  %4475 = vmatprep.mubr.msk.f32.mxu1 %vm258_vm0, %v4954_v58 }
 0x10f   : > { %4466 = vmatmul.mubr.msk.f32.vlgmr.msra.gmra.mxu0 %vm258_vm0, %v4903_v51  ;;  %4476 = vmatmul.mubr.msk.f32.vlgmr.msra.gmra.mxu1 %vm258_vm0, %v4961_v59 }
 0x110   : > { %4468 = vmatprep.mubr.msk.f32.mxu0 %vm258_vm0, %v4925_v54  ;;  %4478 = vmatprep.mubr.msk.f32.mxu1 %vm258_vm0, %v4968_v60 }
 0x113   : > { %4469 = vmatmul.mubr.msk.f32.gmra.mxu0 %vm258_vm0, %v4937_v56  ;;  %4479 = vmatmul.mubr.msk.f32.gmra.mxu1 %vm258_vm0, %v4986_v62 }
 0x147   : > { %v4147_v20 = vpop.f32.mrf.mxu0  ;;  %v4157_v21 = vpop.f32.mrf.mxu1 }
 0x148   : > { %v559_v22 = vadd.f32 %v4147_v20, %v5066_v4 }
 0x149   : > { %v539_v23 = vpop.f32.mrf.mxu0  ;;  %v628_v24 = vpop.f32.mrf.mxu1 }
 0x14a   : > { %v558_v25 = vadd.f32 %v539_v23, %v5073_v6 }
 0x14b   : > { %v4150_v26 = vpop.f32.mrf.mxu0  ;;  %v4160_v27 = vpop.f32.mrf.mxu1 }
 0x14c   : > { %v561_v28 = vadd.f32 %v4150_v26, %v5081_v11 }
 0x14d   : > { %v549_v29 = vpop.f32.mrf.mxu0  ;;  %v638_v30 = vpop.f32.mrf.mxu1 }
 0x14e   : > { %v560_v1 = vadd.f32 %v549_v29, %v445_v5 }
 0x14f   : > { %v4167_v31 = vpop.f32.mrf.mxu0  ;;  %v4177_v32 = vpop.f32.mrf.mxu1 }
 0x150   : > { %v719_v33 = vadd.f32 %v4167_v31, %v4157_v21 }
 0x151   : > { %v713_v34 = vpop.f32.mrf.mxu0  ;;  %v806_v35 = vpop.f32.mrf.mxu1 }
 0x152   : > { %v826_v36 = vadd.f32 %v4177_v32, %v719_v33  ;;  %v714_v37 = vadd.f32 %v713_v34, %v628_v24 }
 0x153   : > { %v4170_v38 = vpop.f32.mrf.mxu0  ;;  %v4180_v39 = vpop.f32.mrf.mxu1 }
 0x154   : > { %v825_v40 = vadd.f32 %v806_v35, %v714_v37  ;;  %v729_v41 = vadd.f32 %v4170_v38, %v4160_v27 }
 0x155   : > { %v723_v42 = vpop.f32.mrf.mxu0  ;;  %v816_v43 = vpop.f32.mrf.mxu1 }
 0x156   : > { %v828_v44 = vadd.f32 %v4180_v39, %v729_v41  ;;  %v724_v45 = vadd.f32 %v723_v42, %v638_v30 }
 0x157   : > { %v4187_v46 = vpop.f32.mrf.mxu0  ;;  %v4197_v47 = vpop.f32.mrf.mxu1 }
 0x158   : > { %v827_v48 = vadd.f32 %v816_v43, %v724_v45  ;;  %v1010_v49 = vadd.f32 %v4197_v47, %v4187_v46 }
 0x159   : > { %v907_v50 = vpop.f32.mrf.mxu0  ;;  %v1004_v51 = vpop.f32.mrf.mxu1 }
 0x15a   : > { %v1005_v52 = vadd.f32 %v1004_v51, %v907_v50 }
 0x15b   : > { %v4190_v53 = vpop.f32.mrf.mxu0  ;;  %v4200_v54 = vpop.f32.mrf.mxu1 }
 0x15c   : > { %v1020_v55 = vadd.f32 %v4200_v54, %v4190_v53 }
 0x15d   : > { %v917_v56 = vpop.f32.mrf.mxu0  ;;  %v1014_v57 = vpop.f32.mrf.mxu1 }
 0x15e   : > { %v1015_v58 = vadd.f32 %v1014_v57, %v917_v56 }
 0x15f   : > { %v4207_v59 = vpop.f32.mrf.mxu0  ;;  %v4217_v60 = vpop.f32.mrf.mxu1 }
 0x160   : > { %v1129_v61 = vadd.f32 %v4207_v59, %v1010_v49 }
 0x161   : > { %v1109_v62 = vpop.f32.mrf.mxu0  ;;  %v1198_v63 = vpop.f32.mrf.mxu1 }
 0x162   : > { %v1400_v2 = vadd.f32 %v1129_v61, %v559_v22  ;;  %v1128_v3 = vadd.f32 %v1109_v62, %v1005_v52 }
 0x163   : > { %v4210_v4 = vpop.f32.mrf.mxu0  ;;  %v4220_v0 = vpop.f32.mrf.mxu1 }
 0x164   : > { %v1399_v6 = vadd.f32 %v1128_v3, %v558_v25  ;;  %v1131_v8 = vadd.f32 %v4210_v4, %v1020_v55 }
 0x165   : > { %v1119_v10 = vpop.f32.mrf.mxu0  ;;  %v1208_v11 = vpop.f32.mrf.mxu1 }
 0x166   : > { %v1402_v7 = vadd.f32 %v1131_v8, %v561_v28  ;;  %v1130_v9 = vadd.f32 %v1119_v10, %v1015_v58 }
 0x167   : > { %v4227_v12 = vpop.f32.mrf.mxu0  ;;  %v4237_v13 = vpop.f32.mrf.mxu1 }
 0x168   : > { %v1401_v14 = vadd.f32 %v1130_v9, %v560_v1  ;;  %v1289_v15 = vadd.f32 %v4227_v12, %v4217_v60 }
 0x169   : > { %v1283_v16 = vpop.f32.mrf.mxu0  ;;  %v1376_v17 = vpop.f32.mrf.mxu1 }
 0x16a   : > { %v1396_v20 = vadd.f32 %v4237_v13, %v1289_v15  ;;  %v1284_v21 = vadd.f32 %v1283_v16, %v1198_v63 }
 0x16b   : > { %v4230_v22 = vpop.f32.mrf.mxu0  ;;  %v4240_v23 = vpop.f32.mrf.mxu1 }
 0x16c   : > { %v1404_v24 = vadd.f32 %v1396_v20, %v826_v36  ;;  %v1395_v26 = vadd.f32 %v1376_v17, %v1284_v21  ;;  %v1299_v18 = vadd.f32 %v4230_v22, %v4220_v0 }
 0x16d   : > { %v1293_v19 = vpop.f32.mrf.mxu0  ;;  %v1386_v25 = vpop.f32.mrf.mxu1 }
 0x16e   : > { %v1403_v27 = vadd.f32 %v1395_v26, %v825_v40  ;;  %v1398_v30 = vadd.f32 %v4240_v23, %v1299_v18  ;;  %v1294_v29 = vadd.f32 %v1293_v19, %v1208_v11 }
 0x16f   : > { %v4247_v28 = vpop.f32.mrf.mxu0  ;;  %v4257_v31 = vpop.f32.mrf.mxu1 }
 0x170   : > { %v1406_v32 = vadd.f32 %v1398_v30, %v828_v44  ;;  %v1397_v33 = vadd.f32 %v1386_v25, %v1294_v29  ;;  %v1588_v34 = vadd.f32 %v4257_v31, %v4247_v28 }
 0x171   : > { %v1485_v35 = vpop.f32.mrf.mxu0  ;;  %v1582_v37 = vpop.f32.mrf.mxu1 }
 0x172   : > { %v1405_v38 = vadd.f32 %v1397_v33, %v827_v48  ;;  %v1583_v39 = vadd.f32 %v1582_v37, %v1485_v35 }
 0x173   : > { %v4250_v41 = vpop.f32.mrf.mxu0  ;;  %v4260_v42 = vpop.f32.mrf.mxu1 }
 0x174   : > { %v1598_v43 = vadd.f32 %v4260_v42, %v4250_v41 }
 0x175   : > { %v1495_v36 = vpop.f32.mrf.mxu0  ;;  %v1592_v45 = vpop.f32.mrf.mxu1 }
 0x176   : > { %v1593_v46 = vadd.f32 %v1592_v45, %v1495_v36 }
 0x177   : > { %v4267_v47 = vpop.f32.mrf.mxu0  ;;  %v4277_v49 = vpop.f32.mrf.mxu1 }
 0x178   : > { %v1707_v40 = vadd.f32 %v4267_v47, %v1588_v34 }
 0x179   : > { %v1687_v50 = vpop.f32.mrf.mxu0  ;;  %v1776_v51 = vpop.f32.mrf.mxu1 }
 0x17a   : > { %v5244_v52 = vadd.f32 %v1707_v40, %v1400_v2  ;;  %v1706_v44 = vadd.f32 %v1687_v50, %v1583_v39 }
 0x17b   : > { %v4270_v53 = vpop.f32.mrf.mxu0  ;;  %v4280_v54 = vpop.f32.mrf.mxu1 }
 0x17c   : > { %5334 = vst [vmem:[#allocation2_spill] sm:$0xff] %v5244_v52  ;;  %v5246_v55 = vadd.f32 %v1706_v44, %v1399_v6  ;;  %v1709_v48 = vadd.f32 %v4270_v53, %v1598_v43 }
 0x17d   : > { %v1697_v56 = vpop.f32.mrf.mxu0  ;;  %v1786_v57 = vpop.f32.mrf.mxu1 }
 0x17e   : > { %5335 = vst [vmem:[#allocation3_spill] sm:$0xff] %v5246_v55  ;;  %v5248_v58 = vadd.f32 %v1709_v48, %v1402_v7  ;;  %v1708_v59 = vadd.f32 %v1697_v56, %v1593_v46 }
 0x180   : > { %5336 = vst [vmem:[#allocation4_spill] sm:$0xff] %v5248_v58  ;;  %v5250_v60 = vadd.f32 %v1708_v59, %v1401_v14  ;;  %v4287_v61 = vpop.f32.mrf.mxu0  ;;  %v4297_v62 = vpop.f32.mrf.mxu1 }
 0x181   : > { %v1867_v63 = vadd.f32 %v4287_v61, %v4277_v49 }
 0x182   : > { %5337 = vst [vmem:[#allocation5_spill] sm:$0xff] %v5250_v60  ;;  %v1861_v3 = vpop.f32.mrf.mxu0  ;;  %v1954_v4 = vpop.f32.mrf.mxu1 }
 0x183   : > { %v1974_v2 = vadd.f32 %v4297_v62, %v1867_v63  ;;  %v1862_v0 = vadd.f32 %v1861_v3, %v1776_v51 }
 0x185   : > { %v5252_v5 = vadd.f32 %v1974_v2, %v1404_v24  ;;  %v1973_v8 = vadd.f32 %v1954_v4, %v1862_v0 }
 0x186   : > { %v4290_v6 = vpop.f32.mrf.mxu0  ;;  %v4300_v10 = vpop.f32.mrf.mxu1 }
 0x187   : > { %5338 = vst [vmem:[#allocation6_spill] sm:$0xff] %v5252_v5  ;;  %v5254_v11 = vadd.f32 %v1973_v8, %v1403_v27  ;;  %v1877_v1 = vadd.f32 %v4290_v6, %v4280_v54 }
 0x188   : > { %v1871_v9 = vpop.f32.mrf.mxu0  ;;  %v1964_v12 = vpop.f32.mrf.mxu1 }
 0x189   : > { %5339 = vst [vmem:[#allocation7_spill] sm:$0xff] %v5254_v11  ;;  %v1976_v13 = vadd.f32 %v4300_v10, %v1877_v1  ;;  %v1872_v14 = vadd.f32 %v1871_v9, %v1786_v57 }
 0x18a   : > { %v5260_v16 = vpop.f32.mrf.mxu0  ;;  %v4317_v17 = vpop.f32.mrf.mxu1 }
 0x18b   : > { %v5262_v20 = vadd.f32 %v1976_v13, %v1406_v32  ;;  %v1975_v21 = vadd.f32 %v1964_v12, %v1872_v14 }
 0x18c   : > { %v2055_v22 = vpop.f32.mrf.mxu0  ;;  %v2140_v23 = vpop.f32.mrf.mxu1 }
 0x18d   : > { %5340 = vst [vmem:[#allocation8_spill] sm:$0xff] %v5262_v20  ;;  %v5264_v24 = vadd.f32 %v1975_v21, %v1405_v38  ;;  %v2146_v20 = vadd.f32 %v4317_v17, %v5260_v16  ;;  %v2141_v58 = vadd.f32 %v2140_v23, %v2055_v22 }
 0x18f   : > { %5341 = vst [vmem:[#allocation9_spill] sm:$0xff] %v5264_v24  ;;  %v4310_v18 = vpop.f32.mrf.mxu0 }
 0x190   : > { %v4320_v25 = vpop.f32.mrf.mxu1 }
 0x191   : > { %v2065_v27 = vpop.f32.mrf.mxu0  ;;  %v2156_v11 = vadd.f32 %v4320_v25, %v4310_v18 }
 0x192   : > { %v2150_v30 = vpop.f32.mrf.mxu1 }
 0x193   : > { %v5270_v29 = vpop.f32.mrf.mxu0  ;;  %v2151_v55 = vadd.f32 %v2150_v30, %v2065_v27 }
 0x194   : > { %v4337_v28 = vpop.f32.mrf.mxu1  ;;  %v2245_v16 = vadd.f32 %v5270_v29, %v2146_v20 }
 0x195   : > { %v2225_v31 = vpop.f32.mrf.mxu0 }
 0x196   : > { %v2314_v32 = vpop.f32.mrf.mxu1  ;;  %v2244_v17 = vadd.f32 %v2225_v31, %v2141_v58 }
 0x197   : > { %v5272_v33 = vpop.f32.mrf.mxu0 }
 0x198   : > { %5342 = vst [vmem:[#allocation10_spill] sm:$0xff] %v5272_v33  ;;  %v4340_v34 = vpop.f32.mrf.mxu1 }
 0x199   : > { %v5274_v35 = vpop.f32.mrf.mxu0 }
 0x19a   : > { %5343 = vst [vmem:[#allocation11_spill] sm:$0xff] %v5274_v35  ;;  %v2324_v37 = vpop.f32.mrf.mxu1 }
 0x19b   : > { %v4347_v38 = vpop.f32.mrf.mxu0 }
 0x19c   : > { %v5276_v39 = vpop.f32.mrf.mxu1  ;;  %v2405_v5 = vadd.f32 %v4347_v38, %v4337_v28 }
 0x19d   : > { %5344 = vst [vmem:[#allocation12_spill] sm:$0xff] %v5276_v39  ;;  %v2399_v41 = vpop.f32.mrf.mxu0 }
 0x19e   : > { %v2484_v42 = vpop.f32.mrf.mxu1  ;;  %v2400_v52 = vadd.f32 %v2399_v41, %v2314_v32 }
 0x19f   : > { %v5349_v25 = vld [vmem:[#allocation10_spill] sm:$0xff] }
 0x1a0   : > { %v2247_v27 = vadd.f32 %v5349_v25, %v2156_v11 }
 0x1a1   : > { %v4350_v43 = vpop.f32.mrf.mxu0  ;;  %v5350_v30 = vld [vmem:[#allocation11_spill] sm:$0xff] }
 0x1a2   : > { %v4360_v36 = vpop.f32.mrf.mxu1  ;;  %v2246_v28 = vadd.f32 %v5350_v30, %v2151_v55  ;;  %v3586_v30 = vpop.permute.xlu0 %3585 }
 0x1a3   : > { %v2409_v45 = vpop.f32.mrf.mxu0 }
 0x1a4   : > { %v5278_v46 = vpop.f32.mrf.mxu1  ;;  %v5351_v41 = vld [vmem:[#allocation12_spill] sm:$0xff] }
 0x1a5   : > { %5345 = vst [vmem:[#allocation13_spill] sm:$0xff] %v5278_v46  ;;  %v4367_v47 = vpop.f32.mrf.mxu0  ;;  %v2410_v46 = vadd.f32 %v2409_v45, %v2324_v37 }
 0x1a6   : > { %v4377_v49 = vpop.f32.mrf.mxu1 }
 0x1a7   : > { %v2573_v40 = vpop.f32.mrf.mxu0  ;;  %v2664_v39 = vadd.f32 %v4377_v49, %v4367_v47 }
 0x1a8   : > { %v2658_v50 = vpop.f32.mrf.mxu1 }
 0x1a9   : > { %v2659_v35 = vadd.f32 %v2658_v50, %v2573_v40 }
 0x1ab   : > { %v4370_v51 = vpop.f32.mrf.mxu0  ;;  %v4380_v44 = vpop.f32.mrf.mxu1 }
 0x1ac   : > { %v5352_v40 = vld [vmem:[#allocation13_spill] sm:$0xff]  ;;  %v2674_v58 = vadd.f32 %v4380_v44, %v4370_v51 }
 0x1ad   : > { %v2583_v53 = vpop.f32.mrf.mxu0  ;;  %v2668_v54 = vpop.f32.mrf.mxu1  ;;  %v2505_v20 = vadd.f32 %v5352_v40, %v2410_v46 }
 0x1ae   : > { %v2669_v50 = vadd.f32 %v2668_v54, %v2583_v53 }
 0x1af   : > { %v4387_v48 = vpop.f32.mrf.mxu0  ;;  %v4397_v56 = vpop.f32.mrf.mxu1 }
 0x1b0   : > { %v2763_v38 = vadd.f32 %v4387_v48, %v2664_v39 }
 0x1b1   : > { %v2743_v57 = vpop.f32.mrf.mxu0  ;;  %v2832_v59 = vpop.f32.mrf.mxu1 }
 0x1b2   : > { %v2762_v32 = vadd.f32 %v2743_v57, %v2659_v35  ;;  %v3026_v35 = vadd.f32 %v2763_v38, %v2245_v16 }
 0x1b3   : > { %v5280_v61 = vpop.f32.mrf.mxu0  ;;  %v4400_v62 = vpop.f32.mrf.mxu1 }
 0x1b4   : > { %5346 = vst [vmem:[#allocation14_spill] sm:$0xff] %v5280_v61  ;;  %v3025_v48 = vadd.f32 %v2762_v32, %v2244_v17 }
 0x1b5   : > { %v5282_v63 = vpop.f32.mrf.mxu0  ;;  %v2842_v3 = vpop.f32.mrf.mxu1 }
 0x1b6   : > { %5347 = vst [vmem:[#allocation15_spill] sm:$0xff] %v5282_v63  ;;  %v2415_v63 = vadd.f32 %v4350_v43, %v4340_v34  ;;  %v2504_v34 = vadd.f32 %v5351_v41, %v2405_v5  ;;  %v2503_v43 = vadd.f32 %v2484_v42, %v2400_v52  ;;  %v5357_v41 = vld [vmem:[#allocation6_spill] sm:$0xff] }
 0x1b7   : > { %v4407_v4 = vpop.f32.mrf.mxu0  ;;  %v4417_v2 = vpop.f32.mrf.mxu1 }
 0x1b8   : > { %v2923_v33 = vadd.f32 %v4407_v4, %v4397_v56  ;;  %v2506_v37 = vadd.f32 %v4360_v36, %v2415_v63 }
 0x1b9   : > { %v2917_v0 = vpop.f32.mrf.mxu0  ;;  %v3002_v8 = vpop.f32.mrf.mxu1 }
 0x1ba   : > { %v2918_v22 = vadd.f32 %v2917_v0, %v2832_v59  ;;  %v3022_v29 = vadd.f32 %v4417_v2, %v2923_v33 }
 0x1bb   : > { %v4410_v6 = vpop.f32.mrf.mxu0  ;;  %v4420_v10 = vpop.f32.mrf.mxu1  ;;  %v5353_v42 = vld [vmem:[#allocation14_spill] sm:$0xff] }
 0x1bc   : > { %v2933_v45 = vadd.f32 %v4410_v6, %v4400_v62  ;;  %v3021_v56 = vadd.f32 %v3002_v8, %v2918_v22  ;;  %v2765_v36 = vadd.f32 %v5353_v42, %v2674_v58  ;;  %v3030_v53 = vadd.f32 %v3022_v29, %v2504_v34  ;;  %v5360_v58 = vld [vmem:[#allocation7_spill] sm:$0xff]  ;;  %v5366_v42 = vld [vmem:[#allocation9_spill] sm:$0xff] }
 0x1bd   : > { %v2927_v1 = vpop.f32.mrf.mxu0  ;;  %v5284_v9 = vpop.f32.mrf.mxu1  ;;  %v5354_v51 = vld [vmem:[#allocation15_spill] sm:$0xff] }
 0x1be   : > { %5348 = vst [vmem:[#allocation16_spill] sm:$0xff] %v5284_v9  ;;  %v2928_v11 = vadd.f32 %v2927_v1, %v2842_v3  ;;  %v3024_v57 = vadd.f32 %v4420_v10, %v2933_v45  ;;  %v2764_v44 = vadd.f32 %v5354_v51, %v2669_v50  ;;  %v3029_v4 = vadd.f32 %v3021_v56, %v2503_v43  ;;  %v3591_v45 = vpop.permute.xlu1 %3590  ;;  %v5362_v56 = vld [vmem:[#allocation4_spill] sm:$0xff] }
 0x1bf   : > { %v4427_v12 = vpop.f32.mrf.mxu0  ;;  %v4437_v13 = vpop.f32.mrf.mxu1 }
 0x1c0   : > { %v3190_v31 = vadd.f32 %v4437_v13, %v4427_v12  ;;  %v3032_v12 = vadd.f32 %v3024_v57, %v2506_v37  ;;  %v3027_v25 = vadd.f32 %v2764_v44, %v2246_v28 }
 0x1c1   : > { %v3099_v14 = vpop.f32.mrf.mxu0  ;;  %v3184_v21 = vpop.f32.mrf.mxu1 }
 0x1c2   : > { %v3185_v59 = vadd.f32 %v3184_v21, %v3099_v14 }
 0x1c3   : > { %v4430_v19 = vpop.f32.mrf.mxu0  ;;  %v4440_v26 = vpop.f32.mrf.mxu1 }
 0x1c4   : > { %v3200_v62 = vadd.f32 %v4440_v26, %v4430_v19 }
 0x1c5   : > { %v3109_v15 = vpop.f32.mrf.mxu0  ;;  %v3194_v7 = vpop.f32.mrf.mxu1  ;;  %v5355_v2 = vld [vmem:[#allocation16_spill] sm:$0xff] }
 0x1c6   : > { %v3023_v0 = vadd.f32 %v5355_v2, %v2928_v11  ;;  %v5363_v11 = vld [vmem:[#allocation8_spill] sm:$0xff] }
 0x1c7   : > { %v4447_v24 = vpop.f32.mrf.mxu0  ;;  %v4457_v60 = vpop.f32.mrf.mxu1 }
 0x1c8   : > { %v3297_v5 = vadd.f32 %v4447_v24, %v3190_v31  ;;  %v3195_v24 = vadd.f32 %v3194_v7, %v3109_v15  ;;  %v3031_v7 = vadd.f32 %v3023_v0, %v2505_v20 }
 0x1c9   : > { %v3277_v61 = vpop.f32.mrf.mxu0  ;;  %v3366_v9 = vpop.f32.mrf.mxu1 }
 0x1ca   : > { %v3296_v63 = vadd.f32 %v3277_v61, %v3185_v59  ;;  %v3568_v1 = vadd.f32 %v3297_v5, %v3026_v35  ;;  %v3028_v61 = vadd.f32 %v2765_v36, %v2247_v27  ;;  %v5364_v59 = vmax.f32 %v5362_v56, %v5363_v11  ;;  %v3601_v35 = vpop.permute.xlu0 %3600 }
 0x1cb   : > { %v4450_v23 = vpop.f32.mrf.mxu0  ;;  %v4460_v18 = vpop.f32.mrf.mxu1 }
 0x1cc   : > { %v3567_v13 = vadd.f32 %v3296_v63, %v3025_v48 }
 0x1cd   : > { %v3287_v47 = vpop.f32.mrf.mxu0  ;;  %v3376_v49 = vpop.f32.mrf.mxu1 }
 0x1ce   : > { %v3298_v14 = vadd.f32 %v3287_v47, %v3195_v24 }
 0x1cf   : > { %v4467_v55 = vpop.f32.mrf.mxu0  ;;  %v4477_v39 = vpop.f32.mrf.mxu1 }
 0x1d0   : > { %v3457_v52 = vadd.f32 %v4467_v55, %v4457_v60  ;;  %v3299_v60 = vadd.f32 %v4450_v23, %v3200_v62  ;;  %v3569_v37 = vadd.f32 %v3298_v14, %v3027_v25  ;;  %v3596_v62 = vpop.permute.xlu1 %3595 }
 0x1d1   : > { %v3451_v46 = vpop.f32.mrf.mxu0  ;;  %v3544_v33 = vpop.f32.mrf.mxu1 }
 0x1d2   : > { %v3452_v54 = vadd.f32 %v3451_v46, %v3366_v9  ;;  %v3564_v3 = vadd.f32 %v4477_v39, %v3457_v52  ;;  %v3570_v15 = vadd.f32 %v3299_v60, %v3028_v61  ;;  %v5365_v52 = vld [vmem:[#allocation5_spill] sm:$0xff] }
 0x1d3   : > { %v4470_v8 = vpop.f32.mrf.mxu0  ;;  %v4480_v6 = vpop.f32.mrf.mxu1  ;;  %v5367_v36 = vmax.f32 %v5365_v52, %v5366_v42 }
 0x1d4   : > { %v3572_v10 = vadd.f32 %v3564_v3, %v3030_v53  ;;  %v3467_v26 = vadd.f32 %v4470_v8, %v4460_v18  ;;  %v3563_v19 = vadd.f32 %v3544_v33, %v3452_v54  ;;  %v5356_v18 = vld [vmem:[#allocation2_spill] sm:$0xff] }
 0x1d5   : > { %v3461_v21 = vpop.f32.mrf.mxu0  ;;  %v3554_v23 = vpop.f32.mrf.mxu1  ;;  %v5358_v34 = vmax.f32 %v5356_v18, %v5357_v41 }
 0x1d6   : > { %v3571_v9 = vadd.f32 %v3563_v19, %v3029_v4  ;;  %v3462_v16 = vadd.f32 %v3461_v21, %v3376_v49  ;;  %v3566_v17 = vadd.f32 %v4480_v6, %v3467_v26  ;;  %v3576_v22 = vmax.f32 %v3568_v1, %v3572_v10  ;;  %v5359_v49 = vld [vmem:[#allocation3_spill] sm:$0xff] }
 0x1d7   : > { %v5361_v29 = vmax.f32 %v5359_v49, %v5360_v58 }
 0x1d8   : > { %v3574_v38 = vadd.f32 %v3566_v17, %v3032_v12  ;;  %v3565_v32 = vadd.f32 %v3554_v23, %v3462_v16  ;;  %v3580_v43 = vmax.f32 %v5358_v34, %v3576_v22  ;;  %v3575_v27 = vmax.f32 %v3567_v13, %v3571_v9 }
 0x1da   : > { %v3573_v47 = vadd.f32 %v3565_v32, %v3031_v7  ;;  %v3604_v40 = vadd.f32 %v3591_v45, %v3580_v43  ;;  %v3579_v28 = vmax.f32 %v5361_v29, %v3575_v27  ;;  %v3578_v20 = vmax.f32 %v3570_v15, %v3574_v38 }
 0x1dc   : > { %v3608_v31 = vmax.f32 %v3604_v40, 0.0  ;;  %v3603_v50 = vadd.f32 %v3586_v30, %v3579_v28  ;;  %v3582_v55 = vmax.f32 %v5364_v59, %v3578_v20  ;;  %v3577_v39 = vmax.f32 %v3569_v37, %v3573_v47 }
 0x1de   : > { %3613 = vst.msk [vmem:[%s177_s10 + $0x8] sm:$0xff] %vm3611_vm1, %v3608_v31  ;;  %v3607_v48 = vmax.f32 %v3603_v50, 0.0  ;;  %v3606_v5 = vadd.f32 %v3601_v35, %v3582_v55  ;;  %v3581_v57 = vmax.f32 %v5367_v36, %v3577_v39 }
 0x1e0   : > { %3612 = vst.msk [vmem:[%s177_s10] sm:$0xff] %vm3611_vm1, %v3607_v48  ;;  %v3610_v63 = vmax.f32 %v3606_v5, 0.0  ;;  %v3605_v46 = vadd.f32 %v3596_v62, %v3581_v57 }
 0x1e2   : > { %3615 = vst.msk [vmem:[%s177_s10 + $0x18] sm:$0xff] %vm3611_vm1, %v3610_v63  ;;  %v3609_v33 = vmax.f32 %v3605_v46, 0.0 }
 0x1e4   : > { %3614 = vst.msk [vmem:[%s177_s10 + $0x10] sm:$0xff] %vm3611_vm1, %v3609_v33 }
 0x1e5 PF: > { %s14_s15 = sadd.s32 1, %s4499_s15  }
 0x1e6   : > { %p11_p4 = scmp.ge.s32.totalorder %s14_s15, 4  }
 0x1e8   :  { %13 = sbr.rel (!%p11_p4) target bundleno = 1 (0x1), region = 79 }

// kernel: cifar_tiny_forward.5
= control target key start
LH: loop header
LB: loop body
LE: loop exit
PB: predicated region body
PF: predicated region fallthrough
CT: control target
= control target key end

     0   :  { %s10067_s15 = smov 0   ;;  %s11000_s0 = inlined_call_operand.vmem [shape: f32[15,8,16], index: 0, kind: input, shape index: {}]   ;;  %s11001_s1 = inlined_call_operand.vmem [shape: f32[15,8,14], index: 1, kind: input, shape index: {}]   ;;  %s11002_s2 = inlined_call_operand.vmem [shape: f32[3,3,16,8], index: 2, kind: input, shape index: {}]   ;;  %s11003_s3 = inlined_call_operand.vmem [shape: f32[16,1], index: 3, kind: input, shape index: {}]   ;;  %s11004_s4 = inlined_call_operand.vmem [shape: f32[6,16,12], index: 4, kind: output, shape index: {}]  }
   0x1 LB: > { %s8854_s16 = sadd.s32 4294967295, %s10038_s15   ;;  %p8857_p0 = scmp.ge.s32.totalorder %s10038_s15, 1  ;;  %s10038_s15 = sphi %s10067_s15, %s14_s15  }
   0x2   : > { %p152_p1 = scmp.lt.s32.totalorder %s10038_s15, 3 }
   0x4   : > { %p153_p2 = pnand %p8857_p0, %p152_p1 }
   0x6   : > { %156 = sbr.rel (%p153_p2) target bundleno = 551 (0x227), region = 36 }
   0xb   : > { %s8876_s17 = smul.u32 48, %s8854_s16  ;;  %v10080_v0 = vld [vmem:[%s11002_s2 + $0x10] sm:$0xff]  ;;  %vm234_vm0 = vcmask 64512   ;;  %v10085_v1 = vld [vmem:[%s11002_s2] sm:$0xff]  ;;  %v10108_v4 = vld [vmem:[%s11002_s2 + $0x18] sm:$0xff]  ;;  %s10040_s30 = smov 126  }
   0xc   : > { %9482 = vmatprep.mubr.msk.f32.mxu0 %vm234_vm0, %v10080_v0  ;;  %9487 = vmatprep.mubr.msk.f32.mxu1 %vm234_vm0, %v10085_v1  ;;  %v10117_v6 = vld [vmem:[%s11002_s2 + $0x8] sm:$0xff]  ;;  %v10125_v8 = vld [vmem:[%s11002_s2 + $0x20] sm:$0xff]  ;;  %v10239_v25 = vld [vmem:[%s11002_s2 + $0x30] sm:$0xff]  ;;  %v10041_v55 = vmov 0   ;;  %vm3081_vm1 = vcmask 97280  }
   0xd   : > { %s10094_s24 = scalar_lea.vmem %s11000_s0, %s8876_s17  ;;  %s10099_s27 = scalar_lea.vmem %s11001_s1, %s8876_s17  ;;  %v10217_v22 = vld [vmem:[%s11002_s2 + $0x28] sm:$0xff]  ;;  %v10230_v24 = vld [vmem:[%s11002_s2 + $0x40] sm:$0xff]  ;;  %v10253_v28 = vld [vmem:[%s11002_s2 + $0x38] sm:$0xff]  ;;  %10031 = vset.pattern.permute.xlu1 %v10041_v55  ;;  %10030 = vset.pattern.permute.xlu0 %v10041_v55 }
   0xe   : > { %v213_v2 = vld [vmem:[%s10094_s24] sm:$0xff]  ;;  %v10103_v3 = vld [vmem:[%s10094_s24 + $0x8] sm:$0xff]  ;;  %v10135_v9 = vld [vmem:[%s10094_s24 + $0x10] sm:$0xff]  ;;  %s10896_s17 = smul.u32 3, %s8854_s16 }
   0xf   : > { %398 = vrot.lane.b32.xlu0 %v213_v2, %s10040_s30  ;;  %v215_v5 = vld [vmem:[%s10099_s27] sm:$0xff]  ;;  %878 = vrot.lane.b32.xlu1 %v10103_v3, %s10040_s30  ;;  %v10120_v7 = vld [vmem:[%s10099_s27 + $0x8] sm:$0xff] }
  0x10   : > { %9480 = vmatprep.subr.mxu0 %v215_v5  ;;  %9485 = vmatprep.subr.mxu1 %v213_v2  ;;  %v10138_v10 = vld [vmem:[%s10099_s27 + $0x10] sm:$0xff]  ;;  %v10149_v11 = vld [vmem:[%s10094_s24 + $0x18] sm:$0xff]  ;;  %v10167_v13 = vld [vmem:[%s10094_s24 + $0x20] sm:$0xff]  ;;  %p175_p3 = scmp.lt.s32.totalorder %s10896_s17, 5 }
  0x11   : > { %9481 = vmatpush3.msra.mxu0 %v215_v5  ;;  %9486 = vmatpush3.msra.mxu1 %v213_v2  ;;  %v10152_v12 = vld [vmem:[%s10099_s27 + $0x18] sm:$0xff]  ;;  %v10170_v14 = vld [vmem:[%s10099_s27 + $0x20] sm:$0xff]  ;;  %v10177_v15 = vld [vmem:[%s10094_s24 + $0x28] sm:$0xff] }
  0x12   : > { %9483 = vmatmul.mubr.msk.f32.vlgmr.msra.gmra.mxu0 %vm234_vm0, %v10108_v4  ;;  %9488 = vmatmul.mubr.msk.f32.vlgmr.msra.gmra.mxu1 %vm234_vm0, %v10117_v6  ;;  %v10180_v16 = vld [vmem:[%s10099_s27 + $0x28] sm:$0xff]  ;;  %v10195_v17 = vld [vmem:[%s10094_s24 + $0x30] sm:$0xff]  ;;  %v10205_v19 = vld [vmem:[%s10094_s24 + $0x38] sm:$0xff]  ;;  %s11040_s17 = smov (!%p175_p3, %s10896_s17), 5 }
  0x13   : > { %635 = vrot.lane.b32.xlu0 %v215_v5, %s10040_s30  ;;  %1115 = vrot.lane.b32.xlu1 %v10120_v7, %s10040_s30  ;;  %v10200_v18 = vld [vmem:[%s10099_s27 + $0x30] sm:$0xff]  ;;  %v10210_v20 = vld [vmem:[%s10099_s27 + $0x38] sm:$0xff]  ;;  %s9155_s16 = sshll.u32 %s11040_s17, 4 }
  0x14   : > { %9492 = vmatprep.mubr.msk.f32.mxu0 %vm234_vm0, %v10125_v8  ;;  %9497 = vmatprep.mubr.msk.f32.mxu1 %vm234_vm0, %v10080_v0  ;;  %v10248_v27 = vld [vmem:[%s11002_s2 + $0x48] sm:$0xff]  ;;  %v10268_v29 = vld [vmem:[%s11002_s2 + $0x50] sm:$0xff]  ;;  %v10275_v30 = vld [vmem:[%s11002_s2 + $0x58] sm:$0xff]  ;;  %s10924_s20 = scalar_lea.vmem %s11004_s4, %s9155_s16 }
  0x15   : > { %v10300_v32 = vld [vmem:[%s11002_s2 + $0x70] sm:$0xff]  ;;  %v10309_v33 = vld [vmem:[%s11002_s2 + $0x60] sm:$0xff]  ;;  %v10316_v34 = vld [vmem:[%s11002_s2 + $0x78] sm:$0xff] }
  0x16   : > { %v10321_v35 = vld [vmem:[%s11002_s2 + $0x68] sm:$0xff]  ;;  %v10336_v37 = vld [vmem:[%s11002_s2 + $0x80] sm:$0xff] }
  0x17   : > { %1362 = vrot.lane.b32.xlu0 %v10135_v9, %s10040_s30  ;;  %1599 = vrot.lane.b32.xlu1 %v10138_v10, %s10040_s30  ;;  %v10341_v38 = vld [vmem:[%s11002_s2 + $0x88] sm:$0xff]  ;;  %v181_v56 = vld [vmem:[%s11003_s3] sm:$0xff] }
  0x18   : > { %v182_v54 = vld [vmem:[%s11003_s3 + $0x8] sm:$0xff] }
  0x1b   : > { %2748 = vrot.lane.b32.xlu0 %v10149_v11, %s10040_s30  ;;  %2979 = vrot.lane.b32.xlu1 %v10152_v12, %s10040_s30 }
  0x1f   : > { %3260 = vrot.lane.b32.xlu0 %v10135_v9, %s10040_s30  ;;  %3491 = vrot.lane.b32.xlu1 %v10138_v10, %s10040_s30 }
  0x23   : > { %3722 = vrot.lane.b32.xlu0 %v10149_v11, %s10040_s30  ;;  %3953 = vrot.lane.b32.xlu1 %v10152_v12, %s10040_s30 }
  0x27   : > { %4188 = vrot.lane.b32.xlu0 %v10167_v13, %s10040_s30  ;;  %4419 = vrot.lane.b32.xlu1 %v10170_v14, %s10040_s30 }
  0x2b   : > { %5568 = vrot.lane.b32.xlu0 %v10177_v15, %s10040_s30  ;;  %5799 = vrot.lane.b32.xlu1 %v10180_v16, %s10040_s30 }
  0x2f   : > { %6070 = vrot.lane.b32.xlu0 %v10167_v13, %s10040_s30  ;;  %6301 = vrot.lane.b32.xlu1 %v10170_v14, %s10040_s30 }
  0x33   : > { %6532 = vrot.lane.b32.xlu0 %v10177_v15, %s10040_s30  ;;  %6763 = vrot.lane.b32.xlu1 %v10180_v16, %s10040_s30 }
  0x37   : > { %6998 = vrot.lane.b32.xlu0 %v10195_v17, %s10040_s30  ;;  %7229 = vrot.lane.b32.xlu1 %v10200_v18, %s10040_s30 }
  0x3b   : > { %8378 = vrot.lane.b32.xlu0 %v10205_v19, %s10040_s30  ;;  %8609 = vrot.lane.b32.xlu1 %v10210_v20, %s10040_s30 }
  0x3f   : > { %3074 = vperm.xlu1 %10031, %v182_v54   ;;  %3069 = vperm.xlu0 %10030, %v181_v56  }
  0x81   : > { %v399_v21 = vpop.permute.xlu0 %398  ;;  %v10241_v26 = vpop.permute.xlu1 %878 }
  0x82   : > { %9490 = vmatprep.subr.mxu0 %v399_v21  ;;  %9495 = vmatprep.subr.mxu1 %v399_v21 }
  0x83   : > { %9491 = vmatpush3.msra.mxu0 %v399_v21  ;;  %9496 = vmatpush3.msra.mxu1 %v399_v21 }
  0x84   : > { %9493 = vmatmul.mubr.msk.f32.vlgmr.msra.gmra.mxu0 %vm234_vm0, %v10217_v22  ;;  %9498 = vmatmul.mubr.msk.f32.vlgmr.msra.gmra.mxu1 %vm234_vm0, %v10108_v4 }
  0x85   : > { %v636_v23 = vpop.permute.xlu0 %635  ;;  %9500 = vmatprep.subr.mxu0 %v215_v5  ;;  %9502 = vmatprep.mubr.msk.f32.mxu0 %vm234_vm0, %v10085_v1  ;;  %v10279_v31 = vpop.permute.xlu1 %1115 }
  0x86   : > { %9505 = vmatprep.subr.mxu1 %v636_v23  ;;  %9501 = vmatpush3.msra.mxu0 %v215_v5 }
  0x87   : > { %9506 = vmatpush3.msra.mxu1 %v636_v23  ;;  %9507 = vmatprep.mubr.msk.f32.mxu1 %vm234_vm0, %v10125_v8 }
  0x88   : > { %9503 = vmatmul.mubr.msk.f32.vlgmr.msra.gmra.mxu0 %vm234_vm0, %v10117_v6  ;;  %9508 = vmatmul.mubr.msk.f32.vlgmr.msra.gmra.mxu1 %vm234_vm0, %v10217_v22 }
  0x89   : > { %9510 = vmatprep.subr.mxu0 %v10120_v7  ;;  %9515 = vmatprep.subr.mxu1 %v10103_v3  ;;  %v1363_v36 = vpop.permute.xlu0 %1362  ;;  %v1600_v39 = vpop.permute.xlu1 %1599 }
  0x8a   : > { %9511 = vmatpush3.msra.mxu0 %v10120_v7  ;;  %9512 = vmatprep.mubr.msk.f32.mxu0 %vm234_vm0, %v10230_v24 }
  0x8b   : > { %9516 = vmatpush3.msra.mxu1 %v10103_v3  ;;  %9517 = vmatprep.mubr.msk.f32.mxu1 %vm234_vm0, %v10239_v25 }
  0x8c   : > { %9513 = vmatmul.mubr.msk.f32.vlgmr.msra.gmra.mxu0 %vm234_vm0, %v10248_v27  ;;  %9518 = vmatmul.mubr.msk.f32.vlgmr.msra.gmra.mxu1 %vm234_vm0, %v10253_v28 }
  0x8d   : > { %9520 = vmatprep.subr.mxu0 %v10241_v26  ;;  %9525 = vmatprep.subr.mxu1 %v10241_v26  ;;  %v2749_v40 = vpop.permute.xlu0 %2748  ;;  %v2980_v41 = vpop.permute.xlu1 %2979 }
  0x8e   : > { %9521 = vmatpush3.msra.mxu0 %v10241_v26  ;;  %9526 = vmatpush3.msra.mxu1 %v10241_v26 }
  0x8f   : > { %9522 = vmatprep.mubr.msk.f32.mxu0 %vm234_vm0, %v10268_v29  ;;  %9527 = vmatprep.mubr.msk.f32.mxu1 %vm234_vm0, %v10230_v24 }
  0x90   : > { %9523 = vmatmul.mubr.msk.f32.vlgmr.msra.gmra.mxu0 %vm234_vm0, %v10275_v30  ;;  %9528 = vmatmul.mubr.msk.f32.vlgmr.msra.gmra.mxu1 %vm234_vm0, %v10248_v27 }
  0x91   : > { %9530 = vmatprep.subr.mxu0 %v10120_v7  ;;  %9535 = vmatprep.subr.mxu1 %v10279_v31  ;;  %v3261_v42 = vpop.permute.xlu0 %3260  ;;  %v3492_v43 = vpop.permute.xlu1 %3491 }
  0x92   : > { %9531 = vmatpush3.msra.mxu0 %v10120_v7  ;;  %9532 = vmatprep.mubr.msk.f32.mxu0 %vm234_vm0, %v10239_v25 }
  0x93   : > { %9536 = vmatpush3.msra.mxu1 %v10279_v31  ;;  %9537 = vmatprep.mubr.msk.f32.mxu1 %vm234_vm0, %v10268_v29 }
  0x94   : > { %9533 = vmatmul.mubr.msk.f32.vlgmr.msra.gmra.mxu0 %vm234_vm0, %v10253_v28  ;;  %9538 = vmatmul.mubr.msk.f32.vlgmr.msra.gmra.mxu1 %vm234_vm0, %v10275_v30 }
  0x95   : > { %9540 = vmatprep.subr.mxu0 %v10138_v10  ;;  %9545 = vmatprep.subr.mxu1 %v10135_v9  ;;  %v10489_v44 = vpop.permute.xlu0 %3722  ;;  %v3954_v48 = vpop.permute.xlu1 %3953 }
  0x96   : > { %9541 = vmatpush3.msra.mxu0 %v10138_v10  ;;  %9542 = vmatprep.mubr.msk.f32.mxu0 %vm234_vm0, %v10300_v32 }
  0x97   : > { %9546 = vmatpush3.msra.mxu1 %v10135_v9  ;;  %9547 = vmatprep.mubr.msk.f32.mxu1 %vm234_vm0, %v10309_v33 }
  0x98   : > { %9543 = vmatmul.mubr.msk.f32.vlgmr.msra.gmra.mxu0 %vm234_vm0, %v10316_v34  ;;  %9548 = vmatmul.mubr.msk.f32.vlgmr.msra.gmra.mxu1 %vm234_vm0, %v10321_v35 }
  0x99   : > { %9550 = vmatprep.subr.mxu0 %v1363_v36  ;;  %9555 = vmatprep.subr.mxu1 %v1363_v36  ;;  %v4189_v49 = vpop.permute.xlu0 %4188  ;;  %v4420_v50 = vpop.permute.xlu1 %4419 }
  0x9a   : > { %9551 = vmatpush3.msra.mxu0 %v1363_v36  ;;  %9556 = vmatpush3.msra.mxu1 %v1363_v36 }
  0x9b   : > { %9552 = vmatprep.mubr.msk.f32.mxu0 %vm234_vm0, %v10336_v37  ;;  %9557 = vmatprep.mubr.msk.f32.mxu1 %vm234_vm0, %v10300_v32 }
  0x9c   : > { %9553 = vmatmul.mubr.msk.f32.vlgmr.msra.gmra.mxu0 %vm234_vm0, %v10341_v38  ;;  %9558 = vmatmul.mubr.msk.f32.vlgmr.msra.gmra.mxu1 %vm234_vm0, %v10316_v34 }
  0x9d   : > { %9560 = vmatprep.subr.mxu0 %v10138_v10  ;;  %9565 = vmatprep.subr.mxu1 %v1600_v39  ;;  %v5569_v51 = vpop.permute.xlu0 %5568  ;;  %v5800_v52 = vpop.permute.xlu1 %5799 }
  0x9e   : > { %9561 = vmatpush3.msra.mxu0 %v10138_v10  ;;  %9566 = vmatpush3.msra.mxu1 %v1600_v39 }
  0x9f   : > { %9562 = vmatprep.mubr.msk.f32.mxu0 %vm234_vm0, %v10309_v33  ;;  %9567 = vmatprep.mubr.msk.f32.mxu1 %vm234_vm0, %v10336_v37 }
  0xa0   : > { %9570 = vmatprep.subr.mxu0 %v10120_v7  ;;  %9575 = vmatprep.subr.mxu1 %v10103_v3 }
  0xa1   : > { %9563 = vmatmul.mubr.msk.f32.vlgmr.msra.gmra.mxu0 %vm234_vm0, %v10321_v35  ;;  %9568 = vmatmul.mubr.msk.f32.vlgmr.msra.gmra.mxu1 %vm234_vm0, %v10341_v38  ;;  %v6071_v53 = vpop.permute.xlu0 %6070  ;;  %v6302_v57 = vpop.permute.xlu1 %6301 }
  0xa2   : > { %9571 = vmatpush3.msra.mxu0 %v10120_v7  ;;  %9576 = vmatpush3.msra.mxu1 %v10103_v3 }
  0xa3   : > { %9580 = vmatprep.subr.mxu0 %v10241_v26  ;;  %9585 = vmatprep.subr.mxu1 %v10241_v26 }
  0xa4   : > { %9572 = vmatprep.mubr.msk.f32.mxu0 %vm234_vm0, %v10080_v0  ;;  %9577 = vmatprep.mubr.msk.f32.mxu1 %vm234_vm0, %v10085_v1 }
  0xa5   : > { %9573 = vmatmul.mubr.msk.f32.vlgmr.msra.gmra.mxu0 %vm234_vm0, %v10108_v4  ;;  %9578 = vmatmul.mubr.msk.f32.vlgmr.msra.gmra.mxu1 %vm234_vm0, %v10117_v6  ;;  %v6533_v58 = vpop.permute.xlu0 %6532  ;;  %v6764_v59 = vpop.permute.xlu1 %6763 }
  0xa6   : > { %9581 = vmatpush3.msra.mxu0 %v10241_v26  ;;  %9586 = vmatpush3.msra.mxu1 %v10241_v26 }
  0xa7   : > { %9595 = vmatprep.subr.mxu1 %v10279_v31  ;;  %9582 = vmatprep.mubr.msk.f32.mxu0 %vm234_vm0, %v10125_v8 }
  0xa8   : > { %9587 = vmatprep.mubr.msk.f32.mxu1 %vm234_vm0, %v10080_v0  ;;  %9590 = vmatprep.subr.mxu0 %v10120_v7 }
  0xa9   : > { %9583 = vmatmul.mubr.msk.f32.vlgmr.msra.gmra.mxu0 %vm234_vm0, %v10217_v22  ;;  %9588 = vmatmul.mubr.msk.f32.vlgmr.msra.gmra.mxu1 %vm234_vm0, %v10108_v4  ;;  %v6999_v60 = vpop.permute.xlu0 %6998  ;;  %v10727_v61 = vpop.permute.xlu1 %7229 }
  0xaa   : > { %9596 = vmatpush3.msra.mxu1 %v10279_v31  ;;  %9591 = vmatpush3.msra.mxu0 %v10120_v7 }
  0xab   : > { %9592 = vmatprep.mubr.msk.f32.mxu0 %vm234_vm0, %v10085_v1  ;;  %9597 = vmatprep.mubr.msk.f32.mxu1 %vm234_vm0, %v10125_v8 }
  0xac   : > { %9600 = vmatprep.subr.mxu0 %v10138_v10  ;;  %9605 = vmatprep.subr.mxu1 %v10135_v9 }
  0xad   : > { %9593 = vmatmul.mubr.msk.f32.vlgmr.msra.gmra.mxu0 %vm234_vm0, %v10117_v6  ;;  %9598 = vmatmul.mubr.msk.f32.vlgmr.msra.gmra.mxu1 %vm234_vm0, %v10217_v22 }
  0xae   : > { %9601 = vmatpush3.msra.mxu0 %v10138_v10  ;;  %9606 = vmatpush3.msra.mxu1 %v10135_v9 }
  0xaf   : > { %9610 = vmatprep.subr.mxu0 %v1363_v36  ;;  %9615 = vmatprep.subr.mxu1 %v1363_v36 }
  0xb0   : > { %9602 = vmatprep.mubr.msk.f32.mxu0 %vm234_vm0, %v10230_v24  ;;  %9607 = vmatprep.mubr.msk.f32.mxu1 %vm234_vm0, %v10239_v25 }
  0xb1   : > { %9603 = vmatmul.mubr.msk.f32.vlgmr.msra.gmra.mxu0 %vm234_vm0, %v10248_v27  ;;  %9608 = vmatmul.mubr.msk.f32.vlgmr.msra.gmra.mxu1 %vm234_vm0, %v10253_v28 }
  0xb2   : > { %9611 = vmatpush3.msra.mxu0 %v1363_v36  ;;  %9616 = vmatpush3.msra.mxu1 %v1363_v36 }
  0xb3   : > { %9625 = vmatprep.subr.mxu1 %v1600_v39  ;;  %9612 = vmatprep.mubr.msk.f32.mxu0 %vm234_vm0, %v10268_v29 }
  0xb4   : > { %9617 = vmatprep.mubr.msk.f32.mxu1 %vm234_vm0, %v10230_v24  ;;  %9620 = vmatprep.subr.mxu0 %v10138_v10 }
  0xb5   : > { %9613 = vmatmul.mubr.msk.f32.vlgmr.msra.gmra.mxu0 %vm234_vm0, %v10275_v30  ;;  %9618 = vmatmul.mubr.msk.f32.vlgmr.msra.gmra.mxu1 %vm234_vm0, %v10248_v27 }
  0xb6   : > { %9626 = vmatpush3.msra.mxu1 %v1600_v39  ;;  %9621 = vmatpush3.msra.mxu0 %v10138_v10 }
  0xb7   : > { %9622 = vmatprep.mubr.msk.f32.mxu0 %vm234_vm0, %v10239_v25  ;;  %9627 = vmatprep.mubr.msk.f32.mxu1 %vm234_vm0, %v10268_v29 }
  0xb8   : > { %9630 = vmatprep.subr.mxu0 %v10152_v12  ;;  %9635 = vmatprep.subr.mxu1 %v10149_v11 }
  0xb9   : > { %9623 = vmatmul.mubr.msk.f32.vlgmr.msra.gmra.mxu0 %vm234_vm0, %v10253_v28  ;;  %9628 = vmatmul.mubr.msk.f32.vlgmr.msra.gmra.mxu1 %vm234_vm0, %v10275_v30 }
  0xba   : > { %9631 = vmatpush3.msra.mxu0 %v10152_v12  ;;  %9632 = vmatprep.mubr.msk.f32.mxu0 %vm234_vm0, %v10300_v32 }
  0xbb   : > { %9636 = vmatpush3.msra.mxu1 %v10149_v11  ;;  %9637 = vmatprep.mubr.msk.f32.mxu1 %vm234_vm0, %v10309_v33 }
  0xbc   : > { %9640 = vmatprep.subr.mxu0 %v2749_v40  ;;  %9645 = vmatprep.subr.mxu1 %v2749_v40 }
  0xbd   : > { %9633 = vmatmul.mubr.msk.f32.vlgmr.msra.gmra.mxu0 %vm234_vm0, %v10316_v34  ;;  %9638 = vmatmul.mubr.msk.f32.vlgmr.msra.gmra.mxu1 %vm234_vm0, %v10321_v35 }
  0xbe   : > { %9641 = vmatpush3.msra.mxu0 %v2749_v40  ;;  %9646 = vmatpush3.msra.mxu1 %v2749_v40 }
  0xbf   : > { %9642 = vmatprep.mubr.msk.f32.mxu0 %vm234_vm0, %v10336_v37  ;;  %9647 = vmatprep.mubr.msk.f32.mxu1 %vm234_vm0, %v10300_v32 }
  0xc0   : > { %9650 = vmatprep.subr.mxu0 %v10152_v12  ;;  %9655 = vmatprep.subr.mxu1 %v2980_v41 }
  0xc1   : > { %9643 = vmatmul.mubr.msk.f32.vlgmr.msra.gmra.mxu0 %vm234_vm0, %v10341_v38  ;;  %9648 = vmatmul.mubr.msk.f32.vlgmr.msra.gmra.mxu1 %vm234_vm0, %v10316_v34 }
  0xc2   : > { %9651 = vmatpush3.msra.mxu0 %v10152_v12  ;;  %9652 = vmatprep.mubr.msk.f32.mxu0 %vm234_vm0, %v10309_v33 }
  0xc3   : > { %9656 = vmatpush3.msra.mxu1 %v2980_v41  ;;  %9657 = vmatprep.mubr.msk.f32.mxu1 %vm234_vm0, %v10336_v37 }
  0xc4   : > { %9660 = vmatprep.subr.mxu0 %v10138_v10  ;;  %9665 = vmatprep.subr.mxu1 %v10135_v9 }
  0xc5   : > { %9653 = vmatmul.mubr.msk.f32.vlgmr.msra.gmra.mxu0 %vm234_vm0, %v10321_v35  ;;  %9658 = vmatmul.mubr.msk.f32.vlgmr.msra.gmra.mxu1 %vm234_vm0, %v10341_v38 }
  0xc6   : > { %9661 = vmatpush3.msra.mxu0 %v10138_v10  ;;  %9662 = vmatprep.mubr.msk.f32.mxu0 %vm234_vm0, %v10080_v0 }
  0xc7   : > { %9666 = vmatpush3.msra.mxu1 %v10135_v9  ;;  %9667 = vmatprep.mubr.msk.f32.mxu1 %vm234_vm0, %v10085_v1 }
  0xc8   : > { %9670 = vmatprep.subr.mxu0 %v3261_v42  ;;  %9675 = vmatprep.subr.mxu1 %v3261_v42 }
  0xc9   : > { %9663 = vmatmul.mubr.msk.f32.vlgmr.msra.gmra.mxu0 %vm234_vm0, %v10108_v4  ;;  %9668 = vmatmul.mubr.msk.f32.vlgmr.msra.gmra.mxu1 %vm234_vm0, %v10117_v6 }
  0xca   : > { %9671 = vmatpush3.msra.mxu0 %v3261_v42  ;;  %9676 = vmatpush3.msra.mxu1 %v3261_v42 }
  0xcb   : > { %9672 = vmatprep.mubr.msk.f32.mxu0 %vm234_vm0, %v10125_v8  ;;  %9677 = vmatprep.mubr.msk.f32.mxu1 %vm234_vm0, %v10080_v0 }
  0xcc   : > { %9680 = vmatprep.subr.mxu0 %v10138_v10  ;;  %9685 = vmatprep.subr.mxu1 %v3492_v43 }
  0xcd   : > { %9673 = vmatmul.mubr.msk.f32.vlgmr.msra.gmra.mxu0 %vm234_vm0, %v10217_v22  ;;  %9678 = vmatmul.mubr.msk.f32.vlgmr.msra.gmra.mxu1 %vm234_vm0, %v10108_v4 }
  0xce   : > { %9681 = vmatpush3.msra.mxu0 %v10138_v10  ;;  %9682 = vmatprep.mubr.msk.f32.mxu0 %vm234_vm0, %v10085_v1 }
  0xcf   : > { %9686 = vmatpush3.msra.mxu1 %v3492_v43  ;;  %9687 = vmatprep.mubr.msk.f32.mxu1 %vm234_vm0, %v10125_v8 }
  0xd0   : > { %9690 = vmatprep.subr.mxu0 %v10152_v12  ;;  %9695 = vmatprep.subr.mxu1 %v10149_v11 }
  0xd1   : > { %9683 = vmatmul.mubr.msk.f32.vlgmr.msra.gmra.mxu0 %vm234_vm0, %v10117_v6  ;;  %9688 = vmatmul.mubr.msk.f32.vlgmr.msra.gmra.mxu1 %vm234_vm0, %v10217_v22 }
  0xd2   : > { %9691 = vmatpush3.msra.mxu0 %v10152_v12  ;;  %9692 = vmatprep.mubr.msk.f32.mxu0 %vm234_vm0, %v10230_v24  ;;  %v9484_v45 = vpop.f32.mrf.mxu0  ;;  %v9489_v46 = vpop.f32.mrf.mxu1 }
  0xd3   : > { %9696 = vmatpush3.msra.mxu1 %v10149_v11  ;;  %9697 = vmatprep.mubr.msk.f32.mxu1 %vm234_vm0, %v10239_v25  ;;  %v10497_v47 = vadd.f32 %v9489_v46, %v9484_v45 }
  0xd4   : > { %9700 = vmatprep.subr.mxu0 %v10489_v44  ;;  %9705 = vmatprep.subr.mxu1 %v10489_v44  ;;  %v307_v62 = vpop.f32.mrf.mxu0  ;;  %v388_v63 = vpop.f32.mrf.mxu1 }
  0xd5   : > { %9693 = vmatmul.mubr.msk.f32.vlgmr.msra.gmra.mxu0 %vm234_vm0, %v10248_v27  ;;  %9698 = vmatmul.mubr.msk.f32.vlgmr.msra.gmra.mxu1 %vm234_vm0, %v10253_v28  ;;  %v389_v2 = vadd.f32 %v388_v63, %v307_v62 }
  0xd6   : > { %9701 = vmatpush3.msra.mxu0 %v10489_v44  ;;  %9706 = vmatpush3.msra.mxu1 %v10489_v44 }
  0xd7   : > { %9702 = vmatprep.mubr.msk.f32.mxu0 %vm234_vm0, %v10268_v29  ;;  %9707 = vmatprep.mubr.msk.f32.mxu1 %vm234_vm0, %v10230_v24 }
  0xd8   : > { %9710 = vmatprep.subr.mxu0 %v10152_v12  ;;  %9715 = vmatprep.subr.mxu1 %v3954_v48 }
  0xd9   : > { %9703 = vmatmul.mubr.msk.f32.vlgmr.msra.gmra.mxu0 %vm234_vm0, %v10275_v30  ;;  %9708 = vmatmul.mubr.msk.f32.vlgmr.msra.gmra.mxu1 %vm234_vm0, %v10248_v27 }
  0xda   : > { %9711 = vmatpush3.msra.mxu0 %v10152_v12  ;;  %9712 = vmatprep.mubr.msk.f32.mxu0 %vm234_vm0, %v10239_v25 }
  0xdb   : > { %9716 = vmatpush3.msra.mxu1 %v3954_v48  ;;  %9717 = vmatprep.mubr.msk.f32.mxu1 %vm234_vm0, %v10268_v29 }
  0xdc   : > { %9720 = vmatprep.subr.mxu0 %v10170_v14  ;;  %9725 = vmatprep.subr.mxu1 %v10167_v13 }
  0xdd   : > { %9713 = vmatmul.mubr.msk.f32.vlgmr.msra.gmra.mxu0 %vm234_vm0, %v10253_v28  ;;  %9718 = vmatmul.mubr.msk.f32.vlgmr.msra.gmra.mxu1 %vm234_vm0, %v10275_v30 }
  0xde   : > { %9721 = vmatpush3.msra.mxu0 %v10170_v14  ;;  %9722 = vmatprep.mubr.msk.f32.mxu0 %vm234_vm0, %v10300_v32 }
  0xdf   : > { %9726 = vmatpush3.msra.mxu1 %v10167_v13  ;;  %9727 = vmatprep.mubr.msk.f32.mxu1 %vm234_vm0, %v10309_v33 }
  0xe0   : > { %9730 = vmatprep.subr.mxu0 %v4189_v49  ;;  %9735 = vmatprep.subr.mxu1 %v4189_v49 }
  0xe1   : > { %9723 = vmatmul.mubr.msk.f32.vlgmr.msra.gmra.mxu0 %vm234_vm0, %v10316_v34  ;;  %9728 = vmatmul.mubr.msk.f32.vlgmr.msra.gmra.mxu1 %vm234_vm0, %v10321_v35 }
  0xe2   : > { %9731 = vmatpush3.msra.mxu0 %v4189_v49  ;;  %9736 = vmatpush3.msra.mxu1 %v4189_v49 }
  0xe3   : > { %9732 = vmatprep.mubr.msk.f32.mxu0 %vm234_vm0, %v10336_v37  ;;  %9737 = vmatprep.mubr.msk.f32.mxu1 %vm234_vm0, %v10300_v32 }
  0xe4   : > { %9740 = vmatprep.subr.mxu0 %v10170_v14  ;;  %9745 = vmatprep.subr.mxu1 %v4420_v50 }
  0xe5   : > { %9733 = vmatmul.mubr.msk.f32.vlgmr.msra.gmra.mxu0 %vm234_vm0, %v10341_v38  ;;  %9738 = vmatmul.mubr.msk.f32.vlgmr.msra.gmra.mxu1 %vm234_vm0, %v10316_v34 }
  0xe6   : > { %9741 = vmatpush3.msra.mxu0 %v10170_v14  ;;  %9746 = vmatpush3.msra.mxu1 %v4420_v50 }
  0xe7   : > { %9742 = vmatprep.mubr.msk.f32.mxu0 %vm234_vm0, %v10309_v33  ;;  %9747 = vmatprep.mubr.msk.f32.mxu1 %vm234_vm0, %v10336_v37 }
  0xe8   : > { %9750 = vmatprep.subr.mxu0 %v10152_v12  ;;  %9755 = vmatprep.subr.mxu1 %v10149_v11 }
  0xe9   : > { %9743 = vmatmul.mubr.msk.f32.vlgmr.msra.gmra.mxu0 %vm234_vm0, %v10321_v35  ;;  %9748 = vmatmul.mubr.msk.f32.vlgmr.msra.gmra.mxu1 %vm234_vm0, %v10341_v38 }
  0xea   : > { %9751 = vmatpush3.msra.mxu0 %v10152_v12  ;;  %9756 = vmatpush3.msra.mxu1 %v10149_v11  ;;  %v8379_v11 = vpop.permute.xlu0 %8378 }
  0xeb   : > { %9760 = vmatprep.subr.mxu0 %v10489_v44  ;;  %9765 = vmatprep.subr.mxu1 %v10489_v44 }
  0xec   : > { %9752 = vmatprep.mubr.msk.f32.mxu0 %vm234_vm0, %v10080_v0  ;;  %9757 = vmatprep.mubr.msk.f32.mxu1 %vm234_vm0, %v10085_v1 }
  0xed   : > { %9753 = vmatmul.mubr.msk.f32.vlgmr.msra.gmra.mxu0 %vm234_vm0, %v10108_v4  ;;  %9758 = vmatmul.mubr.msk.f32.vlgmr.msra.gmra.mxu1 %vm234_vm0, %v10117_v6 }
  0xee   : > { %9761 = vmatpush3.msra.mxu0 %v10489_v44  ;;  %9766 = vmatpush3.msra.mxu1 %v10489_v44 }
  0xef   : > { %9775 = vmatprep.subr.mxu1 %v3954_v48  ;;  %9762 = vmatprep.mubr.msk.f32.mxu0 %vm234_vm0, %v10125_v8 }
  0xf0   : > { %9767 = vmatprep.mubr.msk.f32.mxu1 %vm234_vm0, %v10080_v0  ;;  %9770 = vmatprep.subr.mxu0 %v10152_v12 }
  0xf1   : > { %9763 = vmatmul.mubr.msk.f32.vlgmr.msra.gmra.mxu0 %vm234_vm0, %v10217_v22  ;;  %9768 = vmatmul.mubr.msk.f32.vlgmr.msra.gmra.mxu1 %vm234_vm0, %v10108_v4 }
  0xf2   : > { %9776 = vmatpush3.msra.mxu1 %v3954_v48  ;;  %9771 = vmatpush3.msra.mxu0 %v10152_v12 }
  0xf3   : > { %9772 = vmatprep.mubr.msk.f32.mxu0 %vm234_vm0, %v10085_v1  ;;  %9777 = vmatprep.mubr.msk.f32.mxu1 %vm234_vm0, %v10125_v8 }
  0xf4   : > { %9780 = vmatprep.subr.mxu0 %v10170_v14  ;;  %9785 = vmatprep.subr.mxu1 %v10167_v13 }
  0xf5   : > { %9773 = vmatmul.mubr.msk.f32.vlgmr.msra.gmra.mxu0 %vm234_vm0, %v10117_v6  ;;  %9778 = vmatmul.mubr.msk.f32.vlgmr.msra.gmra.mxu1 %vm234_vm0, %v10217_v22 }
  0xf6   : > { %9781 = vmatpush3.msra.mxu0 %v10170_v14  ;;  %9786 = vmatpush3.msra.mxu1 %v10167_v13 }
  0xf7   : > { %9790 = vmatprep.subr.mxu0 %v4189_v49  ;;  %9795 = vmatprep.subr.mxu1 %v4189_v49 }
  0xf8   : > { %9782 = vmatprep.mubr.msk.f32.mxu0 %vm234_vm0, %v10230_v24  ;;  %9787 = vmatprep.mubr.msk.f32.mxu1 %vm234_vm0, %v10239_v25 }
  0xf9   : > { %9783 = vmatmul.mubr.msk.f32.vlgmr.msra.gmra.mxu0 %vm234_vm0, %v10248_v27  ;;  %9788 = vmatmul.mubr.msk.f32.vlgmr.msra.gmra.mxu1 %vm234_vm0, %v10253_v28 }
  0xfa   : > { %9791 = vmatpush3.msra.mxu0 %v4189_v49  ;;  %9796 = vmatpush3.msra.mxu1 %v4189_v49 }
  0xfb   : > { %9805 = vmatprep.subr.mxu1 %v4420_v50  ;;  %9792 = vmatprep.mubr.msk.f32.mxu0 %vm234_vm0, %v10268_v29 }
  0xfc   : > { %9797 = vmatprep.mubr.msk.f32.mxu1 %vm234_vm0, %v10230_v24  ;;  %9800 = vmatprep.subr.mxu0 %v10170_v14 }
  0xfd   : > { %9793 = vmatmul.mubr.msk.f32.vlgmr.msra.gmra.mxu0 %vm234_vm0, %v10275_v30  ;;  %9798 = vmatmul.mubr.msk.f32.vlgmr.msra.gmra.mxu1 %vm234_vm0, %v10248_v27 }
  0xfe   : > { %9806 = vmatpush3.msra.mxu1 %v4420_v50  ;;  %9801 = vmatpush3.msra.mxu0 %v10170_v14 }
  0xff   : > { %9802 = vmatprep.mubr.msk.f32.mxu0 %vm234_vm0, %v10239_v25  ;;  %9807 = vmatprep.mubr.msk.f32.mxu1 %vm234_vm0, %v10268_v29 }
 0x100   : > { %9810 = vmatprep.subr.mxu0 %v10180_v16  ;;  %9815 = vmatprep.subr.mxu1 %v10177_v15 }
 0x101   : > { %9803 = vmatmul.mubr.msk.f32.vlgmr.msra.gmra.mxu0 %vm234_vm0, %v10253_v28  ;;  %9808 = vmatmul.mubr.msk.f32.vlgmr.msra.gmra.mxu1 %vm234_vm0, %v10275_v30 }
 0x102   : > { %9811 = vmatpush3.msra.mxu0 %v10180_v16  ;;  %9812 = vmatprep.mubr.msk.f32.mxu0 %vm234_vm0, %v10300_v32 }
 0x103   : > { %9816 = vmatpush3.msra.mxu1 %v10177_v15  ;;  %9817 = vmatprep.mubr.msk.f32.mxu1 %vm234_vm0, %v10309_v33 }
 0x104   : > { %9820 = vmatprep.subr.mxu0 %v5569_v51  ;;  %9825 = vmatprep.subr.mxu1 %v5569_v51 }
 0x105   : > { %9813 = vmatmul.mubr.msk.f32.vlgmr.msra.gmra.mxu0 %vm234_vm0, %v10316_v34  ;;  %9818 = vmatmul.mubr.msk.f32.vlgmr.msra.gmra.mxu1 %vm234_vm0, %v10321_v35 }
 0x106   : > { %9821 = vmatpush3.msra.mxu0 %v5569_v51  ;;  %9826 = vmatpush3.msra.mxu1 %v5569_v51 }
 0x107   : > { %9822 = vmatprep.mubr.msk.f32.mxu0 %vm234_vm0, %v10336_v37  ;;  %9827 = vmatprep.mubr.msk.f32.mxu1 %vm234_vm0, %v10300_v32 }
 0x108   : > { %9830 = vmatprep.subr.mxu0 %v10180_v16  ;;  %9835 = vmatprep.subr.mxu1 %v5800_v52 }
 0x109   : > { %9823 = vmatmul.mubr.msk.f32.vlgmr.msra.gmra.mxu0 %vm234_vm0, %v10341_v38  ;;  %9828 = vmatmul.mubr.msk.f32.vlgmr.msra.gmra.mxu1 %vm234_vm0, %v10316_v34 }
 0x10a   : > { %9831 = vmatpush3.msra.mxu0 %v10180_v16  ;;  %9832 = vmatprep.mubr.msk.f32.mxu0 %vm234_vm0, %v10309_v33 }
 0x10b   : > { %9836 = vmatpush3.msra.mxu1 %v5800_v52  ;;  %9837 = vmatprep.mubr.msk.f32.mxu1 %vm234_vm0, %v10336_v37 }
 0x10c   : > { %9840 = vmatprep.subr.mxu0 %v10170_v14  ;;  %9845 = vmatprep.subr.mxu1 %v10167_v13 }
 0x10d   : > { %9833 = vmatmul.mubr.msk.f32.vlgmr.msra.gmra.mxu0 %vm234_vm0, %v10321_v35  ;;  %9838 = vmatmul.mubr.msk.f32.vlgmr.msra.gmra.mxu1 %vm234_vm0, %v10341_v38 }
 0x10e   : > { %9841 = vmatpush3.msra.mxu0 %v10170_v14  ;;  %9842 = vmatprep.mubr.msk.f32.mxu0 %vm234_vm0, %v10080_v0 }
 0x10f   : > { %9846 = vmatpush3.msra.mxu1 %v10167_v13  ;;  %9847 = vmatprep.mubr.msk.f32.mxu1 %vm234_vm0, %v10085_v1 }
 0x110   : > { %9850 = vmatprep.subr.mxu0 %v6071_v53  ;;  %9855 = vmatprep.subr.mxu1 %v6071_v53 }
 0x111   : > { %9843 = vmatmul.mubr.msk.f32.vlgmr.msra.gmra.mxu0 %vm234_vm0, %v10108_v4  ;;  %9848 = vmatmul.mubr.msk.f32.vlgmr.msra.gmra.mxu1 %vm234_vm0, %v10117_v6 }
 0x112   : > { %9851 = vmatpush3.msra.mxu0 %v6071_v53  ;;  %9856 = vmatpush3.msra.mxu1 %v6071_v53 }
 0x113   : > { %9852 = vmatprep.mubr.msk.f32.mxu0 %vm234_vm0, %v10125_v8  ;;  %9857 = vmatprep.mubr.msk.f32.mxu1 %vm234_vm0, %v10080_v0 }
 0x114   : > { %9860 = vmatprep.subr.mxu0 %v10170_v14  ;;  %9865 = vmatprep.subr.mxu1 %v6302_v57 }
 0x115   : > { %9853 = vmatmul.mubr.msk.f32.vlgmr.msra.gmra.mxu0 %vm234_vm0, %v10217_v22  ;;  %9858 = vmatmul.mubr.msk.f32.vlgmr.msra.gmra.mxu1 %vm234_vm0, %v10108_v4 }
 0x116   : > { %9861 = vmatpush3.msra.mxu0 %v10170_v14  ;;  %9862 = vmatprep.mubr.msk.f32.mxu0 %vm234_vm0, %v10085_v1 }
 0x117   : > { %9866 = vmatpush3.msra.mxu1 %v6302_v57  ;;  %9867 = vmatprep.mubr.msk.f32.mxu1 %vm234_vm0, %v10125_v8 }
 0x118   : > { %9870 = vmatprep.subr.mxu0 %v10180_v16  ;;  %9875 = vmatprep.subr.mxu1 %v10177_v15 }
 0x119   : > { %9863 = vmatmul.mubr.msk.f32.vlgmr.msra.gmra.mxu0 %vm234_vm0, %v10117_v6  ;;  %9868 = vmatmul.mubr.msk.f32.vlgmr.msra.gmra.mxu1 %vm234_vm0, %v10217_v22 }
 0x11a   : > { %9871 = vmatpush3.msra.mxu0 %v10180_v16  ;;  %9872 = vmatprep.mubr.msk.f32.mxu0 %vm234_vm0, %v10230_v24 }
 0x11b   : > { %9876 = vmatpush3.msra.mxu1 %v10177_v15  ;;  %9877 = vmatprep.mubr.msk.f32.mxu1 %vm234_vm0, %v10239_v25 }
 0x11c   : > { %9880 = vmatprep.subr.mxu0 %v6533_v58  ;;  %9885 = vmatprep.subr.mxu1 %v6533_v58 }
 0x11d   : > { %9873 = vmatmul.mubr.msk.f32.vlgmr.msra.gmra.mxu0 %vm234_vm0, %v10248_v27  ;;  %9878 = vmatmul.mubr.msk.f32.vlgmr.msra.gmra.mxu1 %vm234_vm0, %v10253_v28 }
 0x11e   : > { %9881 = vmatpush3.msra.mxu0 %v6533_v58  ;;  %9886 = vmatpush3.msra.mxu1 %v6533_v58 }
 0x11f   : > { %9882 = vmatprep.mubr.msk.f32.mxu0 %vm234_vm0, %v10268_v29  ;;  %9887 = vmatprep.mubr.msk.f32.mxu1 %vm234_vm0, %v10230_v24 }
 0x120   : > { %9890 = vmatprep.subr.mxu0 %v10180_v16  ;;  %9895 = vmatprep.subr.mxu1 %v6764_v59 }
 0x121   : > { %9883 = vmatmul.mubr.msk.f32.vlgmr.msra.gmra.mxu0 %vm234_vm0, %v10275_v30  ;;  %9888 = vmatmul.mubr.msk.f32.vlgmr.msra.gmra.mxu1 %vm234_vm0, %v10248_v27 }
 0x122   : > { %9891 = vmatpush3.msra.mxu0 %v10180_v16  ;;  %9892 = vmatprep.mubr.msk.f32.mxu0 %vm234_vm0, %v10239_v25 }
 0x123   : > { %9896 = vmatpush3.msra.mxu1 %v6764_v59  ;;  %9897 = vmatprep.mubr.msk.f32.mxu1 %vm234_vm0, %v10268_v29 }
 0x124   : > { %9900 = vmatprep.subr.mxu0 %v10200_v18  ;;  %9905 = vmatprep.subr.mxu1 %v10195_v17 }
 0x125   : > { %9893 = vmatmul.mubr.msk.f32.vlgmr.msra.gmra.mxu0 %vm234_vm0, %v10253_v28  ;;  %9898 = vmatmul.mubr.msk.f32.vlgmr.msra.gmra.mxu1 %vm234_vm0, %v10275_v30 }
 0x126   : > { %9901 = vmatpush3.msra.mxu0 %v10200_v18  ;;  %9902 = vmatprep.mubr.msk.f32.mxu0 %vm234_vm0, %v10300_v32 }
 0x127   : > { %9906 = vmatpush3.msra.mxu1 %v10195_v17  ;;  %9907 = vmatprep.mubr.msk.f32.mxu1 %vm234_vm0, %v10309_v33 }
 0x128   : > { %9910 = vmatprep.subr.mxu0 %v6999_v60  ;;  %9915 = vmatprep.subr.mxu1 %v6999_v60 }
 0x129   : > { %9903 = vmatmul.mubr.msk.f32.vlgmr.msra.gmra.mxu0 %vm234_vm0, %v10316_v34  ;;  %9908 = vmatmul.mubr.msk.f32.vlgmr.msra.gmra.mxu1 %vm234_vm0, %v10321_v35 }
 0x12a   : > { %9911 = vmatpush3.msra.mxu0 %v6999_v60  ;;  %9916 = vmatpush3.msra.mxu1 %v6999_v60 }
 0x12b   : > { %9912 = vmatprep.mubr.msk.f32.mxu0 %vm234_vm0, %v10336_v37  ;;  %9917 = vmatprep.mubr.msk.f32.mxu1 %vm234_vm0, %v10300_v32 }
 0x12c   : > { %9920 = vmatprep.subr.mxu0 %v10200_v18  ;;  %9925 = vmatprep.subr.mxu1 %v10727_v61 }
 0x12d   : > { %9913 = vmatmul.mubr.msk.f32.vlgmr.msra.gmra.mxu0 %vm234_vm0, %v10341_v38  ;;  %9918 = vmatmul.mubr.msk.f32.vlgmr.msra.gmra.mxu1 %vm234_vm0, %v10316_v34 }
 0x12e   : > { %9921 = vmatpush3.msra.mxu0 %v10200_v18  ;;  %9926 = vmatpush3.msra.mxu1 %v10727_v61 }
 0x12f   : > { %9922 = vmatprep.mubr.msk.f32.mxu0 %vm234_vm0, %v10309_v33  ;;  %9927 = vmatprep.mubr.msk.f32.mxu1 %vm234_vm0, %v10336_v37 }
 0x130   : > { %9930 = vmatprep.subr.mxu0 %v10180_v16  ;;  %9935 = vmatprep.subr.mxu1 %v10177_v15 }
 0x131   : > { %9923 = vmatmul.mubr.msk.f32.vlgmr.msra.gmra.mxu0 %vm234_vm0, %v10321_v35  ;;  %9928 = vmatmul.mubr.msk.f32.vlgmr.msra.gmra.mxu1 %vm234_vm0, %v10341_v38 }
 0x132   : > { %9931 = vmatpush3.msra.mxu0 %v10180_v16  ;;  %9936 = vmatpush3.msra.mxu1 %v10177_v15 }
 0x133   : > { %9940 = vmatprep.subr.mxu0 %v6533_v58  ;;  %9945 = vmatprep.subr.mxu1 %v6533_v58 }
 0x134   : > { %9932 = vmatprep.mubr.msk.f32.mxu0 %vm234_vm0, %v10080_v0  ;;  %9937 = vmatprep.mubr.msk.f32.mxu1 %vm234_vm0, %v10085_v1 }
 0x135   : > { %9933 = vmatmul.mubr.msk.f32.vlgmr.msra.gmra.mxu0 %vm234_vm0, %v10108_v4  ;;  %9938 = vmatmul.mubr.msk.f32.vlgmr.msra.gmra.mxu1 %vm234_vm0, %v10117_v6 }
 0x136   : > { %9941 = vmatpush3.msra.mxu0 %v6533_v58  ;;  %9946 = vmatpush3.msra.mxu1 %v6533_v58 }
 0x137   : > { %9955 = vmatprep.subr.mxu1 %v6764_v59  ;;  %9942 = vmatprep.mubr.msk.f32.mxu0 %vm234_vm0, %v10125_v8 }
 0x138   : > { %9947 = vmatprep.mubr.msk.f32.mxu1 %vm234_vm0, %v10080_v0  ;;  %9950 = vmatprep.subr.mxu0 %v10180_v16 }
 0x139   : > { %9943 = vmatmul.mubr.msk.f32.vlgmr.msra.gmra.mxu0 %vm234_vm0, %v10217_v22  ;;  %9948 = vmatmul.mubr.msk.f32.vlgmr.msra.gmra.mxu1 %vm234_vm0, %v10108_v4 }
 0x13a   : > { %9956 = vmatpush3.msra.mxu1 %v6764_v59  ;;  %9951 = vmatpush3.msra.mxu0 %v10180_v16  ;;  %v8610_v16 = vpop.permute.xlu1 %8609 }
 0x13b   : > { %9952 = vmatprep.mubr.msk.f32.mxu0 %vm234_vm0, %v10085_v1  ;;  %9957 = vmatprep.mubr.msk.f32.mxu1 %vm234_vm0, %v10125_v8 }
 0x13c   : > { %9960 = vmatprep.subr.mxu0 %v10200_v18  ;;  %9965 = vmatprep.subr.mxu1 %v10195_v17 }
 0x13d   : > { %9953 = vmatmul.mubr.msk.f32.vlgmr.msra.gmra.mxu0 %vm234_vm0, %v10117_v6  ;;  %9958 = vmatmul.mubr.msk.f32.vlgmr.msra.gmra.mxu1 %vm234_vm0, %v10217_v22 }
 0x13e   : > { %9961 = vmatpush3.msra.mxu0 %v10200_v18  ;;  %9966 = vmatpush3.msra.mxu1 %v10195_v17 }
 0x13f   : > { %9970 = vmatprep.subr.mxu0 %v6999_v60  ;;  %9975 = vmatprep.subr.mxu1 %v6999_v60 }
 0x140   : > { %9962 = vmatprep.mubr.msk.f32.mxu0 %vm234_vm0, %v10230_v24  ;;  %9967 = vmatprep.mubr.msk.f32.mxu1 %vm234_vm0, %v10239_v25 }
 0x141   : > { %9963 = vmatmul.mubr.msk.f32.vlgmr.msra.gmra.mxu0 %vm234_vm0, %v10248_v27  ;;  %9968 = vmatmul.mubr.msk.f32.vlgmr.msra.gmra.mxu1 %vm234_vm0, %v10253_v28 }
 0x142   : > { %9971 = vmatpush3.msra.mxu0 %v6999_v60  ;;  %9976 = vmatpush3.msra.mxu1 %v6999_v60 }
 0x143   : > { %9985 = vmatprep.subr.mxu1 %v10727_v61  ;;  %9972 = vmatprep.mubr.msk.f32.mxu0 %vm234_vm0, %v10268_v29 }
 0x144   : > { %v9494_v0 = vpop.f32.mrf.mxu0  ;;  %v10791_v1 = vpop.f32.mrf.mxu1  ;;  %9977 = vmatprep.mubr.msk.f32.mxu1 %vm234_vm0, %v10230_v24  ;;  %9980 = vmatprep.subr.mxu0 %v10200_v18 }
 0x145   : > { %v10797_v3 = vadd.f32 %v9494_v0, %v10497_v47  ;;  %9973 = vmatmul.mubr.msk.f32.vlgmr.msra.gmra.mxu0 %vm234_vm0, %v10275_v30  ;;  %9978 = vmatmul.mubr.msk.f32.vlgmr.msra.gmra.mxu1 %vm234_vm0, %v10248_v27 }
 0x146   : > { %v473_v4 = vpop.f32.mrf.mxu0  ;;  %v10802_v5 = vpop.f32.mrf.mxu1  ;;  %9986 = vmatpush3.msra.mxu1 %v10727_v61  ;;  %9981 = vmatpush3.msra.mxu0 %v10200_v18 }
 0x147   : > { %v10808_v6 = vadd.f32 %v473_v4, %v389_v2  ;;  %9982 = vmatprep.mubr.msk.f32.mxu0 %vm234_vm0, %v10239_v25  ;;  %9987 = vmatprep.mubr.msk.f32.mxu1 %vm234_vm0, %v10268_v29 }
 0x148   : > { %v10812_v7 = vpop.f32.mrf.mxu0  ;;  %v10814_v8 = vpop.f32.mrf.mxu1  ;;  %9990 = vmatprep.subr.mxu0 %v10210_v20  ;;  %9995 = vmatprep.subr.mxu1 %v10205_v19 }
 0x149   : > { %9983 = vmatmul.mubr.msk.f32.vlgmr.msra.gmra.mxu0 %vm234_vm0, %v10253_v28  ;;  %9988 = vmatmul.mubr.msk.f32.vlgmr.msra.gmra.mxu1 %vm234_vm0, %v10275_v30  ;;  %v631_v63 = vadd.f32 %v10812_v7, %v10791_v1 }
 0x14a   : > { %v10820_v9 = vpop.f32.mrf.mxu0  ;;  %v10823_v10 = vpop.f32.mrf.mxu1  ;;  %9991 = vmatpush3.msra.mxu0 %v10210_v20  ;;  %9992 = vmatprep.mubr.msk.f32.mxu0 %vm234_vm0, %v10300_v32 }
 0x14b   : > { %9996 = vmatpush3.msra.mxu1 %v10205_v19  ;;  %9997 = vmatprep.mubr.msk.f32.mxu1 %vm234_vm0, %v10309_v33  ;;  %v626_v0 = vadd.f32 %v10820_v9, %v10802_v5 }
 0x14c   : > { %v10833_v12 = vpop.f32.mrf.mxu0  ;;  %v10835_v13 = vpop.f32.mrf.mxu1  ;;  %10000 = vmatprep.subr.mxu0 %v8379_v11  ;;  %10005 = vmatprep.subr.mxu1 %v8379_v11 }
 0x14d   : > { %9993 = vmatmul.mubr.msk.f32.vlgmr.msra.gmra.mxu0 %vm234_vm0, %v10316_v34  ;;  %9998 = vmatmul.mubr.msk.f32.vlgmr.msra.gmra.mxu1 %vm234_vm0, %v10321_v35  ;;  %v874_v57 = vadd.f32 %v10835_v13, %v10833_v12 }
 0x14e   : > { %v10840_v14 = vpop.f32.mrf.mxu0  ;;  %v10842_v15 = vpop.f32.mrf.mxu1  ;;  %10001 = vmatpush3.msra.mxu0 %v8379_v11  ;;  %10006 = vmatpush3.msra.mxu1 %v8379_v11 }
 0x14f   : > { %10002 = vmatprep.mubr.msk.f32.mxu0 %vm234_vm0, %v10336_v37  ;;  %10007 = vmatprep.mubr.msk.f32.mxu1 %vm234_vm0, %v10300_v32  ;;  %v869_v62 = vadd.f32 %v10842_v15, %v10840_v14 }
 0x150   : > { %v9524_v17 = vpop.f32.mrf.mxu0  ;;  %v9529_v18 = vpop.f32.mrf.mxu1  ;;  %10010 = vmatprep.subr.mxu0 %v10210_v20  ;;  %10015 = vmatprep.subr.mxu1 %v8610_v16 }
 0x151   : > { %10003 = vmatmul.mubr.msk.f32.vlgmr.msra.gmra.mxu0 %vm234_vm0, %v10341_v38  ;;  %10008 = vmatmul.mubr.msk.f32.vlgmr.msra.gmra.mxu1 %vm234_vm0, %v10316_v34  ;;  %v963_v2 = vadd.f32 %v9524_v17, %v874_v57 }
 0x152   : > { %v953_v19 = vpop.f32.mrf.mxu0  ;;  %v1030_v21 = vpop.f32.mrf.mxu1  ;;  %10011 = vmatpush3.msra.mxu0 %v10210_v20  ;;  %10012 = vmatprep.mubr.msk.f32.mxu0 %vm234_vm0, %v10309_v33 }
 0x153   : > { %10016 = vmatpush3.msra.mxu1 %v8610_v16  ;;  %10017 = vmatprep.mubr.msk.f32.mxu1 %vm234_vm0, %v10336_v37  ;;  %v962_v16 = vadd.f32 %v953_v19, %v869_v62  ;;  %v1196_v14 = vadd.f32 %v963_v2, %v10797_v3 }
 0x154   : > { %v9534_v22 = vpop.f32.mrf.mxu0  ;;  %v9539_v23 = vpop.f32.mrf.mxu1 }
 0x155   : > { %10013 = vmatmul.mubr.msk.f32.vlgmr.msra.gmra.mxu0 %vm234_vm0, %v10321_v35  ;;  %10018 = vmatmul.mubr.msk.f32.vlgmr.msra.gmra.mxu1 %vm234_vm0, %v10341_v38  ;;  %v1111_v58 = vadd.f32 %v9534_v22, %v9529_v18  ;;  %v713_v22 = vadd.f32 %v10823_v10, %v626_v0  ;;  %v1195_v5 = vadd.f32 %v962_v16, %v10808_v6 }
 0x156   : > { %v1105_v24 = vpop.f32.mrf.mxu0  ;;  %v1184_v25 = vpop.f32.mrf.mxu1 }
 0x157   : > { %v1106_v59 = vadd.f32 %v1105_v24, %v1030_v21  ;;  %v714_v21 = vadd.f32 %v10814_v8, %v631_v63 }
 0x158   : > { %v9544_v26 = vpop.f32.mrf.mxu0  ;;  %v9549_v27 = vpop.f32.mrf.mxu1 }
 0x159   : > { %v1358_v7 = vadd.f32 %v9549_v27, %v9544_v26 }
 0x15a   : > { %v1271_v20 = vpop.f32.mrf.mxu0  ;;  %v1352_v28 = vpop.f32.mrf.mxu1 }
 0x15c   : > { %v9554_v29 = vpop.f32.mrf.mxu0  ;;  %v9559_v30 = vpop.f32.mrf.mxu1 }
 0x15d   : > { %v1447_v8 = vadd.f32 %v9554_v29, %v1358_v7 }
 0x15e   : > { %v10866_v31 = vpop.f32.mrf.mxu0  ;;  %v1514_v32 = vpop.f32.mrf.mxu1 }
 0x161   : > { %v9564_v33 = vpop.f32.mrf.mxu0  ;;  %v9569_v34 = vpop.f32.mrf.mxu1 }
 0x162   : > { %v1595_v18 = vadd.f32 %v9564_v33, %v9559_v30  ;;  %v1353_v33 = vadd.f32 %v1352_v28, %v1271_v20 }
 0x163   : > { %v1589_v36 = vpop.f32.mrf.mxu0  ;;  %v10868_v37 = vpop.f32.mrf.mxu1 }
 0x164   : > { %v1590_v9 = vadd.f32 %v1589_v36, %v1514_v32  ;;  %v1446_v32 = vadd.f32 %v10866_v31, %v1353_v33 }
 0x165   : > { %v9574_v39 = vpop.f32.mrf.mxu0  ;;  %v9579_v40 = vpop.f32.mrf.mxu1 }
 0x166   : > { %v1832_v3 = vadd.f32 %v9579_v40, %v9574_v39  ;;  %v1677_v36 = vadd.f32 %v10868_v37, %v1590_v9 }
 0x167   : > { %v10870_v35 = vpop.f32.mrf.mxu0  ;;  %v10872_v41 = vpop.f32.mrf.mxu1 }
 0x168   : > { %v1827_v20 = vadd.f32 %v10872_v41, %v10870_v35 }
 0x169   : > { %v10874_v38 = vpop.f32.mrf.mxu0  ;;  %v9589_v42 = vpop.f32.mrf.mxu1 }
 0x16a   : > { %v1911_v28 = vadd.f32 %v10874_v38, %v1832_v3 }
 0x16b   : > { %v10876_v43 = vpop.f32.mrf.mxu0  ;;  %v1978_v44 = vpop.f32.mrf.mxu1 }
 0x16c   : > { %11009 = vst [vmem:[#allocation2_spill] sm:$0xff] %v10876_v43  ;;  %v1193_v43 = vadd.f32 %v1184_v25, %v1106_v59 }
 0x16d   : > { %v9594_v45 = vpop.f32.mrf.mxu0  ;;  %v10878_v46 = vpop.f32.mrf.mxu1 }
 0x16e   : > { %v2059_v10 = vadd.f32 %v9594_v45, %v9589_v42 }
 0x16f   : > { %v2053_v47 = vpop.f32.mrf.mxu0  ;;  %v10880_v48 = vpop.f32.mrf.mxu1 }
 0x170   : > { %11010 = vst [vmem:[#allocation3_spill] sm:$0xff] %v10880_v48  ;;  %v1194_v48 = vadd.f32 %v9539_v23, %v1111_v58  ;;  %v1197_v23 = vadd.f32 %v1193_v43, %v713_v22  ;;  %v1678_v58 = vadd.f32 %v9569_v34, %v1595_v18  ;;  %v2054_v59 = vadd.f32 %v2053_v47, %v1978_v44 }
 0x171   : > { %v9604_v49 = vpop.f32.mrf.mxu0  ;;  %v9609_v50 = vpop.f32.mrf.mxu1  ;;  %v2138_v42 = vadd.f32 %v10878_v46, %v2059_v10 }
 0x172   : > { %v1198_v19 = vadd.f32 %v1194_v48, %v714_v21  ;;  %v2286_v24 = vadd.f32 %v9609_v50, %v9604_v49  ;;  %v1681_v46 = vadd.f32 %v1677_v36, %v1197_v23  ;;  %v10926_v10 = vpop.permute.xlu0 %3069 }
 0x173   : > { %v2205_v51 = vpop.f32.mrf.mxu0  ;;  %v2280_v52 = vpop.f32.mrf.mxu1  ;;  %v11011_v49 = vld [vmem:[#allocation2_spill] sm:$0xff]  ;;  %11015 = vst [vmem:[#allocation4_spill] sm:$0xff] %v10926_v10 }
 0x174   : > { %v2281_v62 = vadd.f32 %v2280_v52, %v2205_v51  ;;  %v1682_v31 = vadd.f32 %v1678_v58, %v1198_v19  ;;  %v1910_v37 = vadd.f32 %v11011_v49, %v1827_v20 }
 0x175   : > { %v9614_v53 = vpop.f32.mrf.mxu0  ;;  %v9619_v54 = vpop.f32.mrf.mxu1 }
 0x176   : > { %v2365_v6 = vadd.f32 %v9614_v53, %v2286_v24 }
 0x177   : > { %v2355_v55 = vpop.f32.mrf.mxu0  ;;  %v2432_v56 = vpop.f32.mrf.mxu1  ;;  %v11012_v50 = vld [vmem:[#allocation3_spill] sm:$0xff] }
 0x178   : > { %v2364_v29 = vadd.f32 %v2355_v55, %v2281_v62  ;;  %v2137_v51 = vadd.f32 %v11012_v50, %v2054_v59  ;;  %v2594_v52 = vadd.f32 %v2365_v6, %v1911_v28 }
 0x179   : > { %v9624_v60 = vpop.f32.mrf.mxu0  ;;  %v9629_v61 = vpop.f32.mrf.mxu1 }
 0x17a   : > { %v2513_v17 = vadd.f32 %v9624_v60, %v9619_v54  ;;  %v2593_v60 = vadd.f32 %v2364_v29, %v1910_v37 }
 0x17b   : > { %v2507_v4 = vpop.f32.mrf.mxu0  ;;  %v2582_v11 = vpop.f32.mrf.mxu1 }
 0x17c   : > { %v2508_v25 = vadd.f32 %v2507_v4, %v2432_v56  ;;  %v2592_v43 = vadd.f32 %v9629_v61, %v2513_v17  ;;  %v1680_v56 = vadd.f32 %v1447_v8, %v1196_v14 }
 0x17d   : > { %v9634_v12 = vpop.f32.mrf.mxu0  ;;  %v9639_v13 = vpop.f32.mrf.mxu1 }
 0x17e   : > { %v2744_v48 = vadd.f32 %v9639_v13, %v9634_v12  ;;  %v2591_v34 = vadd.f32 %v2582_v11, %v2508_v25  ;;  %v2596_v41 = vadd.f32 %v2592_v43, %v2138_v42  ;;  %v1679_v12 = vadd.f32 %v1446_v32, %v1195_v5 }
 0x17f   : > { %v2663_v15 = vpop.f32.mrf.mxu0  ;;  %v2738_v1 = vpop.f32.mrf.mxu1  ;;  %v1684_v13 = vmax.f32 %v1680_v56, %v1682_v31 }
 0x180   : > { %v2739_v44 = vadd.f32 %v2738_v1, %v2663_v15  ;;  %v2595_v61 = vadd.f32 %v2591_v34, %v2137_v51  ;;  %v1683_v17 = vmax.f32 %v1679_v12, %v1681_v46 }
 0x181   : > { %v9644_v57 = vpop.f32.mrf.mxu0  ;;  %v9649_v30 = vpop.f32.mrf.mxu1 }
 0x182   : > { %v2827_v45 = vadd.f32 %v9644_v57, %v2744_v48  ;;  %v10914_v57 = vpop.permute.xlu1 %3074 }
 0x183   : > { %v2817_v26 = vpop.f32.mrf.mxu0  ;;  %v2894_v27 = vpop.f32.mrf.mxu1  ;;  %11013 = vst [vmem:[#allocation2_spill] sm:$0xff] %v10914_v57 }
 0x184   : > { %v2826_v38 = vadd.f32 %v2817_v26, %v2739_v44  ;;  %v3060_v2 = vadd.f32 %v2827_v45, %v2594_v52 }
 0x185   : > { %v9654_v39 = vpop.f32.mrf.mxu0  ;;  %v9659_v40 = vpop.f32.mrf.mxu1 }
 0x186   : > { %v2975_v47 = vadd.f32 %v9654_v39, %v9649_v30  ;;  %v3059_v22 = vadd.f32 %v2826_v38, %v2593_v60 }
 0x187   : > { %v2969_v53 = vpop.f32.mrf.mxu0  ;;  %v3048_v35 = vpop.f32.mrf.mxu1 }
 0x188   : > { %v3058_v54 = vadd.f32 %v9659_v40, %v2975_v47  ;;  %v2970_v55 = vadd.f32 %v2969_v53, %v2894_v27 }
 0x189   : > { %v9664_v63 = vpop.f32.mrf.mxu0  ;;  %v9669_v0 = vpop.f32.mrf.mxu1 }
 0x18a   : > { %v3062_v4 = vadd.f32 %v3058_v54, %v2596_v41  ;;  %v3057_v11 = vadd.f32 %v3048_v35, %v2970_v55  ;;  %v3256_v16 = vadd.f32 %v9669_v0, %v9664_v63 }
 0x18b   : > { %v3175_v18 = vpop.f32.mrf.mxu0  ;;  %v3250_v21 = vpop.f32.mrf.mxu1 }
 0x18c   : > { %v3064_v15 = vmax.f32 %v3060_v2, %v3062_v4  ;;  %v3061_v1 = vadd.f32 %v3057_v11, %v2595_v61  ;;  %v3251_v7 = vadd.f32 %v3250_v21, %v3175_v18 }
 0x18d   : > { %v9674_v14 = vpop.f32.mrf.mxu0  ;;  %v10910_v9 = vpop.f32.mrf.mxu1 }
 0x18e   : > { %v3063_v19 = vmax.f32 %v3059_v22, %v3061_v1  ;;  %v10912_v23 = vadd.f32 %v9674_v14, %v3256_v16  ;;  %v3066_v24 = vmax.f32 %v1684_v13, %v3064_v15 }
 0x18f   : > { %v3329_v25 = vpop.f32.mrf.mxu0  ;;  %v10919_v33 = vpop.f32.mrf.mxu1 }
 0x190   : > { %v10916_v5 = vadd.f32 %v3329_v25, %v3251_v7  ;;  %v3078_v30 = vadd.f32 %v10914_v57, %v3066_v24  ;;  %v3065_v8 = vmax.f32 %v1683_v17, %v3063_v19 }
 0x191   : > { %v9684_v58 = vpop.f32.mrf.mxu0  ;;  %v10929_v62 = vpop.f32.mrf.mxu1 }
 0x192   : > { %11014 = vst [vmem:[#allocation3_spill] sm:$0xff] %v10916_v5  ;;  %v3080_v3 = vmax.f32 %v3078_v30, 0.0  ;;  %v3077_v59 = vadd.f32 %v10926_v10, %v3065_v8  ;;  %v3487_v30 = vadd.f32 %v9684_v58, %v10910_v9 }
 0x193   : > { %v3481_v6 = vpop.f32.mrf.mxu0  ;;  %v10933_v27 = vpop.f32.mrf.mxu1 }
 0x194   : > { %3083 = vst.msk [vmem:[%s10924_s20 + $0x8] sm:$0xff] %vm3081_vm1, %v3080_v3  ;;  %v3079_v26 = vmax.f32 %v3077_v59, 0.0  ;;  %v3482_v8 = vadd.f32 %v3481_v6, %v10919_v33 }
 0x195   : > { %v9694_v32 = vpop.f32.mrf.mxu0  ;;  %v9699_v36 = vpop.f32.mrf.mxu1 }
 0x196   : > { %3082 = vst.msk [vmem:[%s10924_s20] sm:$0xff] %vm3081_vm1, %v3079_v26  ;;  %v3718_v14 = vadd.f32 %v9699_v36, %v9694_v32  ;;  %v3569_v32 = vadd.f32 %v10933_v27, %v3482_v8 }
 0x197   : > { %v3637_v43 = vpop.f32.mrf.mxu0  ;;  %v3712_v48 = vpop.f32.mrf.mxu1 }
 0x199   : > { %v9704_v20 = vpop.f32.mrf.mxu0  ;;  %v9709_v28 = vpop.f32.mrf.mxu1 }
 0x19a   : > { %v3801_v3 = vadd.f32 %v9704_v20, %v3718_v14 }
 0x19b   : > { %v3791_v29 = vpop.f32.mrf.mxu0  ;;  %v3868_v34 = vpop.f32.mrf.mxu1 }
 0x19c   : > { %v4034_v36 = vadd.f32 %v3801_v3, %v10912_v23 }
 0x19d   : > { %v9714_v39 = vpop.f32.mrf.mxu0  ;;  %v9719_v40 = vpop.f32.mrf.mxu1 }
 0x19e   : > { %v3949_v17 = vadd.f32 %v9714_v39, %v9709_v28 }
 0x19f   : > { %v3943_v42 = vpop.f32.mrf.mxu0  ;;  %v4022_v44 = vpop.f32.mrf.mxu1 }
 0x1a0   : > { %v3944_v19 = vadd.f32 %v3943_v42, %v3868_v34  ;;  %v4032_v10 = vadd.f32 %v9719_v40, %v3949_v17 }
 0x1a1   : > { %v9724_v45 = vpop.f32.mrf.mxu0  ;;  %v9729_v47 = vpop.f32.mrf.mxu1 }
 0x1a2   : > { %v4031_v57 = vadd.f32 %v4022_v44, %v3944_v19  ;;  %v4184_v9 = vadd.f32 %v9729_v47, %v9724_v45 }
 0x1a3   : > { %v4103_v31 = vpop.f32.mrf.mxu0  ;;  %v4178_v49 = vpop.f32.mrf.mxu1 }
 0x1a4   : > { %v4035_v39 = vadd.f32 %v4031_v57, %v3569_v32 }
 0x1a5   : > { %v9734_v37 = vpop.f32.mrf.mxu0  ;;  %v9739_v50 = vpop.f32.mrf.mxu1 }
 0x1a7   : > { %v10937_v51 = vpop.f32.mrf.mxu0  ;;  %v4334_v52 = vpop.f32.mrf.mxu1 }
 0x1a8   : > { %11016 = vst [vmem:[#allocation5_spill] sm:$0xff] %v10937_v51  ;;  %v3570_v51 = vadd.f32 %v10929_v62, %v3487_v30 }
 0x1a9   : > { %v9744_v53 = vpop.f32.mrf.mxu0  ;;  %v9749_v35 = vpop.f32.mrf.mxu1 }
 0x1aa   : > { %v4036_v20 = vadd.f32 %v4032_v10, %v3570_v51 }
 0x1ab   : > { %v4409_v41 = vpop.f32.mrf.mxu0  ;;  %v4488_v38 = vpop.f32.mrf.mxu1 }
 0x1ac   : > { %v4410_v58 = vadd.f32 %v4409_v41, %v4334_v52 }
 0x1ad   : > { %v9754_v54 = vpop.f32.mrf.mxu0  ;;  %v9759_v55 = vpop.f32.mrf.mxu1 }
 0x1ae   : > { %v4652_v14 = vadd.f32 %v9759_v55, %v9754_v54  ;;  %v4497_v47 = vadd.f32 %v4488_v38, %v4410_v58 }
 0x1af   : > { %v10939_v56 = vpop.f32.mrf.mxu0  ;;  %v4646_v46 = vpop.f32.mrf.mxu1 }
 0x1b0   : > { %11017 = vst [vmem:[#allocation6_spill] sm:$0xff] %v10939_v56 }
 0x1b1   : > { %v9764_v60 = vpop.f32.mrf.mxu0  ;;  %v9769_v61 = vpop.f32.mrf.mxu1 }
 0x1b3   : > { %v10941_v63 = vpop.f32.mrf.mxu0  ;;  %v4798_v0 = vpop.f32.mrf.mxu1 }
 0x1b4   : > { %11018 = vst [vmem:[#allocation7_spill] sm:$0xff] %v10941_v63  ;;  %v4415_v63 = vadd.f32 %v9744_v53, %v9739_v50 }
 0x1b5   : > { %v9774_v2 = vpop.f32.mrf.mxu0  ;;  %v9779_v4 = vpop.f32.mrf.mxu1 }
 0x1b6   : > { %v4879_v40 = vadd.f32 %v9774_v2, %v9769_v61  ;;  %v4498_v50 = vadd.f32 %v9749_v35, %v4415_v63  ;;  %v4731_v61 = vadd.f32 %v9764_v60, %v4652_v14 }
 0x1b7   : > { %v4873_v11 = vpop.f32.mrf.mxu0  ;;  %v10943_v16 = vpop.f32.mrf.mxu1  ;;  %v11021_v57 = vld [vmem:[#allocation6_spill] sm:$0xff] }
 0x1b8   : > { %11019 = vst [vmem:[#allocation8_spill] sm:$0xff] %v10943_v16  ;;  %v3713_v16 = vadd.f32 %v3712_v48, %v3637_v43  ;;  %v4179_v43 = vadd.f32 %v4178_v49, %v4103_v31  ;;  %v4267_v48 = vadd.f32 %v9734_v37, %v4184_v9  ;;  %v4874_v27 = vadd.f32 %v4873_v11, %v4798_v0 }
 0x1b9   : > { %v9784_v12 = vpop.f32.mrf.mxu0  ;;  %v9789_v13 = vpop.f32.mrf.mxu1  ;;  %v4647_v51 = vadd.f32 %v4646_v46, %v11021_v57  ;;  %v4958_v2 = vadd.f32 %v9779_v4, %v4879_v40  ;;  %v4502_v0 = vadd.f32 %v4498_v50, %v4036_v20  ;;  %v11024_v4 = vld [vmem:[#allocation3_spill] sm:$0xff]  ;;  %v11025_v50 = vld [vmem:[#allocation2_spill] sm:$0xff] }
 0x1ba   : > { %v3800_v34 = vadd.f32 %v3791_v29, %v3713_v16  ;;  %v5106_v42 = vadd.f32 %v9789_v13, %v9784_v12  ;;  %v11020_v29 = vld [vmem:[#allocation5_spill] sm:$0xff] }
 0x1bb   : > { %v5025_v18 = vpop.f32.mrf.mxu0  ;;  %v5100_v21 = vpop.f32.mrf.mxu1  ;;  %v4266_v45 = vadd.f32 %v11020_v29, %v4179_v43  ;;  %v11022_v11 = vld [vmem:[#allocation7_spill] sm:$0xff] }
 0x1bc   : > { %v5101_v17 = vadd.f32 %v5100_v21, %v5025_v18  ;;  %v4730_v16 = vadd.f32 %v11022_v11, %v4647_v51 }
 0x1bd   : > { %v9794_v22 = vpop.f32.mrf.mxu0  ;;  %v9799_v15 = vpop.f32.mrf.mxu1 }
 0x1be   : > { %v5185_v23 = vadd.f32 %v9794_v22, %v5106_v42  ;;  %v4033_v22 = vadd.f32 %v3800_v34, %v11024_v4 }
 0x1bf   : > { %v5175_v1 = vpop.f32.mrf.mxu0  ;;  %v5252_v7 = vpop.f32.mrf.mxu1  ;;  %v11023_v12 = vld [vmem:[#allocation8_spill] sm:$0xff] }
 0x1c0   : > { %v5184_v31 = vadd.f32 %v5175_v1, %v5101_v17  ;;  %v4957_v13 = vadd.f32 %v11023_v12, %v4874_v27  ;;  %v5414_v38 = vadd.f32 %v5185_v23, %v4731_v61  ;;  %v4501_v1 = vadd.f32 %v4497_v47, %v4035_v39  ;;  %v11027_v23 = vld [vmem:[#allocation4_spill] sm:$0xff] }
 0x1c1   : > { %v9804_v24 = vpop.f32.mrf.mxu0  ;;  %v9809_v25 = vpop.f32.mrf.mxu1 }
 0x1c2   : > { %v5333_v33 = vadd.f32 %v9804_v24, %v9799_v15  ;;  %v4500_v15 = vadd.f32 %v4267_v48, %v4034_v36 }
 0x1c3   : > { %v5327_v59 = vpop.f32.mrf.mxu0  ;;  %v5402_v26 = vpop.f32.mrf.mxu1 }
 0x1c4   : > { %v5328_v53 = vadd.f32 %v5327_v59, %v5252_v7  ;;  %v5412_v52 = vadd.f32 %v9809_v25, %v5333_v33  ;;  %v5413_v7 = vadd.f32 %v5184_v31, %v4730_v16  ;;  %v4504_v9 = vmax.f32 %v4500_v15, %v4502_v0 }
 0x1c5   : > { %v9814_v5 = vpop.f32.mrf.mxu0  ;;  %v9819_v56 = vpop.f32.mrf.mxu1 }
 0x1c6   : > { %v5564_v41 = vadd.f32 %v9819_v56, %v9814_v5  ;;  %v5411_v37 = vadd.f32 %v5402_v26, %v5328_v53  ;;  %v5416_v5 = vadd.f32 %v5412_v52, %v4958_v2  ;;  %v4499_v26 = vadd.f32 %v4266_v45, %v4033_v22 }
 0x1c7   : > { %v5483_v28 = vpop.f32.mrf.mxu0  ;;  %v5558_v6 = vpop.f32.mrf.mxu1 }
 0x1c8   : > { %v5559_v35 = vadd.f32 %v5558_v6, %v5483_v28  ;;  %v5415_v25 = vadd.f32 %v5411_v37, %v4957_v13  ;;  %v4503_v36 = vmax.f32 %v4499_v26, %v4501_v1 }
 0x1c9   : > { %v9824_v44 = vpop.f32.mrf.mxu0  ;;  %v9829_v62 = vpop.f32.mrf.mxu1 }
 0x1ca   : > { %v5647_v63 = vadd.f32 %v9824_v44, %v5564_v41 }
 0x1cb   : > { %v5637_v19 = vpop.f32.mrf.mxu0  ;;  %v5714_v10 = vpop.f32.mrf.mxu1 }
 0x1cc   : > { %v5646_v56 = vadd.f32 %v5637_v19, %v5559_v35  ;;  %v5880_v30 = vadd.f32 %v5647_v63, %v5414_v38 }
 0x1cd   : > { %v9834_v49 = vpop.f32.mrf.mxu0  ;;  %v9839_v55 = vpop.f32.mrf.mxu1 }
 0x1ce   : > { %v5795_v54 = vadd.f32 %v9834_v49, %v9829_v62  ;;  %v5879_v58 = vadd.f32 %v5646_v56, %v5413_v7 }
 0x1cf   : > { %v5789_v18 = vpop.f32.mrf.mxu0  ;;  %v5868_v60 = vpop.f32.mrf.mxu1 }
 0x1d0   : > { %v5878_v21 = vadd.f32 %v9839_v55, %v5795_v54  ;;  %v5790_v46 = vadd.f32 %v5789_v18, %v5714_v10 }
 0x1d1   : > { %v9844_v24 = vpop.f32.mrf.mxu0  ;;  %v9849_v59 = vpop.f32.mrf.mxu1 }
 0x1d2   : > { %v5882_v8 = vadd.f32 %v5878_v21, %v5416_v5  ;;  %v5877_v3 = vadd.f32 %v5868_v60, %v5790_v46  ;;  %v6066_v32 = vadd.f32 %v9849_v59, %v9844_v24 }
 0x1d3   : > { %v5985_v28 = vpop.f32.mrf.mxu0  ;;  %v6060_v20 = vpop.f32.mrf.mxu1 }
 0x1d4   : > { %v5884_v33 = vmax.f32 %v5880_v30, %v5882_v8  ;;  %v5881_v6 = vadd.f32 %v5877_v3, %v5415_v25  ;;  %v6061_v40 = vadd.f32 %v6060_v20, %v5985_v28 }
 0x1d5   : > { %v9854_v34 = vpop.f32.mrf.mxu0  ;;  %v10957_v43 = vpop.f32.mrf.mxu1 }
 0x1d6   : > { %v5886_v39 = vmax.f32 %v4504_v9, %v5884_v33  ;;  %v5883_v42 = vmax.f32 %v5879_v58, %v5881_v6  ;;  %v10955_v44 = vadd.f32 %v9854_v34, %v6066_v32 }
 0x1d7   : > { %v6139_v48 = vpop.f32.mrf.mxu0  ;;  %v6216_v27 = vpop.f32.mrf.mxu1 }
 0x1d8   : > { %v5888_v53 = vadd.f32 %v5886_v39, %v11025_v50  ;;  %v5885_v62 = vmax.f32 %v4503_v36, %v5883_v42  ;;  %v10960_v14 = vadd.f32 %v6139_v48, %v6061_v40 }
 0x1d9   : > { %v9864_v29 = vpop.f32.mrf.mxu0  ;;  %v10963_v45 = vpop.f32.mrf.mxu1 }
 0x1da   : > { %11026 = vst [vmem:[#allocation5_spill] sm:$0xff] %v10960_v14  ;;  %v5890_v17 = vmax.f32 %v5888_v53, 0.0  ;;  %v5887_v19 = vadd.f32 %v5885_v62, %v11027_v23  ;;  %v6297_v53 = vadd.f32 %v9864_v29, %v10957_v43 }
 0x1db   : > { %v6291_v52 = vpop.f32.mrf.mxu0  ;;  %v10967_v41 = vpop.f32.mrf.mxu1 }
 0x1dc   : > { %9056 = vst.msk [vmem:[%s10924_s20 + $0x18] sm:$0xff] %vm3081_vm1, %v5890_v17  ;;  %v5889_v47 = vmax.f32 %v5887_v19, 0.0  ;;  %v6292_v62 = vadd.f32 %v6291_v52, %v6216_v27 }
 0x1dd   : > { %v9874_v10 = vpop.f32.mrf.mxu0  ;;  %v9879_v57 = vpop.f32.mrf.mxu1 }
 0x1de   : > { %9055 = vst.msk [vmem:[%s10924_s20 + $0x10] sm:$0xff] %vm3081_vm1, %v5889_v47  ;;  %v6528_v34 = vadd.f32 %v9879_v57, %v9874_v10  ;;  %v6379_v10 = vadd.f32 %v10967_v41, %v6292_v62 }
 0x1df   : > { %v6447_v51 = vpop.f32.mrf.mxu0  ;;  %v6522_v61 = vpop.f32.mrf.mxu1 }
 0x1e1   : > { %v9884_v2 = vpop.f32.mrf.mxu0  ;;  %v9889_v31 = vpop.f32.mrf.mxu1 }
 0x1e2   : > { %v6611_v17 = vadd.f32 %v9884_v2, %v6528_v34 }
 0x1e3   : > { %v6601_v49 = vpop.f32.mrf.mxu0  ;;  %v6678_v37 = vpop.f32.mrf.mxu1 }
 0x1e4   : > { %v6844_v57 = vadd.f32 %v6611_v17, %v10955_v44 }
 0x1e5   : > { %v9894_v35 = vpop.f32.mrf.mxu0  ;;  %v9899_v63 = vpop.f32.mrf.mxu1 }
 0x1e6   : > { %v6759_v36 = vadd.f32 %v9894_v35, %v9889_v31 }
 0x1e7   : > { %v6753_v54 = vpop.f32.mrf.mxu0  ;;  %v6832_v55 = vpop.f32.mrf.mxu1 }
 0x1e8   : > { %v6754_v39 = vadd.f32 %v6753_v54, %v6678_v37  ;;  %v6842_v23 = vadd.f32 %v9899_v63, %v6759_v36 }
 0x1e9   : > { %v9904_v0 = vpop.f32.mrf.mxu0  ;;  %v9909_v11 = vpop.f32.mrf.mxu1 }
 0x1ea   : > { %v6841_v50 = vadd.f32 %v6832_v55, %v6754_v39  ;;  %v6994_v43 = vadd.f32 %v9909_v11, %v9904_v0 }
 0x1eb   : > { %v6913_v16 = vpop.f32.mrf.mxu0  ;;  %v6988_v12 = vpop.f32.mrf.mxu1 }
 0x1ec   : > { %v6845_v2 = vadd.f32 %v6841_v50, %v6379_v10 }
 0x1ed   : > { %v9914_v13 = vpop.f32.mrf.mxu0  ;;  %v9919_v38 = vpop.f32.mrf.mxu1 }
 0x1ef   : > { %v10971_v18 = vpop.f32.mrf.mxu0  ;;  %v7144_v5 = vpop.f32.mrf.mxu1 }
 0x1f1   : > { %v9924_v56 = vpop.f32.mrf.mxu0  ;;  %v9929_v21 = vpop.f32.mrf.mxu1 }
 0x1f3   : > { %v7219_v46 = vpop.f32.mrf.mxu0  ;;  %v10973_v60 = vpop.f32.mrf.mxu1 }
 0x1f4   : > { %11028 = vst [vmem:[#allocation6_spill] sm:$0xff] %v10973_v60  ;;  %v6380_v60 = vadd.f32 %v10963_v45, %v6297_v53  ;;  %v7220_v27 = vadd.f32 %v7219_v46, %v7144_v5 }
 0x1f5   : > { %v9934_v4 = vpop.f32.mrf.mxu0  ;;  %v9939_v22 = vpop.f32.mrf.mxu1 }
 0x1f6   : > { %v6846_v52 = vadd.f32 %v6842_v23, %v6380_v60 }
 0x1f7   : > { %v10975_v15 = vpop.f32.mrf.mxu0  ;;  %v7456_v1 = vpop.f32.mrf.mxu1 }
 0x1f8   : > { %11029 = vst [vmem:[#allocation7_spill] sm:$0xff] %v10975_v15  ;;  %v7225_v15 = vadd.f32 %v9924_v56, %v9919_v38  ;;  %v7462_v56 = vadd.f32 %v9939_v22, %v9934_v4 }
 0x1f9   : > { %v9944_v7 = vpop.f32.mrf.mxu0  ;;  %v9949_v24 = vpop.f32.mrf.mxu1 }
 0x1fa   : > { %v7308_v38 = vadd.f32 %v9929_v21, %v7225_v15  ;;  %v7541_v60 = vadd.f32 %v9944_v7, %v7462_v56  ;;  %v11036_v7 = vld [vmem:[#allocation5_spill] sm:$0xff] }
 0x1fb   : > { %v10977_v25 = vpop.f32.mrf.mxu0  ;;  %v7608_v30 = vpop.f32.mrf.mxu1  ;;  %v11032_v0 = vld [vmem:[#allocation6_spill] sm:$0xff] }
 0x1fc   : > { %11030 = vst [vmem:[#allocation8_spill] sm:$0xff] %v10977_v25  ;;  %v6523_v25 = vadd.f32 %v6522_v61, %v6447_v51  ;;  %v6989_v51 = vadd.f32 %v6988_v12, %v6913_v16  ;;  %v7077_v61 = vadd.f32 %v9914_v13, %v6994_v43  ;;  %v7307_v11 = vadd.f32 %v11032_v0, %v7220_v27 }
 0x1fd   : > { %v9954_v8 = vpop.f32.mrf.mxu0  ;;  %v9959_v3 = vpop.f32.mrf.mxu1 }
 0x1fe   : > { %v6610_v35 = vadd.f32 %v6601_v49, %v6523_v25  ;;  %v7689_v63 = vadd.f32 %v9954_v8, %v9949_v24  ;;  %v7076_v49 = vadd.f32 %v10971_v18, %v6989_v51  ;;  %v7312_v25 = vadd.f32 %v7308_v38, %v6846_v52 }
 0x1ff   : > { %v7683_v59 = vpop.f32.mrf.mxu0  ;;  %v10979_v26 = vpop.f32.mrf.mxu1  ;;  %v11033_v5 = vld [vmem:[#allocation7_spill] sm:$0xff] }
 0x200   : > { %11031 = vst [vmem:[#allocation3_spill] sm:$0xff] %v10979_v26  ;;  %v7684_v41 = vadd.f32 %v7683_v59, %v7608_v30  ;;  %v7457_v46 = vadd.f32 %v7456_v1, %v11033_v5  ;;  %v7768_v24 = vadd.f32 %v9959_v3, %v7689_v63  ;;  %v6843_v3 = vadd.f32 %v6610_v35, %v11036_v7 }
 0x201   : > { %v9964_v32 = vpop.f32.mrf.mxu0  ;;  %v9969_v28 = vpop.f32.mrf.mxu1 }
 0x202   : > { %v7916_v54 = vadd.f32 %v9969_v28, %v9964_v32  ;;  %v7309_v17 = vadd.f32 %v7076_v49, %v6843_v3 }
 0x203   : > { %v7835_v9 = vpop.f32.mrf.mxu0  ;;  %v7910_v58 = vpop.f32.mrf.mxu1  ;;  %v11034_v30 = vld [vmem:[#allocation8_spill] sm:$0xff] }
 0x204   : > { %v7911_v36 = vadd.f32 %v7910_v58, %v7835_v9  ;;  %v7540_v8 = vadd.f32 %v11034_v30, %v7457_v46  ;;  %v7310_v58 = vadd.f32 %v7077_v61, %v6844_v57 }
 0x205   : > { %v9974_v33 = vpop.f32.mrf.mxu0  ;;  %v9979_v6 = vpop.f32.mrf.mxu1 }
 0x206   : > { %v7995_v44 = vadd.f32 %v9974_v33, %v7916_v54  ;;  %v7311_v33 = vadd.f32 %v7307_v11, %v6845_v2  ;;  %v11038_v2 = vld [vmem:[#allocation4_spill] sm:$0xff] }
 0x207   : > { %v7985_v20 = vpop.f32.mrf.mxu0  ;;  %v8062_v40 = vpop.f32.mrf.mxu1  ;;  %v11035_v59 = vld [vmem:[#allocation3_spill] sm:$0xff] }
 0x208   : > { %v7994_v16 = vadd.f32 %v7985_v20, %v7911_v36  ;;  %v7767_v18 = vadd.f32 %v11035_v59, %v7684_v41  ;;  %v8224_v32 = vadd.f32 %v7995_v44, %v7541_v60 }
 0x209   : > { %v9984_v42 = vpop.f32.mrf.mxu0  ;;  %v9989_v48 = vpop.f32.mrf.mxu1 }
 0x20a   : > { %v8143_v29 = vadd.f32 %v9984_v42, %v9979_v6  ;;  %v8223_v6 = vadd.f32 %v7994_v16, %v7540_v8 }
 0x20b   : > { %v8137_v19 = vpop.f32.mrf.mxu0  ;;  %v8212_v47 = vpop.f32.mrf.mxu1 }
 0x20c   : > { %v8138_v45 = vadd.f32 %v8137_v19, %v8062_v40  ;;  %v8222_v23 = vadd.f32 %v9989_v48, %v8143_v29  ;;  %v7314_v19 = vmax.f32 %v7310_v58, %v7312_v25  ;;  %v11037_v29 = vld [vmem:[#allocation2_spill] sm:$0xff] }
 0x20d   : > { %v9994_v14 = vpop.f32.mrf.mxu0  ;;  %v9999_v26 = vpop.f32.mrf.mxu1 }
 0x20e   : > { %v8374_v50 = vadd.f32 %v9999_v26, %v9994_v14  ;;  %v8221_v21 = vadd.f32 %v8212_v47, %v8138_v45  ;;  %v8226_v9 = vadd.f32 %v8222_v23, %v7768_v24 }
 0x20f   : > { %v8293_v31 = vpop.f32.mrf.mxu0  ;;  %v8368_v37 = vpop.f32.mrf.mxu1 }
 0x210   : > { %v8369_v4 = vadd.f32 %v8368_v37, %v8293_v31  ;;  %v8225_v40 = vadd.f32 %v8221_v21, %v7767_v18  ;;  %v7313_v37 = vmax.f32 %v7309_v17, %v7311_v33 }
 0x211   : > { %v10004_v55 = vpop.f32.mrf.mxu0  ;;  %v10009_v34 = vpop.f32.mrf.mxu1 }
 0x212   : > { %v8457_v22 = vadd.f32 %v10004_v55, %v8374_v50 }
 0x213   : > { %v8447_v39 = vpop.f32.mrf.mxu0  ;;  %v8524_v53 = vpop.f32.mrf.mxu1 }
 0x214   : > { %v8456_v14 = vadd.f32 %v8447_v39, %v8369_v4  ;;  %v8690_v42 = vadd.f32 %v8457_v22, %v8224_v32 }
 0x215   : > { %v10014_v12 = vpop.f32.mrf.mxu0  ;;  %v10019_v13 = vpop.f32.mrf.mxu1 }
 0x216   : > { %v8605_v15 = vadd.f32 %v10014_v12, %v10009_v34  ;;  %v8689_v47 = vadd.f32 %v8456_v14, %v8223_v6 }
 0x217   : > { %v8599_v28 = vpop.f32.mrf.mxu0  ;;  %v8678_v20 = vpop.f32.mrf.mxu1 }
 0x218   : > { %v8600_v26 = vadd.f32 %v8599_v28, %v8524_v53  ;;  %v8688_v1 = vadd.f32 %v10019_v13, %v8605_v15 }
 0x21a   : > { %v8692_v48 = vadd.f32 %v8688_v1, %v8226_v9  ;;  %v8687_v62 = vadd.f32 %v8678_v20, %v8600_v26 }
 0x21c   : > { %v8694_v10 = vmax.f32 %v8690_v42, %v8692_v48  ;;  %v8691_v31 = vadd.f32 %v8687_v62, %v8225_v40 }
 0x21e   : > { %v8696_v43 = vmax.f32 %v7314_v19, %v8694_v10  ;;  %v8693_v27 = vmax.f32 %v8689_v47, %v8691_v31 }
 0x220   : > { %v8698_v35 = vadd.f32 %v8696_v43, %v11037_v29  ;;  %v8695_v57 = vmax.f32 %v7313_v37, %v8693_v27 }
 0x222   : > { %v8700_v52 = vmax.f32 %v8698_v35, 0.0  ;;  %v8697_v63 = vadd.f32 %v8695_v57, %v11038_v2 }
 0x224   : > { %9152 = vst.msk [vmem:[%s10924_s20 + $0x28] sm:$0xff] %vm3081_vm1, %v8700_v52  ;;  %v8699_v54 = vmax.f32 %v8697_v63, 0.0 }
 0x226   : > { %9151 = vst.msk [vmem:[%s10924_s20 + $0x20] sm:$0xff] %vm3081_vm1, %v8699_v54 }
 0x227 PF: > { %s14_s15 = sadd.s32 1, %s10038_s15  }
 0x228   : > { %p11_p4 = scmp.ge.s32.totalorder %s14_s15, 4  }
 0x22a   :  { %13 = sbr.rel (!%p11_p4) target bundleno = 1 (0x1), region = 97 }

// kernel: cifar_tiny_forward.4
= control target key start
LH: loop header
LB: loop body
LE: loop exit
PB: predicated region body
PF: predicated region fallthrough
CT: control target
= control target key end

     0   :  { %s15404_s15 = smov 0   ;;  %s17106_s0 = inlined_call_operand.vmem [shape: f32[32,3,32], index: 0, kind: input, shape index: {}]   ;;  %s17107_s1 = inlined_call_operand.vmem [shape: f32[32,3,32], index: 1, kind: input, shape index: {}]   ;;  %s17108_s2 = inlined_call_operand.vmem [shape: f32[3,3,8,3], index: 2, kind: input, shape index: {}]   ;;  %s17109_s3 = inlined_call_operand.vmem [shape: f32[8,1], index: 3, kind: input, shape index: {}]   ;;  %s17110_s4 = inlined_call_operand.vmem [shape: f32[15,8,30], index: 4, kind: output, shape index: {}]  }
   0x1 LB: > { %s13595_s16 = sadd.s32 4294967295, %s15373_s15   ;;  %p13598_p0 = scmp.ge.s32.totalorder %s15373_s15, 1  ;;  %s15373_s15 = sphi %s15404_s15, %s14_s15  }
   0x2   : > { %p152_p1 = scmp.lt.s32.totalorder %s15373_s15, 4 }
   0x4   : > { %p153_p2 = pnand %p13598_p0, %p152_p1 }
   0x5   : > { %s13608_s17 = smul.u32 (!%p153_p2), 40, %s13595_s16  ;;  %s15377_s28 = smov (!%p153_p2), 126  }
   0x6   : > { %156 = sbr.rel (%p153_p2) target bundleno = 695 (0x2b7), region = 36 }
   0x7   : > { %s15419_s20 = scalar_lea.vmem (!%p153_p2), %s17106_s0, %s13608_s17  ;;  %s15424_s23 = scalar_lea.vmem (!%p153_p2), %s17107_s1, %s13608_s17 }
   0x8   : > { %s16607_s17 = smul.u32 (!%p153_p2), 5, %s13595_s16 }
   0xa   : > { %p174_p3 = scmp.lt.s32.totalorder (!%p153_p2), %s16607_s17, 14 }
   0xb   : > { %v15375_v0 = vmov 0.0   ;;  %vm226_vm0 = vcmask 1042432   ;;  %vm15376_vm1 = vmmov 0   ;;  %v15433_v1 = vld [vmem:[%s17108_s2 + $0x8] sm:$0xff]  ;;  %v201_v2 = vld [vmem:[%s15419_s20] sm:$0x7] }
   0xc   : > { %14435 = vmatprep.subr.mxu0 %v15375_v0  ;;  %14440 = vmatprep.subr.mxu1 %v15375_v0  ;;  %v15437_v3 = vld [vmem:[%s15419_s20 + $0x4] sm:$0x7]  ;;  %vm222_vm2 = vcmask 23552   ;;  %v15446_v5 = vld [vmem:[%s15424_s23] sm:$0x7]  ;;  %v15585_v33 = vld [vmem:[%s17108_s2 + $0x10] sm:$0xff] }
   0xd   : > { %14437 = vmatprep.mubr.msk.f32.mxu0 %vm15376_vm1, %v15375_v0  ;;  %14442 = vmatprep.mubr.msk.f32.mxu1 %vm15376_vm1, %v15375_v0  ;;  %v15442_v4 = vld [vmem:[%s17108_s2] sm:$0xff]  ;;  %v15467_v7 = vld [vmem:[%s15419_s20 + $0x8] sm:$0x7]  ;;  %v15481_v9 = vld [vmem:[%s15419_s20 + $0xc] sm:$0x7]  ;;  %s17112_s17 = smov (!%p174_p3, %s16607_s17), 14 }
   0xe   : > { %376 = vrot.lane.b32.xlu0 %v201_v2, %s15377_s28  ;;  %821 = vrot.lane.b32.xlu1 %v15437_v3, %s15377_s28  ;;  %v15451_v6 = vld [vmem:[%s15424_s23 + $0x4] sm:$0x7]  ;;  %v15470_v8 = vld [vmem:[%s15424_s23 + $0x8] sm:$0x7]  ;;  %s13599_s16 = sshll.u32 %s17112_s17, 3  ;;  %vm2857_vm3 = vcmask 244736  }
   0xf   : > { %14436 = vmatpush3.msk.msra.mxu0 %vm226_vm0, %v15446_v5  ;;  %14441 = vmatpush3.msk.msra.mxu1 %vm226_vm0, %v201_v2  ;;  %v15484_v10 = vld [vmem:[%s15424_s23 + $0xc] sm:$0x7]  ;;  %v15491_v11 = vld [vmem:[%s15419_s20 + $0x8] sm:$0x7]  ;;  %v15511_v15 = vld [vmem:[%s15419_s20 + $0x10] sm:$0x7]  ;;  %s16685_s21 = scalar_lea.vmem %s17110_s4, %s13599_s16 }
  0x10   : > { %14438 = vmatmul.mubr.msk.f32.vlgmr.msra.gmra.mxu0 %vm222_vm2, %v15433_v1  ;;  %14443 = vmatmul.mubr.msk.f32.vlgmr.msra.gmra.mxu1 %vm222_vm2, %v15442_v4  ;;  %v15494_v12 = vld [vmem:[%s15424_s23 + $0x8] sm:$0x7]  ;;  %v15501_v13 = vld [vmem:[%s15419_s20 + $0xc] sm:$0x7]  ;;  %v15514_v16 = vld [vmem:[%s15424_s23 + $0x10] sm:$0x7] }
  0x11   : > { %14445 = vmatprep.subr.mxu0 %v15375_v0  ;;  %14450 = vmatprep.subr.mxu1 %v15375_v0  ;;  %v15504_v14 = vld [vmem:[%s15424_s23 + $0xc] sm:$0x7]  ;;  %v15521_v17 = vld [vmem:[%s15419_s20 + $0x14] sm:$0x7]  ;;  %v15531_v19 = vld [vmem:[%s15419_s20 + $0x10] sm:$0x7] }
  0x12   : > { %594 = vrot.lane.b32.xlu0 %v15446_v5, %s15377_s28  ;;  %1039 = vrot.lane.b32.xlu1 %v15451_v6, %s15377_s28  ;;  %v15524_v18 = vld [vmem:[%s15424_s23 + $0x14] sm:$0x7]  ;;  %v15534_v20 = vld [vmem:[%s15424_s23 + $0x10] sm:$0x7] }
  0x13   : > { %14447 = vmatprep.mubr.msk.f32.mxu0 %vm15376_vm1, %v15375_v0  ;;  %14452 = vmatprep.mubr.msk.f32.mxu1 %vm15376_vm1, %v15375_v0  ;;  %v15541_v21 = vld [vmem:[%s15419_s20 + $0x14] sm:$0x7]  ;;  %v15551_v23 = vld [vmem:[%s15419_s20 + $0x18] sm:$0x7]  ;;  %v15561_v25 = vld [vmem:[%s15419_s20 + $0x1c] sm:$0x7] }
  0x14   : > { %v15544_v22 = vld [vmem:[%s15424_s23 + $0x14] sm:$0x7]  ;;  %v15556_v24 = vld [vmem:[%s15424_s23 + $0x18] sm:$0x7]  ;;  %v15566_v26 = vld [vmem:[%s15424_s23 + $0x1c] sm:$0x7] }
  0x15   : > { %v13884_v27 = vld [vmem:[%s15419_s20 + $0x18] sm:$0x7]  ;;  %v13889_v29 = vld [vmem:[%s15419_s20 + $0x1c] sm:$0x7]  ;;  %v13895_v31 = vld [vmem:[%s15419_s20 + $0x20] sm:$0x7] }
  0x16   : > { %1268 = vrot.lane.b32.xlu0 %v15467_v7, %s15377_s28  ;;  %1486 = vrot.lane.b32.xlu1 %v15470_v8, %s15377_s28  ;;  %v13886_v28 = vld [vmem:[%s15424_s23 + $0x18] sm:$0x7]  ;;  %v13892_v30 = vld [vmem:[%s15424_s23 + $0x1c] sm:$0x7] }
  0x17   : > { %v13901_v32 = vld [vmem:[%s15419_s20 + $0x24] sm:$0x7]  ;;  %v15616_v37 = vld [vmem:[%s17108_s2 + $0x18] sm:$0xff]  ;;  %v15637_v39 = vld [vmem:[%s17108_s2 + $0x28] sm:$0xff] }
  0x18   : > { %v15611_v36 = vld [vmem:[%s17108_s2 + $0x20] sm:$0xff]  ;;  %v15669_v41 = vld [vmem:[%s17108_s2 + $0x38] sm:$0xff]  ;;  %v15674_v42 = vld [vmem:[%s17108_s2 + $0x30] sm:$0xff] }
  0x19   : > { %v15693_v44 = vld [vmem:[%s17108_s2 + $0x40] sm:$0xff]  ;;  %v13990_v63 = vld [vmem:[%s15419_s20 + $0x28] sm:$0x7] }
  0x1a   : > { %2556 = vrot.lane.b32.xlu0 %v15481_v9, %s15377_s28  ;;  %2771 = vrot.lane.b32.xlu1 %v15484_v10, %s15377_s28  ;;  %v16031_v59 = vld [vmem:[%s15419_s20 + $0x20] sm:$0x7]  ;;  %v13984_v62 = vld [vmem:[%s15419_s20 + $0x24] sm:$0x7] }
  0x1b   : > { %v16040_v60 = vld [vmem:[%s15424_s23 + $0x20] sm:$0x7] }
  0x1e   : > { %3030 = vrot.lane.b32.xlu0 %v15491_v11, %s15377_s28  ;;  %3245 = vrot.lane.b32.xlu1 %v15494_v12, %s15377_s28 }
  0x22   : > { %3466 = vrot.lane.b32.xlu0 %v15501_v13, %s15377_s28  ;;  %3681 = vrot.lane.b32.xlu1 %v15504_v14, %s15377_s28 }
  0x26   : > { %3904 = vrot.lane.b32.xlu0 %v15511_v15, %s15377_s28  ;;  %4119 = vrot.lane.b32.xlu1 %v15514_v16, %s15377_s28 }
  0x2a   : > { %5189 = vrot.lane.b32.xlu0 %v15521_v17, %s15377_s28  ;;  %5404 = vrot.lane.b32.xlu1 %v15524_v18, %s15377_s28 }
  0x2e   : > { %5658 = vrot.lane.b32.xlu0 %v15531_v19, %s15377_s28  ;;  %5873 = vrot.lane.b32.xlu1 %v15534_v20, %s15377_s28 }
  0x32   : > { %6094 = vrot.lane.b32.xlu0 %v15541_v21, %s15377_s28  ;;  %6309 = vrot.lane.b32.xlu1 %v15544_v22, %s15377_s28 }
  0x36   : > { %6532 = vrot.lane.b32.xlu0 %v15551_v23, %s15377_s28  ;;  %6747 = vrot.lane.b32.xlu1 %v15556_v24, %s15377_s28 }
  0x3a   : > { %7817 = vrot.lane.b32.xlu0 %v15561_v25, %s15377_s28  ;;  %8032 = vrot.lane.b32.xlu1 %v15566_v26, %s15377_s28 }
  0x3e   : > { %8286 = vrot.lane.b32.xlu0 %v13884_v27, %s15377_s28  ;;  %8501 = vrot.lane.b32.xlu1 %v13886_v28, %s15377_s28 }
  0x42   : > { %8722 = vrot.lane.b32.xlu0 %v13889_v29, %s15377_s28  ;;  %8937 = vrot.lane.b32.xlu1 %v13892_v30, %s15377_s28 }
  0x46   : > { %9160 = vrot.lane.b32.xlu0 %v13895_v31, %s15377_s28  ;;  %9375 = vrot.lane.b32.xlu1 %v16040_v60, %s15377_s28 }
  0x4a   : > { %10445 = vrot.lane.b32.xlu0 %v13901_v32, %s15377_s28 }
  0x4e   : > { %10914 = vrot.lane.b32.xlu0 %v16031_v59, %s15377_s28 }
  0x52   : > { %11350 = vrot.lane.b32.xlu0 %v13984_v62, %s15377_s28 }
  0x56   : > { %11788 = vrot.lane.b32.xlu0 %v13990_v63, %s15377_s28 }
  0x80   : > { %v377_v34 = vpop.permute.xlu0 %376  ;;  %v15622_v38 = vpop.permute.xlu1 %821 }
  0x81   : > { %14446 = vmatpush3.msk.msra.mxu0 %vm226_vm0, %v377_v34  ;;  %14451 = vmatpush3.msk.msra.mxu1 %vm226_vm0, %v377_v34 }
  0x82   : > { %14448 = vmatmul.mubr.msk.f32.vlgmr.msra.gmra.mxu0 %vm222_vm2, %v15585_v33  ;;  %14453 = vmatmul.mubr.msk.f32.vlgmr.msra.gmra.mxu1 %vm222_vm2, %v15433_v1 }
  0x83   : > { %14455 = vmatprep.subr.mxu0 %v15375_v0  ;;  %14460 = vmatprep.subr.mxu1 %v15375_v0 }
  0x84   : > { %v595_v35 = vpop.permute.xlu0 %594  ;;  %14456 = vmatpush3.msk.msra.mxu0 %vm226_vm0, %v15446_v5  ;;  %14457 = vmatprep.mubr.msk.f32.mxu0 %vm15376_vm1, %v15375_v0  ;;  %v1040_v40 = vpop.permute.xlu1 %1039 }
  0x85   : > { %14461 = vmatpush3.msk.msra.mxu1 %vm226_vm0, %v595_v35  ;;  %14462 = vmatprep.mubr.msk.f32.mxu1 %vm15376_vm1, %v15375_v0 }
  0x86   : > { %14458 = vmatmul.mubr.msk.f32.vlgmr.msra.gmra.mxu0 %vm222_vm2, %v15442_v4  ;;  %14463 = vmatmul.mubr.msk.f32.vlgmr.msra.gmra.mxu1 %vm222_vm2, %v15585_v33 }
  0x87   : > { %14465 = vmatprep.subr.mxu0 %v15375_v0  ;;  %14470 = vmatprep.subr.mxu1 %v15375_v0 }
  0x88   : > { %14466 = vmatpush3.msk.msra.mxu0 %vm226_vm0, %v15451_v6  ;;  %14467 = vmatprep.mubr.msk.f32.mxu0 %vm15376_vm1, %v15375_v0  ;;  %v1269_v43 = vpop.permute.xlu0 %1268  ;;  %v1487_v45 = vpop.permute.xlu1 %1486 }
  0x89   : > { %14471 = vmatpush3.msk.msra.mxu1 %vm226_vm0, %v15437_v3  ;;  %14472 = vmatprep.mubr.msk.f32.mxu1 %vm15376_vm1, %v15375_v0 }
  0x8a   : > { %14468 = vmatmul.mubr.msk.f32.vlgmr.msra.gmra.mxu0 %vm222_vm2, %v15611_v36  ;;  %14473 = vmatmul.mubr.msk.f32.vlgmr.msra.gmra.mxu1 %vm222_vm2, %v15616_v37 }
  0x8b   : > { %14475 = vmatprep.subr.mxu0 %v15375_v0  ;;  %14480 = vmatprep.subr.mxu1 %v15375_v0 }
  0x8c   : > { %14476 = vmatpush3.msk.msra.mxu0 %vm226_vm0, %v15622_v38  ;;  %14477 = vmatprep.mubr.msk.f32.mxu0 %vm15376_vm1, %v15375_v0  ;;  %v2557_v46 = vpop.permute.xlu0 %2556  ;;  %v2772_v47 = vpop.permute.xlu1 %2771 }
  0x8d   : > { %14481 = vmatpush3.msk.msra.mxu1 %vm226_vm0, %v15622_v38  ;;  %14482 = vmatprep.mubr.msk.f32.mxu1 %vm15376_vm1, %v15375_v0 }
  0x8e   : > { %14478 = vmatmul.mubr.msk.f32.vlgmr.msra.gmra.mxu0 %vm222_vm2, %v15637_v39  ;;  %14483 = vmatmul.mubr.msk.f32.vlgmr.msra.gmra.mxu1 %vm222_vm2, %v15611_v36 }
  0x8f   : > { %14485 = vmatprep.subr.mxu0 %v15375_v0  ;;  %14490 = vmatprep.subr.mxu1 %v15375_v0 }
  0x90   : > { %14486 = vmatpush3.msk.msra.mxu0 %vm226_vm0, %v15451_v6  ;;  %14487 = vmatprep.mubr.msk.f32.mxu0 %vm15376_vm1, %v15375_v0  ;;  %v3031_v48 = vpop.permute.xlu0 %3030  ;;  %v3246_v49 = vpop.permute.xlu1 %3245 }
  0x91   : > { %14491 = vmatpush3.msk.msra.mxu1 %vm226_vm0, %v1040_v40  ;;  %14492 = vmatprep.mubr.msk.f32.mxu1 %vm15376_vm1, %v15375_v0 }
  0x92   : > { %14488 = vmatmul.mubr.msk.f32.vlgmr.msra.gmra.mxu0 %vm222_vm2, %v15616_v37  ;;  %14493 = vmatmul.mubr.msk.f32.vlgmr.msra.gmra.mxu1 %vm222_vm2, %v15637_v39 }
  0x93   : > { %14495 = vmatprep.subr.mxu0 %v15375_v0  ;;  %14500 = vmatprep.subr.mxu1 %v15375_v0 }
  0x94   : > { %14496 = vmatpush3.msk.msra.mxu0 %vm226_vm0, %v15470_v8  ;;  %14497 = vmatprep.mubr.msk.f32.mxu0 %vm15376_vm1, %v15375_v0  ;;  %v3467_v52 = vpop.permute.xlu0 %3466  ;;  %v3682_v56 = vpop.permute.xlu1 %3681 }
  0x95   : > { %14501 = vmatpush3.msk.msra.mxu1 %vm226_vm0, %v15467_v7  ;;  %14502 = vmatprep.mubr.msk.f32.mxu1 %vm15376_vm1, %v15375_v0 }
  0x96   : > { %14498 = vmatmul.mubr.msk.f32.vlgmr.msra.gmra.mxu0 %vm222_vm2, %v15669_v41  ;;  %14503 = vmatmul.mubr.msk.f32.vlgmr.msra.gmra.mxu1 %vm222_vm2, %v15674_v42 }
  0x97   : > { %14505 = vmatprep.subr.mxu0 %v15375_v0  ;;  %14510 = vmatprep.subr.mxu1 %v15375_v0 }
  0x98   : > { %14506 = vmatpush3.msk.msra.mxu0 %vm226_vm0, %v1269_v43  ;;  %14507 = vmatprep.mubr.msk.f32.mxu0 %vm15376_vm1, %v15375_v0  ;;  %v3905_v57 = vpop.permute.xlu0 %3904  ;;  %v4120_v58 = vpop.permute.xlu1 %4119 }
  0x99   : > { %14511 = vmatpush3.msk.msra.mxu1 %vm226_vm0, %v1269_v43  ;;  %14512 = vmatprep.mubr.msk.f32.mxu1 %vm15376_vm1, %v15375_v0 }
  0x9a   : > { %14508 = vmatmul.mubr.msk.f32.vlgmr.msra.gmra.mxu0 %vm222_vm2, %v15693_v44  ;;  %14513 = vmatmul.mubr.msk.f32.vlgmr.msra.gmra.mxu1 %vm222_vm2, %v15669_v41 }
  0x9b   : > { %14515 = vmatprep.subr.mxu0 %v15375_v0  ;;  %14520 = vmatprep.subr.mxu1 %v15375_v0 }
  0x9c   : > { %14516 = vmatpush3.msk.msra.mxu0 %vm226_vm0, %v15470_v8  ;;  %14517 = vmatprep.mubr.msk.f32.mxu0 %vm15376_vm1, %v15375_v0  ;;  %v5190_v61 = vpop.permute.xlu0 %5189  ;;  %v5405_v2 = vpop.permute.xlu1 %5404 }
  0x9d   : > { %14521 = vmatpush3.msk.msra.mxu1 %vm226_vm0, %v1487_v45  ;;  %14522 = vmatprep.mubr.msk.f32.mxu1 %vm15376_vm1, %v15375_v0 }
  0x9e   : > { %14518 = vmatmul.mubr.msk.f32.vlgmr.msra.gmra.mxu0 %vm222_vm2, %v15674_v42  ;;  %14523 = vmatmul.mubr.msk.f32.vlgmr.msra.gmra.mxu1 %vm222_vm2, %v15693_v44 }
  0x9f   : > { %14525 = vmatprep.subr.mxu0 %v15375_v0  ;;  %14530 = vmatprep.subr.mxu1 %v15375_v0 }
  0xa0   : > { %14526 = vmatpush3.msk.msra.mxu0 %vm226_vm0, %v15451_v6  ;;  %14531 = vmatpush3.msk.msra.mxu1 %vm226_vm0, %v15437_v3  ;;  %v13996_v3 = vld [vmem:[%s15419_s20 + $0x2c] sm:$0x7]  ;;  %v5659_v5 = vpop.permute.xlu0 %5658 }
  0xa1   : > { %14527 = vmatprep.mubr.msk.f32.mxu0 %vm15376_vm1, %v15375_v0  ;;  %14532 = vmatprep.mubr.msk.f32.mxu1 %vm15376_vm1, %v15375_v0 }
  0xa2   : > { %14535 = vmatprep.subr.mxu0 %v15375_v0  ;;  %14540 = vmatprep.subr.mxu1 %v15375_v0 }
  0xa3   : > { %14528 = vmatmul.mubr.msk.f32.vlgmr.msra.gmra.mxu0 %vm222_vm2, %v15433_v1  ;;  %14533 = vmatmul.mubr.msk.f32.vlgmr.msra.gmra.mxu1 %vm222_vm2, %v15442_v4 }
  0xa4   : > { %14536 = vmatpush3.msk.msra.mxu0 %vm226_vm0, %v15622_v38  ;;  %14541 = vmatpush3.msk.msra.mxu1 %vm226_vm0, %v15622_v38 }
  0xa5   : > { %14537 = vmatprep.mubr.msk.f32.mxu0 %vm15376_vm1, %v15375_v0  ;;  %14542 = vmatprep.mubr.msk.f32.mxu1 %vm15376_vm1, %v15375_v0 }
  0xa6   : > { %14550 = vmatprep.subr.mxu1 %v15375_v0  ;;  %14545 = vmatprep.subr.mxu0 %v15375_v0 }
  0xa7   : > { %14538 = vmatmul.mubr.msk.f32.vlgmr.msra.gmra.mxu0 %vm222_vm2, %v15585_v33  ;;  %14543 = vmatmul.mubr.msk.f32.vlgmr.msra.gmra.mxu1 %vm222_vm2, %v15433_v1 }
  0xa8   : > { %14551 = vmatpush3.msk.msra.mxu1 %vm226_vm0, %v1040_v40  ;;  %14546 = vmatpush3.msk.msra.mxu0 %vm226_vm0, %v15451_v6  ;;  %v15378_v6 = vmov 0  }
  0xa9   : > { %14547 = vmatprep.mubr.msk.f32.mxu0 %vm15376_vm1, %v15375_v0  ;;  %14552 = vmatprep.mubr.msk.f32.mxu1 %vm15376_vm1, %v15375_v0 }
  0xaa   : > { %14555 = vmatprep.subr.mxu0 %v15375_v0  ;;  %14560 = vmatprep.subr.mxu1 %v15375_v0 }
  0xab   : > { %14548 = vmatmul.mubr.msk.f32.vlgmr.msra.gmra.mxu0 %vm222_vm2, %v15442_v4  ;;  %14553 = vmatmul.mubr.msk.f32.vlgmr.msra.gmra.mxu1 %vm222_vm2, %v15585_v33 }
  0xac   : > { %14556 = vmatpush3.msk.msra.mxu0 %vm226_vm0, %v15470_v8  ;;  %14561 = vmatpush3.msk.msra.mxu1 %vm226_vm0, %v15467_v7  ;;  %v179_v7 = vld [vmem:[%s17109_s3] sm:$0xff] }
  0xad   : > { %14557 = vmatprep.mubr.msk.f32.mxu0 %vm15376_vm1, %v15375_v0  ;;  %14562 = vmatprep.mubr.msk.f32.mxu1 %vm15376_vm1, %v15375_v0 }
  0xae   : > { %14565 = vmatprep.subr.mxu0 %v15375_v0  ;;  %14570 = vmatprep.subr.mxu1 %v15375_v0 }
  0xaf   : > { %14558 = vmatmul.mubr.msk.f32.vlgmr.msra.gmra.mxu0 %vm222_vm2, %v15611_v36  ;;  %14563 = vmatmul.mubr.msk.f32.vlgmr.msra.gmra.mxu1 %vm222_vm2, %v15616_v37 }
  0xb0   : > { %14566 = vmatpush3.msk.msra.mxu0 %vm226_vm0, %v1269_v43  ;;  %14571 = vmatpush3.msk.msra.mxu1 %vm226_vm0, %v1269_v43 }
  0xb1   : > { %14567 = vmatprep.mubr.msk.f32.mxu0 %vm15376_vm1, %v15375_v0  ;;  %14572 = vmatprep.mubr.msk.f32.mxu1 %vm15376_vm1, %v15375_v0 }
  0xb2   : > { %14580 = vmatprep.subr.mxu1 %v15375_v0  ;;  %14575 = vmatprep.subr.mxu0 %v15375_v0 }
  0xb3   : > { %14568 = vmatmul.mubr.msk.f32.vlgmr.msra.gmra.mxu0 %vm222_vm2, %v15637_v39  ;;  %14573 = vmatmul.mubr.msk.f32.vlgmr.msra.gmra.mxu1 %vm222_vm2, %v15611_v36 }
  0xb4   : > { %14581 = vmatpush3.msk.msra.mxu1 %vm226_vm0, %v1487_v45  ;;  %14576 = vmatpush3.msk.msra.mxu0 %vm226_vm0, %v15470_v8  ;;  %v5874_v8 = vpop.permute.xlu1 %5873 }
  0xb5   : > { %14577 = vmatprep.mubr.msk.f32.mxu0 %vm15376_vm1, %v15375_v0  ;;  %14582 = vmatprep.mubr.msk.f32.mxu1 %vm15376_vm1, %v15375_v0 }
  0xb6   : > { %14585 = vmatprep.subr.mxu0 %v15375_v0  ;;  %14590 = vmatprep.subr.mxu1 %v15375_v0 }
  0xb7   : > { %14578 = vmatmul.mubr.msk.f32.vlgmr.msra.gmra.mxu0 %vm222_vm2, %v15616_v37  ;;  %14583 = vmatmul.mubr.msk.f32.vlgmr.msra.gmra.mxu1 %vm222_vm2, %v15637_v39 }
  0xb8   : > { %14586 = vmatpush3.msk.msra.mxu0 %vm226_vm0, %v15484_v10  ;;  %14587 = vmatprep.mubr.msk.f32.mxu0 %vm15376_vm1, %v15375_v0 }
  0xb9   : > { %14591 = vmatpush3.msk.msra.mxu1 %vm226_vm0, %v15481_v9  ;;  %14592 = vmatprep.mubr.msk.f32.mxu1 %vm15376_vm1, %v15375_v0  ;;  %v6095_v9 = vpop.permute.xlu0 %6094 }
  0xba   : > { %14595 = vmatprep.subr.mxu0 %v15375_v0  ;;  %14600 = vmatprep.subr.mxu1 %v15375_v0 }
  0xbb   : > { %14588 = vmatmul.mubr.msk.f32.vlgmr.msra.gmra.mxu0 %vm222_vm2, %v15669_v41  ;;  %14593 = vmatmul.mubr.msk.f32.vlgmr.msra.gmra.mxu1 %vm222_vm2, %v15674_v42 }
  0xbc   : > { %14596 = vmatpush3.msk.msra.mxu0 %vm226_vm0, %v2557_v46  ;;  %14597 = vmatprep.mubr.msk.f32.mxu0 %vm15376_vm1, %v15375_v0 }
  0xbd   : > { %14601 = vmatpush3.msk.msra.mxu1 %vm226_vm0, %v2557_v46  ;;  %14602 = vmatprep.mubr.msk.f32.mxu1 %vm15376_vm1, %v15375_v0 }
  0xbe   : > { %14605 = vmatprep.subr.mxu0 %v15375_v0  ;;  %14610 = vmatprep.subr.mxu1 %v15375_v0 }
  0xbf   : > { %14598 = vmatmul.mubr.msk.f32.vlgmr.msra.gmra.mxu0 %vm222_vm2, %v15693_v44  ;;  %14603 = vmatmul.mubr.msk.f32.vlgmr.msra.gmra.mxu1 %vm222_vm2, %v15669_v41 }
  0xc0   : > { %14606 = vmatpush3.msk.msra.mxu0 %vm226_vm0, %v15484_v10  ;;  %14607 = vmatprep.mubr.msk.f32.mxu0 %vm15376_vm1, %v15375_v0  ;;  %v6310_v10 = vpop.permute.xlu1 %6309 }
  0xc1   : > { %14611 = vmatpush3.msk.msra.mxu1 %vm226_vm0, %v2772_v47  ;;  %14612 = vmatprep.mubr.msk.f32.mxu1 %vm15376_vm1, %v15375_v0  ;;  %v15348_v47 = vld [vmem:[%s15424_s23 + $0x18] sm:$0x7] }
  0xc2   : > { %14615 = vmatprep.subr.mxu0 %v15375_v0  ;;  %14620 = vmatprep.subr.mxu1 %v15375_v0 }
  0xc3   : > { %14608 = vmatmul.mubr.msk.f32.vlgmr.msra.gmra.mxu0 %vm222_vm2, %v15674_v42  ;;  %14613 = vmatmul.mubr.msk.f32.vlgmr.msra.gmra.mxu1 %vm222_vm2, %v15693_v44 }
  0xc4   : > { %14616 = vmatpush3.msk.msra.mxu0 %vm226_vm0, %v15494_v12  ;;  %14617 = vmatprep.mubr.msk.f32.mxu0 %vm15376_vm1, %v15375_v0 }
  0xc5   : > { %14621 = vmatpush3.msk.msra.mxu1 %vm226_vm0, %v15491_v11  ;;  %14622 = vmatprep.mubr.msk.f32.mxu1 %vm15376_vm1, %v15375_v0  ;;  %v16172_v11 = vld [vmem:[%s15424_s23 + $0x24] sm:$0x7] }
  0xc6   : > { %14625 = vmatprep.subr.mxu0 %v15375_v0  ;;  %14630 = vmatprep.subr.mxu1 %v15375_v0 }
  0xc7   : > { %14618 = vmatmul.mubr.msk.f32.vlgmr.msra.gmra.mxu0 %vm222_vm2, %v15433_v1  ;;  %14623 = vmatmul.mubr.msk.f32.vlgmr.msra.gmra.mxu1 %vm222_vm2, %v15442_v4 }
  0xc8   : > { %14626 = vmatpush3.msk.msra.mxu0 %vm226_vm0, %v3031_v48  ;;  %14627 = vmatprep.mubr.msk.f32.mxu0 %vm15376_vm1, %v15375_v0 }
  0xc9   : > { %14631 = vmatpush3.msk.msra.mxu1 %vm226_vm0, %v3031_v48  ;;  %14632 = vmatprep.mubr.msk.f32.mxu1 %vm15376_vm1, %v15375_v0 }
  0xca   : > { %14635 = vmatprep.subr.mxu0 %v15375_v0  ;;  %14640 = vmatprep.subr.mxu1 %v15375_v0 }
  0xcb   : > { %14628 = vmatmul.mubr.msk.f32.vlgmr.msra.gmra.mxu0 %vm222_vm2, %v15585_v33  ;;  %14633 = vmatmul.mubr.msk.f32.vlgmr.msra.gmra.mxu1 %vm222_vm2, %v15433_v1 }
  0xcc   : > { %14636 = vmatpush3.msk.msra.mxu0 %vm226_vm0, %v15494_v12  ;;  %14637 = vmatprep.mubr.msk.f32.mxu0 %vm15376_vm1, %v15375_v0  ;;  %v16185_v12 = vpop.permute.xlu0 %6532 }
  0xcd   : > { %14641 = vmatpush3.msk.msra.mxu1 %vm226_vm0, %v3246_v49  ;;  %14642 = vmatprep.mubr.msk.f32.mxu1 %vm15376_vm1, %v15375_v0  ;;  %v15349_v49 = vld [vmem:[%s15419_s20 + $0x18] sm:$0x7] }
  0xce   : > { %14645 = vmatprep.subr.mxu0 %v15375_v0  ;;  %14650 = vmatprep.subr.mxu1 %v15375_v0 }
  0xcf   : > { %14638 = vmatmul.mubr.msk.f32.vlgmr.msra.gmra.mxu0 %vm222_vm2, %v15442_v4  ;;  %14643 = vmatmul.mubr.msk.f32.vlgmr.msra.gmra.mxu1 %vm222_vm2, %v15585_v33 }
  0xd0   : > { %14646 = vmatpush3.msk.msra.mxu0 %vm226_vm0, %v15504_v14  ;;  %14647 = vmatprep.mubr.msk.f32.mxu0 %vm15376_vm1, %v15375_v0  ;;  %v296_v50 = vpop.f32.mrf.mxu0  ;;  %v372_v51 = vpop.f32.mrf.mxu1 }
  0xd1   : > { %14651 = vmatpush3.msk.msra.mxu1 %vm226_vm0, %v15501_v13  ;;  %14652 = vmatprep.mubr.msk.f32.mxu1 %vm15376_vm1, %v15375_v0  ;;  %v15886_v53 = vadd.f32 %v372_v51, %v296_v50  ;;  %v7818_v32 = vpop.permute.xlu0 %7817 }
  0xd2   : > { %14655 = vmatprep.subr.mxu0 %v15375_v0  ;;  %14660 = vmatprep.subr.mxu1 %v15375_v0  ;;  %v14439_v54 = vpop.f32.mrf.mxu0  ;;  %v14444_v55 = vpop.f32.mrf.mxu1 }
  0xd3   : > { %14648 = vmatmul.mubr.msk.f32.vlgmr.msra.gmra.mxu0 %vm222_vm2, %v15611_v36  ;;  %14653 = vmatmul.mubr.msk.f32.vlgmr.msra.gmra.mxu1 %vm222_vm2, %v15616_v37 }
  0xd4   : > { %14656 = vmatpush3.msk.msra.mxu0 %vm226_vm0, %v3467_v52  ;;  %14657 = vmatprep.mubr.msk.f32.mxu0 %vm15376_vm1, %v15375_v0 }
  0xd5   : > { %14661 = vmatpush3.msk.msra.mxu1 %vm226_vm0, %v3467_v52  ;;  %14662 = vmatprep.mubr.msk.f32.mxu1 %vm15376_vm1, %v15375_v0  ;;  %v8287_v48 = vpop.permute.xlu0 %8286 }
  0xd6   : > { %14665 = vmatprep.subr.mxu0 %v15375_v0  ;;  %14670 = vmatprep.subr.mxu1 %v15375_v0 }
  0xd7   : > { %14658 = vmatmul.mubr.msk.f32.vlgmr.msra.gmra.mxu0 %vm222_vm2, %v15637_v39  ;;  %14663 = vmatmul.mubr.msk.f32.vlgmr.msra.gmra.mxu1 %vm222_vm2, %v15611_v36 }
  0xd8   : > { %14666 = vmatpush3.msk.msra.mxu0 %vm226_vm0, %v15504_v14  ;;  %14667 = vmatprep.mubr.msk.f32.mxu0 %vm15376_vm1, %v15375_v0 }
  0xd9   : > { %14671 = vmatpush3.msk.msra.mxu1 %vm226_vm0, %v3682_v56  ;;  %14672 = vmatprep.mubr.msk.f32.mxu1 %vm15376_vm1, %v15375_v0 }
  0xda   : > { %14675 = vmatprep.subr.mxu0 %v15375_v0  ;;  %14680 = vmatprep.subr.mxu1 %v15375_v0 }
  0xdb   : > { %14668 = vmatmul.mubr.msk.f32.vlgmr.msra.gmra.mxu0 %vm222_vm2, %v15616_v37  ;;  %14673 = vmatmul.mubr.msk.f32.vlgmr.msra.gmra.mxu1 %vm222_vm2, %v15637_v39 }
  0xdc   : > { %14676 = vmatpush3.msk.msra.mxu0 %vm226_vm0, %v15514_v16  ;;  %14677 = vmatprep.mubr.msk.f32.mxu0 %vm15376_vm1, %v15375_v0 }
  0xdd   : > { %14681 = vmatpush3.msk.msra.mxu1 %vm226_vm0, %v15511_v15  ;;  %14682 = vmatprep.mubr.msk.f32.mxu1 %vm15376_vm1, %v15375_v0 }
  0xde   : > { %14685 = vmatprep.subr.mxu0 %v15375_v0  ;;  %14690 = vmatprep.subr.mxu1 %v15375_v0 }
  0xdf   : > { %14678 = vmatmul.mubr.msk.f32.vlgmr.msra.gmra.mxu0 %vm222_vm2, %v15669_v41  ;;  %14683 = vmatmul.mubr.msk.f32.vlgmr.msra.gmra.mxu1 %vm222_vm2, %v15674_v42 }
  0xe0   : > { %14686 = vmatpush3.msk.msra.mxu0 %vm226_vm0, %v3905_v57  ;;  %14687 = vmatprep.mubr.msk.f32.mxu0 %vm15376_vm1, %v15375_v0 }
  0xe1   : > { %14691 = vmatpush3.msk.msra.mxu1 %vm226_vm0, %v3905_v57  ;;  %14692 = vmatprep.mubr.msk.f32.mxu1 %vm15376_vm1, %v15375_v0 }
  0xe2   : > { %14695 = vmatprep.subr.mxu0 %v15375_v0  ;;  %14700 = vmatprep.subr.mxu1 %v15375_v0 }
  0xe3   : > { %14688 = vmatmul.mubr.msk.f32.vlgmr.msra.gmra.mxu0 %vm222_vm2, %v15693_v44  ;;  %14693 = vmatmul.mubr.msk.f32.vlgmr.msra.gmra.mxu1 %vm222_vm2, %v15669_v41 }
  0xe4   : > { %14696 = vmatpush3.msk.msra.mxu0 %vm226_vm0, %v15514_v16  ;;  %14697 = vmatprep.mubr.msk.f32.mxu0 %vm15376_vm1, %v15375_v0 }
  0xe5   : > { %14701 = vmatpush3.msk.msra.mxu1 %vm226_vm0, %v4120_v58  ;;  %14702 = vmatprep.mubr.msk.f32.mxu1 %vm15376_vm1, %v15375_v0 }
  0xe6   : > { %14705 = vmatprep.subr.mxu0 %v15375_v0  ;;  %14710 = vmatprep.subr.mxu1 %v15375_v0 }
  0xe7   : > { %14698 = vmatmul.mubr.msk.f32.vlgmr.msra.gmra.mxu0 %vm222_vm2, %v15674_v42  ;;  %14703 = vmatmul.mubr.msk.f32.vlgmr.msra.gmra.mxu1 %vm222_vm2, %v15693_v44 }
  0xe8   : > { %14706 = vmatpush3.msk.msra.mxu0 %vm226_vm0, %v15504_v14  ;;  %14711 = vmatpush3.msk.msra.mxu1 %vm226_vm0, %v15501_v13  ;;  %v16205_v13 = vpop.permute.xlu1 %6747 }
  0xe9   : > { %14707 = vmatprep.mubr.msk.f32.mxu0 %vm15376_vm1, %v15375_v0  ;;  %14712 = vmatprep.mubr.msk.f32.mxu1 %vm15376_vm1, %v15375_v0 }
  0xea   : > { %14715 = vmatprep.subr.mxu0 %v15375_v0  ;;  %14720 = vmatprep.subr.mxu1 %v15375_v0 }
  0xeb   : > { %14708 = vmatmul.mubr.msk.f32.vlgmr.msra.gmra.mxu0 %vm222_vm2, %v15433_v1  ;;  %14713 = vmatmul.mubr.msk.f32.vlgmr.msra.gmra.mxu1 %vm222_vm2, %v15442_v4 }
  0xec   : > { %14716 = vmatpush3.msk.msra.mxu0 %vm226_vm0, %v3467_v52  ;;  %14721 = vmatpush3.msk.msra.mxu1 %vm226_vm0, %v3467_v52  ;;  %v8033_v38 = vpop.permute.xlu1 %8032  ;;  %v16382_v52 = vld [vmem:[%s17108_s2] sm:$0xff] }
  0xed   : > { %14717 = vmatprep.mubr.msk.f32.mxu0 %vm15376_vm1, %v15375_v0  ;;  %14722 = vmatprep.mubr.msk.f32.mxu1 %vm15376_vm1, %v15375_v0 }
  0xee   : > { %14730 = vmatprep.subr.mxu1 %v15375_v0  ;;  %14725 = vmatprep.subr.mxu0 %v15375_v0 }
  0xef   : > { %14718 = vmatmul.mubr.msk.f32.vlgmr.msra.gmra.mxu0 %vm222_vm2, %v15585_v33  ;;  %14723 = vmatmul.mubr.msk.f32.vlgmr.msra.gmra.mxu1 %vm222_vm2, %v15433_v1 }
  0xf0   : > { %14731 = vmatpush3.msk.msra.mxu1 %vm226_vm0, %v3682_v56  ;;  %14726 = vmatpush3.msk.msra.mxu0 %vm226_vm0, %v15504_v14  ;;  %v16228_v14 = vld [vmem:[%s15424_s23 + $0x20] sm:$0x7]  ;;  %v8502_v63 = vpop.permute.xlu1 %8501 }
  0xf1   : > { %14727 = vmatprep.mubr.msk.f32.mxu0 %vm15376_vm1, %v15375_v0  ;;  %14732 = vmatprep.mubr.msk.f32.mxu1 %vm15376_vm1, %v15375_v0 }
  0xf2   : > { %14735 = vmatprep.subr.mxu0 %v15375_v0  ;;  %14740 = vmatprep.subr.mxu1 %v15375_v0 }
  0xf3   : > { %14728 = vmatmul.mubr.msk.f32.vlgmr.msra.gmra.mxu0 %vm222_vm2, %v15442_v4  ;;  %14733 = vmatmul.mubr.msk.f32.vlgmr.msra.gmra.mxu1 %vm222_vm2, %v15585_v33 }
  0xf4   : > { %14736 = vmatpush3.msk.msra.mxu0 %vm226_vm0, %v15514_v16  ;;  %14741 = vmatpush3.msk.msra.mxu1 %vm226_vm0, %v15511_v15 }
  0xf5   : > { %14737 = vmatprep.mubr.msk.f32.mxu0 %vm15376_vm1, %v15375_v0  ;;  %14742 = vmatprep.mubr.msk.f32.mxu1 %vm15376_vm1, %v15375_v0 }
  0xf6   : > { %14745 = vmatprep.subr.mxu0 %v15375_v0  ;;  %14750 = vmatprep.subr.mxu1 %v15375_v0 }
  0xf7   : > { %14738 = vmatmul.mubr.msk.f32.vlgmr.msra.gmra.mxu0 %vm222_vm2, %v15611_v36  ;;  %14743 = vmatmul.mubr.msk.f32.vlgmr.msra.gmra.mxu1 %vm222_vm2, %v15616_v37 }
  0xf8   : > { %14746 = vmatpush3.msk.msra.mxu0 %vm226_vm0, %v3905_v57  ;;  %14751 = vmatpush3.msk.msra.mxu1 %vm226_vm0, %v3905_v57 }
  0xf9   : > { %14747 = vmatprep.mubr.msk.f32.mxu0 %vm15376_vm1, %v15375_v0  ;;  %14752 = vmatprep.mubr.msk.f32.mxu1 %vm15376_vm1, %v15375_v0 }
  0xfa   : > { %14760 = vmatprep.subr.mxu1 %v15375_v0  ;;  %14755 = vmatprep.subr.mxu0 %v15375_v0 }
  0xfb   : > { %14748 = vmatmul.mubr.msk.f32.vlgmr.msra.gmra.mxu0 %vm222_vm2, %v15637_v39  ;;  %14753 = vmatmul.mubr.msk.f32.vlgmr.msra.gmra.mxu1 %vm222_vm2, %v15611_v36 }
  0xfc   : > { %14761 = vmatpush3.msk.msra.mxu1 %vm226_vm0, %v4120_v58  ;;  %14756 = vmatpush3.msk.msra.mxu0 %vm226_vm0, %v15514_v16 }
  0xfd   : > { %14757 = vmatprep.mubr.msk.f32.mxu0 %vm15376_vm1, %v15375_v0  ;;  %14762 = vmatprep.mubr.msk.f32.mxu1 %vm15376_vm1, %v15375_v0 }
  0xfe   : > { %14765 = vmatprep.subr.mxu0 %v15375_v0  ;;  %14770 = vmatprep.subr.mxu1 %v15375_v0 }
  0xff   : > { %14758 = vmatmul.mubr.msk.f32.vlgmr.msra.gmra.mxu0 %vm222_vm2, %v15616_v37  ;;  %14763 = vmatmul.mubr.msk.f32.vlgmr.msra.gmra.mxu1 %vm222_vm2, %v15637_v39 }
 0x100   : > { %14766 = vmatpush3.msk.msra.mxu0 %vm226_vm0, %v15524_v18  ;;  %14767 = vmatprep.mubr.msk.f32.mxu0 %vm15376_vm1, %v15375_v0 }
 0x101   : > { %14771 = vmatpush3.msk.msra.mxu1 %vm226_vm0, %v15521_v17  ;;  %14772 = vmatprep.mubr.msk.f32.mxu1 %vm15376_vm1, %v15375_v0 }
 0x102   : > { %14775 = vmatprep.subr.mxu0 %v15375_v0  ;;  %14780 = vmatprep.subr.mxu1 %v15375_v0 }
 0x103   : > { %14768 = vmatmul.mubr.msk.f32.vlgmr.msra.gmra.mxu0 %vm222_vm2, %v15669_v41  ;;  %14773 = vmatmul.mubr.msk.f32.vlgmr.msra.gmra.mxu1 %vm222_vm2, %v15674_v42 }
 0x104   : > { %14776 = vmatpush3.msk.msra.mxu0 %vm226_vm0, %v5190_v61  ;;  %14777 = vmatprep.mubr.msk.f32.mxu0 %vm15376_vm1, %v15375_v0 }
 0x105   : > { %14781 = vmatpush3.msk.msra.mxu1 %vm226_vm0, %v5190_v61  ;;  %14782 = vmatprep.mubr.msk.f32.mxu1 %vm15376_vm1, %v15375_v0 }
 0x106   : > { %14785 = vmatprep.subr.mxu0 %v15375_v0  ;;  %14790 = vmatprep.subr.mxu1 %v15375_v0 }
 0x107   : > { %14778 = vmatmul.mubr.msk.f32.vlgmr.msra.gmra.mxu0 %vm222_vm2, %v15693_v44  ;;  %14783 = vmatmul.mubr.msk.f32.vlgmr.msra.gmra.mxu1 %vm222_vm2, %v15669_v41 }
 0x108   : > { %14786 = vmatpush3.msk.msra.mxu0 %vm226_vm0, %v15524_v18  ;;  %14787 = vmatprep.mubr.msk.f32.mxu0 %vm15376_vm1, %v15375_v0 }
 0x109   : > { %14791 = vmatpush3.msk.msra.mxu1 %vm226_vm0, %v5405_v2  ;;  %14792 = vmatprep.mubr.msk.f32.mxu1 %vm15376_vm1, %v15375_v0 }
 0x10a   : > { %14795 = vmatprep.subr.mxu0 %v15375_v0  ;;  %14800 = vmatprep.subr.mxu1 %v15375_v0 }
 0x10b   : > { %14788 = vmatmul.mubr.msk.f32.vlgmr.msra.gmra.mxu0 %vm222_vm2, %v15674_v42  ;;  %14793 = vmatmul.mubr.msk.f32.vlgmr.msra.gmra.mxu1 %vm222_vm2, %v15693_v44 }
 0x10c   : > { %13073 = vrot.lane.b32.xlu0 %v13996_v3, %s15377_s28  ;;  %14796 = vmatpush3.msk.msra.mxu0 %vm226_vm0, %v15534_v20  ;;  %v16397_v3 = vld [vmem:[%s17108_s2 + $0x10] sm:$0xff] }
 0x10d   : > { %14797 = vmatprep.mubr.msk.f32.mxu0 %vm15376_vm1, %v15375_v0  ;;  %14801 = vmatpush3.msk.msra.mxu1 %vm226_vm0, %v15531_v19 }
 0x10e   : > { %14802 = vmatprep.mubr.msk.f32.mxu1 %vm15376_vm1, %v15375_v0  ;;  %15347 = vset.pattern.permute.xlu0 %v15378_v6 }
 0x10f   : > { %14798 = vmatmul.mubr.msk.f32.vlgmr.msra.gmra.mxu0 %vm222_vm2, %v15433_v1  ;;  %14803 = vmatmul.mubr.msk.f32.vlgmr.msra.gmra.mxu1 %vm222_vm2, %v15442_v4 }
 0x110   : > { %14805 = vmatprep.subr.mxu0 %v15375_v0  ;;  %14810 = vmatprep.subr.mxu1 %v15375_v0 }
 0x111   : > { %14806 = vmatpush3.msk.msra.mxu0 %vm226_vm0, %v5659_v5  ;;  %14807 = vmatprep.mubr.msk.f32.mxu0 %vm15376_vm1, %v15375_v0 }
 0x112   : > { %14811 = vmatpush3.msk.msra.mxu1 %vm226_vm0, %v5659_v5  ;;  %14812 = vmatprep.mubr.msk.f32.mxu1 %vm15376_vm1, %v15375_v0 }
 0x113   : > { %2852 = vperm.xlu0 %15347, %v179_v7   ;;  %14808 = vmatmul.mubr.msk.f32.vlgmr.msra.gmra.mxu0 %vm222_vm2, %v15585_v33 }
 0x114   : > { %14813 = vmatmul.mubr.msk.f32.vlgmr.msra.gmra.mxu1 %vm222_vm2, %v15433_v1  ;;  %14815 = vmatprep.subr.mxu0 %v15375_v0 }
 0x115   : > { %14820 = vmatprep.subr.mxu1 %v15375_v0  ;;  %14816 = vmatpush3.msk.msra.mxu0 %vm226_vm0, %v15534_v20 }
 0x116   : > { %14817 = vmatprep.mubr.msk.f32.mxu0 %vm15376_vm1, %v15375_v0  ;;  %14821 = vmatpush3.msk.msra.mxu1 %vm226_vm0, %v5874_v8 }
 0x117   : > { %14822 = vmatprep.mubr.msk.f32.mxu1 %vm15376_vm1, %v15375_v0  ;;  %14818 = vmatmul.mubr.msk.f32.vlgmr.msra.gmra.mxu0 %vm222_vm2, %v15442_v4 }
 0x118   : > { %14823 = vmatmul.mubr.msk.f32.vlgmr.msra.gmra.mxu1 %vm222_vm2, %v15585_v33  ;;  %14825 = vmatprep.subr.mxu0 %v15375_v0 }
 0x119   : > { %14830 = vmatprep.subr.mxu1 %v15375_v0  ;;  %14826 = vmatpush3.msk.msra.mxu0 %vm226_vm0, %v15544_v22 }
 0x11a   : > { %14827 = vmatprep.mubr.msk.f32.mxu0 %vm15376_vm1, %v15375_v0  ;;  %14831 = vmatpush3.msk.msra.mxu1 %vm226_vm0, %v15541_v21 }
 0x11b   : > { %14832 = vmatprep.mubr.msk.f32.mxu1 %vm15376_vm1, %v15375_v0  ;;  %14828 = vmatmul.mubr.msk.f32.vlgmr.msra.gmra.mxu0 %vm222_vm2, %v15611_v36 }
 0x11c   : > { %14833 = vmatmul.mubr.msk.f32.vlgmr.msra.gmra.mxu1 %vm222_vm2, %v15616_v37  ;;  %14835 = vmatprep.subr.mxu0 %v15375_v0 }
 0x11d   : > { %14840 = vmatprep.subr.mxu1 %v15375_v0  ;;  %14836 = vmatpush3.msk.msra.mxu0 %vm226_vm0, %v6095_v9 }
 0x11e   : > { %14837 = vmatprep.mubr.msk.f32.mxu0 %vm15376_vm1, %v15375_v0  ;;  %14841 = vmatpush3.msk.msra.mxu1 %vm226_vm0, %v6095_v9 }
 0x11f   : > { %14842 = vmatprep.mubr.msk.f32.mxu1 %vm15376_vm1, %v15375_v0  ;;  %14838 = vmatmul.mubr.msk.f32.vlgmr.msra.gmra.mxu0 %vm222_vm2, %v15637_v39 }
 0x120   : > { %14843 = vmatmul.mubr.msk.f32.vlgmr.msra.gmra.mxu1 %vm222_vm2, %v15611_v36  ;;  %14845 = vmatprep.subr.mxu0 %v15375_v0 }
 0x121   : > { %14850 = vmatprep.subr.mxu1 %v15375_v0  ;;  %14846 = vmatpush3.msk.msra.mxu0 %vm226_vm0, %v15544_v22 }
 0x122   : > { %14847 = vmatprep.mubr.msk.f32.mxu0 %vm15376_vm1, %v15375_v0  ;;  %14851 = vmatpush3.msk.msra.mxu1 %vm226_vm0, %v6310_v10 }
 0x123   : > { %14852 = vmatprep.mubr.msk.f32.mxu1 %vm15376_vm1, %v15375_v0  ;;  %14848 = vmatmul.mubr.msk.f32.vlgmr.msra.gmra.mxu0 %vm222_vm2, %v15616_v37 }
 0x124   : > { %14853 = vmatmul.mubr.msk.f32.vlgmr.msra.gmra.mxu1 %vm222_vm2, %v15637_v39  ;;  %14855 = vmatprep.subr.mxu0 %v15375_v0 }
 0x125   : > { %14860 = vmatprep.subr.mxu1 %v15375_v0  ;;  %14856 = vmatpush3.msk.msra.mxu0 %vm226_vm0, %v15556_v24 }
 0x126   : > { %14857 = vmatprep.mubr.msk.f32.mxu0 %vm15376_vm1, %v15375_v0  ;;  %14861 = vmatpush3.msk.msra.mxu1 %vm226_vm0, %v15551_v23 }
 0x127   : > { %14862 = vmatprep.mubr.msk.f32.mxu1 %vm15376_vm1, %v15375_v0  ;;  %10660 = vrot.lane.b32.xlu1 %v16172_v11, %s15377_s28 }
 0x128   : > { %14858 = vmatmul.mubr.msk.f32.vlgmr.msra.gmra.mxu0 %vm222_vm2, %v15669_v41  ;;  %14863 = vmatmul.mubr.msk.f32.vlgmr.msra.gmra.mxu1 %vm222_vm2, %v15674_v42 }
 0x129   : > { %14865 = vmatprep.subr.mxu0 %v15375_v0  ;;  %14870 = vmatprep.subr.mxu1 %v15375_v0 }
 0x12a   : > { %14866 = vmatpush3.msk.msra.mxu0 %vm226_vm0, %v16185_v12  ;;  %14867 = vmatprep.mubr.msk.f32.mxu0 %vm15376_vm1, %v15375_v0 }
 0x12b   : > { %14871 = vmatpush3.msk.msra.mxu1 %vm226_vm0, %v16185_v12  ;;  %14872 = vmatprep.mubr.msk.f32.mxu1 %vm15376_vm1, %v15375_v0 }
 0x12c   : > { %14868 = vmatmul.mubr.msk.f32.vlgmr.msra.gmra.mxu0 %vm222_vm2, %v15693_v44  ;;  %14873 = vmatmul.mubr.msk.f32.vlgmr.msra.gmra.mxu1 %vm222_vm2, %v15669_v41 }
 0x12d   : > { %14875 = vmatprep.subr.mxu0 %v15375_v0  ;;  %14880 = vmatprep.subr.mxu1 %v15375_v0 }
 0x12e   : > { %14876 = vmatpush3.msk.msra.mxu0 %vm226_vm0, %v15556_v24  ;;  %14877 = vmatprep.mubr.msk.f32.mxu0 %vm15376_vm1, %v15375_v0 }
 0x12f   : > { %14881 = vmatpush3.msk.msra.mxu1 %vm226_vm0, %v16205_v13  ;;  %14882 = vmatprep.mubr.msk.f32.mxu1 %vm15376_vm1, %v15375_v0 }
 0x130   : > { %14878 = vmatmul.mubr.msk.f32.vlgmr.msra.gmra.mxu0 %vm222_vm2, %v15674_v42  ;;  %14883 = vmatmul.mubr.msk.f32.vlgmr.msra.gmra.mxu1 %vm222_vm2, %v15693_v44 }
 0x131   : > { %14885 = vmatprep.subr.mxu0 %v15375_v0  ;;  %14890 = vmatprep.subr.mxu1 %v15375_v0 }
 0x132   : > { %14886 = vmatpush3.msk.msra.mxu0 %vm226_vm0, %v15544_v22  ;;  %14891 = vmatpush3.msk.msra.mxu1 %vm226_vm0, %v15541_v21 }
 0x133   : > { %14887 = vmatprep.mubr.msk.f32.mxu0 %vm15376_vm1, %v15375_v0  ;;  %14892 = vmatprep.mubr.msk.f32.mxu1 %vm15376_vm1, %v15375_v0 }
 0x134   : > { %14895 = vmatprep.subr.mxu0 %v15375_v0  ;;  %14900 = vmatprep.subr.mxu1 %v15375_v0 }
 0x135   : > { %11129 = vrot.lane.b32.xlu1 %v16228_v14, %s15377_s28  ;;  %14888 = vmatmul.mubr.msk.f32.vlgmr.msra.gmra.mxu0 %vm222_vm2, %v15433_v1 }
 0x136   : > { %14893 = vmatmul.mubr.msk.f32.vlgmr.msra.gmra.mxu1 %vm222_vm2, %v15442_v4  ;;  %14896 = vmatpush3.msk.msra.mxu0 %vm226_vm0, %v6095_v9 }
 0x137   : > { %14901 = vmatpush3.msk.msra.mxu1 %vm226_vm0, %v6095_v9  ;;  %14897 = vmatprep.mubr.msk.f32.mxu0 %vm15376_vm1, %v15375_v0 }
 0x138   : > { %14902 = vmatprep.mubr.msk.f32.mxu1 %vm15376_vm1, %v15375_v0  ;;  %14910 = vmatprep.subr.mxu1 %v15375_v0 }
 0x139   : > { %14898 = vmatmul.mubr.msk.f32.vlgmr.msra.gmra.mxu0 %vm222_vm2, %v15585_v33  ;;  %14905 = vmatprep.subr.mxu0 %v15375_v0 }
 0x13a   : > { %14903 = vmatmul.mubr.msk.f32.vlgmr.msra.gmra.mxu1 %vm222_vm2, %v15433_v1  ;;  %14906 = vmatpush3.msk.msra.mxu0 %vm226_vm0, %v15544_v22  ;;  %v16270_v1 = vld [vmem:[%s15424_s23 + $0x24] sm:$0x7] }
 0x13b   : > { %14911 = vmatpush3.msk.msra.mxu1 %vm226_vm0, %v6310_v10  ;;  %14907 = vmatprep.mubr.msk.f32.mxu0 %vm15376_vm1, %v15375_v0 }
 0x13c   : > { %14912 = vmatprep.mubr.msk.f32.mxu1 %vm15376_vm1, %v15375_v0  ;;  %14915 = vmatprep.subr.mxu0 %v15375_v0 }
 0x13d   : > { %14908 = vmatmul.mubr.msk.f32.vlgmr.msra.gmra.mxu0 %vm222_vm2, %v15442_v4  ;;  %14920 = vmatprep.subr.mxu1 %v15375_v0 }
 0x13e   : > { %14913 = vmatmul.mubr.msk.f32.vlgmr.msra.gmra.mxu1 %vm222_vm2, %v15585_v33  ;;  %14916 = vmatpush3.msk.msra.mxu0 %vm226_vm0, %v15556_v24 }
 0x13f   : > { %14921 = vmatpush3.msk.msra.mxu1 %vm226_vm0, %v15551_v23  ;;  %14917 = vmatprep.mubr.msk.f32.mxu0 %vm15376_vm1, %v15375_v0 }
 0x140   : > { %14922 = vmatprep.mubr.msk.f32.mxu1 %vm15376_vm1, %v15375_v0  ;;  %14925 = vmatprep.subr.mxu0 %v15375_v0 }
 0x141   : > { %14930 = vmatprep.subr.mxu1 %v15375_v0  ;;  %11565 = vrot.lane.b32.xlu1 %v16270_v1, %s15377_s28 }
 0x142   : > { %v449_v4 = vpop.f32.mrf.mxu0  ;;  %v520_v15 = vpop.f32.mrf.mxu1  ;;  %14918 = vmatmul.mubr.msk.f32.vlgmr.msra.gmra.mxu0 %vm222_vm2, %v15611_v36  ;;  %14923 = vmatmul.mubr.msk.f32.vlgmr.msra.gmra.mxu1 %vm222_vm2, %v15616_v37 }
 0x143   : > { %v16283_v16 = vadd.f32 %v449_v4, %v15886_v53  ;;  %14926 = vmatpush3.msk.msra.mxu0 %vm226_vm0, %v16185_v12  ;;  %14931 = vmatpush3.msk.msra.mxu1 %vm226_vm0, %v16185_v12 }
 0x144   : > { %v14449_v17 = vpop.f32.mrf.mxu0  ;;  %v14454_v18 = vpop.f32.mrf.mxu1  ;;  %14927 = vmatprep.mubr.msk.f32.mxu0 %vm15376_vm1, %v15375_v0  ;;  %14932 = vmatprep.mubr.msk.f32.mxu1 %vm15376_vm1, %v15375_v0 }
 0x145   : > { %14940 = vmatprep.subr.mxu1 %v15375_v0  ;;  %14935 = vmatprep.subr.mxu0 %v15375_v0 }
 0x146   : > { %v590_v19 = vpop.f32.mrf.mxu0  ;;  %v664_v20 = vpop.f32.mrf.mxu1  ;;  %14928 = vmatmul.mubr.msk.f32.vlgmr.msra.gmra.mxu0 %vm222_vm2, %v15637_v39  ;;  %14933 = vmatmul.mubr.msk.f32.vlgmr.msra.gmra.mxu1 %vm222_vm2, %v15611_v36 }
 0x147   : > { %v591_v21 = vadd.f32 %v590_v19, %v520_v15  ;;  %14941 = vmatpush3.msk.msra.mxu1 %vm226_vm0, %v16205_v13  ;;  %14936 = vmatpush3.msk.msra.mxu0 %vm226_vm0, %v15556_v24  ;;  %v16320_v24 = vld [vmem:[%s15424_s23 + $0x28] sm:$0x7]  ;;  %v16436_v19 = vld [vmem:[%s15419_s20 + $0x1c] sm:$0x7] }
 0x148   : > { %v14459_v22 = vpop.f32.mrf.mxu0  ;;  %v14464_v23 = vpop.f32.mrf.mxu1  ;;  %14937 = vmatprep.mubr.msk.f32.mxu0 %vm15376_vm1, %v15375_v0  ;;  %14942 = vmatprep.mubr.msk.f32.mxu1 %vm15376_vm1, %v15375_v0 }
 0x149   : > { %v16307_v27 = vadd.f32 %v664_v20, %v591_v21  ;;  %14945 = vmatprep.subr.mxu0 %v15375_v0  ;;  %14950 = vmatprep.subr.mxu1 %v15375_v0  ;;  %v16440_v20 = vpop.permute.xlu0 %8722  ;;  %v16452_v23 = vld [vmem:[%s17108_s2 + $0x20] sm:$0xff] }
 0x14a   : > { %v741_v28 = vpop.f32.mrf.mxu0  ;;  %v817_v29 = vpop.f32.mrf.mxu1  ;;  %14938 = vmatmul.mubr.msk.f32.vlgmr.msra.gmra.mxu0 %vm222_vm2, %v15616_v37  ;;  %14943 = vmatmul.mubr.msk.f32.vlgmr.msra.gmra.mxu1 %vm222_vm2, %v15637_v39 }
 0x14b   : > { %14946 = vmatpush3.msk.msra.mxu0 %vm226_vm0, %v15566_v26  ;;  %14947 = vmatprep.mubr.msk.f32.mxu0 %vm15376_vm1, %v15375_v0  ;;  %v818_v51 = vadd.f32 %v817_v29, %v741_v28 }
 0x14c   : > { %v14469_v30 = vpop.f32.mrf.mxu0  ;;  %v14474_v31 = vpop.f32.mrf.mxu1  ;;  %14951 = vmatpush3.msk.msra.mxu1 %vm226_vm0, %v15561_v25  ;;  %14952 = vmatprep.mubr.msk.f32.mxu1 %vm15376_vm1, %v15375_v0 }
 0x14d   : > { %12003 = vrot.lane.b32.xlu1 %v16320_v24, %s15377_s28  ;;  %14955 = vmatprep.subr.mxu0 %v15375_v0  ;;  %v16470_v30 = vpop.permute.xlu1 %8937 }
 0x14e   : > { %v894_v33 = vpop.f32.mrf.mxu0  ;;  %v965_v34 = vpop.f32.mrf.mxu1  ;;  %14948 = vmatmul.mubr.msk.f32.vlgmr.msra.gmra.mxu0 %vm222_vm2, %v15669_v41  ;;  %14953 = vmatmul.mubr.msk.f32.vlgmr.msra.gmra.mxu1 %vm222_vm2, %v15674_v42 }
 0x14f   : > { %14960 = vmatprep.subr.mxu1 %v15375_v0  ;;  %14956 = vmatpush3.msk.msra.mxu0 %vm226_vm0, %v7818_v32  ;;  %v898_v55 = vadd.f32 %v894_v33, %v818_v51  ;;  %v16482_v33 = vld [vmem:[%s17108_s2 + $0x28] sm:$0xff]  ;;  %v16550_v51 = vld [vmem:[%s17108_s2 + $0x40] sm:$0xff] }
 0x150   : > { %v14479_v35 = vpop.f32.mrf.mxu0  ;;  %v14484_v36 = vpop.f32.mrf.mxu1  ;;  %14957 = vmatprep.mubr.msk.f32.mxu0 %vm15376_vm1, %v15375_v0  ;;  %14961 = vmatpush3.msk.msra.mxu1 %vm226_vm0, %v7818_v32 }
 0x151   : > { %14962 = vmatprep.mubr.msk.f32.mxu1 %vm15376_vm1, %v15375_v0  ;;  %14965 = vmatprep.subr.mxu0 %v15375_v0  ;;  %v1114_v7 = vadd.f32 %v898_v55, %v16283_v16  ;;  %v16429_v16 = vld [vmem:[%s15424_s23 + $0x1c] sm:$0x7]  ;;  %v16495_v36 = vpop.permute.xlu0 %9160 }
 0x152   : > { %v1035_v25 = vpop.f32.mrf.mxu0  ;;  %v1109_v37 = vpop.f32.mrf.mxu1  ;;  %14958 = vmatmul.mubr.msk.f32.vlgmr.msra.gmra.mxu0 %vm222_vm2, %v15693_v44  ;;  %14963 = vmatmul.mubr.msk.f32.vlgmr.msra.gmra.mxu1 %vm222_vm2, %v15669_v41 }
 0x153   : > { %14970 = vmatprep.subr.mxu1 %v15375_v0  ;;  %14966 = vmatpush3.msk.msra.mxu0 %vm226_vm0, %v15566_v26  ;;  %v1036_v46 = vadd.f32 %v1035_v25, %v965_v34 }
 0x154   : > { %v14489_v39 = vpop.f32.mrf.mxu0  ;;  %v14494_v40 = vpop.f32.mrf.mxu1  ;;  %14967 = vmatprep.mubr.msk.f32.mxu0 %vm15376_vm1, %v15375_v0  ;;  %14971 = vmatpush3.msk.msra.mxu1 %vm226_vm0, %v8033_v38  ;;  %v16505_v38 = vld [vmem:[%s15424_s23 + $0x2c] sm:$0x7] }
 0x155   : > { %14972 = vmatprep.mubr.msk.f32.mxu1 %vm15376_vm1, %v15375_v0  ;;  %14975 = vmatprep.subr.mxu0 %v15375_v0  ;;  %v1113_v56 = vadd.f32 %v1109_v37, %v1036_v46  ;;  %v16526_v46 = vld [vmem:[%s17108_s2 + $0x38] sm:$0xff] }
 0x156   : > { %v1188_v43 = vpop.f32.mrf.mxu0  ;;  %v1264_v45 = vpop.f32.mrf.mxu1  ;;  %14968 = vmatmul.mubr.msk.f32.vlgmr.msra.gmra.mxu0 %vm222_vm2, %v15674_v42  ;;  %14973 = vmatmul.mubr.msk.f32.vlgmr.msra.gmra.mxu1 %vm222_vm2, %v15693_v44  ;;  %v16375_v44 = vld [vmem:[%s17108_s2 + $0x8] sm:$0xff] }
 0x157   : > { %14980 = vmatprep.subr.mxu1 %v15375_v0  ;;  %14976 = vmatpush3.msk.msra.mxu0 %vm226_vm0, %v15348_v47  ;;  %v1265_v57 = vadd.f32 %v1264_v45, %v1188_v43  ;;  %v1115_v8 = vadd.f32 %v1113_v56, %v16307_v27  ;;  %v16459_v27 = vld [vmem:[%s17108_s2 + $0x18] sm:$0xff]  ;;  %v16513_v43 = vld [vmem:[%s15419_s20 + $0x20] sm:$0x7]  ;;  %v16517_v45 = vpop.permute.xlu0 %10445 }
 0x158   : > { %v14499_v26 = vpop.f32.mrf.mxu0  ;;  %v14504_v41 = vpop.f32.mrf.mxu1  ;;  %14977 = vmatprep.mubr.msk.f32.mxu0 %vm15376_vm1, %v15375_v0  ;;  %14981 = vmatpush3.msk.msra.mxu1 %vm226_vm0, %v15349_v49 }
 0x159   : > { %14982 = vmatprep.mubr.msk.f32.mxu1 %vm15376_vm1, %v15375_v0  ;;  %14985 = vmatprep.subr.mxu0 %v15375_v0 }
 0x15a   : > { %v1341_v50 = vpop.f32.mrf.mxu0  ;;  %v1412_v42 = vpop.f32.mrf.mxu1  ;;  %14978 = vmatmul.mubr.msk.f32.vlgmr.msra.gmra.mxu0 %vm222_vm2, %v16375_v44  ;;  %14983 = vmatmul.mubr.msk.f32.vlgmr.msra.gmra.mxu1 %vm222_vm2, %v16382_v52 }
 0x15b   : > { %14990 = vmatprep.subr.mxu1 %v15375_v0  ;;  %14986 = vmatpush3.msk.msra.mxu0 %vm226_vm0, %v8287_v48  ;;  %v1345_v62 = vadd.f32 %v1341_v50, %v1265_v57 }
 0x15c   : > { %v14509_v53 = vpop.f32.mrf.mxu0  ;;  %v14514_v54 = vpop.f32.mrf.mxu1  ;;  %14987 = vmatprep.mubr.msk.f32.mxu0 %vm15376_vm1, %v15375_v0  ;;  %14991 = vmatpush3.msk.msra.mxu1 %vm226_vm0, %v8287_v48 }
 0x15d   : > { %14992 = vmatprep.mubr.msk.f32.mxu1 %vm15376_vm1, %v15375_v0  ;;  %14995 = vmatprep.subr.mxu0 %v15375_v0  ;;  %v16410_v10 = vadd.f32 %v1345_v62, %v1114_v7  ;;  %v16556_v53 = vpop.permute.xlu1 %9375  ;;  %v16558_v54 = vpop.permute.xlu0 %10914 }
 0x15e   : > { %v1482_v58 = vpop.f32.mrf.mxu0  ;;  %v1556_v61 = vpop.f32.mrf.mxu1  ;;  %14988 = vmatmul.mubr.msk.f32.vlgmr.msra.gmra.mxu0 %vm222_vm2, %v16397_v3  ;;  %14993 = vmatmul.mubr.msk.f32.vlgmr.msra.gmra.mxu1 %vm222_vm2, %v16375_v44 }
 0x15f   : > { %v1483_v2 = vadd.f32 %v1482_v58, %v1412_v42  ;;  %15000 = vmatprep.subr.mxu1 %v15375_v0  ;;  %14996 = vmatpush3.msk.msra.mxu0 %vm226_vm0, %v15348_v47  ;;  %v16533_v47 = vld [vmem:[%s17108_s2 + $0x30] sm:$0xff] }
 0x160   : > { %v14519_v5 = vpop.f32.mrf.mxu0  ;;  %v14524_v6 = vpop.f32.mrf.mxu1  ;;  %14997 = vmatprep.mubr.msk.f32.mxu0 %vm15376_vm1, %v15375_v0  ;;  %15001 = vmatpush3.msk.msra.mxu1 %vm226_vm0, %v8502_v63 }
 0x161   : > { %v1560_v9 = vadd.f32 %v1556_v61, %v1483_v2  ;;  %15002 = vmatprep.mubr.msk.f32.mxu1 %vm15376_vm1, %v15375_v0  ;;  %15005 = vmatprep.subr.mxu0 %v15375_v0  ;;  %v16580_v2 = vpop.permute.xlu0 %11350 }
 0x162   : > { %14998 = vmatmul.mubr.msk.f32.vlgmr.msra.gmra.mxu0 %vm222_vm2, %v16382_v52  ;;  %15003 = vmatmul.mubr.msk.f32.vlgmr.msra.gmra.mxu1 %vm222_vm2, %v16397_v3 }
 0x163   : > { %v16414_v12 = vadd.f32 %v1560_v9, %v1115_v8  ;;  %v16417_v13 = vpop.f32.mrf.mxu0  ;;  %v16419_v4 = vpop.f32.mrf.mxu1  ;;  %15010 = vmatprep.subr.mxu1 %v15375_v0  ;;  %15006 = vmatpush3.msk.msra.mxu0 %vm226_vm0, %v16429_v16 }
 0x164   : > { %15007 = vmatprep.mubr.msk.f32.mxu0 %vm15376_vm1, %v15375_v0  ;;  %15011 = vmatpush3.msk.msra.mxu1 %vm226_vm0, %v16436_v19  ;;  %v1701_v9 = vadd.f32 %v16419_v4, %v16417_v13 }
 0x165   : > { %v1563_v15 = vmax.f32 %v16410_v10, %v16414_v12  ;;  %v14529_v17 = vpop.f32.mrf.mxu0  ;;  %v14534_v18 = vpop.f32.mrf.mxu1  ;;  %15012 = vmatprep.mubr.msk.f32.mxu1 %vm15376_vm1, %v15375_v0  ;;  %15015 = vmatprep.subr.mxu0 %v15375_v0 }
 0x166   : > { %15008 = vmatmul.mubr.msk.f32.vlgmr.msra.gmra.mxu0 %vm222_vm2, %v16452_v23  ;;  %15013 = vmatmul.mubr.msk.f32.vlgmr.msra.gmra.mxu1 %vm222_vm2, %v16459_v27 }
 0x167   : > { %v16445_v21 = vpop.f32.mrf.mxu0  ;;  %v16447_v22 = vpop.f32.mrf.mxu1  ;;  %15020 = vmatprep.subr.mxu1 %v15375_v0  ;;  %15016 = vmatpush3.msk.msra.mxu0 %vm226_vm0, %v16440_v20 }
 0x168   : > { %15017 = vmatprep.mubr.msk.f32.mxu0 %vm15376_vm1, %v15375_v0  ;;  %15021 = vmatpush3.msk.msra.mxu1 %vm226_vm0, %v16440_v20 }
 0x169   : > { %v14539_v28 = vpop.f32.mrf.mxu0  ;;  %v14544_v29 = vpop.f32.mrf.mxu1  ;;  %15022 = vmatprep.mubr.msk.f32.mxu1 %vm15376_vm1, %v15375_v0  ;;  %15025 = vmatprep.subr.mxu0 %v15375_v0 }
 0x16a   : > { %15018 = vmatmul.mubr.msk.f32.vlgmr.msra.gmra.mxu0 %vm222_vm2, %v16482_v33  ;;  %15023 = vmatmul.mubr.msk.f32.vlgmr.msra.gmra.mxu1 %vm222_vm2, %v16452_v23  ;;  %v1774_v29 = vadd.f32 %v16445_v21, %v1701_v9  ;;  %v16612_v21 = vpop.permute.xlu0 %11788 }
 0x16b   : > { %v16475_v31 = vpop.f32.mrf.mxu0  ;;  %v16477_v32 = vpop.f32.mrf.mxu1  ;;  %15030 = vmatprep.subr.mxu1 %v15375_v0  ;;  %15026 = vmatpush3.msk.msra.mxu0 %vm226_vm0, %v16429_v16 }
 0x16c   : > { %15027 = vmatprep.mubr.msk.f32.mxu0 %vm15376_vm1, %v15375_v0  ;;  %15031 = vmatpush3.msk.msra.mxu1 %vm226_vm0, %v16470_v30  ;;  %v1912_v7 = vadd.f32 %v16475_v31, %v16447_v22 }
 0x16d   : > { %v14549_v34 = vpop.f32.mrf.mxu0  ;;  %v14554_v35 = vpop.f32.mrf.mxu1  ;;  %15032 = vmatprep.mubr.msk.f32.mxu1 %vm15376_vm1, %v15375_v0  ;;  %15035 = vmatprep.subr.mxu0 %v15375_v0 }
 0x16e   : > { %15028 = vmatmul.mubr.msk.f32.vlgmr.msra.gmra.mxu0 %vm222_vm2, %v16459_v27  ;;  %15033 = vmatmul.mubr.msk.f32.vlgmr.msra.gmra.mxu1 %vm222_vm2, %v16482_v33  ;;  %v1985_v31 = vadd.f32 %v16477_v32, %v1912_v7 }
 0x16f   : > { %v2052_v25 = vpop.f32.mrf.mxu0  ;;  %v2122_v37 = vpop.f32.mrf.mxu1  ;;  %15040 = vmatprep.subr.mxu1 %v15375_v0  ;;  %15036 = vmatpush3.msk.msra.mxu0 %vm226_vm0, %v16040_v60 }
 0x170   : > { %15037 = vmatprep.mubr.msk.f32.mxu0 %vm15376_vm1, %v15375_v0  ;;  %15041 = vmatpush3.msk.msra.mxu1 %vm226_vm0, %v16513_v43  ;;  %v2123_v8 = vadd.f32 %v2122_v37, %v2052_v25 }
 0x171   : > { %v14559_v39 = vpop.f32.mrf.mxu0  ;;  %v14564_v40 = vpop.f32.mrf.mxu1  ;;  %15042 = vmatprep.mubr.msk.f32.mxu1 %vm15376_vm1, %v15375_v0  ;;  %13288 = vrot.lane.b32.xlu1 %v16505_v38, %s15377_s28 }
 0x172   : > { %15038 = vmatmul.mubr.msk.f32.vlgmr.msra.gmra.mxu0 %vm222_vm2, %v16526_v46  ;;  %15043 = vmatmul.mubr.msk.f32.vlgmr.msra.gmra.mxu1 %vm222_vm2, %v16533_v47 }
 0x173   : > { %v2192_v26 = vpop.f32.mrf.mxu0  ;;  %v2263_v41 = vpop.f32.mrf.mxu1  ;;  %15045 = vmatprep.subr.mxu0 %v15375_v0  ;;  %15050 = vmatprep.subr.mxu1 %v15375_v0 }
 0x174   : > { %15046 = vmatpush3.msk.msra.mxu0 %vm226_vm0, %v16495_v36  ;;  %15047 = vmatprep.mubr.msk.f32.mxu0 %vm15376_vm1, %v15375_v0 }
 0x175   : > { %v14569_v48 = vpop.f32.mrf.mxu0  ;;  %v14574_v49 = vpop.f32.mrf.mxu1  ;;  %15051 = vmatpush3.msk.msra.mxu1 %vm226_vm0, %v16495_v36  ;;  %15052 = vmatprep.mubr.msk.f32.mxu1 %vm15376_vm1, %v15375_v0 }
 0x176   : > { %15048 = vmatmul.mubr.msk.f32.vlgmr.msra.gmra.mxu0 %vm222_vm2, %v16550_v51  ;;  %15053 = vmatmul.mubr.msk.f32.vlgmr.msra.gmra.mxu1 %vm222_vm2, %v16526_v46 }
 0x177   : > { %v2333_v50 = vpop.f32.mrf.mxu0  ;;  %v2403_v42 = vpop.f32.mrf.mxu1  ;;  %15055 = vmatprep.subr.mxu0 %v15375_v0  ;;  %15060 = vmatprep.subr.mxu1 %v15375_v0 }
 0x178   : > { %15056 = vmatpush3.msk.msra.mxu0 %vm226_vm0, %v16040_v60  ;;  %15057 = vmatprep.mubr.msk.f32.mxu0 %vm15376_vm1, %v15375_v0  ;;  %v2334_v63 = vadd.f32 %v2333_v50, %v2263_v41 }
 0x179   : > { %v14579_v55 = vpop.f32.mrf.mxu0  ;;  %v14584_v56 = vpop.f32.mrf.mxu1  ;;  %15061 = vmatpush3.msk.msra.mxu1 %vm226_vm0, %v16556_v53  ;;  %15062 = vmatprep.mubr.msk.f32.mxu1 %vm15376_vm1, %v15375_v0 }
 0x17a   : > { %15058 = vmatmul.mubr.msk.f32.vlgmr.msra.gmra.mxu0 %vm222_vm2, %v16533_v47  ;;  %15063 = vmatmul.mubr.msk.f32.vlgmr.msra.gmra.mxu1 %vm222_vm2, %v16550_v51  ;;  %v2407_v28 = vadd.f32 %v2403_v42, %v2334_v63 }
 0x17b   : > { %v2479_v57 = vpop.f32.mrf.mxu0  ;;  %v2552_v58 = vpop.f32.mrf.mxu1  ;;  %15065 = vmatprep.subr.mxu0 %v15375_v0  ;;  %15070 = vmatprep.subr.mxu1 %v15375_v0 }
 0x17c   : > { %15066 = vmatpush3.msk.msra.mxu0 %vm226_vm0, %v16429_v16  ;;  %15071 = vmatpush3.msk.msra.mxu1 %vm226_vm0, %v16436_v19  ;;  %v2196_v19 = vadd.f32 %v2192_v26, %v2123_v8  ;;  %v2553_v22 = vadd.f32 %v2552_v58, %v2479_v57  ;;  %v2409_v39 = vadd.f32 %v2407_v28, %v1985_v31  ;;  %v15362_v8 = vld [vmem:[%s15419_s20 + $0x24] sm:$0x7] }
 0x17d   : > { %v14589_v61 = vpop.f32.mrf.mxu0  ;;  %v14594_v62 = vpop.f32.mrf.mxu1  ;;  %15067 = vmatprep.mubr.msk.f32.mxu0 %vm15376_vm1, %v15375_v0  ;;  %15072 = vmatprep.mubr.msk.f32.mxu1 %vm15376_vm1, %v15375_v0 }
 0x17e   : > { %15075 = vmatprep.subr.mxu0 %v15375_v0  ;;  %15080 = vmatprep.subr.mxu1 %v15375_v0  ;;  %v2408_v37 = vadd.f32 %v2196_v19, %v1774_v29  ;;  %v16637_v42 = vpop.permute.xlu0 %13073 }
 0x17f   : > { %v2626_v5 = vpop.f32.mrf.mxu0  ;;  %v2697_v6 = vpop.f32.mrf.mxu1  ;;  %15068 = vmatmul.mubr.msk.f32.vlgmr.msra.gmra.mxu0 %vm222_vm2, %v16375_v44  ;;  %15073 = vmatmul.mubr.msk.f32.vlgmr.msra.gmra.mxu1 %vm222_vm2, %v16382_v52 }
 0x180   : > { %15076 = vmatpush3.msk.msra.mxu0 %vm226_vm0, %v16440_v20  ;;  %15081 = vmatpush3.msk.msra.mxu1 %vm226_vm0, %v16440_v20  ;;  %v2630_v34 = vadd.f32 %v2626_v5, %v2553_v22 }
 0x181   : > { %v14599_v17 = vpop.f32.mrf.mxu0  ;;  %v14604_v18 = vpop.f32.mrf.mxu1  ;;  %15077 = vmatprep.mubr.msk.f32.mxu0 %vm15376_vm1, %v15375_v0  ;;  %15082 = vmatprep.mubr.msk.f32.mxu1 %vm15376_vm1, %v15375_v0 }
 0x182   : > { %15090 = vmatprep.subr.mxu1 %v15375_v0  ;;  %15085 = vmatprep.subr.mxu0 %v15375_v0  ;;  %v2846_v41 = vadd.f32 %v2630_v34, %v2408_v37 }
 0x183   : > { %v2767_v13 = vpop.f32.mrf.mxu0  ;;  %v2841_v4 = vpop.f32.mrf.mxu1  ;;  %15078 = vmatmul.mubr.msk.f32.vlgmr.msra.gmra.mxu0 %vm222_vm2, %v16397_v3  ;;  %15083 = vmatmul.mubr.msk.f32.vlgmr.msra.gmra.mxu1 %vm222_vm2, %v16375_v44 }
 0x184   : > { %v2768_v20 = vadd.f32 %v2767_v13, %v2697_v6  ;;  %15091 = vmatpush3.msk.msra.mxu1 %vm226_vm0, %v16470_v30  ;;  %15086 = vmatpush3.msk.msra.mxu0 %vm226_vm0, %v16429_v16 }
 0x185   : > { %v14609_v35 = vpop.f32.mrf.mxu0  ;;  %v14614_v25 = vpop.f32.mrf.mxu1  ;;  %15087 = vmatprep.mubr.msk.f32.mxu0 %vm15376_vm1, %v15375_v0  ;;  %15092 = vmatprep.mubr.msk.f32.mxu1 %vm15376_vm1, %v15375_v0 }
 0x186   : > { %v2845_v32 = vadd.f32 %v2841_v4, %v2768_v20  ;;  %15095 = vmatprep.subr.mxu0 %v15375_v0  ;;  %15100 = vmatprep.subr.mxu1 %v15375_v0 }
 0x187   : > { %v2953_v40 = vpop.f32.mrf.mxu0  ;;  %v3026_v26 = vpop.f32.mrf.mxu1  ;;  %15088 = vmatmul.mubr.msk.f32.vlgmr.msra.gmra.mxu0 %vm222_vm2, %v16382_v52  ;;  %15093 = vmatmul.mubr.msk.f32.vlgmr.msra.gmra.mxu1 %vm222_vm2, %v16397_v3 }
 0x188   : > { %v2847_v30 = vadd.f32 %v2845_v32, %v2409_v39  ;;  %v3027_v48 = vadd.f32 %v3026_v26, %v2953_v40  ;;  %15096 = vmatpush3.msk.msra.mxu0 %vm226_vm0, %v16040_v60  ;;  %15101 = vmatpush3.msk.msra.mxu1 %vm226_vm0, %v16513_v43 }
 0x189   : > { %v14619_v16 = vpop.f32.mrf.mxu0  ;;  %v14624_v49 = vpop.f32.mrf.mxu1  ;;  %15097 = vmatprep.mubr.msk.f32.mxu0 %vm15376_vm1, %v15375_v0  ;;  %15102 = vmatprep.mubr.msk.f32.mxu1 %vm15376_vm1, %v15375_v0 }
 0x18a   : > { %v2848_v50 = vmax.f32 %v2846_v41, %v2847_v30  ;;  %15105 = vmatprep.subr.mxu0 %v15375_v0  ;;  %15110 = vmatprep.subr.mxu1 %v15375_v0 }
 0x18b   : > { %v3100_v55 = vpop.f32.mrf.mxu0  ;;  %v16643_v56 = vpop.f32.mrf.mxu1  ;;  %15098 = vmatmul.mubr.msk.f32.vlgmr.msra.gmra.mxu0 %vm222_vm2, %v16452_v23  ;;  %15103 = vmatmul.mubr.msk.f32.vlgmr.msra.gmra.mxu1 %vm222_vm2, %v16459_v27 }
 0x18c   : > { %v16650_v57 = vadd.f32 %v3100_v55, %v3027_v48  ;;  %v2849_v43 = vmax.f32 %v1563_v15, %v2848_v50  ;;  %15106 = vmatpush3.msk.msra.mxu0 %vm226_vm0, %v16495_v36  ;;  %15111 = vmatpush3.msk.msra.mxu1 %vm226_vm0, %v16495_v36  ;;  %v16816_v48 = vld [vmem:[%s15419_s20 + $0x24] sm:$0x7] }
 0x18d   : > { %v14629_v58 = vpop.f32.mrf.mxu0  ;;  %v14634_v61 = vpop.f32.mrf.mxu1  ;;  %15107 = vmatprep.mubr.msk.f32.mxu0 %vm15376_vm1, %v15375_v0  ;;  %15112 = vmatprep.mubr.msk.f32.mxu1 %vm15376_vm1, %v15375_v0 }
 0x18e   : > { %15120 = vmatprep.subr.mxu1 %v15375_v0  ;;  %15115 = vmatprep.subr.mxu0 %v15375_v0  ;;  %v16673_v15 = vpop.permute.xlu0 %2852 }
 0x18f   : > { %v16667_v10 = vpop.f32.mrf.mxu0  ;;  %v16669_v12 = vpop.f32.mrf.mxu1  ;;  %15108 = vmatmul.mubr.msk.f32.vlgmr.msra.gmra.mxu0 %vm222_vm2, %v16482_v33  ;;  %15113 = vmatmul.mubr.msk.f32.vlgmr.msra.gmra.mxu1 %vm222_vm2, %v16452_v23  ;;  %v2855_v36 = vadd.f32 %v16673_v15, %v2849_v43 }
 0x190   : > { %15121 = vmatpush3.msk.msra.mxu1 %vm226_vm0, %v16556_v53  ;;  %15116 = vmatpush3.msk.msra.mxu0 %vm226_vm0, %v16040_v60 }
 0x191   : > { %v14639_v62 = vpop.f32.mrf.mxu0  ;;  %v14644_v63 = vpop.f32.mrf.mxu1  ;;  %v2856_v5 = vmax.f32 %v2855_v36, 0.0  ;;  %15117 = vmatprep.mubr.msk.f32.mxu0 %vm15376_vm1, %v15375_v0  ;;  %15122 = vmatprep.mubr.msk.f32.mxu1 %vm15376_vm1, %v15375_v0 }
 0x192   : > { %15125 = vmatprep.subr.mxu0 %v15375_v0  ;;  %15130 = vmatprep.subr.mxu1 %v15375_v0 }
 0x193   : > { %v16693_v6 = vpop.f32.mrf.mxu0  ;;  %v16695_v53 = vpop.f32.mrf.mxu1  ;;  %2858 = vst.msk [vmem:[%s16685_s21] sm:$0xff] %vm2857_vm3, %v2856_v5  ;;  %15118 = vmatmul.mubr.msk.f32.vlgmr.msra.gmra.mxu0 %vm222_vm2, %v16459_v27  ;;  %15123 = vmatmul.mubr.msk.f32.vlgmr.msra.gmra.mxu1 %vm222_vm2, %v16482_v33 }
 0x194   : > { %15126 = vmatpush3.msk.msra.mxu0 %vm226_vm0, %v16172_v11  ;;  %15127 = vmatprep.mubr.msk.f32.mxu0 %vm15376_vm1, %v15375_v0 }
 0x195   : > { %v14649_v60 = vpop.f32.mrf.mxu0  ;;  %v14654_v7 = vpop.f32.mrf.mxu1  ;;  %15131 = vmatpush3.msk.msra.mxu1 %vm226_vm0, %v15362_v8  ;;  %15132 = vmatprep.mubr.msk.f32.mxu1 %vm15376_vm1, %v15375_v0  ;;  %v16873_v8 = vld [vmem:[%s15419_s20 + $0x28] sm:$0x7] }
 0x196   : > { %15135 = vmatprep.subr.mxu0 %v15375_v0  ;;  %15140 = vmatprep.subr.mxu1 %v15375_v0 }
 0x197   : > { %v16713_v9 = vpop.f32.mrf.mxu0  ;;  %v16715_v17 = vpop.f32.mrf.mxu1  ;;  %15128 = vmatmul.mubr.msk.f32.vlgmr.msra.gmra.mxu0 %vm222_vm2, %v16526_v46  ;;  %15133 = vmatmul.mubr.msk.f32.vlgmr.msra.gmra.mxu1 %vm222_vm2, %v16533_v47 }
 0x198   : > { %15136 = vmatpush3.msk.msra.mxu0 %vm226_vm0, %v16517_v45  ;;  %15137 = vmatprep.mubr.msk.f32.mxu0 %vm15376_vm1, %v15375_v0 }
 0x199   : > { %v14659_v18 = vpop.f32.mrf.mxu0  ;;  %v14664_v19 = vpop.f32.mrf.mxu1  ;;  %15141 = vmatpush3.msk.msra.mxu1 %vm226_vm0, %v16517_v45  ;;  %15142 = vmatprep.mubr.msk.f32.mxu1 %vm15376_vm1, %v15375_v0 }
 0x19a   : > { %v10661_v22 = vpop.permute.xlu1 %10660  ;;  %15145 = vmatprep.subr.mxu0 %v15375_v0  ;;  %15150 = vmatprep.subr.mxu1 %v15375_v0 }
 0x19b   : > { %v16731_v28 = vpop.f32.mrf.mxu0  ;;  %v16735_v29 = vpop.f32.mrf.mxu1  ;;  %15138 = vmatmul.mubr.msk.f32.vlgmr.msra.gmra.mxu0 %vm222_vm2, %v16550_v51  ;;  %15143 = vmatmul.mubr.msk.f32.vlgmr.msra.gmra.mxu1 %vm222_vm2, %v16526_v46 }
 0x19c   : > { %15146 = vmatpush3.msk.msra.mxu0 %vm226_vm0, %v16172_v11  ;;  %15147 = vmatprep.mubr.msk.f32.mxu0 %vm15376_vm1, %v15375_v0 }
 0x19d   : > { %v14669_v13 = vpop.f32.mrf.mxu0  ;;  %v14674_v45 = vpop.f32.mrf.mxu1  ;;  %15151 = vmatpush3.msk.msra.mxu1 %vm226_vm0, %v10661_v22  ;;  %15152 = vmatprep.mubr.msk.f32.mxu1 %vm15376_vm1, %v15375_v0 }
 0x19e   : > { %15155 = vmatprep.subr.mxu0 %v15375_v0  ;;  %15160 = vmatprep.subr.mxu1 %v15375_v0 }
 0x19f   : > { %v16748_v4 = vpop.f32.mrf.mxu0  ;;  %v16752_v31 = vpop.f32.mrf.mxu1  ;;  %15148 = vmatmul.mubr.msk.f32.vlgmr.msra.gmra.mxu0 %vm222_vm2, %v16533_v47  ;;  %15153 = vmatmul.mubr.msk.f32.vlgmr.msra.gmra.mxu1 %vm222_vm2, %v16550_v51 }
 0x1a0   : > { %15156 = vmatpush3.msk.msra.mxu0 %vm226_vm0, %v16228_v14  ;;  %15157 = vmatprep.mubr.msk.f32.mxu0 %vm15376_vm1, %v15375_v0 }
 0x1a1   : > { %v14679_v11 = vpop.f32.mrf.mxu0  ;;  %v14684_v34 = vpop.f32.mrf.mxu1  ;;  %15161 = vmatpush3.msk.msra.mxu1 %vm226_vm0, %v16031_v59  ;;  %15162 = vmatprep.mubr.msk.f32.mxu1 %vm15376_vm1, %v15375_v0 }
 0x1a2   : > { %15165 = vmatprep.subr.mxu0 %v15375_v0  ;;  %15170 = vmatprep.subr.mxu1 %v15375_v0 }
 0x1a3   : > { %v16766_v20 = vpop.f32.mrf.mxu0  ;;  %v16770_v35 = vpop.f32.mrf.mxu1  ;;  %15158 = vmatmul.mubr.msk.f32.vlgmr.msra.gmra.mxu0 %vm222_vm2, %v16375_v44  ;;  %15163 = vmatmul.mubr.msk.f32.vlgmr.msra.gmra.mxu1 %vm222_vm2, %v16382_v52 }
 0x1a4   : > { %15166 = vmatpush3.msk.msra.mxu0 %vm226_vm0, %v16558_v54  ;;  %15167 = vmatprep.mubr.msk.f32.mxu0 %vm15376_vm1, %v15375_v0 }
 0x1a5   : > { %v14689_v25 = vpop.f32.mrf.mxu0  ;;  %v14694_v59 = vpop.f32.mrf.mxu1  ;;  %15171 = vmatpush3.msk.msra.mxu1 %vm226_vm0, %v16558_v54  ;;  %15172 = vmatprep.mubr.msk.f32.mxu1 %vm15376_vm1, %v15375_v0 }
 0x1a6   : > { %15175 = vmatprep.subr.mxu0 %v15375_v0  ;;  %15180 = vmatprep.subr.mxu1 %v15375_v0 }
 0x1a7   : > { %v16784_v37 = vpop.f32.mrf.mxu0  ;;  %v16788_v39 = vpop.f32.mrf.mxu1  ;;  %15168 = vmatmul.mubr.msk.f32.vlgmr.msra.gmra.mxu0 %vm222_vm2, %v16397_v3  ;;  %15173 = vmatmul.mubr.msk.f32.vlgmr.msra.gmra.mxu1 %vm222_vm2, %v16375_v44 }
 0x1a8   : > { %v11130_v32 = vpop.permute.xlu1 %11129  ;;  %15176 = vmatpush3.msk.msra.mxu0 %vm226_vm0, %v16228_v14  ;;  %15177 = vmatprep.mubr.msk.f32.mxu0 %vm15376_vm1, %v15375_v0 }
 0x1a9   : > { %v14699_v40 = vpop.f32.mrf.mxu0  ;;  %v14704_v54 = vpop.f32.mrf.mxu1  ;;  %15181 = vmatpush3.msk.msra.mxu1 %vm226_vm0, %v11130_v32  ;;  %15182 = vmatprep.mubr.msk.f32.mxu1 %vm15376_vm1, %v15375_v0 }
 0x1aa   : > { %15185 = vmatprep.subr.mxu0 %v15375_v0  ;;  %15190 = vmatprep.subr.mxu1 %v15375_v0  ;;  %v3242_v40 = vadd.f32 %v16667_v10, %v16643_v56  ;;  %v3678_v54 = vadd.f32 %v16731_v28, %v16715_v17  ;;  %v3463_v10 = vadd.f32 %v16695_v53, %v16693_v6 }
 0x1ab   : > { %v16801_v26 = vpop.f32.mrf.mxu0  ;;  %v16805_v41 = vpop.f32.mrf.mxu1  ;;  %15178 = vmatmul.mubr.msk.f32.vlgmr.msra.gmra.mxu0 %vm222_vm2, %v16382_v52  ;;  %15183 = vmatmul.mubr.msk.f32.vlgmr.msra.gmra.mxu1 %vm222_vm2, %v16397_v3 }
 0x1ac   : > { %15186 = vmatpush3.msk.msra.mxu0 %vm226_vm0, %v16270_v1  ;;  %15187 = vmatprep.mubr.msk.f32.mxu0 %vm15376_vm1, %v15375_v0 }
 0x1ad   : > { %v14709_v14 = vpop.f32.mrf.mxu0  ;;  %v14714_v30 = vpop.f32.mrf.mxu1  ;;  %15191 = vmatpush3.msk.msra.mxu1 %vm226_vm0, %v16816_v48  ;;  %15192 = vmatprep.mubr.msk.f32.mxu1 %vm15376_vm1, %v15375_v0 }
 0x1ae   : > { %15195 = vmatprep.subr.mxu0 %v15375_v0  ;;  %15200 = vmatprep.subr.mxu1 %v15375_v0 }
 0x1af   : > { %v16822_v16 = vpop.f32.mrf.mxu0  ;;  %v16826_v49 = vpop.f32.mrf.mxu1  ;;  %15188 = vmatmul.mubr.msk.f32.vlgmr.msra.gmra.mxu0 %vm222_vm2, %v16452_v23  ;;  %15193 = vmatmul.mubr.msk.f32.vlgmr.msra.gmra.mxu1 %vm222_vm2, %v16459_v27 }
 0x1b0   : > { %15196 = vmatpush3.msk.msra.mxu0 %vm226_vm0, %v16580_v2  ;;  %15197 = vmatprep.mubr.msk.f32.mxu0 %vm15376_vm1, %v15375_v0 }
 0x1b1   : > { %v14719_v50 = vpop.f32.mrf.mxu0  ;;  %v14724_v55 = vpop.f32.mrf.mxu1  ;;  %15201 = vmatpush3.msk.msra.mxu1 %vm226_vm0, %v16580_v2  ;;  %15202 = vmatprep.mubr.msk.f32.mxu1 %vm15376_vm1, %v15375_v0 }
 0x1b2   : > { %15205 = vmatprep.subr.mxu0 %v15375_v0  ;;  %15210 = vmatprep.subr.mxu1 %v15375_v0  ;;  %v4116_v50 = vadd.f32 %v16784_v37, %v16770_v35  ;;  %v3319_v35 = vadd.f32 %v16669_v12, %v3242_v40  ;;  %v3755_v37 = vadd.f32 %v16735_v29, %v3678_v54 }
 0x1b3   : > { %v16840_v43 = vpop.f32.mrf.mxu0  ;;  %v16844_v58 = vpop.f32.mrf.mxu1  ;;  %15198 = vmatmul.mubr.msk.f32.vlgmr.msra.gmra.mxu0 %vm222_vm2, %v16482_v33  ;;  %15203 = vmatmul.mubr.msk.f32.vlgmr.msra.gmra.mxu1 %vm222_vm2, %v16452_v23  ;;  %v3540_v55 = vadd.f32 %v16713_v9, %v3463_v10  ;;  %v3901_v29 = vadd.f32 %v16752_v31, %v16748_v4  ;;  %v4334_v9 = vadd.f32 %v16805_v41, %v16801_v26 }
 0x1b4   : > { %v16850_v61 = vpop.permute.xlu1 %11565  ;;  %15206 = vmatpush3.msk.msra.mxu0 %vm226_vm0, %v16270_v1  ;;  %15207 = vmatprep.mubr.msk.f32.mxu0 %vm15376_vm1, %v15375_v0  ;;  %v4545_v6 = vadd.f32 %v16840_v43, %v16826_v49  ;;  %v3757_v4 = vadd.f32 %v3755_v37, %v3319_v35 }
 0x1b5   : > { %v14729_v36 = vpop.f32.mrf.mxu0  ;;  %v14734_v62 = vpop.f32.mrf.mxu1  ;;  %15211 = vmatpush3.msk.msra.mxu1 %vm226_vm0, %v16850_v61  ;;  %15212 = vmatprep.mubr.msk.f32.mxu1 %vm15376_vm1, %v15375_v0  ;;  %v3978_v31 = vadd.f32 %v16766_v20, %v3901_v29  ;;  %v3756_v20 = vadd.f32 %v3540_v55, %v16650_v57 }
 0x1b6   : > { %15215 = vmatprep.subr.mxu0 %v15375_v0  ;;  %15220 = vmatprep.subr.mxu1 %v15375_v0  ;;  %v4193_v36 = vadd.f32 %v16788_v39, %v4116_v50  ;;  %v4407_v39 = vadd.f32 %v16822_v16, %v4334_v9  ;;  %v4618_v41 = vadd.f32 %v16844_v58, %v4545_v6  ;;  %v15365_v50 = vld [vmem:[%s15424_s23 + $0x28] sm:$0x7] }
 0x1b7   : > { %v16860_v63 = vpop.f32.mrf.mxu0  ;;  %v4755_v5 = vpop.f32.mrf.mxu1  ;;  %15208 = vmatmul.mubr.msk.f32.vlgmr.msra.gmra.mxu0 %vm222_vm2, %v16459_v27  ;;  %15213 = vmatmul.mubr.msk.f32.vlgmr.msra.gmra.mxu1 %vm222_vm2, %v16482_v33 }
 0x1b8   : > { %15216 = vmatpush3.msk.msra.mxu0 %vm226_vm0, %v16320_v24  ;;  %15217 = vmatprep.mubr.msk.f32.mxu0 %vm15376_vm1, %v15375_v0  ;;  %v4756_v53 = vadd.f32 %v4755_v5, %v16860_v63 }
 0x1b9   : > { %v14739_v60 = vpop.f32.mrf.mxu0  ;;  %v14744_v7 = vpop.f32.mrf.mxu1  ;;  %15221 = vmatpush3.msk.msra.mxu1 %vm226_vm0, %v16873_v8  ;;  %15222 = vmatprep.mubr.msk.f32.mxu1 %vm15376_vm1, %v15375_v0 }
 0x1ba   : > { %15225 = vmatprep.subr.mxu0 %v15375_v0  ;;  %15230 = vmatprep.subr.mxu1 %v15375_v0  ;;  %v4195_v7 = vadd.f32 %v4193_v36, %v3757_v4 }
 0x1bb   : > { %v4825_v18 = vpop.f32.mrf.mxu0  ;;  %v4896_v19 = vpop.f32.mrf.mxu1  ;;  %15218 = vmatmul.mubr.msk.f32.vlgmr.msra.gmra.mxu0 %vm222_vm2, %v16526_v46  ;;  %15223 = vmatmul.mubr.msk.f32.vlgmr.msra.gmra.mxu1 %vm222_vm2, %v16533_v47 }
 0x1bc   : > { %15226 = vmatpush3.msk.msra.mxu0 %vm226_vm0, %v16612_v21  ;;  %15227 = vmatprep.mubr.msk.f32.mxu0 %vm15376_vm1, %v15375_v0  ;;  %v4829_v43 = vadd.f32 %v4825_v18, %v4756_v53 }
 0x1bd   : > { %v14749_v22 = vpop.f32.mrf.mxu0  ;;  %v14754_v13 = vpop.f32.mrf.mxu1  ;;  %15231 = vmatpush3.msk.msra.mxu1 %vm226_vm0, %v16612_v21  ;;  %15232 = vmatprep.mubr.msk.f32.mxu1 %vm15376_vm1, %v15375_v0 }
 0x1be   : > { %15235 = vmatprep.subr.mxu0 %v15375_v0  ;;  %15240 = vmatprep.subr.mxu1 %v15375_v0  ;;  %v5041_v58 = vadd.f32 %v4829_v43, %v4407_v39 }
 0x1bf   : > { %v4966_v45 = vpop.f32.mrf.mxu0  ;;  %v5036_v11 = vpop.f32.mrf.mxu1  ;;  %15228 = vmatmul.mubr.msk.f32.vlgmr.msra.gmra.mxu0 %vm222_vm2, %v16550_v51  ;;  %15233 = vmatmul.mubr.msk.f32.vlgmr.msra.gmra.mxu1 %vm222_vm2, %v16526_v46 }
 0x1c0   : > { %v16899_v34 = vpop.permute.xlu1 %12003  ;;  %15236 = vmatpush3.msk.msra.mxu0 %vm226_vm0, %v16320_v24  ;;  %15237 = vmatprep.mubr.msk.f32.mxu0 %vm15376_vm1, %v15375_v0  ;;  %v4967_v17 = vadd.f32 %v4966_v45, %v4896_v19 }
 0x1c1   : > { %v14759_v25 = vpop.f32.mrf.mxu0  ;;  %v14764_v59 = vpop.f32.mrf.mxu1  ;;  %15241 = vmatpush3.msk.msra.mxu1 %vm226_vm0, %v16899_v34  ;;  %15242 = vmatprep.mubr.msk.f32.mxu1 %vm15376_vm1, %v15375_v0 }
 0x1c2   : > { %15245 = vmatprep.subr.mxu0 %v15375_v0  ;;  %15250 = vmatprep.subr.mxu1 %v15375_v0  ;;  %v5040_v62 = vadd.f32 %v5036_v11, %v4967_v17 }
 0x1c3   : > { %v5112_v32 = vpop.f32.mrf.mxu0  ;;  %v5185_v14 = vpop.f32.mrf.mxu1  ;;  %15238 = vmatmul.mubr.msk.f32.vlgmr.msra.gmra.mxu0 %vm222_vm2, %v16533_v47  ;;  %15243 = vmatmul.mubr.msk.f32.vlgmr.msra.gmra.mxu1 %vm222_vm2, %v16550_v51 }
 0x1c4   : > { %15246 = vmatpush3.msk.msra.mxu0 %vm226_vm0, %v16270_v1  ;;  %15251 = vmatpush3.msk.msra.mxu1 %vm226_vm0, %v16816_v48  ;;  %v5186_v63 = vadd.f32 %v5185_v14, %v5112_v32  ;;  %v5042_v19 = vadd.f32 %v5040_v62, %v4618_v41 }
 0x1c5   : > { %v14769_v30 = vpop.f32.mrf.mxu0  ;;  %v14774_v56 = vpop.f32.mrf.mxu1  ;;  %15247 = vmatprep.mubr.msk.f32.mxu0 %vm15376_vm1, %v15375_v0  ;;  %15252 = vmatprep.mubr.msk.f32.mxu1 %vm15376_vm1, %v15375_v0 }
 0x1c6   : > { %15255 = vmatprep.subr.mxu0 %v15375_v0  ;;  %15260 = vmatprep.subr.mxu1 %v15375_v0 }
 0x1c7   : > { %v5259_v28 = vpop.f32.mrf.mxu0  ;;  %v5330_v48 = vpop.f32.mrf.mxu1  ;;  %15248 = vmatmul.mubr.msk.f32.vlgmr.msra.gmra.mxu0 %vm222_vm2, %v16375_v44  ;;  %15253 = vmatmul.mubr.msk.f32.vlgmr.msra.gmra.mxu1 %vm222_vm2, %v16382_v52 }
 0x1c8   : > { %15256 = vmatpush3.msk.msra.mxu0 %vm226_vm0, %v16580_v2  ;;  %15261 = vmatpush3.msk.msra.mxu1 %vm226_vm0, %v16580_v2  ;;  %v5263_v5 = vadd.f32 %v5259_v28, %v5186_v63  ;;  %v15366_v28 = vld [vmem:[%s15419_s20 + $0x2c] sm:$0x7] }
 0x1c9   : > { %v14779_v12 = vpop.f32.mrf.mxu0  ;;  %v14784_v49 = vpop.f32.mrf.mxu1  ;;  %15257 = vmatprep.mubr.msk.f32.mxu0 %vm15376_vm1, %v15375_v0  ;;  %15262 = vmatprep.mubr.msk.f32.mxu1 %vm15376_vm1, %v15375_v0 }
 0x1ca   : > { %15270 = vmatprep.subr.mxu1 %v15375_v0  ;;  %15265 = vmatprep.subr.mxu0 %v15375_v0  ;;  %v5479_v22 = vadd.f32 %v5263_v5, %v5041_v58 }
 0x1cb   : > { %v5400_v2 = vpop.f32.mrf.mxu0  ;;  %v5474_v26 = vpop.f32.mrf.mxu1  ;;  %15258 = vmatmul.mubr.msk.f32.vlgmr.msra.gmra.mxu0 %vm222_vm2, %v16397_v3  ;;  %15263 = vmatmul.mubr.msk.f32.vlgmr.msra.gmra.mxu1 %vm222_vm2, %v16375_v44 }
 0x1cc   : > { %v5401_v60 = vadd.f32 %v5400_v2, %v5330_v48  ;;  %15271 = vmatpush3.msk.msra.mxu1 %vm226_vm0, %v16850_v61  ;;  %15266 = vmatpush3.msk.msra.mxu0 %vm226_vm0, %v16270_v1  ;;  %v4194_v61 = vadd.f32 %v3978_v31, %v3756_v20 }
 0x1cd   : > { %v14789_v16 = vpop.f32.mrf.mxu0  ;;  %v14794_v18 = vpop.f32.mrf.mxu1  ;;  %15267 = vmatprep.mubr.msk.f32.mxu0 %vm15376_vm1, %v15375_v0  ;;  %15272 = vmatprep.mubr.msk.f32.mxu1 %vm15376_vm1, %v15375_v0 }
 0x1ce   : > { %v5478_v44 = vadd.f32 %v5474_v26, %v5401_v60  ;;  %15275 = vmatprep.subr.mxu0 %v15375_v0  ;;  %15280 = vmatprep.subr.mxu1 %v15375_v0  ;;  %v4196_v25 = vmax.f32 %v4194_v61, %v4195_v7 }
 0x1cf   : > { %v5581_v57 = vpop.f32.mrf.mxu0  ;;  %15268 = vmatmul.mubr.msk.f32.vlgmr.msra.gmra.mxu0 %vm222_vm2, %v16382_v52  ;;  %15273 = vmatmul.mubr.msk.f32.vlgmr.msra.gmra.mxu1 %vm222_vm2, %v16397_v3  ;;  %v5654_v13 = vpop.f32.mrf.mxu1 }
 0x1d0   : > { %v5480_v1 = vadd.f32 %v5478_v44, %v5042_v19  ;;  %15276 = vmatpush3.msk.msra.mxu0 %vm226_vm0, %v16320_v24  ;;  %15281 = vmatpush3.msk.msra.mxu1 %vm226_vm0, %v16873_v8  ;;  %v5655_v11 = vadd.f32 %v5654_v13, %v5581_v57 }
 0x1d1   : > { %v14799_v45 = vpop.f32.mrf.mxu0  ;;  %15277 = vmatprep.mubr.msk.f32.mxu0 %vm15376_vm1, %v15375_v0  ;;  %15282 = vmatprep.mubr.msk.f32.mxu1 %vm15376_vm1, %v15375_v0  ;;  %v14804_v52 = vpop.f32.mrf.mxu1 }
 0x1d2   : > { %v5481_v59 = vmax.f32 %v5479_v22, %v5480_v1  ;;  %15285 = vmatprep.subr.mxu0 %v15375_v0  ;;  %15290 = vmatprep.subr.mxu1 %v15375_v0 }
 0x1d3   : > { %15278 = vmatmul.mubr.msk.f32.vlgmr.msra.gmra.mxu0 %vm222_vm2, %v16452_v23  ;;  %15283 = vmatmul.mubr.msk.f32.vlgmr.msra.gmra.mxu1 %vm222_vm2, %v16459_v27  ;;  %v5728_v24 = vpop.f32.mrf.mxu0 }
 0x1d4   : > { %v5482_v3 = vmax.f32 %v4196_v25, %v5481_v59  ;;  %15286 = vmatpush3.msk.msra.mxu0 %vm226_vm0, %v16612_v21  ;;  %15291 = vmatpush3.msk.msra.mxu1 %vm226_vm0, %v16612_v21  ;;  %v16998_v8 = vadd.f32 %v5728_v24, %v5655_v11  ;;  %v17000_v32 = vpop.f32.mrf.mxu1 }
 0x1d5   : > { %15287 = vmatprep.mubr.msk.f32.mxu0 %vm15376_vm1, %v15375_v0  ;;  %15292 = vmatprep.mubr.msk.f32.mxu1 %vm15376_vm1, %v15375_v0  ;;  %v14809_v54 = vpop.f32.mrf.mxu0 }
 0x1d6   : > { %v5483_v40 = vadd.f32 %v5482_v3, %v16673_v15  ;;  %15300 = vmatprep.subr.mxu1 %v15375_v0  ;;  %15295 = vmatprep.subr.mxu0 %v15375_v0  ;;  %v14814_v14 = vpop.f32.mrf.mxu1 }
 0x1d7   : > { %15288 = vmatmul.mubr.msk.f32.vlgmr.msra.gmra.mxu0 %vm222_vm2, %v16482_v33  ;;  %15293 = vmatmul.mubr.msk.f32.vlgmr.msra.gmra.mxu1 %vm222_vm2, %v16452_v23  ;;  %v5869_v30 = vpop.f32.mrf.mxu0 }
 0x1d8   : > { %v5484_v21 = vmax.f32 %v5483_v40, 0.0  ;;  %15301 = vmatpush3.msk.msra.mxu1 %vm226_vm0, %v16899_v34  ;;  %15296 = vmatpush3.msk.msra.mxu0 %vm226_vm0, %v15365_v50  ;;  %v5943_v56 = vpop.f32.mrf.mxu1  ;;  %v5870_v63 = vadd.f32 %v5869_v30, %v17000_v32 }
 0x1d9   : > { %15297 = vmatprep.mubr.msk.f32.mxu0 %vm15376_vm1, %v15375_v0  ;;  %15302 = vmatprep.mubr.msk.f32.mxu1 %vm15376_vm1, %v15375_v0  ;;  %v14819_v10 = vpop.f32.mrf.mxu0 }
 0x1da   : > { %13787 = vst.msk [vmem:[%s16685_s21 + $0x8] sm:$0xff] %vm2857_vm3, %v5484_v21  ;;  %15305 = vmatprep.subr.mxu0 %v15375_v0  ;;  %v14824_v23 = vpop.f32.mrf.mxu1  ;;  %15310 = vmatprep.subr.mxu1 %v15375_v0  ;;  %v5947_v5 = vadd.f32 %v5943_v56, %v5870_v63 }
 0x1db   : > { %15298 = vmatmul.mubr.msk.f32.vlgmr.msra.gmra.mxu0 %vm222_vm2, %v16459_v27  ;;  %15303 = vmatmul.mubr.msk.f32.vlgmr.msra.gmra.mxu1 %vm222_vm2, %v16482_v33  ;;  %v6017_v34 = vpop.f32.mrf.mxu0 }
 0x1dc   : > { %15306 = vmatpush3.msk.msra.mxu0 %vm226_vm0, %v16505_v38  ;;  %15307 = vmatprep.mubr.msk.f32.mxu0 %vm15376_vm1, %v15375_v0  ;;  %v6090_v17 = vpop.f32.mrf.mxu1 }
 0x1dd   : > { %15311 = vmatpush3.msk.msra.mxu1 %vm226_vm0, %v15366_v28  ;;  %15312 = vmatprep.mubr.msk.f32.mxu1 %vm15376_vm1, %v15375_v0  ;;  %v14829_v35 = vpop.f32.mrf.mxu0  ;;  %v6091_v4 = vadd.f32 %v6090_v17, %v6017_v34 }
 0x1de   : > { %15315 = vmatprep.subr.mxu0 %v15375_v0  ;;  %15320 = vmatprep.subr.mxu1 %v15375_v0  ;;  %v14834_v27 = vpop.f32.mrf.mxu1 }
 0x1df   : > { %15308 = vmatmul.mubr.msk.f32.vlgmr.msra.gmra.mxu0 %vm222_vm2, %v16526_v46  ;;  %15313 = vmatmul.mubr.msk.f32.vlgmr.msra.gmra.mxu1 %vm222_vm2, %v16533_v47  ;;  %v6164_v33 = vpop.f32.mrf.mxu0 }
 0x1e0   : > { %15316 = vmatpush3.msk.msra.mxu0 %vm226_vm0, %v16637_v42  ;;  %15317 = vmatprep.mubr.msk.f32.mxu0 %vm15376_vm1, %v15375_v0  ;;  %v6235_v37 = vpop.f32.mrf.mxu1  ;;  %v6168_v39 = vadd.f32 %v6164_v33, %v6091_v4 }
 0x1e1   : > { %15321 = vmatpush3.msk.msra.mxu1 %vm226_vm0, %v16637_v42  ;;  %15322 = vmatprep.mubr.msk.f32.mxu1 %vm15376_vm1, %v15375_v0  ;;  %v14839_v48 = vpop.f32.mrf.mxu0 }
 0x1e2   : > { %15325 = vmatprep.subr.mxu0 %v15375_v0  ;;  %v14844_v55 = vpop.f32.mrf.mxu1  ;;  %15330 = vmatprep.subr.mxu1 %v15375_v0  ;;  %v6384_v16 = vadd.f32 %v6168_v39, %v16998_v8 }
 0x1e3   : > { %15318 = vmatmul.mubr.msk.f32.vlgmr.msra.gmra.mxu0 %vm222_vm2, %v16550_v51  ;;  %15323 = vmatmul.mubr.msk.f32.vlgmr.msra.gmra.mxu1 %vm222_vm2, %v16526_v46  ;;  %v13289_v6 = vpop.permute.xlu1 %13288  ;;  %v6305_v53 = vpop.f32.mrf.mxu0 }
 0x1e4   : > { %15326 = vmatpush3.msk.msra.mxu0 %vm226_vm0, %v16505_v38  ;;  %15327 = vmatprep.mubr.msk.f32.mxu0 %vm15376_vm1, %v15375_v0  ;;  %v6379_v42 = vpop.f32.mrf.mxu1  ;;  %v6306_v49 = vadd.f32 %v6305_v53, %v6235_v37 }
 0x1e5   : > { %15331 = vmatpush3.msk.msra.mxu1 %vm226_vm0, %v13289_v6  ;;  %15332 = vmatprep.mubr.msk.f32.mxu1 %vm15376_vm1, %v15375_v0  ;;  %v14849_v12 = vpop.f32.mrf.mxu0 }
 0x1e6   : > { %v14854_v29 = vpop.f32.mrf.mxu1  ;;  %v6383_v2 = vadd.f32 %v6379_v42, %v6306_v49 }
 0x1e7   : > { %15328 = vmatmul.mubr.msk.f32.vlgmr.msra.gmra.mxu0 %vm222_vm2, %v16533_v47  ;;  %15333 = vmatmul.mubr.msk.f32.vlgmr.msra.gmra.mxu1 %vm222_vm2, %v16550_v51 }
 0x1e8   : > { %v6455_v46 = vpop.f32.mrf.mxu0  ;;  %v6528_v36 = vpop.f32.mrf.mxu1  ;;  %v6385_v18 = vadd.f32 %v6383_v2, %v5947_v5 }
 0x1e9   : > { %v6529_v26 = vadd.f32 %v6528_v36, %v6455_v46 }
 0x1ea   : > { %v14859_v38 = vpop.f32.mrf.mxu0  ;;  %v14864_v9 = vpop.f32.mrf.mxu1 }
 0x1ec   : > { %v6602_v43 = vpop.f32.mrf.mxu0  ;;  %v6673_v62 = vpop.f32.mrf.mxu1 }
 0x1ed   : > { %v6606_v60 = vadd.f32 %v6602_v43, %v6529_v26 }
 0x1ee   : > { %v14869_v31 = vpop.f32.mrf.mxu0  ;;  %v14874_v0 = vpop.f32.mrf.mxu1 }
 0x1ef   : > { %v17070_v19 = vadd.f32 %v6606_v60, %v6384_v16 }
 0x1f0   : > { %v6743_v41 = vpop.f32.mrf.mxu0  ;;  %v6817_v47 = vpop.f32.mrf.mxu1 }
 0x1f1   : > { %v6744_v51 = vadd.f32 %v6743_v41, %v6673_v62 }
 0x1f2   : > { %v14879_v20 = vpop.f32.mrf.mxu0  ;;  %v14884_v7 = vpop.f32.mrf.mxu1 }
 0x1f3   : > { %v6821_v58 = vadd.f32 %v6817_v47, %v6744_v51 }
 0x1f5   : > { %v17072_v44 = vadd.f32 %v6821_v58, %v6385_v18  ;;  %v6891_v57 = vpop.f32.mrf.mxu0 }
 0x1f6   : > { %v6961_v61 = vpop.f32.mrf.mxu1 }
 0x1f7   : > { %v6824_v22 = vmax.f32 %v17070_v19, %v17072_v44  ;;  %v14889_v1 = vpop.f32.mrf.mxu0  ;;  %v6962_v29 = vadd.f32 %v6961_v61, %v6891_v57 }
 0x1f8   : > { %v14894_v13 = vpop.f32.mrf.mxu1 }
 0x1f9   : > { %v7031_v45 = vpop.f32.mrf.mxu0 }
 0x1fa   : > { %v7102_v11 = vpop.f32.mrf.mxu1  ;;  %v7035_v43 = vadd.f32 %v7031_v45, %v6962_v29 }
 0x1fb   : > { %v14899_v25 = vpop.f32.mrf.mxu0 }
 0x1fc   : > { %v14904_v59 = vpop.f32.mrf.mxu1 }
 0x1fd   : > { %v7172_v52 = vpop.f32.mrf.mxu0 }
 0x1fe   : > { %v7242_v3 = vpop.f32.mrf.mxu1  ;;  %v7173_v6 = vadd.f32 %v7172_v52, %v7102_v11 }
 0x1ff   : > { %v14909_v24 = vpop.f32.mrf.mxu0 }
 0x200   : > { %v14914_v8 = vpop.f32.mrf.mxu1  ;;  %v7246_v62 = vadd.f32 %v7242_v3, %v7173_v6 }
 0x202   : > { %v7313_v32 = vpop.f32.mrf.mxu0  ;;  %v7383_v40 = vpop.f32.mrf.mxu1 }
 0x203   : > { %v7384_v53 = vadd.f32 %v7383_v40, %v7313_v32 }
 0x204   : > { %v14919_v54 = vpop.f32.mrf.mxu0  ;;  %v14924_v14 = vpop.f32.mrf.mxu1 }
 0x206   : > { %v7453_v21 = vpop.f32.mrf.mxu0  ;;  %v7524_v30 = vpop.f32.mrf.mxu1 }
 0x207   : > { %v7457_v46 = vadd.f32 %v7453_v21, %v7384_v53 }
 0x208   : > { %v14929_v50 = vpop.f32.mrf.mxu0  ;;  %v14934_v56 = vpop.f32.mrf.mxu1 }
 0x209   : > { %v7669_v39 = vadd.f32 %v7457_v46, %v7035_v43 }
 0x20a   : > { %v7594_v10 = vpop.f32.mrf.mxu0  ;;  %v7664_v23 = vpop.f32.mrf.mxu1 }
 0x20b   : > { %v7595_v37 = vadd.f32 %v7594_v10, %v7524_v30 }
 0x20c   : > { %v14939_v34 = vpop.f32.mrf.mxu0  ;;  %v14944_v17 = vpop.f32.mrf.mxu1 }
 0x20d   : > { %v7668_v36 = vadd.f32 %v7664_v23, %v7595_v37 }
 0x20e   : > { %v7740_v28 = vpop.f32.mrf.mxu0  ;;  %v7813_v35 = vpop.f32.mrf.mxu1 }
 0x20f   : > { %v7814_v38 = vadd.f32 %v7813_v35, %v7740_v28  ;;  %v7670_v2 = vadd.f32 %v7668_v36, %v7246_v62 }
 0x210   : > { %v14949_v27 = vpop.f32.mrf.mxu0  ;;  %v14954_v33 = vpop.f32.mrf.mxu1 }
 0x212   : > { %v7887_v48 = vpop.f32.mrf.mxu0  ;;  %v7958_v55 = vpop.f32.mrf.mxu1 }
 0x213   : > { %v7891_v63 = vadd.f32 %v7887_v48, %v7814_v38 }
 0x214   : > { %v14959_v42 = vpop.f32.mrf.mxu0  ;;  %v14964_v12 = vpop.f32.mrf.mxu1 }
 0x215   : > { %v8107_v5 = vadd.f32 %v7891_v63, %v7669_v39 }
 0x216   : > { %v8028_v9 = vpop.f32.mrf.mxu0  ;;  %v8102_v49 = vpop.f32.mrf.mxu1 }
 0x217   : > { %v8029_v4 = vadd.f32 %v8028_v9, %v7958_v55 }
 0x218   : > { %v14969_v31 = vpop.f32.mrf.mxu0  ;;  %v14974_v0 = vpop.f32.mrf.mxu1 }
 0x219   : > { %v8106_v26 = vadd.f32 %v8102_v49, %v8029_v4 }
 0x21a   : > { %v8209_v41 = vpop.f32.mrf.mxu0  ;;  %v8282_v47 = vpop.f32.mrf.mxu1 }
 0x21b   : > { %v8108_v60 = vadd.f32 %v8106_v26, %v7670_v2  ;;  %v8283_v51 = vadd.f32 %v8282_v47, %v8209_v41 }
 0x21c   : > { %v14979_v20 = vpop.f32.mrf.mxu0  ;;  %v14984_v7 = vpop.f32.mrf.mxu1 }
 0x21d   : > { %v8109_v16 = vmax.f32 %v8107_v5, %v8108_v60 }
 0x21e   : > { %v8356_v18 = vpop.f32.mrf.mxu0  ;;  %v17076_v58 = vpop.f32.mrf.mxu1 }
 0x21f   : > { %v8110_v19 = vmax.f32 %v6824_v22, %v8109_v16  ;;  %v17078_v44 = vadd.f32 %v8356_v18, %v8283_v51 }
 0x220   : > { %v14989_v57 = vpop.f32.mrf.mxu0  ;;  %v14994_v61 = vpop.f32.mrf.mxu1 }
 0x221   : > { %v8111_v1 = vadd.f32 %v8110_v19, %v16673_v15 }
 0x222   : > { %v8497_v13 = vpop.f32.mrf.mxu0  ;;  %v17081_v45 = vpop.f32.mrf.mxu1 }
 0x223   : > { %v8112_v11 = vmax.f32 %v8111_v1, 0.0  ;;  %v8498_v18 = vadd.f32 %v8497_v13, %v17076_v58 }
 0x224   : > { %v14999_v25 = vpop.f32.mrf.mxu0  ;;  %v15004_v59 = vpop.f32.mrf.mxu1 }
 0x225   : > { %13882 = vst.msk [vmem:[%s16685_s21 + $0x10] sm:$0xff] %vm2857_vm3, %v8112_v11 }
 0x226   : > { %v8645_v52 = vpop.f32.mrf.mxu0  ;;  %v8718_v3 = vpop.f32.mrf.mxu1 }
 0x227   : > { %v8719_v11 = vadd.f32 %v8718_v3, %v8645_v52 }
 0x228   : > { %v15009_v24 = vpop.f32.mrf.mxu0  ;;  %v15014_v8 = vpop.f32.mrf.mxu1 }
 0x22a   : > { %v8792_v32 = vpop.f32.mrf.mxu0  ;;  %v8863_v22 = vpop.f32.mrf.mxu1 }
 0x22c   : > { %v15019_v40 = vpop.f32.mrf.mxu0  ;;  %v15024_v54 = vpop.f32.mrf.mxu1 }
 0x22d   : > { %v8575_v54 = vadd.f32 %v17081_v45, %v8498_v18 }
 0x22e   : > { %v8933_v14 = vpop.f32.mrf.mxu0  ;;  %v9007_v21 = vpop.f32.mrf.mxu1 }
 0x22f   : > { %v8934_v20 = vadd.f32 %v8933_v14, %v8863_v22 }
 0x230   : > { %v15029_v30 = vpop.f32.mrf.mxu0  ;;  %v15034_v50 = vpop.f32.mrf.mxu1 }
 0x231   : > { %v9011_v25 = vadd.f32 %v9007_v21, %v8934_v20  ;;  %v8796_v30 = vadd.f32 %v8792_v32, %v8719_v11 }
 0x232   : > { %v9083_v56 = vpop.f32.mrf.mxu0  ;;  %v9156_v10 = vpop.f32.mrf.mxu1 }
 0x233   : > { %v9157_v50 = vadd.f32 %v9156_v10, %v9083_v56 }
 0x234   : > { %v15039_v23 = vpop.f32.mrf.mxu0  ;;  %v15044_v34 = vpop.f32.mrf.mxu1 }
 0x236   : > { %v9230_v17 = vpop.f32.mrf.mxu0  ;;  %v9301_v28 = vpop.f32.mrf.mxu1 }
 0x238   : > { %v15049_v35 = vpop.f32.mrf.mxu0  ;;  %v15054_v27 = vpop.f32.mrf.mxu1 }
 0x239   : > { %v9234_v27 = vadd.f32 %v9230_v17, %v9157_v50 }
 0x23a   : > { %v9371_v33 = vpop.f32.mrf.mxu0  ;;  %v9445_v37 = vpop.f32.mrf.mxu1 }
 0x23b   : > { %v9372_v19 = vadd.f32 %v9371_v33, %v9301_v28  ;;  %v9013_v28 = vadd.f32 %v9011_v25, %v8575_v54 }
 0x23c   : > { %v15059_v48 = vpop.f32.mrf.mxu0  ;;  %v15064_v55 = vpop.f32.mrf.mxu1 }
 0x23d   : > { %v9449_v23 = vadd.f32 %v9445_v37, %v9372_v19 }
 0x23f   : > { %v9519_v6 = vpop.f32.mrf.mxu0  ;;  %v9589_v53 = vpop.f32.mrf.mxu1  ;;  %v9451_v56 = vadd.f32 %v9449_v23, %v9013_v28 }
 0x240   : > { %v9590_v34 = vadd.f32 %v9589_v53, %v9519_v6 }
 0x241   : > { %v15069_v42 = vpop.f32.mrf.mxu0  ;;  %v15074_v12 = vpop.f32.mrf.mxu1 }
 0x242   : > { %v9012_v42 = vadd.f32 %v8796_v30, %v17078_v44 }
 0x243   : > { %v9659_v29 = vpop.f32.mrf.mxu0  ;;  %v9730_v46 = vpop.f32.mrf.mxu1 }
 0x244   : > { %v9663_v3 = vadd.f32 %v9659_v29, %v9590_v34 }
 0x245   : > { %v15079_v36 = vpop.f32.mrf.mxu0  ;;  %v15084_v38 = vpop.f32.mrf.mxu1 }
 0x247   : > { %v9800_v9 = vpop.f32.mrf.mxu0  ;;  %v9870_v49 = vpop.f32.mrf.mxu1 }
 0x248   : > { %v9801_v8 = vadd.f32 %v9800_v9, %v9730_v46  ;;  %v9450_v46 = vadd.f32 %v9234_v27, %v9012_v42 }
 0x249   : > { %v15089_v43 = vpop.f32.mrf.mxu0  ;;  %v15094_v62 = vpop.f32.mrf.mxu1 }
 0x24a   : > { %v9874_v21 = vadd.f32 %v9870_v49, %v9801_v8  ;;  %v9452_v49 = vmax.f32 %v9450_v46, %v9451_v56 }
 0x24b   : > { %v9941_v63 = vpop.f32.mrf.mxu0  ;;  %v10011_v4 = vpop.f32.mrf.mxu1 }
 0x24c   : > { %v10012_v40 = vadd.f32 %v10011_v4, %v9941_v63 }
 0x24d   : > { %v15099_v31 = vpop.f32.mrf.mxu0  ;;  %v15104_v0 = vpop.f32.mrf.mxu1 }
 0x24f   : > { %v10081_v39 = vpop.f32.mrf.mxu0  ;;  %v10152_v2 = vpop.f32.mrf.mxu1 }
 0x250   : > { %v10085_v35 = vadd.f32 %v10081_v39, %v10012_v40 }
 0x251   : > { %v15109_v26 = vpop.f32.mrf.mxu0  ;;  %v15114_v41 = vpop.f32.mrf.mxu1 }
 0x252   : > { %v10297_v10 = vadd.f32 %v10085_v35, %v9663_v3 }
 0x253   : > { %v10222_v47 = vpop.f32.mrf.mxu0  ;;  %v10292_v5 = vpop.f32.mrf.mxu1 }
 0x254   : > { %v10223_v1 = vadd.f32 %v10222_v47, %v10152_v2 }
 0x255   : > { %v15119_v60 = vpop.f32.mrf.mxu0  ;;  %v15124_v51 = vpop.f32.mrf.mxu1 }
 0x256   : > { %v10296_v58 = vadd.f32 %v10292_v5, %v10223_v1 }
 0x257   : > { %v10368_v7 = vpop.f32.mrf.mxu0  ;;  %v10441_v16 = vpop.f32.mrf.mxu1 }
 0x258   : > { %v10442_v13 = vadd.f32 %v10441_v16, %v10368_v7  ;;  %v10298_v37 = vadd.f32 %v10296_v58, %v9874_v21 }
 0x259   : > { %v15129_v57 = vpop.f32.mrf.mxu0  ;;  %v15134_v61 = vpop.f32.mrf.mxu1 }
 0x25b   : > { %v10515_v59 = vpop.f32.mrf.mxu0  ;;  %v10586_v24 = vpop.f32.mrf.mxu1 }
 0x25c   : > { %v10519_v48 = vadd.f32 %v10515_v59, %v10442_v13 }
 0x25d   : > { %v15139_v22 = vpop.f32.mrf.mxu0  ;;  %v15144_v14 = vpop.f32.mrf.mxu1 }
 0x25e   : > { %v10735_v36 = vadd.f32 %v10519_v48, %v10297_v10 }
 0x25f   : > { %v10656_v33 = vpop.f32.mrf.mxu0  ;;  %v10730_v52 = vpop.f32.mrf.mxu1 }
 0x260   : > { %v10657_v55 = vadd.f32 %v10656_v33, %v10586_v24 }
 0x261   : > { %v15149_v45 = vpop.f32.mrf.mxu0  ;;  %v15154_v32 = vpop.f32.mrf.mxu1 }
 0x262   : > { %v10734_v12 = vadd.f32 %v10730_v52, %v10657_v55 }
 0x263   : > { %v10837_v6 = vpop.f32.mrf.mxu0  ;;  %v10910_v53 = vpop.f32.mrf.mxu1 }
 0x264   : > { %v10736_v38 = vadd.f32 %v10734_v12, %v10298_v37  ;;  %v10911_v17 = vadd.f32 %v10910_v53, %v10837_v6 }
 0x265   : > { %v15159_v9 = vpop.f32.mrf.mxu0  ;;  %v15164_v29 = vpop.f32.mrf.mxu1 }
 0x266   : > { %v10737_v43 = vmax.f32 %v10735_v36, %v10736_v38 }
 0x267   : > { %v10984_v62 = vpop.f32.mrf.mxu0  ;;  %v17088_v63 = vpop.f32.mrf.mxu1 }
 0x268   : > { %v10738_v44 = vmax.f32 %v9452_v49, %v10737_v43  ;;  %v17090_v4 = vadd.f32 %v10984_v62, %v10911_v17 }
 0x269   : > { %v15169_v31 = vpop.f32.mrf.mxu0  ;;  %v15174_v0 = vpop.f32.mrf.mxu1 }
 0x26a   : > { %v10739_v39 = vadd.f32 %v10738_v44, %v16673_v15 }
 0x26b   : > { %v11125_v2 = vpop.f32.mrf.mxu0  ;;  %v17093_v26 = vpop.f32.mrf.mxu1 }
 0x26c   : > { %v10740_v41 = vmax.f32 %v10739_v39, 0.0  ;;  %v11126_v62 = vadd.f32 %v11125_v2, %v17088_v63 }
 0x26d   : > { %v15179_v47 = vpop.f32.mrf.mxu0  ;;  %v15184_v5 = vpop.f32.mrf.mxu1 }
 0x26e   : > { %13977 = vst.msk [vmem:[%s16685_s21 + $0x18] sm:$0xff] %vm2857_vm3, %v10740_v41 }
 0x26f   : > { %v11273_v60 = vpop.f32.mrf.mxu0  ;;  %v11346_v51 = vpop.f32.mrf.mxu1 }
 0x270   : > { %v11347_v41 = vadd.f32 %v11346_v51, %v11273_v60 }
 0x271   : > { %v15189_v20 = vpop.f32.mrf.mxu0  ;;  %v15194_v7 = vpop.f32.mrf.mxu1 }
 0x273   : > { %v11420_v16 = vpop.f32.mrf.mxu0  ;;  %v11491_v18 = vpop.f32.mrf.mxu1 }
 0x275   : > { %v15199_v19 = vpop.f32.mrf.mxu0  ;;  %v15204_v57 = vpop.f32.mrf.mxu1 }
 0x276   : > { %v11203_v57 = vadd.f32 %v17093_v26, %v11126_v62 }
 0x277   : > { %v11561_v61 = vpop.f32.mrf.mxu0  ;;  %v11635_v1 = vpop.f32.mrf.mxu1 }
 0x278   : > { %v11562_v29 = vadd.f32 %v11561_v61, %v11491_v18 }
 0x279   : > { %v15209_v11 = vpop.f32.mrf.mxu0  ;;  %v15214_v25 = vpop.f32.mrf.mxu1 }
 0x27a   : > { %v11639_v47 = vadd.f32 %v11635_v1, %v11562_v29  ;;  %v11424_v11 = vadd.f32 %v11420_v16, %v11347_v41 }
 0x27b   : > { %v11711_v59 = vpop.f32.mrf.mxu0  ;;  %v11784_v24 = vpop.f32.mrf.mxu1 }
 0x27c   : > { %v11785_v25 = vadd.f32 %v11784_v24, %v11711_v59  ;;  %v11640_v26 = vadd.f32 %v11424_v11, %v17090_v4 }
 0x27d   : > { %v15219_v8 = vpop.f32.mrf.mxu0  ;;  %v15224_v40 = vpop.f32.mrf.mxu1 }
 0x27f   : > { %v11858_v54 = vpop.f32.mrf.mxu0  ;;  %v11929_v30 = vpop.f32.mrf.mxu1 }
 0x281   : > { %v15229_v50 = vpop.f32.mrf.mxu0  ;;  %v15234_v23 = vpop.f32.mrf.mxu1 }
 0x282   : > { %v11862_v23 = vadd.f32 %v11858_v54, %v11785_v25 }
 0x283   : > { %v11999_v22 = vpop.f32.mrf.mxu0  ;;  %v12073_v14 = vpop.f32.mrf.mxu1 }
 0x284   : > { %v12000_v44 = vadd.f32 %v11999_v22, %v11929_v30  ;;  %v11641_v30 = vadd.f32 %v11639_v47, %v11203_v57 }
 0x285   : > { %v15239_v34 = vpop.f32.mrf.mxu0  ;;  %v15244_v35 = vpop.f32.mrf.mxu1 }
 0x286   : > { %v12077_v8 = vadd.f32 %v12073_v14, %v12000_v44 }
 0x287   : > { %v12147_v58 = vpop.f32.mrf.mxu0  ;;  %v12217_v13 = vpop.f32.mrf.mxu1 }
 0x288   : > { %v12218_v40 = vadd.f32 %v12217_v13, %v12147_v58  ;;  %v12079_v24 = vadd.f32 %v12077_v8, %v11641_v30  ;;  %v12078_v13 = vadd.f32 %v11862_v23, %v11640_v26 }
 0x289   : > { %v15249_v28 = vpop.f32.mrf.mxu0  ;;  %v15254_v27 = vpop.f32.mrf.mxu1 }
 0x28b   : > { %v12287_v33 = vpop.f32.mrf.mxu0  ;;  %v12358_v52 = vpop.f32.mrf.mxu1 }
 0x28c   : > { %v12291_v51 = vadd.f32 %v12287_v33, %v12218_v40 }
 0x28d   : > { %v15259_v3 = vpop.f32.mrf.mxu0  ;;  %v15264_v21 = vpop.f32.mrf.mxu1 }
 0x28e   : > { %v12080_v3 = vmax.f32 %v12078_v13, %v12079_v24 }
 0x28f   : > { %v12428_v48 = vpop.f32.mrf.mxu0  ;;  %v12498_v55 = vpop.f32.mrf.mxu1 }
 0x290   : > { %v12429_v7 = vadd.f32 %v12428_v48, %v12358_v52 }
 0x291   : > { %v15269_v42 = vpop.f32.mrf.mxu0  ;;  %v15274_v45 = vpop.f32.mrf.mxu1 }
 0x292   : > { %v12502_v1 = vadd.f32 %v12498_v55, %v12429_v7 }
 0x293   : > { %v12569_v32 = vpop.f32.mrf.mxu0  ;;  %v12639_v56 = vpop.f32.mrf.mxu1 }
 0x294   : > { %v12640_v19 = vadd.f32 %v12639_v56, %v12569_v32 }
 0x295   : > { %v15279_v10 = vpop.f32.mrf.mxu0  ;;  %v15284_v37 = vpop.f32.mrf.mxu1 }
 0x297   : > { %v12709_v12 = vpop.f32.mrf.mxu0  ;;  %v12780_v6 = vpop.f32.mrf.mxu1 }
 0x298   : > { %v12713_v50 = vadd.f32 %v12709_v12, %v12640_v19 }
 0x299   : > { %v15289_v53 = vpop.f32.mrf.mxu0  ;;  %v15294_v46 = vpop.f32.mrf.mxu1 }
 0x29a   : > { %v12925_v14 = vadd.f32 %v12713_v50, %v12291_v51 }
 0x29b   : > { %v12850_v36 = vpop.f32.mrf.mxu0  ;;  %v12920_v38 = vpop.f32.mrf.mxu1 }
 0x29c   : > { %v12851_v39 = vadd.f32 %v12850_v36, %v12780_v6 }
 0x29d   : > { %v15299_v17 = vpop.f32.mrf.mxu0  ;;  %v15304_v9 = vpop.f32.mrf.mxu1 }
 0x29e   : > { %v12924_v63 = vadd.f32 %v12920_v38, %v12851_v39 }
 0x29f   : > { %v12996_v49 = vpop.f32.mrf.mxu0  ;;  %v13069_v43 = vpop.f32.mrf.mxu1 }
 0x2a0   : > { %v13070_v2 = vadd.f32 %v13069_v43, %v12996_v49  ;;  %v12926_v28 = vadd.f32 %v12924_v63, %v12502_v1 }
 0x2a1   : > { %v15309_v31 = vpop.f32.mrf.mxu0  ;;  %v15314_v0 = vpop.f32.mrf.mxu1 }
 0x2a3   : > { %v13143_v5 = vpop.f32.mrf.mxu0  ;;  %v13214_v20 = vpop.f32.mrf.mxu1 }
 0x2a4   : > { %v13147_v34 = vadd.f32 %v13143_v5, %v13070_v2 }
 0x2a5   : > { %v15319_v18 = vpop.f32.mrf.mxu0  ;;  %v15324_v61 = vpop.f32.mrf.mxu1 }
 0x2a6   : > { %v13363_v27 = vadd.f32 %v13147_v34, %v12925_v14 }
 0x2a7   : > { %v13284_v22 = vpop.f32.mrf.mxu0  ;;  %v13358_v60 = vpop.f32.mrf.mxu1 }
 0x2a8   : > { %v13285_v35 = vadd.f32 %v13284_v22, %v13214_v20 }
 0x2a9   : > { %v15329_v16 = vpop.f32.mrf.mxu0  ;;  %v15334_v59 = vpop.f32.mrf.mxu1 }
 0x2aa   : > { %v13362_v58 = vadd.f32 %v13358_v60, %v13285_v35 }
 0x2ac   : > { %v13364_v52 = vadd.f32 %v13362_v58, %v12926_v28 }
 0x2ae   : > { %v13365_v54 = vmax.f32 %v13363_v27, %v13364_v52 }
 0x2b0   : > { %v13366_v21 = vmax.f32 %v12080_v3, %v13365_v54 }
 0x2b2   : > { %v13367_v33 = vadd.f32 %v13366_v21, %v16673_v15 }
 0x2b4   : > { %v13368_v48 = vmax.f32 %v13367_v33, 0.0 }
 0x2b6   : > { %14072 = vst.msk [vmem:[%s16685_s21 + $0x20] sm:$0xff] %vm2857_vm3, %v13368_v48 }
 0x2b7 PF: > { %s14_s15 = sadd.s32 1, %s15373_s15  }
 0x2b8   : > { %p11_p4 = scmp.ge.s32.totalorder %s14_s15, 5  }
 0x2ba   :  { %13 = sbr.rel (!%p11_p4) target bundleno = 1 (0x1), region = 115 }

</bundles_post_ra>
